<compile_context>
chip_gen: v7x
topology: tpu7x:2x2x1
jax: 0.10.0
libtpu: 0.0.40
codegen_flags: <defaults>
</compile_context>

<pallas_src>
import jax
import jax.numpy as jnp
from jax.experimental import pallas as pl
from jax.experimental.pallas import tpu as pltpu

C1 = 3            # conv1 out channels
C2 = 5            # conv2 out channels
N_ACT = 5         # number of actions (Linear out features)
EPS = 1e-5        # BatchNorm eps (PyTorch default)
NEG_SLOPE = 0.01  # leaky_relu default slope


def _leaky_relu(x):
    return jnp.where(x >= 0, x, NEG_SLOPE * x)


def cnn_policy_kernel(xps_ref, w1_ref, g1_ref, be1_ref,
                      w2_ref, g2_ref, be2_ref,
                      wfc_ref, bfc_ref, out_ref):
    # xps_ref: (9, B, H, W) — the 9 shifted views of the padded input, built in
    # the wrapper so no in-kernel relayouts are needed for conv1 taps.
    _, B, H, W = xps_ref.shape
    H2, W2 = H - 2, W - 2               # conv2 output spatial (valid)
    inv_cnt1 = 1.0 / float(B * H * W)
    inv_cnt2 = 1.0 / float(B * H2 * W2)

    # ---- conv1 (1->3, 3x3, pad=1): tap-major / oc-minor, 3 live accumulators.
    # Conv bias omitted: cancelled exactly by the train-mode BN mean subtraction.
    acc1 = [None] * C1
    for di in range(3):
        for dj in range(3):
            t = di * 3 + dj
            tap = xps_ref[t]                                 # (B, H, W), aligned load
            for oc in range(C1):
                term = w1_ref[oc * 9 + t] * tap
                acc1[oc] = term if acc1[oc] is None else acc1[oc] + term

    # Fused BatchNorm1 (batch stats) + leaky_relu, per channel.
    h1 = []
    for oc in range(C1):
        a = acc1[oc]
        s = jnp.sum(a)
        s2 = jnp.sum(a * a)
        mean = s * inv_cnt1
        var = jnp.maximum(s2 * inv_cnt1 - mean * mean, 0.0)
        scale = jax.lax.rsqrt(var + EPS) * g1_ref[oc]
        shift = be1_ref[oc] - mean * scale
        h1.append(_leaky_relu(a * scale + shift))            # (B, H, W)

    # ---- conv2 (3->5, 3x3, valid): tap-major (ic,di,dj) / oc-minor.
    # One shifted slice of h1 is live at a time and is consumed by all 5 output
    # channels immediately (no 27-slice hoist).
    acc2 = [None] * C2
    for ic in range(C1):
        for di in range(3):
            for dj in range(3):
                sl = h1[ic][:, di:di + H2, dj:dj + W2]       # (B, H2, W2)
                for oc in range(C2):
                    wv = w2_ref[((oc * C1 + ic) * 3 + di) * 3 + dj]
                    term = wv * sl
                    acc2[oc] = term if acc2[oc] is None else acc2[oc] + term

    # Fused BatchNorm2 + leaky_relu, then the Linear(F, 5) contribution of each
    # conv2 channel, one (H2, W2) FC-weight slab at a time (no (B,N_ACT,H2,W2)
    # broadcast product).
    action_scores = [None] * N_ACT                            # each (B, 1)
    for oc in range(C2):
        a = acc2[oc]
        s = jnp.sum(a)
        s2 = jnp.sum(a * a)
        mean = s * inv_cnt2
        var = jnp.maximum(s2 * inv_cnt2 - mean * mean, 0.0)
        scale = jax.lax.rsqrt(var + EPS) * g2_ref[oc]
        shift = be2_ref[oc] - mean * scale
        h2c = _leaky_relu(a * scale + shift)                  # (B, H2, W2)

        for act in range(N_ACT):
            w_slab = wfc_ref[oc, act]                         # (H2, W2)
            prod = h2c * w_slab[None, :, :]                   # (B, H2, W2)
            contrib = jnp.sum(jnp.sum(prod, axis=2), axis=1, keepdims=True)  # (B, 1)
            if action_scores[act] is None:
                action_scores[act] = contrib
            else:
                action_scores[act] = action_scores[act] + contrib

    scores = jnp.concatenate(action_scores, axis=1) + bfc_ref[...]   # (B, N_ACT)

    # ---- softmax over dim=1
    m = jnp.max(scores, axis=1, keepdims=True)
    e = jnp.exp(scores - m)
    out_ref[...] = e / jnp.sum(e, axis=1, keepdims=True)


def cnn_policy_forward(x, params):
    """x: (B, 1, H, W) float32 (NCHW).  Returns (B, 5) action probabilities."""
    B, _, H, W = x.shape
    H2, W2 = H - 2, W - 2                                    # conv2 output spatial

    # Build the 9 shifted views of the padded input in XLA (fused with the pad)
    # so the kernel never has to do lane/sublane relayouts for conv1 taps.
    xp = jnp.pad(x[:, 0], ((0, 0), (1, 1), (1, 1)))          # (B, H+2, W+2)
    xps = jnp.stack([xp[:, di:di + H, dj:dj + W]
                     for di in range(3) for dj in range(3)], axis=0)  # (9, B, H, W)

    w1f = params["w1"].reshape(-1).astype(jnp.float32)       # (27,)
    w2f = params["w2"].reshape(-1).astype(jnp.float32)       # (135,)
    # (N_ACT, F) -> (N_ACT, C2, H2, W2) -> (C2, N_ACT, H2, W2): channel-major
    # flatten folded into the weight layout; indexed per (channel, action)
    # in-kernel so only one (H2, W2) slab is live at a time.
    wfc_r = params["wfc"].reshape(N_ACT, C2, H2, W2) \
                         .transpose(1, 0, 2, 3).astype(jnp.float32)
    bfc_r = params["bfc"].reshape(1, N_ACT).astype(jnp.float32)

    vmem = pl.BlockSpec(memory_space=pltpu.MemorySpace.VMEM)
    smem = pl.BlockSpec(memory_space=pltpu.MemorySpace.SMEM)

    # NOTE: conv biases (b1, b2) are intentionally not passed: with train-mode
    # BatchNorm (batch statistics) they are cancelled by the mean subtraction.
    # TODO(synk): for non-toy batch sizes, add a parallel batch grid axis
    # (v7x second core), put batch on the lane axis, and run the FC on the MXU.
    return pl.pallas_call(
        cnn_policy_kernel,
        out_shape=jax.ShapeDtypeStruct((B, N_ACT), jnp.float32),
        in_specs=[vmem,                 # xps: (9, B, H, W) shifted input views
                  smem, smem, smem,     # w1, gamma1, beta1
                  smem, smem, smem,     # w2, gamma2, beta2
                  vmem, vmem],          # wfc (C2, N_ACT, H2, W2), fc bias (1, 5)
        out_specs=vmem,
    )(xps, w1f,
      params["g1"].astype(jnp.float32), params["be1"].astype(jnp.float32),
      w2f,
      params["g2"].astype(jnp.float32), params["be2"].astype(jnp.float32),
      wfc_r, bfc_r)


# ---------------- pure-JAX reference (for correctness check) ----------------
def _bn_train(y, g, b):
    mean = jnp.mean(y, axis=(0, 2, 3), keepdims=True)
    var = jnp.mean((y - mean) ** 2, axis=(0, 2, 3), keepdims=True)
    return (y - mean) / jnp.sqrt(var + EPS) * g[None, :, None, None] \
        + b[None, :, None, None]


def ref_forward(x, p):
    dn = ("NCHW", "OIHW", "NCHW")
    y = jax.lax.conv_general_dilated(x, p["w1"], (1, 1), ((1, 1), (1, 1)),
                                     dimension_numbers=dn)
    y = y + p["b1"][None, :, None, None]
    y = jax.nn.leaky_relu(_bn_train(y, p["g1"], p["be1"]), NEG_SLOPE)
    y = jax.lax.conv_general_dilated(y, p["w2"], (1, 1), "VALID",
                                     dimension_numbers=dn)
    y = y + p["b2"][None, :, None, None]
    y = jax.nn.leaky_relu(_bn_train(y, p["g2"], p["be2"]), NEG_SLOPE)
    flat = y.reshape(y.shape[0], -1)
    scores = flat @ p["wfc"].T + p["bfc"]
    return jax.nn.softmax(scores, axis=1)


if __name__ == "__main__":
    eye_sight = 7
    side = 2 * eye_sight + 1          # 15
    B = 2
    F = C2 * (side - 2) * (side - 2)  # get_flattened_shape(eye_sight) = 845

    key = jax.random.PRNGKey(0)
    ks = jax.random.split(key, 12)

    x = jax.random.normal(ks[0], (B, 1, side, side), jnp.float32)

    params = {
        "w1": 0.2 * jax.random.normal(ks[1], (C1, 1, 3, 3), jnp.float32),
        "b1": 0.1 * jax.random.normal(ks[2], (C1,), jnp.float32),
        "g1": 1.0 + 0.1 * jax.random.normal(ks[3], (C1,), jnp.float32),
        "be1": 0.1 * jax.random.normal(ks[4], (C1,), jnp.float32),
        "w2": 0.2 * jax.random.normal(ks[5], (C2, C1, 3, 3), jnp.float32),
        "b2": 0.1 * jax.random.normal(ks[6], (C2,), jnp.float32),
        "g2": 1.0 + 0.1 * jax.random.normal(ks[7], (C2,), jnp.float32),
        "be2": 0.1 * jax.random.normal(ks[8], (C2,), jnp.float32),
        "wfc": 0.05 * jax.random.normal(ks[9], (N_ACT, F), jnp.float32),
        "bfc": 0.1 * jax.random.normal(ks[10], (N_ACT,), jnp.float32),
    }

    probs = cnn_policy_forward(x, params)
    probs = jax.block_until_ready(probs)

    ref = ref_forward(x, params)
    assert probs.shape == (B, N_ACT)
    assert jnp.allclose(jnp.sum(probs, axis=1), 1.0, atol=1e-5)
    assert jnp.allclose(probs, ref, atol=5e-5, rtol=5e-4), (probs, ref)

    print("KERNEL_OK")
</pallas_src>

<mosaic_0001>
module attributes {stable_mosaic.version = 11 : i64} {
  func.func @cnn_policy_kernel(%arg0: memref<9x2x15x15xf32, #tpu.memory_space<vmem>>, %arg1: memref<27xf32, #tpu.memory_space<smem>>, %arg2: memref<3xf32, #tpu.memory_space<smem>>, %arg3: memref<3xf32, #tpu.memory_space<smem>>, %arg4: memref<135xf32, #tpu.memory_space<smem>>, %arg5: memref<5xf32, #tpu.memory_space<smem>>, %arg6: memref<5xf32, #tpu.memory_space<smem>>, %arg7: memref<5x5x13x13xf32, #tpu.memory_space<vmem>>, %arg8: memref<1x5xf32, #tpu.memory_space<vmem>>, %arg9: memref<2x5xf32, #tpu.memory_space<vmem>>) attributes {dimension_semantics = [], scalar_prefetch = 0 : i64, scratch_operands = 0 : i64, tpu.core_type = #tpu.core_type<tc>} {
    %c0 = arith.constant 0 : index
    %c0_0 = arith.constant 0 : index
    %c0_1 = arith.constant 0 : index
    %c0_2 = arith.constant 0 : index
    %0 = vector.load %arg0[%c0, %c0_0, %c0_1, %c0_2] : memref<9x2x15x15xf32, #tpu.memory_space<vmem>>, vector<1x2x15x15xf32>
    %1 = vector.shape_cast %0 : vector<1x2x15x15xf32> to vector<2x15x15xf32>
    %c0_3 = arith.constant 0 : index
    %2 = memref.load %arg1[%c0_3] : memref<27xf32, #tpu.memory_space<smem>>
    %3 = vector.broadcast %2 : f32 to vector<2x15x15xf32>
    %4 = arith.mulf %3, %1 : vector<2x15x15xf32>
    %c9 = arith.constant 9 : index
    %5 = memref.load %arg1[%c9] : memref<27xf32, #tpu.memory_space<smem>>
    %6 = vector.broadcast %5 : f32 to vector<2x15x15xf32>
    %7 = arith.mulf %6, %1 : vector<2x15x15xf32>
    %c18 = arith.constant 18 : index
    %8 = memref.load %arg1[%c18] : memref<27xf32, #tpu.memory_space<smem>>
    %9 = vector.broadcast %8 : f32 to vector<2x15x15xf32>
    %10 = arith.mulf %9, %1 : vector<2x15x15xf32>
    %c1 = arith.constant 1 : index
    %c0_4 = arith.constant 0 : index
    %c0_5 = arith.constant 0 : index
    %c0_6 = arith.constant 0 : index
    %11 = vector.load %arg0[%c1, %c0_4, %c0_5, %c0_6] : memref<9x2x15x15xf32, #tpu.memory_space<vmem>>, vector<1x2x15x15xf32>
    %12 = vector.shape_cast %11 : vector<1x2x15x15xf32> to vector<2x15x15xf32>
    %c1_7 = arith.constant 1 : index
    %13 = memref.load %arg1[%c1_7] : memref<27xf32, #tpu.memory_space<smem>>
    %14 = vector.broadcast %13 : f32 to vector<2x15x15xf32>
    %15 = arith.mulf %14, %12 : vector<2x15x15xf32>
    %16 = arith.addf %4, %15 : vector<2x15x15xf32>
    %c10 = arith.constant 10 : index
    %17 = memref.load %arg1[%c10] : memref<27xf32, #tpu.memory_space<smem>>
    %18 = vector.broadcast %17 : f32 to vector<2x15x15xf32>
    %19 = arith.mulf %18, %12 : vector<2x15x15xf32>
    %20 = arith.addf %7, %19 : vector<2x15x15xf32>
    %c19 = arith.constant 19 : index
    %21 = memref.load %arg1[%c19] : memref<27xf32, #tpu.memory_space<smem>>
    %22 = vector.broadcast %21 : f32 to vector<2x15x15xf32>
    %23 = arith.mulf %22, %12 : vector<2x15x15xf32>
    %24 = arith.addf %10, %23 : vector<2x15x15xf32>
    %c2 = arith.constant 2 : index
    %c0_8 = arith.constant 0 : index
    %c0_9 = arith.constant 0 : index
    %c0_10 = arith.constant 0 : index
    %25 = vector.load %arg0[%c2, %c0_8, %c0_9, %c0_10] : memref<9x2x15x15xf32, #tpu.memory_space<vmem>>, vector<1x2x15x15xf32>
    %26 = vector.shape_cast %25 : vector<1x2x15x15xf32> to vector<2x15x15xf32>
    %c2_11 = arith.constant 2 : index
    %27 = memref.load %arg1[%c2_11] : memref<27xf32, #tpu.memory_space<smem>>
    %28 = vector.broadcast %27 : f32 to vector<2x15x15xf32>
    %29 = arith.mulf %28, %26 : vector<2x15x15xf32>
    %30 = arith.addf %16, %29 : vector<2x15x15xf32>
    %c11 = arith.constant 11 : index
    %31 = memref.load %arg1[%c11] : memref<27xf32, #tpu.memory_space<smem>>
    %32 = vector.broadcast %31 : f32 to vector<2x15x15xf32>
    %33 = arith.mulf %32, %26 : vector<2x15x15xf32>
    %34 = arith.addf %20, %33 : vector<2x15x15xf32>
    %c20 = arith.constant 20 : index
    %35 = memref.load %arg1[%c20] : memref<27xf32, #tpu.memory_space<smem>>
    %36 = vector.broadcast %35 : f32 to vector<2x15x15xf32>
    %37 = arith.mulf %36, %26 : vector<2x15x15xf32>
    %38 = arith.addf %24, %37 : vector<2x15x15xf32>
    %c3 = arith.constant 3 : index
    %c0_12 = arith.constant 0 : index
    %c0_13 = arith.constant 0 : index
    %c0_14 = arith.constant 0 : index
    %39 = vector.load %arg0[%c3, %c0_12, %c0_13, %c0_14] : memref<9x2x15x15xf32, #tpu.memory_space<vmem>>, vector<1x2x15x15xf32>
    %40 = vector.shape_cast %39 : vector<1x2x15x15xf32> to vector<2x15x15xf32>
    %c3_15 = arith.constant 3 : index
    %41 = memref.load %arg1[%c3_15] : memref<27xf32, #tpu.memory_space<smem>>
    %42 = vector.broadcast %41 : f32 to vector<2x15x15xf32>
    %43 = arith.mulf %42, %40 : vector<2x15x15xf32>
    %44 = arith.addf %30, %43 : vector<2x15x15xf32>
    %c12 = arith.constant 12 : index
    %45 = memref.load %arg1[%c12] : memref<27xf32, #tpu.memory_space<smem>>
    %46 = vector.broadcast %45 : f32 to vector<2x15x15xf32>
    %47 = arith.mulf %46, %40 : vector<2x15x15xf32>
    %48 = arith.addf %34, %47 : vector<2x15x15xf32>
    %c21 = arith.constant 21 : index
    %49 = memref.load %arg1[%c21] : memref<27xf32, #tpu.memory_space<smem>>
    %50 = vector.broadcast %49 : f32 to vector<2x15x15xf32>
    %51 = arith.mulf %50, %40 : vector<2x15x15xf32>
    %52 = arith.addf %38, %51 : vector<2x15x15xf32>
    %c4 = arith.constant 4 : index
    %c0_16 = arith.constant 0 : index
    %c0_17 = arith.constant 0 : index
    %c0_18 = arith.constant 0 : index
    %53 = vector.load %arg0[%c4, %c0_16, %c0_17, %c0_18] : memref<9x2x15x15xf32, #tpu.memory_space<vmem>>, vector<1x2x15x15xf32>
    %54 = vector.shape_cast %53 : vector<1x2x15x15xf32> to vector<2x15x15xf32>
    %c4_19 = arith.constant 4 : index
    %55 = memref.load %arg1[%c4_19] : memref<27xf32, #tpu.memory_space<smem>>
    %56 = vector.broadcast %55 : f32 to vector<2x15x15xf32>
    %57 = arith.mulf %56, %54 : vector<2x15x15xf32>
    %58 = arith.addf %44, %57 : vector<2x15x15xf32>
    %c13 = arith.constant 13 : index
    %59 = memref.load %arg1[%c13] : memref<27xf32, #tpu.memory_space<smem>>
    %60 = vector.broadcast %59 : f32 to vector<2x15x15xf32>
    %61 = arith.mulf %60, %54 : vector<2x15x15xf32>
    %62 = arith.addf %48, %61 : vector<2x15x15xf32>
    %c22 = arith.constant 22 : index
    %63 = memref.load %arg1[%c22] : memref<27xf32, #tpu.memory_space<smem>>
    %64 = vector.broadcast %63 : f32 to vector<2x15x15xf32>
    %65 = arith.mulf %64, %54 : vector<2x15x15xf32>
    %66 = arith.addf %52, %65 : vector<2x15x15xf32>
    %c5 = arith.constant 5 : index
    %c0_20 = arith.constant 0 : index
    %c0_21 = arith.constant 0 : index
    %c0_22 = arith.constant 0 : index
    %67 = vector.load %arg0[%c5, %c0_20, %c0_21, %c0_22] : memref<9x2x15x15xf32, #tpu.memory_space<vmem>>, vector<1x2x15x15xf32>
    %68 = vector.shape_cast %67 : vector<1x2x15x15xf32> to vector<2x15x15xf32>
    %c5_23 = arith.constant 5 : index
    %69 = memref.load %arg1[%c5_23] : memref<27xf32, #tpu.memory_space<smem>>
    %70 = vector.broadcast %69 : f32 to vector<2x15x15xf32>
    %71 = arith.mulf %70, %68 : vector<2x15x15xf32>
    %72 = arith.addf %58, %71 : vector<2x15x15xf32>
    %c14 = arith.constant 14 : index
    %73 = memref.load %arg1[%c14] : memref<27xf32, #tpu.memory_space<smem>>
    %74 = vector.broadcast %73 : f32 to vector<2x15x15xf32>
    %75 = arith.mulf %74, %68 : vector<2x15x15xf32>
    %76 = arith.addf %62, %75 : vector<2x15x15xf32>
    %c23 = arith.constant 23 : index
    %77 = memref.load %arg1[%c23] : memref<27xf32, #tpu.memory_space<smem>>
    %78 = vector.broadcast %77 : f32 to vector<2x15x15xf32>
    %79 = arith.mulf %78, %68 : vector<2x15x15xf32>
    %80 = arith.addf %66, %79 : vector<2x15x15xf32>
    %c6 = arith.constant 6 : index
    %c0_24 = arith.constant 0 : index
    %c0_25 = arith.constant 0 : index
    %c0_26 = arith.constant 0 : index
    %81 = vector.load %arg0[%c6, %c0_24, %c0_25, %c0_26] : memref<9x2x15x15xf32, #tpu.memory_space<vmem>>, vector<1x2x15x15xf32>
    %82 = vector.shape_cast %81 : vector<1x2x15x15xf32> to vector<2x15x15xf32>
    %c6_27 = arith.constant 6 : index
    %83 = memref.load %arg1[%c6_27] : memref<27xf32, #tpu.memory_space<smem>>
    %84 = vector.broadcast %83 : f32 to vector<2x15x15xf32>
    %85 = arith.mulf %84, %82 : vector<2x15x15xf32>
    %86 = arith.addf %72, %85 : vector<2x15x15xf32>
    %c15 = arith.constant 15 : index
    %87 = memref.load %arg1[%c15] : memref<27xf32, #tpu.memory_space<smem>>
    %88 = vector.broadcast %87 : f32 to vector<2x15x15xf32>
    %89 = arith.mulf %88, %82 : vector<2x15x15xf32>
    %90 = arith.addf %76, %89 : vector<2x15x15xf32>
    %c24 = arith.constant 24 : index
    %91 = memref.load %arg1[%c24] : memref<27xf32, #tpu.memory_space<smem>>
    %92 = vector.broadcast %91 : f32 to vector<2x15x15xf32>
    %93 = arith.mulf %92, %82 : vector<2x15x15xf32>
    %94 = arith.addf %80, %93 : vector<2x15x15xf32>
    %c7 = arith.constant 7 : index
    %c0_28 = arith.constant 0 : index
    %c0_29 = arith.constant 0 : index
    %c0_30 = arith.constant 0 : index
    %95 = vector.load %arg0[%c7, %c0_28, %c0_29, %c0_30] : memref<9x2x15x15xf32, #tpu.memory_space<vmem>>, vector<1x2x15x15xf32>
    %96 = vector.shape_cast %95 : vector<1x2x15x15xf32> to vector<2x15x15xf32>
    %c7_31 = arith.constant 7 : index
    %97 = memref.load %arg1[%c7_31] : memref<27xf32, #tpu.memory_space<smem>>
    %98 = vector.broadcast %97 : f32 to vector<2x15x15xf32>
    %99 = arith.mulf %98, %96 : vector<2x15x15xf32>
    %100 = arith.addf %86, %99 : vector<2x15x15xf32>
    %c16 = arith.constant 16 : index
    %101 = memref.load %arg1[%c16] : memref<27xf32, #tpu.memory_space<smem>>
    %102 = vector.broadcast %101 : f32 to vector<2x15x15xf32>
    %103 = arith.mulf %102, %96 : vector<2x15x15xf32>
    %104 = arith.addf %90, %103 : vector<2x15x15xf32>
    %c25 = arith.constant 25 : index
    %105 = memref.load %arg1[%c25] : memref<27xf32, #tpu.memory_space<smem>>
    %106 = vector.broadcast %105 : f32 to vector<2x15x15xf32>
    %107 = arith.mulf %106, %96 : vector<2x15x15xf32>
    %108 = arith.addf %94, %107 : vector<2x15x15xf32>
    %c8 = arith.constant 8 : index
    %c0_32 = arith.constant 0 : index
    %c0_33 = arith.constant 0 : index
    %c0_34 = arith.constant 0 : index
    %109 = vector.load %arg0[%c8, %c0_32, %c0_33, %c0_34] : memref<9x2x15x15xf32, #tpu.memory_space<vmem>>, vector<1x2x15x15xf32>
    %110 = vector.shape_cast %109 : vector<1x2x15x15xf32> to vector<2x15x15xf32>
    %c8_35 = arith.constant 8 : index
    %111 = memref.load %arg1[%c8_35] : memref<27xf32, #tpu.memory_space<smem>>
    %112 = vector.broadcast %111 : f32 to vector<2x15x15xf32>
    %113 = arith.mulf %112, %110 : vector<2x15x15xf32>
    %114 = arith.addf %100, %113 : vector<2x15x15xf32>
    %c17 = arith.constant 17 : index
    %115 = memref.load %arg1[%c17] : memref<27xf32, #tpu.memory_space<smem>>
    %116 = vector.broadcast %115 : f32 to vector<2x15x15xf32>
    %117 = arith.mulf %116, %110 : vector<2x15x15xf32>
    %118 = arith.addf %104, %117 : vector<2x15x15xf32>
    %c26 = arith.constant 26 : index
    %119 = memref.load %arg1[%c26] : memref<27xf32, #tpu.memory_space<smem>>
    %120 = vector.broadcast %119 : f32 to vector<2x15x15xf32>
    %121 = arith.mulf %120, %110 : vector<2x15x15xf32>
    %122 = arith.addf %108, %121 : vector<2x15x15xf32>
    %123 = vector.shape_cast %114 : vector<2x15x15xf32> to vector<1x2x15x15xf32>
    %cst = arith.constant dense<0.000000e+00> : vector<1xf32>
    %124 = vector.multi_reduction <add>, %123, %cst [1, 2, 3] : vector<1x2x15x15xf32> to vector<1xf32>
    %125 = vector.shape_cast %124 : vector<1xf32> to vector<1x1x1x1xf32>
    %126 = vector.extract %125[0, 0, 0, 0] : f32 from vector<1x1x1x1xf32>
    %127 = arith.mulf %114, %114 : vector<2x15x15xf32>
    %128 = vector.shape_cast %127 : vector<2x15x15xf32> to vector<1x2x15x15xf32>
    %cst_36 = arith.constant dense<0.000000e+00> : vector<1xf32>
    %129 = vector.multi_reduction <add>, %128, %cst_36 [1, 2, 3] : vector<1x2x15x15xf32> to vector<1xf32>
    %130 = vector.shape_cast %129 : vector<1xf32> to vector<1x1x1x1xf32>
    %131 = vector.extract %130[0, 0, 0, 0] : f32 from vector<1x1x1x1xf32>
    %cst_37 = arith.constant 0.00222222228 : f32
    %132 = arith.mulf %126, %cst_37 : f32
    %cst_38 = arith.constant 0.00222222228 : f32
    %133 = arith.mulf %131, %cst_38 : f32
    %134 = arith.mulf %132, %132 : f32
    %135 = arith.subf %133, %134 : f32
    %cst_39 = arith.constant 0.000000e+00 : f32
    %136 = arith.maximumf %135, %cst_39 : f32
    %cst_40 = arith.constant 9.99999974E-6 : f32
    %137 = arith.addf %136, %cst_40 : f32
    %138 = math.rsqrt %137 : f32
    %c0_41 = arith.constant 0 : index
    %139 = memref.load %arg2[%c0_41] : memref<3xf32, #tpu.memory_space<smem>>
    %140 = arith.mulf %138, %139 : f32
    %c0_42 = arith.constant 0 : index
    %141 = memref.load %arg3[%c0_42] : memref<3xf32, #tpu.memory_space<smem>>
    %142 = arith.mulf %132, %140 : f32
    %143 = arith.subf %141, %142 : f32
    %144 = vector.broadcast %140 : f32 to vector<2x15x15xf32>
    %145 = arith.mulf %114, %144 : vector<2x15x15xf32>
    %146 = vector.broadcast %143 : f32 to vector<2x15x15xf32>
    %147 = arith.addf %145, %146 : vector<2x15x15xf32>
    %cst_43 = arith.constant 0.000000e+00 : f32
    %148 = vector.broadcast %cst_43 : f32 to vector<2x15x15xf32>
    %149 = arith.cmpf oge, %147, %148 : vector<2x15x15xf32>
    %cst_44 = arith.constant 0.00999999977 : f32
    %150 = vector.broadcast %cst_44 : f32 to vector<2x15x15xf32>
    %151 = arith.mulf %150, %147 : vector<2x15x15xf32>
    %152 = arith.select %149, %147, %151 : vector<2x15x15xi1>, vector<2x15x15xf32>
    %153 = vector.shape_cast %118 : vector<2x15x15xf32> to vector<1x2x15x15xf32>
    %cst_45 = arith.constant dense<0.000000e+00> : vector<1xf32>
    %154 = vector.multi_reduction <add>, %153, %cst_45 [1, 2, 3] : vector<1x2x15x15xf32> to vector<1xf32>
    %155 = vector.shape_cast %154 : vector<1xf32> to vector<1x1x1x1xf32>
    %156 = vector.extract %155[0, 0, 0, 0] : f32 from vector<1x1x1x1xf32>
    %157 = arith.mulf %118, %118 : vector<2x15x15xf32>
    %158 = vector.shape_cast %157 : vector<2x15x15xf32> to vector<1x2x15x15xf32>
    %cst_46 = arith.constant dense<0.000000e+00> : vector<1xf32>
    %159 = vector.multi_reduction <add>, %158, %cst_46 [1, 2, 3] : vector<1x2x15x15xf32> to vector<1xf32>
    %160 = vector.shape_cast %159 : vector<1xf32> to vector<1x1x1x1xf32>
    %161 = vector.extract %160[0, 0, 0, 0] : f32 from vector<1x1x1x1xf32>
    %cst_47 = arith.constant 0.00222222228 : f32
    %162 = arith.mulf %156, %cst_47 : f32
    %cst_48 = arith.constant 0.00222222228 : f32
    %163 = arith.mulf %161, %cst_48 : f32
    %164 = arith.mulf %162, %162 : f32
    %165 = arith.subf %163, %164 : f32
    %cst_49 = arith.constant 0.000000e+00 : f32
    %166 = arith.maximumf %165, %cst_49 : f32
    %cst_50 = arith.constant 9.99999974E-6 : f32
    %167 = arith.addf %166, %cst_50 : f32
    %168 = math.rsqrt %167 : f32
    %c1_51 = arith.constant 1 : index
    %169 = memref.load %arg2[%c1_51] : memref<3xf32, #tpu.memory_space<smem>>
    %170 = arith.mulf %168, %169 : f32
    %c1_52 = arith.constant 1 : index
    %171 = memref.load %arg3[%c1_52] : memref<3xf32, #tpu.memory_space<smem>>
    %172 = arith.mulf %162, %170 : f32
    %173 = arith.subf %171, %172 : f32
    %174 = vector.broadcast %170 : f32 to vector<2x15x15xf32>
    %175 = arith.mulf %118, %174 : vector<2x15x15xf32>
    %176 = vector.broadcast %173 : f32 to vector<2x15x15xf32>
    %177 = arith.addf %175, %176 : vector<2x15x15xf32>
    %cst_53 = arith.constant 0.000000e+00 : f32
    %178 = vector.broadcast %cst_53 : f32 to vector<2x15x15xf32>
    %179 = arith.cmpf oge, %177, %178 : vector<2x15x15xf32>
    %cst_54 = arith.constant 0.00999999977 : f32
    %180 = vector.broadcast %cst_54 : f32 to vector<2x15x15xf32>
    %181 = arith.mulf %180, %177 : vector<2x15x15xf32>
    %182 = arith.select %179, %177, %181 : vector<2x15x15xi1>, vector<2x15x15xf32>
    %183 = vector.shape_cast %122 : vector<2x15x15xf32> to vector<1x2x15x15xf32>
    %cst_55 = arith.constant dense<0.000000e+00> : vector<1xf32>
    %184 = vector.multi_reduction <add>, %183, %cst_55 [1, 2, 3] : vector<1x2x15x15xf32> to vector<1xf32>
    %185 = vector.shape_cast %184 : vector<1xf32> to vector<1x1x1x1xf32>
    %186 = vector.extract %185[0, 0, 0, 0] : f32 from vector<1x1x1x1xf32>
    %187 = arith.mulf %122, %122 : vector<2x15x15xf32>
    %188 = vector.shape_cast %187 : vector<2x15x15xf32> to vector<1x2x15x15xf32>
    %cst_56 = arith.constant dense<0.000000e+00> : vector<1xf32>
    %189 = vector.multi_reduction <add>, %188, %cst_56 [1, 2, 3] : vector<1x2x15x15xf32> to vector<1xf32>
    %190 = vector.shape_cast %189 : vector<1xf32> to vector<1x1x1x1xf32>
    %191 = vector.extract %190[0, 0, 0, 0] : f32 from vector<1x1x1x1xf32>
    %cst_57 = arith.constant 0.00222222228 : f32
    %192 = arith.mulf %186, %cst_57 : f32
    %cst_58 = arith.constant 0.00222222228 : f32
    %193 = arith.mulf %191, %cst_58 : f32
    %194 = arith.mulf %192, %192 : f32
    %195 = arith.subf %193, %194 : f32
    %cst_59 = arith.constant 0.000000e+00 : f32
    %196 = arith.maximumf %195, %cst_59 : f32
    %cst_60 = arith.constant 9.99999974E-6 : f32
    %197 = arith.addf %196, %cst_60 : f32
    %198 = math.rsqrt %197 : f32
    %c2_61 = arith.constant 2 : index
    %199 = memref.load %arg2[%c2_61] : memref<3xf32, #tpu.memory_space<smem>>
    %200 = arith.mulf %198, %199 : f32
    %c2_62 = arith.constant 2 : index
    %201 = memref.load %arg3[%c2_62] : memref<3xf32, #tpu.memory_space<smem>>
    %202 = arith.mulf %192, %200 : f32
    %203 = arith.subf %201, %202 : f32
    %204 = vector.broadcast %200 : f32 to vector<2x15x15xf32>
    %205 = arith.mulf %122, %204 : vector<2x15x15xf32>
    %206 = vector.broadcast %203 : f32 to vector<2x15x15xf32>
    %207 = arith.addf %205, %206 : vector<2x15x15xf32>
    %cst_63 = arith.constant 0.000000e+00 : f32
    %208 = vector.broadcast %cst_63 : f32 to vector<2x15x15xf32>
    %209 = arith.cmpf oge, %207, %208 : vector<2x15x15xf32>
    %cst_64 = arith.constant 0.00999999977 : f32
    %210 = vector.broadcast %cst_64 : f32 to vector<2x15x15xf32>
    %211 = arith.mulf %210, %207 : vector<2x15x15xf32>
    %212 = arith.select %209, %207, %211 : vector<2x15x15xi1>, vector<2x15x15xf32>
    %213 = vector.extract_strided_slice %152 {offsets = [0, 0, 0], sizes = [2, 13, 13], strides = [1, 1, 1]} : vector<2x15x15xf32> to vector<2x13x13xf32>
    %c0_65 = arith.constant 0 : index
    %214 = memref.load %arg4[%c0_65] : memref<135xf32, #tpu.memory_space<smem>>
    %215 = vector.broadcast %214 : f32 to vector<2x13x13xf32>
    %216 = arith.mulf %215, %213 : vector<2x13x13xf32>
    %c27 = arith.constant 27 : index
    %217 = memref.load %arg4[%c27] : memref<135xf32, #tpu.memory_space<smem>>
    %218 = vector.broadcast %217 : f32 to vector<2x13x13xf32>
    %219 = arith.mulf %218, %213 : vector<2x13x13xf32>
    %c54 = arith.constant 54 : index
    %220 = memref.load %arg4[%c54] : memref<135xf32, #tpu.memory_space<smem>>
    %221 = vector.broadcast %220 : f32 to vector<2x13x13xf32>
    %222 = arith.mulf %221, %213 : vector<2x13x13xf32>
    %c81 = arith.constant 81 : index
    %223 = memref.load %arg4[%c81] : memref<135xf32, #tpu.memory_space<smem>>
    %224 = vector.broadcast %223 : f32 to vector<2x13x13xf32>
    %225 = arith.mulf %224, %213 : vector<2x13x13xf32>
    %c108 = arith.constant 108 : index
    %226 = memref.load %arg4[%c108] : memref<135xf32, #tpu.memory_space<smem>>
    %227 = vector.broadcast %226 : f32 to vector<2x13x13xf32>
    %228 = arith.mulf %227, %213 : vector<2x13x13xf32>
    %229 = vector.extract_strided_slice %152 {offsets = [0, 0, 1], sizes = [2, 13, 13], strides = [1, 1, 1]} : vector<2x15x15xf32> to vector<2x13x13xf32>
    %c1_66 = arith.constant 1 : index
    %230 = memref.load %arg4[%c1_66] : memref<135xf32, #tpu.memory_space<smem>>
    %231 = vector.broadcast %230 : f32 to vector<2x13x13xf32>
    %232 = arith.mulf %231, %229 : vector<2x13x13xf32>
    %233 = arith.addf %216, %232 : vector<2x13x13xf32>
    %c28 = arith.constant 28 : index
    %234 = memref.load %arg4[%c28] : memref<135xf32, #tpu.memory_space<smem>>
    %235 = vector.broadcast %234 : f32 to vector<2x13x13xf32>
    %236 = arith.mulf %235, %229 : vector<2x13x13xf32>
    %237 = arith.addf %219, %236 : vector<2x13x13xf32>
    %c55 = arith.constant 55 : index
    %238 = memref.load %arg4[%c55] : memref<135xf32, #tpu.memory_space<smem>>
    %239 = vector.broadcast %238 : f32 to vector<2x13x13xf32>
    %240 = arith.mulf %239, %229 : vector<2x13x13xf32>
    %241 = arith.addf %222, %240 : vector<2x13x13xf32>
    %c82 = arith.constant 82 : index
    %242 = memref.load %arg4[%c82] : memref<135xf32, #tpu.memory_space<smem>>
    %243 = vector.broadcast %242 : f32 to vector<2x13x13xf32>
    %244 = arith.mulf %243, %229 : vector<2x13x13xf32>
    %245 = arith.addf %225, %244 : vector<2x13x13xf32>
    %c109 = arith.constant 109 : index
    %246 = memref.load %arg4[%c109] : memref<135xf32, #tpu.memory_space<smem>>
    %247 = vector.broadcast %246 : f32 to vector<2x13x13xf32>
    %248 = arith.mulf %247, %229 : vector<2x13x13xf32>
    %249 = arith.addf %228, %248 : vector<2x13x13xf32>
    %250 = vector.extract_strided_slice %152 {offsets = [0, 0, 2], sizes = [2, 13, 13], strides = [1, 1, 1]} : vector<2x15x15xf32> to vector<2x13x13xf32>
    %c2_67 = arith.constant 2 : index
    %251 = memref.load %arg4[%c2_67] : memref<135xf32, #tpu.memory_space<smem>>
    %252 = vector.broadcast %251 : f32 to vector<2x13x13xf32>
    %253 = arith.mulf %252, %250 : vector<2x13x13xf32>
    %254 = arith.addf %233, %253 : vector<2x13x13xf32>
    %c29 = arith.constant 29 : index
    %255 = memref.load %arg4[%c29] : memref<135xf32, #tpu.memory_space<smem>>
    %256 = vector.broadcast %255 : f32 to vector<2x13x13xf32>
    %257 = arith.mulf %256, %250 : vector<2x13x13xf32>
    %258 = arith.addf %237, %257 : vector<2x13x13xf32>
    %c56 = arith.constant 56 : index
    %259 = memref.load %arg4[%c56] : memref<135xf32, #tpu.memory_space<smem>>
    %260 = vector.broadcast %259 : f32 to vector<2x13x13xf32>
    %261 = arith.mulf %260, %250 : vector<2x13x13xf32>
    %262 = arith.addf %241, %261 : vector<2x13x13xf32>
    %c83 = arith.constant 83 : index
    %263 = memref.load %arg4[%c83] : memref<135xf32, #tpu.memory_space<smem>>
    %264 = vector.broadcast %263 : f32 to vector<2x13x13xf32>
    %265 = arith.mulf %264, %250 : vector<2x13x13xf32>
    %266 = arith.addf %245, %265 : vector<2x13x13xf32>
    %c110 = arith.constant 110 : index
    %267 = memref.load %arg4[%c110] : memref<135xf32, #tpu.memory_space<smem>>
    %268 = vector.broadcast %267 : f32 to vector<2x13x13xf32>
    %269 = arith.mulf %268, %250 : vector<2x13x13xf32>
    %270 = arith.addf %249, %269 : vector<2x13x13xf32>
    %271 = vector.extract_strided_slice %152 {offsets = [0, 1, 0], sizes = [2, 13, 13], strides = [1, 1, 1]} : vector<2x15x15xf32> to vector<2x13x13xf32>
    %c3_68 = arith.constant 3 : index
    %272 = memref.load %arg4[%c3_68] : memref<135xf32, #tpu.memory_space<smem>>
    %273 = vector.broadcast %272 : f32 to vector<2x13x13xf32>
    %274 = arith.mulf %273, %271 : vector<2x13x13xf32>
    %275 = arith.addf %254, %274 : vector<2x13x13xf32>
    %c30 = arith.constant 30 : index
    %276 = memref.load %arg4[%c30] : memref<135xf32, #tpu.memory_space<smem>>
    %277 = vector.broadcast %276 : f32 to vector<2x13x13xf32>
    %278 = arith.mulf %277, %271 : vector<2x13x13xf32>
    %279 = arith.addf %258, %278 : vector<2x13x13xf32>
    %c57 = arith.constant 57 : index
    %280 = memref.load %arg4[%c57] : memref<135xf32, #tpu.memory_space<smem>>
    %281 = vector.broadcast %280 : f32 to vector<2x13x13xf32>
    %282 = arith.mulf %281, %271 : vector<2x13x13xf32>
    %283 = arith.addf %262, %282 : vector<2x13x13xf32>
    %c84 = arith.constant 84 : index
    %284 = memref.load %arg4[%c84] : memref<135xf32, #tpu.memory_space<smem>>
    %285 = vector.broadcast %284 : f32 to vector<2x13x13xf32>
    %286 = arith.mulf %285, %271 : vector<2x13x13xf32>
    %287 = arith.addf %266, %286 : vector<2x13x13xf32>
    %c111 = arith.constant 111 : index
    %288 = memref.load %arg4[%c111] : memref<135xf32, #tpu.memory_space<smem>>
    %289 = vector.broadcast %288 : f32 to vector<2x13x13xf32>
    %290 = arith.mulf %289, %271 : vector<2x13x13xf32>
    %291 = arith.addf %270, %290 : vector<2x13x13xf32>
    %292 = vector.extract_strided_slice %152 {offsets = [0, 1, 1], sizes = [2, 13, 13], strides = [1, 1, 1]} : vector<2x15x15xf32> to vector<2x13x13xf32>
    %c4_69 = arith.constant 4 : index
    %293 = memref.load %arg4[%c4_69] : memref<135xf32, #tpu.memory_space<smem>>
    %294 = vector.broadcast %293 : f32 to vector<2x13x13xf32>
    %295 = arith.mulf %294, %292 : vector<2x13x13xf32>
    %296 = arith.addf %275, %295 : vector<2x13x13xf32>
    %c31 = arith.constant 31 : index
    %297 = memref.load %arg4[%c31] : memref<135xf32, #tpu.memory_space<smem>>
    %298 = vector.broadcast %297 : f32 to vector<2x13x13xf32>
    %299 = arith.mulf %298, %292 : vector<2x13x13xf32>
    %300 = arith.addf %279, %299 : vector<2x13x13xf32>
    %c58 = arith.constant 58 : index
    %301 = memref.load %arg4[%c58] : memref<135xf32, #tpu.memory_space<smem>>
    %302 = vector.broadcast %301 : f32 to vector<2x13x13xf32>
    %303 = arith.mulf %302, %292 : vector<2x13x13xf32>
    %304 = arith.addf %283, %303 : vector<2x13x13xf32>
    %c85 = arith.constant 85 : index
    %305 = memref.load %arg4[%c85] : memref<135xf32, #tpu.memory_space<smem>>
    %306 = vector.broadcast %305 : f32 to vector<2x13x13xf32>
    %307 = arith.mulf %306, %292 : vector<2x13x13xf32>
    %308 = arith.addf %287, %307 : vector<2x13x13xf32>
    %c112 = arith.constant 112 : index
    %309 = memref.load %arg4[%c112] : memref<135xf32, #tpu.memory_space<smem>>
    %310 = vector.broadcast %309 : f32 to vector<2x13x13xf32>
    %311 = arith.mulf %310, %292 : vector<2x13x13xf32>
    %312 = arith.addf %291, %311 : vector<2x13x13xf32>
    %313 = vector.extract_strided_slice %152 {offsets = [0, 1, 2], sizes = [2, 13, 13], strides = [1, 1, 1]} : vector<2x15x15xf32> to vector<2x13x13xf32>
    %c5_70 = arith.constant 5 : index
    %314 = memref.load %arg4[%c5_70] : memref<135xf32, #tpu.memory_space<smem>>
    %315 = vector.broadcast %314 : f32 to vector<2x13x13xf32>
    %316 = arith.mulf %315, %313 : vector<2x13x13xf32>
    %317 = arith.addf %296, %316 : vector<2x13x13xf32>
    %c32 = arith.constant 32 : index
    %318 = memref.load %arg4[%c32] : memref<135xf32, #tpu.memory_space<smem>>
    %319 = vector.broadcast %318 : f32 to vector<2x13x13xf32>
    %320 = arith.mulf %319, %313 : vector<2x13x13xf32>
    %321 = arith.addf %300, %320 : vector<2x13x13xf32>
    %c59 = arith.constant 59 : index
    %322 = memref.load %arg4[%c59] : memref<135xf32, #tpu.memory_space<smem>>
    %323 = vector.broadcast %322 : f32 to vector<2x13x13xf32>
    %324 = arith.mulf %323, %313 : vector<2x13x13xf32>
    %325 = arith.addf %304, %324 : vector<2x13x13xf32>
    %c86 = arith.constant 86 : index
    %326 = memref.load %arg4[%c86] : memref<135xf32, #tpu.memory_space<smem>>
    %327 = vector.broadcast %326 : f32 to vector<2x13x13xf32>
    %328 = arith.mulf %327, %313 : vector<2x13x13xf32>
    %329 = arith.addf %308, %328 : vector<2x13x13xf32>
    %c113 = arith.constant 113 : index
    %330 = memref.load %arg4[%c113] : memref<135xf32, #tpu.memory_space<smem>>
    %331 = vector.broadcast %330 : f32 to vector<2x13x13xf32>
    %332 = arith.mulf %331, %313 : vector<2x13x13xf32>
    %333 = arith.addf %312, %332 : vector<2x13x13xf32>
    %334 = vector.extract_strided_slice %152 {offsets = [0, 2, 0], sizes = [2, 13, 13], strides = [1, 1, 1]} : vector<2x15x15xf32> to vector<2x13x13xf32>
    %c6_71 = arith.constant 6 : index
    %335 = memref.load %arg4[%c6_71] : memref<135xf32, #tpu.memory_space<smem>>
    %336 = vector.broadcast %335 : f32 to vector<2x13x13xf32>
    %337 = arith.mulf %336, %334 : vector<2x13x13xf32>
    %338 = arith.addf %317, %337 : vector<2x13x13xf32>
    %c33 = arith.constant 33 : index
    %339 = memref.load %arg4[%c33] : memref<135xf32, #tpu.memory_space<smem>>
    %340 = vector.broadcast %339 : f32 to vector<2x13x13xf32>
    %341 = arith.mulf %340, %334 : vector<2x13x13xf32>
    %342 = arith.addf %321, %341 : vector<2x13x13xf32>
    %c60 = arith.constant 60 : index
    %343 = memref.load %arg4[%c60] : memref<135xf32, #tpu.memory_space<smem>>
    %344 = vector.broadcast %343 : f32 to vector<2x13x13xf32>
    %345 = arith.mulf %344, %334 : vector<2x13x13xf32>
    %346 = arith.addf %325, %345 : vector<2x13x13xf32>
    %c87 = arith.constant 87 : index
    %347 = memref.load %arg4[%c87] : memref<135xf32, #tpu.memory_space<smem>>
    %348 = vector.broadcast %347 : f32 to vector<2x13x13xf32>
    %349 = arith.mulf %348, %334 : vector<2x13x13xf32>
    %350 = arith.addf %329, %349 : vector<2x13x13xf32>
    %c114 = arith.constant 114 : index
    %351 = memref.load %arg4[%c114] : memref<135xf32, #tpu.memory_space<smem>>
    %352 = vector.broadcast %351 : f32 to vector<2x13x13xf32>
    %353 = arith.mulf %352, %334 : vector<2x13x13xf32>
    %354 = arith.addf %333, %353 : vector<2x13x13xf32>
    %355 = vector.extract_strided_slice %152 {offsets = [0, 2, 1], sizes = [2, 13, 13], strides = [1, 1, 1]} : vector<2x15x15xf32> to vector<2x13x13xf32>
    %c7_72 = arith.constant 7 : index
    %356 = memref.load %arg4[%c7_72] : memref<135xf32, #tpu.memory_space<smem>>
    %357 = vector.broadcast %356 : f32 to vector<2x13x13xf32>
    %358 = arith.mulf %357, %355 : vector<2x13x13xf32>
    %359 = arith.addf %338, %358 : vector<2x13x13xf32>
    %c34 = arith.constant 34 : index
    %360 = memref.load %arg4[%c34] : memref<135xf32, #tpu.memory_space<smem>>
    %361 = vector.broadcast %360 : f32 to vector<2x13x13xf32>
    %362 = arith.mulf %361, %355 : vector<2x13x13xf32>
    %363 = arith.addf %342, %362 : vector<2x13x13xf32>
    %c61 = arith.constant 61 : index
    %364 = memref.load %arg4[%c61] : memref<135xf32, #tpu.memory_space<smem>>
    %365 = vector.broadcast %364 : f32 to vector<2x13x13xf32>
    %366 = arith.mulf %365, %355 : vector<2x13x13xf32>
    %367 = arith.addf %346, %366 : vector<2x13x13xf32>
    %c88 = arith.constant 88 : index
    %368 = memref.load %arg4[%c88] : memref<135xf32, #tpu.memory_space<smem>>
    %369 = vector.broadcast %368 : f32 to vector<2x13x13xf32>
    %370 = arith.mulf %369, %355 : vector<2x13x13xf32>
    %371 = arith.addf %350, %370 : vector<2x13x13xf32>
    %c115 = arith.constant 115 : index
    %372 = memref.load %arg4[%c115] : memref<135xf32, #tpu.memory_space<smem>>
    %373 = vector.broadcast %372 : f32 to vector<2x13x13xf32>
    %374 = arith.mulf %373, %355 : vector<2x13x13xf32>
    %375 = arith.addf %354, %374 : vector<2x13x13xf32>
    %376 = vector.extract_strided_slice %152 {offsets = [0, 2, 2], sizes = [2, 13, 13], strides = [1, 1, 1]} : vector<2x15x15xf32> to vector<2x13x13xf32>
    %c8_73 = arith.constant 8 : index
    %377 = memref.load %arg4[%c8_73] : memref<135xf32, #tpu.memory_space<smem>>
    %378 = vector.broadcast %377 : f32 to vector<2x13x13xf32>
    %379 = arith.mulf %378, %376 : vector<2x13x13xf32>
    %380 = arith.addf %359, %379 : vector<2x13x13xf32>
    %c35 = arith.constant 35 : index
    %381 = memref.load %arg4[%c35] : memref<135xf32, #tpu.memory_space<smem>>
    %382 = vector.broadcast %381 : f32 to vector<2x13x13xf32>
    %383 = arith.mulf %382, %376 : vector<2x13x13xf32>
    %384 = arith.addf %363, %383 : vector<2x13x13xf32>
    %c62 = arith.constant 62 : index
    %385 = memref.load %arg4[%c62] : memref<135xf32, #tpu.memory_space<smem>>
    %386 = vector.broadcast %385 : f32 to vector<2x13x13xf32>
    %387 = arith.mulf %386, %376 : vector<2x13x13xf32>
    %388 = arith.addf %367, %387 : vector<2x13x13xf32>
    %c89 = arith.constant 89 : index
    %389 = memref.load %arg4[%c89] : memref<135xf32, #tpu.memory_space<smem>>
    %390 = vector.broadcast %389 : f32 to vector<2x13x13xf32>
    %391 = arith.mulf %390, %376 : vector<2x13x13xf32>
    %392 = arith.addf %371, %391 : vector<2x13x13xf32>
    %c116 = arith.constant 116 : index
    %393 = memref.load %arg4[%c116] : memref<135xf32, #tpu.memory_space<smem>>
    %394 = vector.broadcast %393 : f32 to vector<2x13x13xf32>
    %395 = arith.mulf %394, %376 : vector<2x13x13xf32>
    %396 = arith.addf %375, %395 : vector<2x13x13xf32>
    %397 = vector.extract_strided_slice %182 {offsets = [0, 0, 0], sizes = [2, 13, 13], strides = [1, 1, 1]} : vector<2x15x15xf32> to vector<2x13x13xf32>
    %c9_74 = arith.constant 9 : index
    %398 = memref.load %arg4[%c9_74] : memref<135xf32, #tpu.memory_space<smem>>
    %399 = vector.broadcast %398 : f32 to vector<2x13x13xf32>
    %400 = arith.mulf %399, %397 : vector<2x13x13xf32>
    %401 = arith.addf %380, %400 : vector<2x13x13xf32>
    %c36 = arith.constant 36 : index
    %402 = memref.load %arg4[%c36] : memref<135xf32, #tpu.memory_space<smem>>
    %403 = vector.broadcast %402 : f32 to vector<2x13x13xf32>
    %404 = arith.mulf %403, %397 : vector<2x13x13xf32>
    %405 = arith.addf %384, %404 : vector<2x13x13xf32>
    %c63 = arith.constant 63 : index
    %406 = memref.load %arg4[%c63] : memref<135xf32, #tpu.memory_space<smem>>
    %407 = vector.broadcast %406 : f32 to vector<2x13x13xf32>
    %408 = arith.mulf %407, %397 : vector<2x13x13xf32>
    %409 = arith.addf %388, %408 : vector<2x13x13xf32>
    %c90 = arith.constant 90 : index
    %410 = memref.load %arg4[%c90] : memref<135xf32, #tpu.memory_space<smem>>
    %411 = vector.broadcast %410 : f32 to vector<2x13x13xf32>
    %412 = arith.mulf %411, %397 : vector<2x13x13xf32>
    %413 = arith.addf %392, %412 : vector<2x13x13xf32>
    %c117 = arith.constant 117 : index
    %414 = memref.load %arg4[%c117] : memref<135xf32, #tpu.memory_space<smem>>
    %415 = vector.broadcast %414 : f32 to vector<2x13x13xf32>
    %416 = arith.mulf %415, %397 : vector<2x13x13xf32>
    %417 = arith.addf %396, %416 : vector<2x13x13xf32>
    %418 = vector.extract_strided_slice %182 {offsets = [0, 0, 1], sizes = [2, 13, 13], strides = [1, 1, 1]} : vector<2x15x15xf32> to vector<2x13x13xf32>
    %c10_75 = arith.constant 10 : index
    %419 = memref.load %arg4[%c10_75] : memref<135xf32, #tpu.memory_space<smem>>
    %420 = vector.broadcast %419 : f32 to vector<2x13x13xf32>
    %421 = arith.mulf %420, %418 : vector<2x13x13xf32>
    %422 = arith.addf %401, %421 : vector<2x13x13xf32>
    %c37 = arith.constant 37 : index
    %423 = memref.load %arg4[%c37] : memref<135xf32, #tpu.memory_space<smem>>
    %424 = vector.broadcast %423 : f32 to vector<2x13x13xf32>
    %425 = arith.mulf %424, %418 : vector<2x13x13xf32>
    %426 = arith.addf %405, %425 : vector<2x13x13xf32>
    %c64 = arith.constant 64 : index
    %427 = memref.load %arg4[%c64] : memref<135xf32, #tpu.memory_space<smem>>
    %428 = vector.broadcast %427 : f32 to vector<2x13x13xf32>
    %429 = arith.mulf %428, %418 : vector<2x13x13xf32>
    %430 = arith.addf %409, %429 : vector<2x13x13xf32>
    %c91 = arith.constant 91 : index
    %431 = memref.load %arg4[%c91] : memref<135xf32, #tpu.memory_space<smem>>
    %432 = vector.broadcast %431 : f32 to vector<2x13x13xf32>
    %433 = arith.mulf %432, %418 : vector<2x13x13xf32>
    %434 = arith.addf %413, %433 : vector<2x13x13xf32>
    %c118 = arith.constant 118 : index
    %435 = memref.load %arg4[%c118] : memref<135xf32, #tpu.memory_space<smem>>
    %436 = vector.broadcast %435 : f32 to vector<2x13x13xf32>
    %437 = arith.mulf %436, %418 : vector<2x13x13xf32>
    %438 = arith.addf %417, %437 : vector<2x13x13xf32>
    %439 = vector.extract_strided_slice %182 {offsets = [0, 0, 2], sizes = [2, 13, 13], strides = [1, 1, 1]} : vector<2x15x15xf32> to vector<2x13x13xf32>
    %c11_76 = arith.constant 11 : index
    %440 = memref.load %arg4[%c11_76] : memref<135xf32, #tpu.memory_space<smem>>
    %441 = vector.broadcast %440 : f32 to vector<2x13x13xf32>
    %442 = arith.mulf %441, %439 : vector<2x13x13xf32>
    %443 = arith.addf %422, %442 : vector<2x13x13xf32>
    %c38 = arith.constant 38 : index
    %444 = memref.load %arg4[%c38] : memref<135xf32, #tpu.memory_space<smem>>
    %445 = vector.broadcast %444 : f32 to vector<2x13x13xf32>
    %446 = arith.mulf %445, %439 : vector<2x13x13xf32>
    %447 = arith.addf %426, %446 : vector<2x13x13xf32>
    %c65 = arith.constant 65 : index
    %448 = memref.load %arg4[%c65] : memref<135xf32, #tpu.memory_space<smem>>
    %449 = vector.broadcast %448 : f32 to vector<2x13x13xf32>
    %450 = arith.mulf %449, %439 : vector<2x13x13xf32>
    %451 = arith.addf %430, %450 : vector<2x13x13xf32>
    %c92 = arith.constant 92 : index
    %452 = memref.load %arg4[%c92] : memref<135xf32, #tpu.memory_space<smem>>
    %453 = vector.broadcast %452 : f32 to vector<2x13x13xf32>
    %454 = arith.mulf %453, %439 : vector<2x13x13xf32>
    %455 = arith.addf %434, %454 : vector<2x13x13xf32>
    %c119 = arith.constant 119 : index
    %456 = memref.load %arg4[%c119] : memref<135xf32, #tpu.memory_space<smem>>
    %457 = vector.broadcast %456 : f32 to vector<2x13x13xf32>
    %458 = arith.mulf %457, %439 : vector<2x13x13xf32>
    %459 = arith.addf %438, %458 : vector<2x13x13xf32>
    %460 = vector.extract_strided_slice %182 {offsets = [0, 1, 0], sizes = [2, 13, 13], strides = [1, 1, 1]} : vector<2x15x15xf32> to vector<2x13x13xf32>
    %c12_77 = arith.constant 12 : index
    %461 = memref.load %arg4[%c12_77] : memref<135xf32, #tpu.memory_space<smem>>
    %462 = vector.broadcast %461 : f32 to vector<2x13x13xf32>
    %463 = arith.mulf %462, %460 : vector<2x13x13xf32>
    %464 = arith.addf %443, %463 : vector<2x13x13xf32>
    %c39 = arith.constant 39 : index
    %465 = memref.load %arg4[%c39] : memref<135xf32, #tpu.memory_space<smem>>
    %466 = vector.broadcast %465 : f32 to vector<2x13x13xf32>
    %467 = arith.mulf %466, %460 : vector<2x13x13xf32>
    %468 = arith.addf %447, %467 : vector<2x13x13xf32>
    %c66 = arith.constant 66 : index
    %469 = memref.load %arg4[%c66] : memref<135xf32, #tpu.memory_space<smem>>
    %470 = vector.broadcast %469 : f32 to vector<2x13x13xf32>
    %471 = arith.mulf %470, %460 : vector<2x13x13xf32>
    %472 = arith.addf %451, %471 : vector<2x13x13xf32>
    %c93 = arith.constant 93 : index
    %473 = memref.load %arg4[%c93] : memref<135xf32, #tpu.memory_space<smem>>
    %474 = vector.broadcast %473 : f32 to vector<2x13x13xf32>
    %475 = arith.mulf %474, %460 : vector<2x13x13xf32>
    %476 = arith.addf %455, %475 : vector<2x13x13xf32>
    %c120 = arith.constant 120 : index
    %477 = memref.load %arg4[%c120] : memref<135xf32, #tpu.memory_space<smem>>
    %478 = vector.broadcast %477 : f32 to vector<2x13x13xf32>
    %479 = arith.mulf %478, %460 : vector<2x13x13xf32>
    %480 = arith.addf %459, %479 : vector<2x13x13xf32>
    %481 = vector.extract_strided_slice %182 {offsets = [0, 1, 1], sizes = [2, 13, 13], strides = [1, 1, 1]} : vector<2x15x15xf32> to vector<2x13x13xf32>
    %c13_78 = arith.constant 13 : index
    %482 = memref.load %arg4[%c13_78] : memref<135xf32, #tpu.memory_space<smem>>
    %483 = vector.broadcast %482 : f32 to vector<2x13x13xf32>
    %484 = arith.mulf %483, %481 : vector<2x13x13xf32>
    %485 = arith.addf %464, %484 : vector<2x13x13xf32>
    %c40 = arith.constant 40 : index
    %486 = memref.load %arg4[%c40] : memref<135xf32, #tpu.memory_space<smem>>
    %487 = vector.broadcast %486 : f32 to vector<2x13x13xf32>
    %488 = arith.mulf %487, %481 : vector<2x13x13xf32>
    %489 = arith.addf %468, %488 : vector<2x13x13xf32>
    %c67 = arith.constant 67 : index
    %490 = memref.load %arg4[%c67] : memref<135xf32, #tpu.memory_space<smem>>
    %491 = vector.broadcast %490 : f32 to vector<2x13x13xf32>
    %492 = arith.mulf %491, %481 : vector<2x13x13xf32>
    %493 = arith.addf %472, %492 : vector<2x13x13xf32>
    %c94 = arith.constant 94 : index
    %494 = memref.load %arg4[%c94] : memref<135xf32, #tpu.memory_space<smem>>
    %495 = vector.broadcast %494 : f32 to vector<2x13x13xf32>
    %496 = arith.mulf %495, %481 : vector<2x13x13xf32>
    %497 = arith.addf %476, %496 : vector<2x13x13xf32>
    %c121 = arith.constant 121 : index
    %498 = memref.load %arg4[%c121] : memref<135xf32, #tpu.memory_space<smem>>
    %499 = vector.broadcast %498 : f32 to vector<2x13x13xf32>
    %500 = arith.mulf %499, %481 : vector<2x13x13xf32>
    %501 = arith.addf %480, %500 : vector<2x13x13xf32>
    %502 = vector.extract_strided_slice %182 {offsets = [0, 1, 2], sizes = [2, 13, 13], strides = [1, 1, 1]} : vector<2x15x15xf32> to vector<2x13x13xf32>
    %c14_79 = arith.constant 14 : index
    %503 = memref.load %arg4[%c14_79] : memref<135xf32, #tpu.memory_space<smem>>
    %504 = vector.broadcast %503 : f32 to vector<2x13x13xf32>
    %505 = arith.mulf %504, %502 : vector<2x13x13xf32>
    %506 = arith.addf %485, %505 : vector<2x13x13xf32>
    %c41 = arith.constant 41 : index
    %507 = memref.load %arg4[%c41] : memref<135xf32, #tpu.memory_space<smem>>
    %508 = vector.broadcast %507 : f32 to vector<2x13x13xf32>
    %509 = arith.mulf %508, %502 : vector<2x13x13xf32>
    %510 = arith.addf %489, %509 : vector<2x13x13xf32>
    %c68 = arith.constant 68 : index
    %511 = memref.load %arg4[%c68] : memref<135xf32, #tpu.memory_space<smem>>
    %512 = vector.broadcast %511 : f32 to vector<2x13x13xf32>
    %513 = arith.mulf %512, %502 : vector<2x13x13xf32>
    %514 = arith.addf %493, %513 : vector<2x13x13xf32>
    %c95 = arith.constant 95 : index
    %515 = memref.load %arg4[%c95] : memref<135xf32, #tpu.memory_space<smem>>
    %516 = vector.broadcast %515 : f32 to vector<2x13x13xf32>
    %517 = arith.mulf %516, %502 : vector<2x13x13xf32>
    %518 = arith.addf %497, %517 : vector<2x13x13xf32>
    %c122 = arith.constant 122 : index
    %519 = memref.load %arg4[%c122] : memref<135xf32, #tpu.memory_space<smem>>
    %520 = vector.broadcast %519 : f32 to vector<2x13x13xf32>
    %521 = arith.mulf %520, %502 : vector<2x13x13xf32>
    %522 = arith.addf %501, %521 : vector<2x13x13xf32>
    %523 = vector.extract_strided_slice %182 {offsets = [0, 2, 0], sizes = [2, 13, 13], strides = [1, 1, 1]} : vector<2x15x15xf32> to vector<2x13x13xf32>
    %c15_80 = arith.constant 15 : index
    %524 = memref.load %arg4[%c15_80] : memref<135xf32, #tpu.memory_space<smem>>
    %525 = vector.broadcast %524 : f32 to vector<2x13x13xf32>
    %526 = arith.mulf %525, %523 : vector<2x13x13xf32>
    %527 = arith.addf %506, %526 : vector<2x13x13xf32>
    %c42 = arith.constant 42 : index
    %528 = memref.load %arg4[%c42] : memref<135xf32, #tpu.memory_space<smem>>
    %529 = vector.broadcast %528 : f32 to vector<2x13x13xf32>
    %530 = arith.mulf %529, %523 : vector<2x13x13xf32>
    %531 = arith.addf %510, %530 : vector<2x13x13xf32>
    %c69 = arith.constant 69 : index
    %532 = memref.load %arg4[%c69] : memref<135xf32, #tpu.memory_space<smem>>
    %533 = vector.broadcast %532 : f32 to vector<2x13x13xf32>
    %534 = arith.mulf %533, %523 : vector<2x13x13xf32>
    %535 = arith.addf %514, %534 : vector<2x13x13xf32>
    %c96 = arith.constant 96 : index
    %536 = memref.load %arg4[%c96] : memref<135xf32, #tpu.memory_space<smem>>
    %537 = vector.broadcast %536 : f32 to vector<2x13x13xf32>
    %538 = arith.mulf %537, %523 : vector<2x13x13xf32>
    %539 = arith.addf %518, %538 : vector<2x13x13xf32>
    %c123 = arith.constant 123 : index
    %540 = memref.load %arg4[%c123] : memref<135xf32, #tpu.memory_space<smem>>
    %541 = vector.broadcast %540 : f32 to vector<2x13x13xf32>
    %542 = arith.mulf %541, %523 : vector<2x13x13xf32>
    %543 = arith.addf %522, %542 : vector<2x13x13xf32>
    %544 = vector.extract_strided_slice %182 {offsets = [0, 2, 1], sizes = [2, 13, 13], strides = [1, 1, 1]} : vector<2x15x15xf32> to vector<2x13x13xf32>
    %c16_81 = arith.constant 16 : index
    %545 = memref.load %arg4[%c16_81] : memref<135xf32, #tpu.memory_space<smem>>
    %546 = vector.broadcast %545 : f32 to vector<2x13x13xf32>
    %547 = arith.mulf %546, %544 : vector<2x13x13xf32>
    %548 = arith.addf %527, %547 : vector<2x13x13xf32>
    %c43 = arith.constant 43 : index
    %549 = memref.load %arg4[%c43] : memref<135xf32, #tpu.memory_space<smem>>
    %550 = vector.broadcast %549 : f32 to vector<2x13x13xf32>
    %551 = arith.mulf %550, %544 : vector<2x13x13xf32>
    %552 = arith.addf %531, %551 : vector<2x13x13xf32>
    %c70 = arith.constant 70 : index
    %553 = memref.load %arg4[%c70] : memref<135xf32, #tpu.memory_space<smem>>
    %554 = vector.broadcast %553 : f32 to vector<2x13x13xf32>
    %555 = arith.mulf %554, %544 : vector<2x13x13xf32>
    %556 = arith.addf %535, %555 : vector<2x13x13xf32>
    %c97 = arith.constant 97 : index
    %557 = memref.load %arg4[%c97] : memref<135xf32, #tpu.memory_space<smem>>
    %558 = vector.broadcast %557 : f32 to vector<2x13x13xf32>
    %559 = arith.mulf %558, %544 : vector<2x13x13xf32>
    %560 = arith.addf %539, %559 : vector<2x13x13xf32>
    %c124 = arith.constant 124 : index
    %561 = memref.load %arg4[%c124] : memref<135xf32, #tpu.memory_space<smem>>
    %562 = vector.broadcast %561 : f32 to vector<2x13x13xf32>
    %563 = arith.mulf %562, %544 : vector<2x13x13xf32>
    %564 = arith.addf %543, %563 : vector<2x13x13xf32>
    %565 = vector.extract_strided_slice %182 {offsets = [0, 2, 2], sizes = [2, 13, 13], strides = [1, 1, 1]} : vector<2x15x15xf32> to vector<2x13x13xf32>
    %c17_82 = arith.constant 17 : index
    %566 = memref.load %arg4[%c17_82] : memref<135xf32, #tpu.memory_space<smem>>
    %567 = vector.broadcast %566 : f32 to vector<2x13x13xf32>
    %568 = arith.mulf %567, %565 : vector<2x13x13xf32>
    %569 = arith.addf %548, %568 : vector<2x13x13xf32>
    %c44 = arith.constant 44 : index
    %570 = memref.load %arg4[%c44] : memref<135xf32, #tpu.memory_space<smem>>
    %571 = vector.broadcast %570 : f32 to vector<2x13x13xf32>
    %572 = arith.mulf %571, %565 : vector<2x13x13xf32>
    %573 = arith.addf %552, %572 : vector<2x13x13xf32>
    %c71 = arith.constant 71 : index
    %574 = memref.load %arg4[%c71] : memref<135xf32, #tpu.memory_space<smem>>
    %575 = vector.broadcast %574 : f32 to vector<2x13x13xf32>
    %576 = arith.mulf %575, %565 : vector<2x13x13xf32>
    %577 = arith.addf %556, %576 : vector<2x13x13xf32>
    %c98 = arith.constant 98 : index
    %578 = memref.load %arg4[%c98] : memref<135xf32, #tpu.memory_space<smem>>
    %579 = vector.broadcast %578 : f32 to vector<2x13x13xf32>
    %580 = arith.mulf %579, %565 : vector<2x13x13xf32>
    %581 = arith.addf %560, %580 : vector<2x13x13xf32>
    %c125 = arith.constant 125 : index
    %582 = memref.load %arg4[%c125] : memref<135xf32, #tpu.memory_space<smem>>
    %583 = vector.broadcast %582 : f32 to vector<2x13x13xf32>
    %584 = arith.mulf %583, %565 : vector<2x13x13xf32>
    %585 = arith.addf %564, %584 : vector<2x13x13xf32>
    %586 = vector.extract_strided_slice %212 {offsets = [0, 0, 0], sizes = [2, 13, 13], strides = [1, 1, 1]} : vector<2x15x15xf32> to vector<2x13x13xf32>
    %c18_83 = arith.constant 18 : index
    %587 = memref.load %arg4[%c18_83] : memref<135xf32, #tpu.memory_space<smem>>
    %588 = vector.broadcast %587 : f32 to vector<2x13x13xf32>
    %589 = arith.mulf %588, %586 : vector<2x13x13xf32>
    %590 = arith.addf %569, %589 : vector<2x13x13xf32>
    %c45 = arith.constant 45 : index
    %591 = memref.load %arg4[%c45] : memref<135xf32, #tpu.memory_space<smem>>
    %592 = vector.broadcast %591 : f32 to vector<2x13x13xf32>
    %593 = arith.mulf %592, %586 : vector<2x13x13xf32>
    %594 = arith.addf %573, %593 : vector<2x13x13xf32>
    %c72 = arith.constant 72 : index
    %595 = memref.load %arg4[%c72] : memref<135xf32, #tpu.memory_space<smem>>
    %596 = vector.broadcast %595 : f32 to vector<2x13x13xf32>
    %597 = arith.mulf %596, %586 : vector<2x13x13xf32>
    %598 = arith.addf %577, %597 : vector<2x13x13xf32>
    %c99 = arith.constant 99 : index
    %599 = memref.load %arg4[%c99] : memref<135xf32, #tpu.memory_space<smem>>
    %600 = vector.broadcast %599 : f32 to vector<2x13x13xf32>
    %601 = arith.mulf %600, %586 : vector<2x13x13xf32>
    %602 = arith.addf %581, %601 : vector<2x13x13xf32>
    %c126 = arith.constant 126 : index
    %603 = memref.load %arg4[%c126] : memref<135xf32, #tpu.memory_space<smem>>
    %604 = vector.broadcast %603 : f32 to vector<2x13x13xf32>
    %605 = arith.mulf %604, %586 : vector<2x13x13xf32>
    %606 = arith.addf %585, %605 : vector<2x13x13xf32>
    %607 = vector.extract_strided_slice %212 {offsets = [0, 0, 1], sizes = [2, 13, 13], strides = [1, 1, 1]} : vector<2x15x15xf32> to vector<2x13x13xf32>
    %c19_84 = arith.constant 19 : index
    %608 = memref.load %arg4[%c19_84] : memref<135xf32, #tpu.memory_space<smem>>
    %609 = vector.broadcast %608 : f32 to vector<2x13x13xf32>
    %610 = arith.mulf %609, %607 : vector<2x13x13xf32>
    %611 = arith.addf %590, %610 : vector<2x13x13xf32>
    %c46 = arith.constant 46 : index
    %612 = memref.load %arg4[%c46] : memref<135xf32, #tpu.memory_space<smem>>
    %613 = vector.broadcast %612 : f32 to vector<2x13x13xf32>
    %614 = arith.mulf %613, %607 : vector<2x13x13xf32>
    %615 = arith.addf %594, %614 : vector<2x13x13xf32>
    %c73 = arith.constant 73 : index
    %616 = memref.load %arg4[%c73] : memref<135xf32, #tpu.memory_space<smem>>
    %617 = vector.broadcast %616 : f32 to vector<2x13x13xf32>
    %618 = arith.mulf %617, %607 : vector<2x13x13xf32>
    %619 = arith.addf %598, %618 : vector<2x13x13xf32>
    %c100 = arith.constant 100 : index
    %620 = memref.load %arg4[%c100] : memref<135xf32, #tpu.memory_space<smem>>
    %621 = vector.broadcast %620 : f32 to vector<2x13x13xf32>
    %622 = arith.mulf %621, %607 : vector<2x13x13xf32>
    %623 = arith.addf %602, %622 : vector<2x13x13xf32>
    %c127 = arith.constant 127 : index
    %624 = memref.load %arg4[%c127] : memref<135xf32, #tpu.memory_space<smem>>
    %625 = vector.broadcast %624 : f32 to vector<2x13x13xf32>
    %626 = arith.mulf %625, %607 : vector<2x13x13xf32>
    %627 = arith.addf %606, %626 : vector<2x13x13xf32>
    %628 = vector.extract_strided_slice %212 {offsets = [0, 0, 2], sizes = [2, 13, 13], strides = [1, 1, 1]} : vector<2x15x15xf32> to vector<2x13x13xf32>
    %c20_85 = arith.constant 20 : index
    %629 = memref.load %arg4[%c20_85] : memref<135xf32, #tpu.memory_space<smem>>
    %630 = vector.broadcast %629 : f32 to vector<2x13x13xf32>
    %631 = arith.mulf %630, %628 : vector<2x13x13xf32>
    %632 = arith.addf %611, %631 : vector<2x13x13xf32>
    %c47 = arith.constant 47 : index
    %633 = memref.load %arg4[%c47] : memref<135xf32, #tpu.memory_space<smem>>
    %634 = vector.broadcast %633 : f32 to vector<2x13x13xf32>
    %635 = arith.mulf %634, %628 : vector<2x13x13xf32>
    %636 = arith.addf %615, %635 : vector<2x13x13xf32>
    %c74 = arith.constant 74 : index
    %637 = memref.load %arg4[%c74] : memref<135xf32, #tpu.memory_space<smem>>
    %638 = vector.broadcast %637 : f32 to vector<2x13x13xf32>
    %639 = arith.mulf %638, %628 : vector<2x13x13xf32>
    %640 = arith.addf %619, %639 : vector<2x13x13xf32>
    %c101 = arith.constant 101 : index
    %641 = memref.load %arg4[%c101] : memref<135xf32, #tpu.memory_space<smem>>
    %642 = vector.broadcast %641 : f32 to vector<2x13x13xf32>
    %643 = arith.mulf %642, %628 : vector<2x13x13xf32>
    %644 = arith.addf %623, %643 : vector<2x13x13xf32>
    %c128 = arith.constant 128 : index
    %645 = memref.load %arg4[%c128] : memref<135xf32, #tpu.memory_space<smem>>
    %646 = vector.broadcast %645 : f32 to vector<2x13x13xf32>
    %647 = arith.mulf %646, %628 : vector<2x13x13xf32>
    %648 = arith.addf %627, %647 : vector<2x13x13xf32>
    %649 = vector.extract_strided_slice %212 {offsets = [0, 1, 0], sizes = [2, 13, 13], strides = [1, 1, 1]} : vector<2x15x15xf32> to vector<2x13x13xf32>
    %c21_86 = arith.constant 21 : index
    %650 = memref.load %arg4[%c21_86] : memref<135xf32, #tpu.memory_space<smem>>
    %651 = vector.broadcast %650 : f32 to vector<2x13x13xf32>
    %652 = arith.mulf %651, %649 : vector<2x13x13xf32>
    %653 = arith.addf %632, %652 : vector<2x13x13xf32>
    %c48 = arith.constant 48 : index
    %654 = memref.load %arg4[%c48] : memref<135xf32, #tpu.memory_space<smem>>
    %655 = vector.broadcast %654 : f32 to vector<2x13x13xf32>
    %656 = arith.mulf %655, %649 : vector<2x13x13xf32>
    %657 = arith.addf %636, %656 : vector<2x13x13xf32>
    %c75 = arith.constant 75 : index
    %658 = memref.load %arg4[%c75] : memref<135xf32, #tpu.memory_space<smem>>
    %659 = vector.broadcast %658 : f32 to vector<2x13x13xf32>
    %660 = arith.mulf %659, %649 : vector<2x13x13xf32>
    %661 = arith.addf %640, %660 : vector<2x13x13xf32>
    %c102 = arith.constant 102 : index
    %662 = memref.load %arg4[%c102] : memref<135xf32, #tpu.memory_space<smem>>
    %663 = vector.broadcast %662 : f32 to vector<2x13x13xf32>
    %664 = arith.mulf %663, %649 : vector<2x13x13xf32>
    %665 = arith.addf %644, %664 : vector<2x13x13xf32>
    %c129 = arith.constant 129 : index
    %666 = memref.load %arg4[%c129] : memref<135xf32, #tpu.memory_space<smem>>
    %667 = vector.broadcast %666 : f32 to vector<2x13x13xf32>
    %668 = arith.mulf %667, %649 : vector<2x13x13xf32>
    %669 = arith.addf %648, %668 : vector<2x13x13xf32>
    %670 = vector.extract_strided_slice %212 {offsets = [0, 1, 1], sizes = [2, 13, 13], strides = [1, 1, 1]} : vector<2x15x15xf32> to vector<2x13x13xf32>
    %c22_87 = arith.constant 22 : index
    %671 = memref.load %arg4[%c22_87] : memref<135xf32, #tpu.memory_space<smem>>
    %672 = vector.broadcast %671 : f32 to vector<2x13x13xf32>
    %673 = arith.mulf %672, %670 : vector<2x13x13xf32>
    %674 = arith.addf %653, %673 : vector<2x13x13xf32>
    %c49 = arith.constant 49 : index
    %675 = memref.load %arg4[%c49] : memref<135xf32, #tpu.memory_space<smem>>
    %676 = vector.broadcast %675 : f32 to vector<2x13x13xf32>
    %677 = arith.mulf %676, %670 : vector<2x13x13xf32>
    %678 = arith.addf %657, %677 : vector<2x13x13xf32>
    %c76 = arith.constant 76 : index
    %679 = memref.load %arg4[%c76] : memref<135xf32, #tpu.memory_space<smem>>
    %680 = vector.broadcast %679 : f32 to vector<2x13x13xf32>
    %681 = arith.mulf %680, %670 : vector<2x13x13xf32>
    %682 = arith.addf %661, %681 : vector<2x13x13xf32>
    %c103 = arith.constant 103 : index
    %683 = memref.load %arg4[%c103] : memref<135xf32, #tpu.memory_space<smem>>
    %684 = vector.broadcast %683 : f32 to vector<2x13x13xf32>
    %685 = arith.mulf %684, %670 : vector<2x13x13xf32>
    %686 = arith.addf %665, %685 : vector<2x13x13xf32>
    %c130 = arith.constant 130 : index
    %687 = memref.load %arg4[%c130] : memref<135xf32, #tpu.memory_space<smem>>
    %688 = vector.broadcast %687 : f32 to vector<2x13x13xf32>
    %689 = arith.mulf %688, %670 : vector<2x13x13xf32>
    %690 = arith.addf %669, %689 : vector<2x13x13xf32>
    %691 = vector.extract_strided_slice %212 {offsets = [0, 1, 2], sizes = [2, 13, 13], strides = [1, 1, 1]} : vector<2x15x15xf32> to vector<2x13x13xf32>
    %c23_88 = arith.constant 23 : index
    %692 = memref.load %arg4[%c23_88] : memref<135xf32, #tpu.memory_space<smem>>
    %693 = vector.broadcast %692 : f32 to vector<2x13x13xf32>
    %694 = arith.mulf %693, %691 : vector<2x13x13xf32>
    %695 = arith.addf %674, %694 : vector<2x13x13xf32>
    %c50 = arith.constant 50 : index
    %696 = memref.load %arg4[%c50] : memref<135xf32, #tpu.memory_space<smem>>
    %697 = vector.broadcast %696 : f32 to vector<2x13x13xf32>
    %698 = arith.mulf %697, %691 : vector<2x13x13xf32>
    %699 = arith.addf %678, %698 : vector<2x13x13xf32>
    %c77 = arith.constant 77 : index
    %700 = memref.load %arg4[%c77] : memref<135xf32, #tpu.memory_space<smem>>
    %701 = vector.broadcast %700 : f32 to vector<2x13x13xf32>
    %702 = arith.mulf %701, %691 : vector<2x13x13xf32>
    %703 = arith.addf %682, %702 : vector<2x13x13xf32>
    %c104 = arith.constant 104 : index
    %704 = memref.load %arg4[%c104] : memref<135xf32, #tpu.memory_space<smem>>
    %705 = vector.broadcast %704 : f32 to vector<2x13x13xf32>
    %706 = arith.mulf %705, %691 : vector<2x13x13xf32>
    %707 = arith.addf %686, %706 : vector<2x13x13xf32>
    %c131 = arith.constant 131 : index
    %708 = memref.load %arg4[%c131] : memref<135xf32, #tpu.memory_space<smem>>
    %709 = vector.broadcast %708 : f32 to vector<2x13x13xf32>
    %710 = arith.mulf %709, %691 : vector<2x13x13xf32>
    %711 = arith.addf %690, %710 : vector<2x13x13xf32>
    %712 = vector.extract_strided_slice %212 {offsets = [0, 2, 0], sizes = [2, 13, 13], strides = [1, 1, 1]} : vector<2x15x15xf32> to vector<2x13x13xf32>
    %c24_89 = arith.constant 24 : index
    %713 = memref.load %arg4[%c24_89] : memref<135xf32, #tpu.memory_space<smem>>
    %714 = vector.broadcast %713 : f32 to vector<2x13x13xf32>
    %715 = arith.mulf %714, %712 : vector<2x13x13xf32>
    %716 = arith.addf %695, %715 : vector<2x13x13xf32>
    %c51 = arith.constant 51 : index
    %717 = memref.load %arg4[%c51] : memref<135xf32, #tpu.memory_space<smem>>
    %718 = vector.broadcast %717 : f32 to vector<2x13x13xf32>
    %719 = arith.mulf %718, %712 : vector<2x13x13xf32>
    %720 = arith.addf %699, %719 : vector<2x13x13xf32>
    %c78 = arith.constant 78 : index
    %721 = memref.load %arg4[%c78] : memref<135xf32, #tpu.memory_space<smem>>
    %722 = vector.broadcast %721 : f32 to vector<2x13x13xf32>
    %723 = arith.mulf %722, %712 : vector<2x13x13xf32>
    %724 = arith.addf %703, %723 : vector<2x13x13xf32>
    %c105 = arith.constant 105 : index
    %725 = memref.load %arg4[%c105] : memref<135xf32, #tpu.memory_space<smem>>
    %726 = vector.broadcast %725 : f32 to vector<2x13x13xf32>
    %727 = arith.mulf %726, %712 : vector<2x13x13xf32>
    %728 = arith.addf %707, %727 : vector<2x13x13xf32>
    %c132 = arith.constant 132 : index
    %729 = memref.load %arg4[%c132] : memref<135xf32, #tpu.memory_space<smem>>
    %730 = vector.broadcast %729 : f32 to vector<2x13x13xf32>
    %731 = arith.mulf %730, %712 : vector<2x13x13xf32>
    %732 = arith.addf %711, %731 : vector<2x13x13xf32>
    %733 = vector.extract_strided_slice %212 {offsets = [0, 2, 1], sizes = [2, 13, 13], strides = [1, 1, 1]} : vector<2x15x15xf32> to vector<2x13x13xf32>
    %c25_90 = arith.constant 25 : index
    %734 = memref.load %arg4[%c25_90] : memref<135xf32, #tpu.memory_space<smem>>
    %735 = vector.broadcast %734 : f32 to vector<2x13x13xf32>
    %736 = arith.mulf %735, %733 : vector<2x13x13xf32>
    %737 = arith.addf %716, %736 : vector<2x13x13xf32>
    %c52 = arith.constant 52 : index
    %738 = memref.load %arg4[%c52] : memref<135xf32, #tpu.memory_space<smem>>
    %739 = vector.broadcast %738 : f32 to vector<2x13x13xf32>
    %740 = arith.mulf %739, %733 : vector<2x13x13xf32>
    %741 = arith.addf %720, %740 : vector<2x13x13xf32>
    %c79 = arith.constant 79 : index
    %742 = memref.load %arg4[%c79] : memref<135xf32, #tpu.memory_space<smem>>
    %743 = vector.broadcast %742 : f32 to vector<2x13x13xf32>
    %744 = arith.mulf %743, %733 : vector<2x13x13xf32>
    %745 = arith.addf %724, %744 : vector<2x13x13xf32>
    %c106 = arith.constant 106 : index
    %746 = memref.load %arg4[%c106] : memref<135xf32, #tpu.memory_space<smem>>
    %747 = vector.broadcast %746 : f32 to vector<2x13x13xf32>
    %748 = arith.mulf %747, %733 : vector<2x13x13xf32>
    %749 = arith.addf %728, %748 : vector<2x13x13xf32>
    %c133 = arith.constant 133 : index
    %750 = memref.load %arg4[%c133] : memref<135xf32, #tpu.memory_space<smem>>
    %751 = vector.broadcast %750 : f32 to vector<2x13x13xf32>
    %752 = arith.mulf %751, %733 : vector<2x13x13xf32>
    %753 = arith.addf %732, %752 : vector<2x13x13xf32>
    %754 = vector.extract_strided_slice %212 {offsets = [0, 2, 2], sizes = [2, 13, 13], strides = [1, 1, 1]} : vector<2x15x15xf32> to vector<2x13x13xf32>
    %c26_91 = arith.constant 26 : index
    %755 = memref.load %arg4[%c26_91] : memref<135xf32, #tpu.memory_space<smem>>
    %756 = vector.broadcast %755 : f32 to vector<2x13x13xf32>
    %757 = arith.mulf %756, %754 : vector<2x13x13xf32>
    %758 = arith.addf %737, %757 : vector<2x13x13xf32>
    %c53 = arith.constant 53 : index
    %759 = memref.load %arg4[%c53] : memref<135xf32, #tpu.memory_space<smem>>
    %760 = vector.broadcast %759 : f32 to vector<2x13x13xf32>
    %761 = arith.mulf %760, %754 : vector<2x13x13xf32>
    %762 = arith.addf %741, %761 : vector<2x13x13xf32>
    %c80 = arith.constant 80 : index
    %763 = memref.load %arg4[%c80] : memref<135xf32, #tpu.memory_space<smem>>
    %764 = vector.broadcast %763 : f32 to vector<2x13x13xf32>
    %765 = arith.mulf %764, %754 : vector<2x13x13xf32>
    %766 = arith.addf %745, %765 : vector<2x13x13xf32>
    %c107 = arith.constant 107 : index
    %767 = memref.load %arg4[%c107] : memref<135xf32, #tpu.memory_space<smem>>
    %768 = vector.broadcast %767 : f32 to vector<2x13x13xf32>
    %769 = arith.mulf %768, %754 : vector<2x13x13xf32>
    %770 = arith.addf %749, %769 : vector<2x13x13xf32>
    %c134 = arith.constant 134 : index
    %771 = memref.load %arg4[%c134] : memref<135xf32, #tpu.memory_space<smem>>
    %772 = vector.broadcast %771 : f32 to vector<2x13x13xf32>
    %773 = arith.mulf %772, %754 : vector<2x13x13xf32>
    %774 = arith.addf %753, %773 : vector<2x13x13xf32>
    %775 = vector.shape_cast %758 : vector<2x13x13xf32> to vector<1x2x13x13xf32>
    %cst_92 = arith.constant dense<0.000000e+00> : vector<1xf32>
    %776 = vector.multi_reduction <add>, %775, %cst_92 [1, 2, 3] : vector<1x2x13x13xf32> to vector<1xf32>
    %777 = vector.shape_cast %776 : vector<1xf32> to vector<1x1x1x1xf32>
    %778 = vector.extract %777[0, 0, 0, 0] : f32 from vector<1x1x1x1xf32>
    %779 = arith.mulf %758, %758 : vector<2x13x13xf32>
    %780 = vector.shape_cast %779 : vector<2x13x13xf32> to vector<1x2x13x13xf32>
    %cst_93 = arith.constant dense<0.000000e+00> : vector<1xf32>
    %781 = vector.multi_reduction <add>, %780, %cst_93 [1, 2, 3] : vector<1x2x13x13xf32> to vector<1xf32>
    %782 = vector.shape_cast %781 : vector<1xf32> to vector<1x1x1x1xf32>
    %783 = vector.extract %782[0, 0, 0, 0] : f32 from vector<1x1x1x1xf32>
    %cst_94 = arith.constant 2.958580e-03 : f32
    %784 = arith.mulf %778, %cst_94 : f32
    %cst_95 = arith.constant 2.958580e-03 : f32
    %785 = arith.mulf %783, %cst_95 : f32
    %786 = arith.mulf %784, %784 : f32
    %787 = arith.subf %785, %786 : f32
    %cst_96 = arith.constant 0.000000e+00 : f32
    %788 = arith.maximumf %787, %cst_96 : f32
    %cst_97 = arith.constant 9.99999974E-6 : f32
    %789 = arith.addf %788, %cst_97 : f32
    %790 = math.rsqrt %789 : f32
    %c0_98 = arith.constant 0 : index
    %791 = memref.load %arg5[%c0_98] : memref<5xf32, #tpu.memory_space<smem>>
    %792 = arith.mulf %790, %791 : f32
    %c0_99 = arith.constant 0 : index
    %793 = memref.load %arg6[%c0_99] : memref<5xf32, #tpu.memory_space<smem>>
    %794 = arith.mulf %784, %792 : f32
    %795 = arith.subf %793, %794 : f32
    %796 = vector.broadcast %792 : f32 to vector<2x13x13xf32>
    %797 = arith.mulf %758, %796 : vector<2x13x13xf32>
    %798 = vector.broadcast %795 : f32 to vector<2x13x13xf32>
    %799 = arith.addf %797, %798 : vector<2x13x13xf32>
    %cst_100 = arith.constant 0.000000e+00 : f32
    %800 = vector.broadcast %cst_100 : f32 to vector<2x13x13xf32>
    %801 = arith.cmpf oge, %799, %800 : vector<2x13x13xf32>
    %cst_101 = arith.constant 0.00999999977 : f32
    %802 = vector.broadcast %cst_101 : f32 to vector<2x13x13xf32>
    %803 = arith.mulf %802, %799 : vector<2x13x13xf32>
    %804 = arith.select %801, %799, %803 : vector<2x13x13xi1>, vector<2x13x13xf32>
    %c0_102 = arith.constant 0 : index
    %c0_103 = arith.constant 0 : index
    %c0_104 = arith.constant 0 : index
    %c0_105 = arith.constant 0 : index
    %805 = vector.load %arg7[%c0_102, %c0_103, %c0_104, %c0_105] : memref<5x5x13x13xf32, #tpu.memory_space<vmem>>, vector<1x1x13x13xf32>
    %806 = vector.shape_cast %805 : vector<1x1x13x13xf32> to vector<13x13xf32>
    %807 = vector.shape_cast %806 : vector<13x13xf32> to vector<1x13x13xf32>
    %808 = vector.broadcast %807 : vector<1x13x13xf32> to vector<2x13x13xf32>
    %809 = arith.mulf %804, %808 : vector<2x13x13xf32>
    %cst_106 = arith.constant dense<0.000000e+00> : vector<2x13xf32>
    %810 = vector.multi_reduction <add>, %809, %cst_106 [2] : vector<2x13x13xf32> to vector<2x13xf32>
    %cst_107 = arith.constant dense<0.000000e+00> : vector<2xf32>
    %811 = vector.multi_reduction <add>, %810, %cst_107 [1] : vector<2x13xf32> to vector<2xf32>
    %812 = vector.shape_cast %811 : vector<2xf32> to vector<2x1xf32>
    %c0_108 = arith.constant 0 : index
    %c1_109 = arith.constant 1 : index
    %c0_110 = arith.constant 0 : index
    %c0_111 = arith.constant 0 : index
    %813 = vector.load %arg7[%c0_108, %c1_109, %c0_110, %c0_111] : memref<5x5x13x13xf32, #tpu.memory_space<vmem>>, vector<1x1x13x13xf32>
    %814 = vector.shape_cast %813 : vector<1x1x13x13xf32> to vector<13x13xf32>
    %815 = vector.shape_cast %814 : vector<13x13xf32> to vector<1x13x13xf32>
    %816 = vector.broadcast %815 : vector<1x13x13xf32> to vector<2x13x13xf32>
    %817 = arith.mulf %804, %816 : vector<2x13x13xf32>
    %cst_112 = arith.constant dense<0.000000e+00> : vector<2x13xf32>
    %818 = vector.multi_reduction <add>, %817, %cst_112 [2] : vector<2x13x13xf32> to vector<2x13xf32>
    %cst_113 = arith.constant dense<0.000000e+00> : vector<2xf32>
    %819 = vector.multi_reduction <add>, %818, %cst_113 [1] : vector<2x13xf32> to vector<2xf32>
    %820 = vector.shape_cast %819 : vector<2xf32> to vector<2x1xf32>
    %c0_114 = arith.constant 0 : index
    %c2_115 = arith.constant 2 : index
    %c0_116 = arith.constant 0 : index
    %c0_117 = arith.constant 0 : index
    %821 = vector.load %arg7[%c0_114, %c2_115, %c0_116, %c0_117] : memref<5x5x13x13xf32, #tpu.memory_space<vmem>>, vector<1x1x13x13xf32>
    %822 = vector.shape_cast %821 : vector<1x1x13x13xf32> to vector<13x13xf32>
    %823 = vector.shape_cast %822 : vector<13x13xf32> to vector<1x13x13xf32>
    %824 = vector.broadcast %823 : vector<1x13x13xf32> to vector<2x13x13xf32>
    %825 = arith.mulf %804, %824 : vector<2x13x13xf32>
    %cst_118 = arith.constant dense<0.000000e+00> : vector<2x13xf32>
    %826 = vector.multi_reduction <add>, %825, %cst_118 [2] : vector<2x13x13xf32> to vector<2x13xf32>
    %cst_119 = arith.constant dense<0.000000e+00> : vector<2xf32>
    %827 = vector.multi_reduction <add>, %826, %cst_119 [1] : vector<2x13xf32> to vector<2xf32>
    %828 = vector.shape_cast %827 : vector<2xf32> to vector<2x1xf32>
    %c0_120 = arith.constant 0 : index
    %c3_121 = arith.constant 3 : index
    %c0_122 = arith.constant 0 : index
    %c0_123 = arith.constant 0 : index
    %829 = vector.load %arg7[%c0_120, %c3_121, %c0_122, %c0_123] : memref<5x5x13x13xf32, #tpu.memory_space<vmem>>, vector<1x1x13x13xf32>
    %830 = vector.shape_cast %829 : vector<1x1x13x13xf32> to vector<13x13xf32>
    %831 = vector.shape_cast %830 : vector<13x13xf32> to vector<1x13x13xf32>
    %832 = vector.broadcast %831 : vector<1x13x13xf32> to vector<2x13x13xf32>
    %833 = arith.mulf %804, %832 : vector<2x13x13xf32>
    %cst_124 = arith.constant dense<0.000000e+00> : vector<2x13xf32>
    %834 = vector.multi_reduction <add>, %833, %cst_124 [2] : vector<2x13x13xf32> to vector<2x13xf32>
    %cst_125 = arith.constant dense<0.000000e+00> : vector<2xf32>
    %835 = vector.multi_reduction <add>, %834, %cst_125 [1] : vector<2x13xf32> to vector<2xf32>
    %836 = vector.shape_cast %835 : vector<2xf32> to vector<2x1xf32>
    %c0_126 = arith.constant 0 : index
    %c4_127 = arith.constant 4 : index
    %c0_128 = arith.constant 0 : index
    %c0_129 = arith.constant 0 : index
    %837 = vector.load %arg7[%c0_126, %c4_127, %c0_128, %c0_129] : memref<5x5x13x13xf32, #tpu.memory_space<vmem>>, vector<1x1x13x13xf32>
    %838 = vector.shape_cast %837 : vector<1x1x13x13xf32> to vector<13x13xf32>
    %839 = vector.shape_cast %838 : vector<13x13xf32> to vector<1x13x13xf32>
    %840 = vector.broadcast %839 : vector<1x13x13xf32> to vector<2x13x13xf32>
    %841 = arith.mulf %804, %840 : vector<2x13x13xf32>
    %cst_130 = arith.constant dense<0.000000e+00> : vector<2x13xf32>
    %842 = vector.multi_reduction <add>, %841, %cst_130 [2] : vector<2x13x13xf32> to vector<2x13xf32>
    %cst_131 = arith.constant dense<0.000000e+00> : vector<2xf32>
    %843 = vector.multi_reduction <add>, %842, %cst_131 [1] : vector<2x13xf32> to vector<2xf32>
    %844 = vector.shape_cast %843 : vector<2xf32> to vector<2x1xf32>
    %845 = vector.shape_cast %762 : vector<2x13x13xf32> to vector<1x2x13x13xf32>
    %cst_132 = arith.constant dense<0.000000e+00> : vector<1xf32>
    %846 = vector.multi_reduction <add>, %845, %cst_132 [1, 2, 3] : vector<1x2x13x13xf32> to vector<1xf32>
    %847 = vector.shape_cast %846 : vector<1xf32> to vector<1x1x1x1xf32>
    %848 = vector.extract %847[0, 0, 0, 0] : f32 from vector<1x1x1x1xf32>
    %849 = arith.mulf %762, %762 : vector<2x13x13xf32>
    %850 = vector.shape_cast %849 : vector<2x13x13xf32> to vector<1x2x13x13xf32>
    %cst_133 = arith.constant dense<0.000000e+00> : vector<1xf32>
    %851 = vector.multi_reduction <add>, %850, %cst_133 [1, 2, 3] : vector<1x2x13x13xf32> to vector<1xf32>
    %852 = vector.shape_cast %851 : vector<1xf32> to vector<1x1x1x1xf32>
    %853 = vector.extract %852[0, 0, 0, 0] : f32 from vector<1x1x1x1xf32>
    %cst_134 = arith.constant 2.958580e-03 : f32
    %854 = arith.mulf %848, %cst_134 : f32
    %cst_135 = arith.constant 2.958580e-03 : f32
    %855 = arith.mulf %853, %cst_135 : f32
    %856 = arith.mulf %854, %854 : f32
    %857 = arith.subf %855, %856 : f32
    %cst_136 = arith.constant 0.000000e+00 : f32
    %858 = arith.maximumf %857, %cst_136 : f32
    %cst_137 = arith.constant 9.99999974E-6 : f32
    %859 = arith.addf %858, %cst_137 : f32
    %860 = math.rsqrt %859 : f32
    %c1_138 = arith.constant 1 : index
    %861 = memref.load %arg5[%c1_138] : memref<5xf32, #tpu.memory_space<smem>>
    %862 = arith.mulf %860, %861 : f32
    %c1_139 = arith.constant 1 : index
    %863 = memref.load %arg6[%c1_139] : memref<5xf32, #tpu.memory_space<smem>>
    %864 = arith.mulf %854, %862 : f32
    %865 = arith.subf %863, %864 : f32
    %866 = vector.broadcast %862 : f32 to vector<2x13x13xf32>
    %867 = arith.mulf %762, %866 : vector<2x13x13xf32>
    %868 = vector.broadcast %865 : f32 to vector<2x13x13xf32>
    %869 = arith.addf %867, %868 : vector<2x13x13xf32>
    %cst_140 = arith.constant 0.000000e+00 : f32
    %870 = vector.broadcast %cst_140 : f32 to vector<2x13x13xf32>
    %871 = arith.cmpf oge, %869, %870 : vector<2x13x13xf32>
    %cst_141 = arith.constant 0.00999999977 : f32
    %872 = vector.broadcast %cst_141 : f32 to vector<2x13x13xf32>
    %873 = arith.mulf %872, %869 : vector<2x13x13xf32>
    %874 = arith.select %871, %869, %873 : vector<2x13x13xi1>, vector<2x13x13xf32>
    %c1_142 = arith.constant 1 : index
    %c0_143 = arith.constant 0 : index
    %c0_144 = arith.constant 0 : index
    %c0_145 = arith.constant 0 : index
    %875 = vector.load %arg7[%c1_142, %c0_143, %c0_144, %c0_145] : memref<5x5x13x13xf32, #tpu.memory_space<vmem>>, vector<1x1x13x13xf32>
    %876 = vector.shape_cast %875 : vector<1x1x13x13xf32> to vector<13x13xf32>
    %877 = vector.shape_cast %876 : vector<13x13xf32> to vector<1x13x13xf32>
    %878 = vector.broadcast %877 : vector<1x13x13xf32> to vector<2x13x13xf32>
    %879 = arith.mulf %874, %878 : vector<2x13x13xf32>
    %cst_146 = arith.constant dense<0.000000e+00> : vector<2x13xf32>
    %880 = vector.multi_reduction <add>, %879, %cst_146 [2] : vector<2x13x13xf32> to vector<2x13xf32>
    %cst_147 = arith.constant dense<0.000000e+00> : vector<2xf32>
    %881 = vector.multi_reduction <add>, %880, %cst_147 [1] : vector<2x13xf32> to vector<2xf32>
    %882 = vector.shape_cast %881 : vector<2xf32> to vector<2x1xf32>
    %883 = arith.addf %812, %882 : vector<2x1xf32>
    %c1_148 = arith.constant 1 : index
    %c1_149 = arith.constant 1 : index
    %c0_150 = arith.constant 0 : index
    %c0_151 = arith.constant 0 : index
    %884 = vector.load %arg7[%c1_148, %c1_149, %c0_150, %c0_151] : memref<5x5x13x13xf32, #tpu.memory_space<vmem>>, vector<1x1x13x13xf32>
    %885 = vector.shape_cast %884 : vector<1x1x13x13xf32> to vector<13x13xf32>
    %886 = vector.shape_cast %885 : vector<13x13xf32> to vector<1x13x13xf32>
    %887 = vector.broadcast %886 : vector<1x13x13xf32> to vector<2x13x13xf32>
    %888 = arith.mulf %874, %887 : vector<2x13x13xf32>
    %cst_152 = arith.constant dense<0.000000e+00> : vector<2x13xf32>
    %889 = vector.multi_reduction <add>, %888, %cst_152 [2] : vector<2x13x13xf32> to vector<2x13xf32>
    %cst_153 = arith.constant dense<0.000000e+00> : vector<2xf32>
    %890 = vector.multi_reduction <add>, %889, %cst_153 [1] : vector<2x13xf32> to vector<2xf32>
    %891 = vector.shape_cast %890 : vector<2xf32> to vector<2x1xf32>
    %892 = arith.addf %820, %891 : vector<2x1xf32>
    %c1_154 = arith.constant 1 : index
    %c2_155 = arith.constant 2 : index
    %c0_156 = arith.constant 0 : index
    %c0_157 = arith.constant 0 : index
    %893 = vector.load %arg7[%c1_154, %c2_155, %c0_156, %c0_157] : memref<5x5x13x13xf32, #tpu.memory_space<vmem>>, vector<1x1x13x13xf32>
    %894 = vector.shape_cast %893 : vector<1x1x13x13xf32> to vector<13x13xf32>
    %895 = vector.shape_cast %894 : vector<13x13xf32> to vector<1x13x13xf32>
    %896 = vector.broadcast %895 : vector<1x13x13xf32> to vector<2x13x13xf32>
    %897 = arith.mulf %874, %896 : vector<2x13x13xf32>
    %cst_158 = arith.constant dense<0.000000e+00> : vector<2x13xf32>
    %898 = vector.multi_reduction <add>, %897, %cst_158 [2] : vector<2x13x13xf32> to vector<2x13xf32>
    %cst_159 = arith.constant dense<0.000000e+00> : vector<2xf32>
    %899 = vector.multi_reduction <add>, %898, %cst_159 [1] : vector<2x13xf32> to vector<2xf32>
    %900 = vector.shape_cast %899 : vector<2xf32> to vector<2x1xf32>
    %901 = arith.addf %828, %900 : vector<2x1xf32>
    %c1_160 = arith.constant 1 : index
    %c3_161 = arith.constant 3 : index
    %c0_162 = arith.constant 0 : index
    %c0_163 = arith.constant 0 : index
    %902 = vector.load %arg7[%c1_160, %c3_161, %c0_162, %c0_163] : memref<5x5x13x13xf32, #tpu.memory_space<vmem>>, vector<1x1x13x13xf32>
    %903 = vector.shape_cast %902 : vector<1x1x13x13xf32> to vector<13x13xf32>
    %904 = vector.shape_cast %903 : vector<13x13xf32> to vector<1x13x13xf32>
    %905 = vector.broadcast %904 : vector<1x13x13xf32> to vector<2x13x13xf32>
    %906 = arith.mulf %874, %905 : vector<2x13x13xf32>
    %cst_164 = arith.constant dense<0.000000e+00> : vector<2x13xf32>
    %907 = vector.multi_reduction <add>, %906, %cst_164 [2] : vector<2x13x13xf32> to vector<2x13xf32>
    %cst_165 = arith.constant dense<0.000000e+00> : vector<2xf32>
    %908 = vector.multi_reduction <add>, %907, %cst_165 [1] : vector<2x13xf32> to vector<2xf32>
    %909 = vector.shape_cast %908 : vector<2xf32> to vector<2x1xf32>
    %910 = arith.addf %836, %909 : vector<2x1xf32>
    %c1_166 = arith.constant 1 : index
    %c4_167 = arith.constant 4 : index
    %c0_168 = arith.constant 0 : index
    %c0_169 = arith.constant 0 : index
    %911 = vector.load %arg7[%c1_166, %c4_167, %c0_168, %c0_169] : memref<5x5x13x13xf32, #tpu.memory_space<vmem>>, vector<1x1x13x13xf32>
    %912 = vector.shape_cast %911 : vector<1x1x13x13xf32> to vector<13x13xf32>
    %913 = vector.shape_cast %912 : vector<13x13xf32> to vector<1x13x13xf32>
    %914 = vector.broadcast %913 : vector<1x13x13xf32> to vector<2x13x13xf32>
    %915 = arith.mulf %874, %914 : vector<2x13x13xf32>
    %cst_170 = arith.constant dense<0.000000e+00> : vector<2x13xf32>
    %916 = vector.multi_reduction <add>, %915, %cst_170 [2] : vector<2x13x13xf32> to vector<2x13xf32>
    %cst_171 = arith.constant dense<0.000000e+00> : vector<2xf32>
    %917 = vector.multi_reduction <add>, %916, %cst_171 [1] : vector<2x13xf32> to vector<2xf32>
    %918 = vector.shape_cast %917 : vector<2xf32> to vector<2x1xf32>
    %919 = arith.addf %844, %918 : vector<2x1xf32>
    %920 = vector.shape_cast %766 : vector<2x13x13xf32> to vector<1x2x13x13xf32>
    %cst_172 = arith.constant dense<0.000000e+00> : vector<1xf32>
    %921 = vector.multi_reduction <add>, %920, %cst_172 [1, 2, 3] : vector<1x2x13x13xf32> to vector<1xf32>
    %922 = vector.shape_cast %921 : vector<1xf32> to vector<1x1x1x1xf32>
    %923 = vector.extract %922[0, 0, 0, 0] : f32 from vector<1x1x1x1xf32>
    %924 = arith.mulf %766, %766 : vector<2x13x13xf32>
    %925 = vector.shape_cast %924 : vector<2x13x13xf32> to vector<1x2x13x13xf32>
    %cst_173 = arith.constant dense<0.000000e+00> : vector<1xf32>
    %926 = vector.multi_reduction <add>, %925, %cst_173 [1, 2, 3] : vector<1x2x13x13xf32> to vector<1xf32>
    %927 = vector.shape_cast %926 : vector<1xf32> to vector<1x1x1x1xf32>
    %928 = vector.extract %927[0, 0, 0, 0] : f32 from vector<1x1x1x1xf32>
    %cst_174 = arith.constant 2.958580e-03 : f32
    %929 = arith.mulf %923, %cst_174 : f32
    %cst_175 = arith.constant 2.958580e-03 : f32
    %930 = arith.mulf %928, %cst_175 : f32
    %931 = arith.mulf %929, %929 : f32
    %932 = arith.subf %930, %931 : f32
    %cst_176 = arith.constant 0.000000e+00 : f32
    %933 = arith.maximumf %932, %cst_176 : f32
    %cst_177 = arith.constant 9.99999974E-6 : f32
    %934 = arith.addf %933, %cst_177 : f32
    %935 = math.rsqrt %934 : f32
    %c2_178 = arith.constant 2 : index
    %936 = memref.load %arg5[%c2_178] : memref<5xf32, #tpu.memory_space<smem>>
    %937 = arith.mulf %935, %936 : f32
    %c2_179 = arith.constant 2 : index
    %938 = memref.load %arg6[%c2_179] : memref<5xf32, #tpu.memory_space<smem>>
    %939 = arith.mulf %929, %937 : f32
    %940 = arith.subf %938, %939 : f32
    %941 = vector.broadcast %937 : f32 to vector<2x13x13xf32>
    %942 = arith.mulf %766, %941 : vector<2x13x13xf32>
    %943 = vector.broadcast %940 : f32 to vector<2x13x13xf32>
    %944 = arith.addf %942, %943 : vector<2x13x13xf32>
    %cst_180 = arith.constant 0.000000e+00 : f32
    %945 = vector.broadcast %cst_180 : f32 to vector<2x13x13xf32>
    %946 = arith.cmpf oge, %944, %945 : vector<2x13x13xf32>
    %cst_181 = arith.constant 0.00999999977 : f32
    %947 = vector.broadcast %cst_181 : f32 to vector<2x13x13xf32>
    %948 = arith.mulf %947, %944 : vector<2x13x13xf32>
    %949 = arith.select %946, %944, %948 : vector<2x13x13xi1>, vector<2x13x13xf32>
    %c2_182 = arith.constant 2 : index
    %c0_183 = arith.constant 0 : index
    %c0_184 = arith.constant 0 : index
    %c0_185 = arith.constant 0 : index
    %950 = vector.load %arg7[%c2_182, %c0_183, %c0_184, %c0_185] : memref<5x5x13x13xf32, #tpu.memory_space<vmem>>, vector<1x1x13x13xf32>
    %951 = vector.shape_cast %950 : vector<1x1x13x13xf32> to vector<13x13xf32>
    %952 = vector.shape_cast %951 : vector<13x13xf32> to vector<1x13x13xf32>
    %953 = vector.broadcast %952 : vector<1x13x13xf32> to vector<2x13x13xf32>
    %954 = arith.mulf %949, %953 : vector<2x13x13xf32>
    %cst_186 = arith.constant dense<0.000000e+00> : vector<2x13xf32>
    %955 = vector.multi_reduction <add>, %954, %cst_186 [2] : vector<2x13x13xf32> to vector<2x13xf32>
    %cst_187 = arith.constant dense<0.000000e+00> : vector<2xf32>
    %956 = vector.multi_reduction <add>, %955, %cst_187 [1] : vector<2x13xf32> to vector<2xf32>
    %957 = vector.shape_cast %956 : vector<2xf32> to vector<2x1xf32>
    %958 = arith.addf %883, %957 : vector<2x1xf32>
    %c2_188 = arith.constant 2 : index
    %c1_189 = arith.constant 1 : index
    %c0_190 = arith.constant 0 : index
    %c0_191 = arith.constant 0 : index
    %959 = vector.load %arg7[%c2_188, %c1_189, %c0_190, %c0_191] : memref<5x5x13x13xf32, #tpu.memory_space<vmem>>, vector<1x1x13x13xf32>
    %960 = vector.shape_cast %959 : vector<1x1x13x13xf32> to vector<13x13xf32>
    %961 = vector.shape_cast %960 : vector<13x13xf32> to vector<1x13x13xf32>
    %962 = vector.broadcast %961 : vector<1x13x13xf32> to vector<2x13x13xf32>
    %963 = arith.mulf %949, %962 : vector<2x13x13xf32>
    %cst_192 = arith.constant dense<0.000000e+00> : vector<2x13xf32>
    %964 = vector.multi_reduction <add>, %963, %cst_192 [2] : vector<2x13x13xf32> to vector<2x13xf32>
    %cst_193 = arith.constant dense<0.000000e+00> : vector<2xf32>
    %965 = vector.multi_reduction <add>, %964, %cst_193 [1] : vector<2x13xf32> to vector<2xf32>
    %966 = vector.shape_cast %965 : vector<2xf32> to vector<2x1xf32>
    %967 = arith.addf %892, %966 : vector<2x1xf32>
    %c2_194 = arith.constant 2 : index
    %c2_195 = arith.constant 2 : index
    %c0_196 = arith.constant 0 : index
    %c0_197 = arith.constant 0 : index
    %968 = vector.load %arg7[%c2_194, %c2_195, %c0_196, %c0_197] : memref<5x5x13x13xf32, #tpu.memory_space<vmem>>, vector<1x1x13x13xf32>
    %969 = vector.shape_cast %968 : vector<1x1x13x13xf32> to vector<13x13xf32>
    %970 = vector.shape_cast %969 : vector<13x13xf32> to vector<1x13x13xf32>
    %971 = vector.broadcast %970 : vector<1x13x13xf32> to vector<2x13x13xf32>
    %972 = arith.mulf %949, %971 : vector<2x13x13xf32>
    %cst_198 = arith.constant dense<0.000000e+00> : vector<2x13xf32>
    %973 = vector.multi_reduction <add>, %972, %cst_198 [2] : vector<2x13x13xf32> to vector<2x13xf32>
    %cst_199 = arith.constant dense<0.000000e+00> : vector<2xf32>
    %974 = vector.multi_reduction <add>, %973, %cst_199 [1] : vector<2x13xf32> to vector<2xf32>
    %975 = vector.shape_cast %974 : vector<2xf32> to vector<2x1xf32>
    %976 = arith.addf %901, %975 : vector<2x1xf32>
    %c2_200 = arith.constant 2 : index
    %c3_201 = arith.constant 3 : index
    %c0_202 = arith.constant 0 : index
    %c0_203 = arith.constant 0 : index
    %977 = vector.load %arg7[%c2_200, %c3_201, %c0_202, %c0_203] : memref<5x5x13x13xf32, #tpu.memory_space<vmem>>, vector<1x1x13x13xf32>
    %978 = vector.shape_cast %977 : vector<1x1x13x13xf32> to vector<13x13xf32>
    %979 = vector.shape_cast %978 : vector<13x13xf32> to vector<1x13x13xf32>
    %980 = vector.broadcast %979 : vector<1x13x13xf32> to vector<2x13x13xf32>
    %981 = arith.mulf %949, %980 : vector<2x13x13xf32>
    %cst_204 = arith.constant dense<0.000000e+00> : vector<2x13xf32>
    %982 = vector.multi_reduction <add>, %981, %cst_204 [2] : vector<2x13x13xf32> to vector<2x13xf32>
    %cst_205 = arith.constant dense<0.000000e+00> : vector<2xf32>
    %983 = vector.multi_reduction <add>, %982, %cst_205 [1] : vector<2x13xf32> to vector<2xf32>
    %984 = vector.shape_cast %983 : vector<2xf32> to vector<2x1xf32>
    %985 = arith.addf %910, %984 : vector<2x1xf32>
    %c2_206 = arith.constant 2 : index
    %c4_207 = arith.constant 4 : index
    %c0_208 = arith.constant 0 : index
    %c0_209 = arith.constant 0 : index
    %986 = vector.load %arg7[%c2_206, %c4_207, %c0_208, %c0_209] : memref<5x5x13x13xf32, #tpu.memory_space<vmem>>, vector<1x1x13x13xf32>
    %987 = vector.shape_cast %986 : vector<1x1x13x13xf32> to vector<13x13xf32>
    %988 = vector.shape_cast %987 : vector<13x13xf32> to vector<1x13x13xf32>
    %989 = vector.broadcast %988 : vector<1x13x13xf32> to vector<2x13x13xf32>
    %990 = arith.mulf %949, %989 : vector<2x13x13xf32>
    %cst_210 = arith.constant dense<0.000000e+00> : vector<2x13xf32>
    %991 = vector.multi_reduction <add>, %990, %cst_210 [2] : vector<2x13x13xf32> to vector<2x13xf32>
    %cst_211 = arith.constant dense<0.000000e+00> : vector<2xf32>
    %992 = vector.multi_reduction <add>, %991, %cst_211 [1] : vector<2x13xf32> to vector<2xf32>
    %993 = vector.shape_cast %992 : vector<2xf32> to vector<2x1xf32>
    %994 = arith.addf %919, %993 : vector<2x1xf32>
    %995 = vector.shape_cast %770 : vector<2x13x13xf32> to vector<1x2x13x13xf32>
    %cst_212 = arith.constant dense<0.000000e+00> : vector<1xf32>
    %996 = vector.multi_reduction <add>, %995, %cst_212 [1, 2, 3] : vector<1x2x13x13xf32> to vector<1xf32>
    %997 = vector.shape_cast %996 : vector<1xf32> to vector<1x1x1x1xf32>
    %998 = vector.extract %997[0, 0, 0, 0] : f32 from vector<1x1x1x1xf32>
    %999 = arith.mulf %770, %770 : vector<2x13x13xf32>
    %1000 = vector.shape_cast %999 : vector<2x13x13xf32> to vector<1x2x13x13xf32>
    %cst_213 = arith.constant dense<0.000000e+00> : vector<1xf32>
    %1001 = vector.multi_reduction <add>, %1000, %cst_213 [1, 2, 3] : vector<1x2x13x13xf32> to vector<1xf32>
    %1002 = vector.shape_cast %1001 : vector<1xf32> to vector<1x1x1x1xf32>
    %1003 = vector.extract %1002[0, 0, 0, 0] : f32 from vector<1x1x1x1xf32>
    %cst_214 = arith.constant 2.958580e-03 : f32
    %1004 = arith.mulf %998, %cst_214 : f32
    %cst_215 = arith.constant 2.958580e-03 : f32
    %1005 = arith.mulf %1003, %cst_215 : f32
    %1006 = arith.mulf %1004, %1004 : f32
    %1007 = arith.subf %1005, %1006 : f32
    %cst_216 = arith.constant 0.000000e+00 : f32
    %1008 = arith.maximumf %1007, %cst_216 : f32
    %cst_217 = arith.constant 9.99999974E-6 : f32
    %1009 = arith.addf %1008, %cst_217 : f32
    %1010 = math.rsqrt %1009 : f32
    %c3_218 = arith.constant 3 : index
    %1011 = memref.load %arg5[%c3_218] : memref<5xf32, #tpu.memory_space<smem>>
    %1012 = arith.mulf %1010, %1011 : f32
    %c3_219 = arith.constant 3 : index
    %1013 = memref.load %arg6[%c3_219] : memref<5xf32, #tpu.memory_space<smem>>
    %1014 = arith.mulf %1004, %1012 : f32
    %1015 = arith.subf %1013, %1014 : f32
    %1016 = vector.broadcast %1012 : f32 to vector<2x13x13xf32>
    %1017 = arith.mulf %770, %1016 : vector<2x13x13xf32>
    %1018 = vector.broadcast %1015 : f32 to vector<2x13x13xf32>
    %1019 = arith.addf %1017, %1018 : vector<2x13x13xf32>
    %cst_220 = arith.constant 0.000000e+00 : f32
    %1020 = vector.broadcast %cst_220 : f32 to vector<2x13x13xf32>
    %1021 = arith.cmpf oge, %1019, %1020 : vector<2x13x13xf32>
    %cst_221 = arith.constant 0.00999999977 : f32
    %1022 = vector.broadcast %cst_221 : f32 to vector<2x13x13xf32>
    %1023 = arith.mulf %1022, %1019 : vector<2x13x13xf32>
    %1024 = arith.select %1021, %1019, %1023 : vector<2x13x13xi1>, vector<2x13x13xf32>
    %c3_222 = arith.constant 3 : index
    %c0_223 = arith.constant 0 : index
    %c0_224 = arith.constant 0 : index
    %c0_225 = arith.constant 0 : index
    %1025 = vector.load %arg7[%c3_222, %c0_223, %c0_224, %c0_225] : memref<5x5x13x13xf32, #tpu.memory_space<vmem>>, vector<1x1x13x13xf32>
    %1026 = vector.shape_cast %1025 : vector<1x1x13x13xf32> to vector<13x13xf32>
    %1027 = vector.shape_cast %1026 : vector<13x13xf32> to vector<1x13x13xf32>
    %1028 = vector.broadcast %1027 : vector<1x13x13xf32> to vector<2x13x13xf32>
    %1029 = arith.mulf %1024, %1028 : vector<2x13x13xf32>
    %cst_226 = arith.constant dense<0.000000e+00> : vector<2x13xf32>
    %1030 = vector.multi_reduction <add>, %1029, %cst_226 [2] : vector<2x13x13xf32> to vector<2x13xf32>
    %cst_227 = arith.constant dense<0.000000e+00> : vector<2xf32>
    %1031 = vector.multi_reduction <add>, %1030, %cst_227 [1] : vector<2x13xf32> to vector<2xf32>
    %1032 = vector.shape_cast %1031 : vector<2xf32> to vector<2x1xf32>
    %1033 = arith.addf %958, %1032 : vector<2x1xf32>
    %c3_228 = arith.constant 3 : index
    %c1_229 = arith.constant 1 : index
    %c0_230 = arith.constant 0 : index
    %c0_231 = arith.constant 0 : index
    %1034 = vector.load %arg7[%c3_228, %c1_229, %c0_230, %c0_231] : memref<5x5x13x13xf32, #tpu.memory_space<vmem>>, vector<1x1x13x13xf32>
    %1035 = vector.shape_cast %1034 : vector<1x1x13x13xf32> to vector<13x13xf32>
    %1036 = vector.shape_cast %1035 : vector<13x13xf32> to vector<1x13x13xf32>
    %1037 = vector.broadcast %1036 : vector<1x13x13xf32> to vector<2x13x13xf32>
    %1038 = arith.mulf %1024, %1037 : vector<2x13x13xf32>
    %cst_232 = arith.constant dense<0.000000e+00> : vector<2x13xf32>
    %1039 = vector.multi_reduction <add>, %1038, %cst_232 [2] : vector<2x13x13xf32> to vector<2x13xf32>
    %cst_233 = arith.constant dense<0.000000e+00> : vector<2xf32>
    %1040 = vector.multi_reduction <add>, %1039, %cst_233 [1] : vector<2x13xf32> to vector<2xf32>
    %1041 = vector.shape_cast %1040 : vector<2xf32> to vector<2x1xf32>
    %1042 = arith.addf %967, %1041 : vector<2x1xf32>
    %c3_234 = arith.constant 3 : index
    %c2_235 = arith.constant 2 : index
    %c0_236 = arith.constant 0 : index
    %c0_237 = arith.constant 0 : index
    %1043 = vector.load %arg7[%c3_234, %c2_235, %c0_236, %c0_237] : memref<5x5x13x13xf32, #tpu.memory_space<vmem>>, vector<1x1x13x13xf32>
    %1044 = vector.shape_cast %1043 : vector<1x1x13x13xf32> to vector<13x13xf32>
    %1045 = vector.shape_cast %1044 : vector<13x13xf32> to vector<1x13x13xf32>
    %1046 = vector.broadcast %1045 : vector<1x13x13xf32> to vector<2x13x13xf32>
    %1047 = arith.mulf %1024, %1046 : vector<2x13x13xf32>
    %cst_238 = arith.constant dense<0.000000e+00> : vector<2x13xf32>
    %1048 = vector.multi_reduction <add>, %1047, %cst_238 [2] : vector<2x13x13xf32> to vector<2x13xf32>
    %cst_239 = arith.constant dense<0.000000e+00> : vector<2xf32>
    %1049 = vector.multi_reduction <add>, %1048, %cst_239 [1] : vector<2x13xf32> to vector<2xf32>
    %1050 = vector.shape_cast %1049 : vector<2xf32> to vector<2x1xf32>
    %1051 = arith.addf %976, %1050 : vector<2x1xf32>
    %c3_240 = arith.constant 3 : index
    %c3_241 = arith.constant 3 : index
    %c0_242 = arith.constant 0 : index
    %c0_243 = arith.constant 0 : index
    %1052 = vector.load %arg7[%c3_240, %c3_241, %c0_242, %c0_243] : memref<5x5x13x13xf32, #tpu.memory_space<vmem>>, vector<1x1x13x13xf32>
    %1053 = vector.shape_cast %1052 : vector<1x1x13x13xf32> to vector<13x13xf32>
    %1054 = vector.shape_cast %1053 : vector<13x13xf32> to vector<1x13x13xf32>
    %1055 = vector.broadcast %1054 : vector<1x13x13xf32> to vector<2x13x13xf32>
    %1056 = arith.mulf %1024, %1055 : vector<2x13x13xf32>
    %cst_244 = arith.constant dense<0.000000e+00> : vector<2x13xf32>
    %1057 = vector.multi_reduction <add>, %1056, %cst_244 [2] : vector<2x13x13xf32> to vector<2x13xf32>
    %cst_245 = arith.constant dense<0.000000e+00> : vector<2xf32>
    %1058 = vector.multi_reduction <add>, %1057, %cst_245 [1] : vector<2x13xf32> to vector<2xf32>
    %1059 = vector.shape_cast %1058 : vector<2xf32> to vector<2x1xf32>
    %1060 = arith.addf %985, %1059 : vector<2x1xf32>
    %c3_246 = arith.constant 3 : index
    %c4_247 = arith.constant 4 : index
    %c0_248 = arith.constant 0 : index
    %c0_249 = arith.constant 0 : index
    %1061 = vector.load %arg7[%c3_246, %c4_247, %c0_248, %c0_249] : memref<5x5x13x13xf32, #tpu.memory_space<vmem>>, vector<1x1x13x13xf32>
    %1062 = vector.shape_cast %1061 : vector<1x1x13x13xf32> to vector<13x13xf32>
    %1063 = vector.shape_cast %1062 : vector<13x13xf32> to vector<1x13x13xf32>
    %1064 = vector.broadcast %1063 : vector<1x13x13xf32> to vector<2x13x13xf32>
    %1065 = arith.mulf %1024, %1064 : vector<2x13x13xf32>
    %cst_250 = arith.constant dense<0.000000e+00> : vector<2x13xf32>
    %1066 = vector.multi_reduction <add>, %1065, %cst_250 [2] : vector<2x13x13xf32> to vector<2x13xf32>
    %cst_251 = arith.constant dense<0.000000e+00> : vector<2xf32>
    %1067 = vector.multi_reduction <add>, %1066, %cst_251 [1] : vector<2x13xf32> to vector<2xf32>
    %1068 = vector.shape_cast %1067 : vector<2xf32> to vector<2x1xf32>
    %1069 = arith.addf %994, %1068 : vector<2x1xf32>
    %1070 = vector.shape_cast %774 : vector<2x13x13xf32> to vector<1x2x13x13xf32>
    %cst_252 = arith.constant dense<0.000000e+00> : vector<1xf32>
    %1071 = vector.multi_reduction <add>, %1070, %cst_252 [1, 2, 3] : vector<1x2x13x13xf32> to vector<1xf32>
    %1072 = vector.shape_cast %1071 : vector<1xf32> to vector<1x1x1x1xf32>
    %1073 = vector.extract %1072[0, 0, 0, 0] : f32 from vector<1x1x1x1xf32>
    %1074 = arith.mulf %774, %774 : vector<2x13x13xf32>
    %1075 = vector.shape_cast %1074 : vector<2x13x13xf32> to vector<1x2x13x13xf32>
    %cst_253 = arith.constant dense<0.000000e+00> : vector<1xf32>
    %1076 = vector.multi_reduction <add>, %1075, %cst_253 [1, 2, 3] : vector<1x2x13x13xf32> to vector<1xf32>
    %1077 = vector.shape_cast %1076 : vector<1xf32> to vector<1x1x1x1xf32>
    %1078 = vector.extract %1077[0, 0, 0, 0] : f32 from vector<1x1x1x1xf32>
    %cst_254 = arith.constant 2.958580e-03 : f32
    %1079 = arith.mulf %1073, %cst_254 : f32
    %cst_255 = arith.constant 2.958580e-03 : f32
    %1080 = arith.mulf %1078, %cst_255 : f32
    %1081 = arith.mulf %1079, %1079 : f32
    %1082 = arith.subf %1080, %1081 : f32
    %cst_256 = arith.constant 0.000000e+00 : f32
    %1083 = arith.maximumf %1082, %cst_256 : f32
    %cst_257 = arith.constant 9.99999974E-6 : f32
    %1084 = arith.addf %1083, %cst_257 : f32
    %1085 = math.rsqrt %1084 : f32
    %c4_258 = arith.constant 4 : index
    %1086 = memref.load %arg5[%c4_258] : memref<5xf32, #tpu.memory_space<smem>>
    %1087 = arith.mulf %1085, %1086 : f32
    %c4_259 = arith.constant 4 : index
    %1088 = memref.load %arg6[%c4_259] : memref<5xf32, #tpu.memory_space<smem>>
    %1089 = arith.mulf %1079, %1087 : f32
    %1090 = arith.subf %1088, %1089 : f32
    %1091 = vector.broadcast %1087 : f32 to vector<2x13x13xf32>
    %1092 = arith.mulf %774, %1091 : vector<2x13x13xf32>
    %1093 = vector.broadcast %1090 : f32 to vector<2x13x13xf32>
    %1094 = arith.addf %1092, %1093 : vector<2x13x13xf32>
    %cst_260 = arith.constant 0.000000e+00 : f32
    %1095 = vector.broadcast %cst_260 : f32 to vector<2x13x13xf32>
    %1096 = arith.cmpf oge, %1094, %1095 : vector<2x13x13xf32>
    %cst_261 = arith.constant 0.00999999977 : f32
    %1097 = vector.broadcast %cst_261 : f32 to vector<2x13x13xf32>
    %1098 = arith.mulf %1097, %1094 : vector<2x13x13xf32>
    %1099 = arith.select %1096, %1094, %1098 : vector<2x13x13xi1>, vector<2x13x13xf32>
    %c4_262 = arith.constant 4 : index
    %c0_263 = arith.constant 0 : index
    %c0_264 = arith.constant 0 : index
    %c0_265 = arith.constant 0 : index
    %1100 = vector.load %arg7[%c4_262, %c0_263, %c0_264, %c0_265] : memref<5x5x13x13xf32, #tpu.memory_space<vmem>>, vector<1x1x13x13xf32>
    %1101 = vector.shape_cast %1100 : vector<1x1x13x13xf32> to vector<13x13xf32>
    %1102 = vector.shape_cast %1101 : vector<13x13xf32> to vector<1x13x13xf32>
    %1103 = vector.broadcast %1102 : vector<1x13x13xf32> to vector<2x13x13xf32>
    %1104 = arith.mulf %1099, %1103 : vector<2x13x13xf32>
    %cst_266 = arith.constant dense<0.000000e+00> : vector<2x13xf32>
    %1105 = vector.multi_reduction <add>, %1104, %cst_266 [2] : vector<2x13x13xf32> to vector<2x13xf32>
    %cst_267 = arith.constant dense<0.000000e+00> : vector<2xf32>
    %1106 = vector.multi_reduction <add>, %1105, %cst_267 [1] : vector<2x13xf32> to vector<2xf32>
    %1107 = vector.shape_cast %1106 : vector<2xf32> to vector<2x1xf32>
    %1108 = arith.addf %1033, %1107 : vector<2x1xf32>
    %c4_268 = arith.constant 4 : index
    %c1_269 = arith.constant 1 : index
    %c0_270 = arith.constant 0 : index
    %c0_271 = arith.constant 0 : index
    %1109 = vector.load %arg7[%c4_268, %c1_269, %c0_270, %c0_271] : memref<5x5x13x13xf32, #tpu.memory_space<vmem>>, vector<1x1x13x13xf32>
    %1110 = vector.shape_cast %1109 : vector<1x1x13x13xf32> to vector<13x13xf32>
    %1111 = vector.shape_cast %1110 : vector<13x13xf32> to vector<1x13x13xf32>
    %1112 = vector.broadcast %1111 : vector<1x13x13xf32> to vector<2x13x13xf32>
    %1113 = arith.mulf %1099, %1112 : vector<2x13x13xf32>
    %cst_272 = arith.constant dense<0.000000e+00> : vector<2x13xf32>
    %1114 = vector.multi_reduction <add>, %1113, %cst_272 [2] : vector<2x13x13xf32> to vector<2x13xf32>
    %cst_273 = arith.constant dense<0.000000e+00> : vector<2xf32>
    %1115 = vector.multi_reduction <add>, %1114, %cst_273 [1] : vector<2x13xf32> to vector<2xf32>
    %1116 = vector.shape_cast %1115 : vector<2xf32> to vector<2x1xf32>
    %1117 = arith.addf %1042, %1116 : vector<2x1xf32>
    %c4_274 = arith.constant 4 : index
    %c2_275 = arith.constant 2 : index
    %c0_276 = arith.constant 0 : index
    %c0_277 = arith.constant 0 : index
    %1118 = vector.load %arg7[%c4_274, %c2_275, %c0_276, %c0_277] : memref<5x5x13x13xf32, #tpu.memory_space<vmem>>, vector<1x1x13x13xf32>
    %1119 = vector.shape_cast %1118 : vector<1x1x13x13xf32> to vector<13x13xf32>
    %1120 = vector.shape_cast %1119 : vector<13x13xf32> to vector<1x13x13xf32>
    %1121 = vector.broadcast %1120 : vector<1x13x13xf32> to vector<2x13x13xf32>
    %1122 = arith.mulf %1099, %1121 : vector<2x13x13xf32>
    %cst_278 = arith.constant dense<0.000000e+00> : vector<2x13xf32>
    %1123 = vector.multi_reduction <add>, %1122, %cst_278 [2] : vector<2x13x13xf32> to vector<2x13xf32>
    %cst_279 = arith.constant dense<0.000000e+00> : vector<2xf32>
    %1124 = vector.multi_reduction <add>, %1123, %cst_279 [1] : vector<2x13xf32> to vector<2xf32>
    %1125 = vector.shape_cast %1124 : vector<2xf32> to vector<2x1xf32>
    %1126 = arith.addf %1051, %1125 : vector<2x1xf32>
    %c4_280 = arith.constant 4 : index
    %c3_281 = arith.constant 3 : index
    %c0_282 = arith.constant 0 : index
    %c0_283 = arith.constant 0 : index
    %1127 = vector.load %arg7[%c4_280, %c3_281, %c0_282, %c0_283] : memref<5x5x13x13xf32, #tpu.memory_space<vmem>>, vector<1x1x13x13xf32>
    %1128 = vector.shape_cast %1127 : vector<1x1x13x13xf32> to vector<13x13xf32>
    %1129 = vector.shape_cast %1128 : vector<13x13xf32> to vector<1x13x13xf32>
    %1130 = vector.broadcast %1129 : vector<1x13x13xf32> to vector<2x13x13xf32>
    %1131 = arith.mulf %1099, %1130 : vector<2x13x13xf32>
    %cst_284 = arith.constant dense<0.000000e+00> : vector<2x13xf32>
    %1132 = vector.multi_reduction <add>, %1131, %cst_284 [2] : vector<2x13x13xf32> to vector<2x13xf32>
    %cst_285 = arith.constant dense<0.000000e+00> : vector<2xf32>
    %1133 = vector.multi_reduction <add>, %1132, %cst_285 [1] : vector<2x13xf32> to vector<2xf32>
    %1134 = vector.shape_cast %1133 : vector<2xf32> to vector<2x1xf32>
    %1135 = arith.addf %1060, %1134 : vector<2x1xf32>
    %c4_286 = arith.constant 4 : index
    %c4_287 = arith.constant 4 : index
    %c0_288 = arith.constant 0 : index
    %c0_289 = arith.constant 0 : index
    %1136 = vector.load %arg7[%c4_286, %c4_287, %c0_288, %c0_289] : memref<5x5x13x13xf32, #tpu.memory_space<vmem>>, vector<1x1x13x13xf32>
    %1137 = vector.shape_cast %1136 : vector<1x1x13x13xf32> to vector<13x13xf32>
    %1138 = vector.shape_cast %1137 : vector<13x13xf32> to vector<1x13x13xf32>
    %1139 = vector.broadcast %1138 : vector<1x13x13xf32> to vector<2x13x13xf32>
    %1140 = arith.mulf %1099, %1139 : vector<2x13x13xf32>
    %cst_290 = arith.constant dense<0.000000e+00> : vector<2x13xf32>
    %1141 = vector.multi_reduction <add>, %1140, %cst_290 [2] : vector<2x13x13xf32> to vector<2x13xf32>
    %cst_291 = arith.constant dense<0.000000e+00> : vector<2xf32>
    %1142 = vector.multi_reduction <add>, %1141, %cst_291 [1] : vector<2x13xf32> to vector<2xf32>
    %1143 = vector.shape_cast %1142 : vector<2xf32> to vector<2x1xf32>
    %1144 = arith.addf %1069, %1143 : vector<2x1xf32>
    %1145 = tpu.concatenate %1108, %1117, %1126, %1135, %1144 in 1 : vector<2x1xf32>, vector<2x1xf32>, vector<2x1xf32>, vector<2x1xf32>, vector<2x1xf32> -> vector<2x5xf32>
    %c0_292 = arith.constant 0 : index
    %c0_293 = arith.constant 0 : index
    %1146 = vector.load %arg8[%c0_292, %c0_293] : memref<1x5xf32, #tpu.memory_space<vmem>>, vector<1x5xf32>
    %1147 = vector.broadcast %1146 : vector<1x5xf32> to vector<2x5xf32>
    %1148 = arith.addf %1145, %1147 : vector<2x5xf32>
    %cst_294 = arith.constant dense<0xFF800000> : vector<2xf32>
    %1149 = vector.multi_reduction <maximumf>, %1148, %cst_294 [1] : vector<2x5xf32> to vector<2xf32>
    %1150 = vector.shape_cast %1149 : vector<2xf32> to vector<2x1xf32>
    %1151 = vector.broadcast %1150 : vector<2x1xf32> to vector<2x5xf32>
    %1152 = arith.subf %1148, %1151 : vector<2x5xf32>
    %1153 = math.exp %1152 : vector<2x5xf32>
    %cst_295 = arith.constant dense<0.000000e+00> : vector<2xf32>
    %1154 = vector.multi_reduction <add>, %1153, %cst_295 [1] : vector<2x5xf32> to vector<2xf32>
    %1155 = vector.shape_cast %1154 : vector<2xf32> to vector<2x1xf32>
    %1156 = vector.broadcast %1155 : vector<2x1xf32> to vector<2x5xf32>
    %1157 = arith.divf %1153, %1156 : vector<2x5xf32>
    %c0_296 = arith.constant 0 : index
    %c0_297 = arith.constant 0 : index
    %1158 = vector.load %arg9[%c0_296, %c0_297] : memref<2x5xf32, #tpu.memory_space<vmem>>, vector<2x5xf32>
    tpu.vector_store %arg9[%c0_296, %c0_297], %1157 {strides = array<i32>} : memref<2x5xf32, #tpu.memory_space<vmem>>, vector<2x5xf32>,
    return
  }
}

</mosaic_0001>

<bundles_post_ra>
// kernel: tpu_custom_call.1
= control target key start
LH: loop header
LB: loop body
LE: loop exit
PB: predicated region body
PF: predicated region fallthrough
CT: control target
= control target key end

     0   :  { %14 = vsyncpa [#allocation4], 0  ;;  %s11164_s0 = inlined_call_operand.vmem [shape: f32[9,2,15,15], index: 0, kind: input, shape index: {}]   ;;  %s11165_s1 = inlined_call_operand.vmem [shape: f32[27], index: 1, kind: input, shape index: {}]   ;;  %s11166_s2 = inlined_call_operand.vmem [shape: f32[3], index: 2, kind: input, shape index: {}]   ;;  %s11167_s3 = inlined_call_operand.vmem [shape: f32[3], index: 3, kind: input, shape index: {}]   ;;  %s11168_s4 = inlined_call_operand.vmem [shape: f32[135], index: 4, kind: input, shape index: {}]   ;;  %s11169_s5 = inlined_call_operand.vmem [shape: f32[5], index: 5, kind: input, shape index: {}]   ;;  %s11170_s6 = inlined_call_operand.vmem [shape: f32[5], index: 6, kind: input, shape index: {}]   ;;  %s11171_s7 = inlined_call_operand.vmem [shape: f32[5,5,13,13], index: 7, kind: input, shape index: {}]   ;;  %s11172_s8 = inlined_call_operand.vmem [shape: f32[1,5], index: 8, kind: input, shape index: {}]   ;;  %s11173_s9 = inlined_call_operand.hbm [shape: f32[2,5], index: 9, kind: output, shape index: {}]  }
   0x1   :  { %15 = vsyncpa [#allocation6], 0 }
   0x2   :  { %16 = vsyncpa [#allocation9], 0 }
   0x3   :  { %17 = vsyncpa [#allocation12], 0  ;;  %s37_s11 = sshll.u32 %s11166_s2, 4  ;;  %s38_s11 = int_to_ptr.vmem [resolvable:$true] %s37_s11 }
   0x4   :  { %18 = vsyncpa [#allocation3], 0  ;;  %s57_s14 = sshll.u32 %s11168_s4, 4  ;;  %s6091_s15 = scalar_lea.vmem %s38_s11, 16  ;;  %s58_s14 = int_to_ptr.vmem [resolvable:$true] %s57_s14 }
   0x5   :  { %p6092_p0 = scmp.ne.s32.totalorder %s38_s11, %s6091_s15  ;;  %p6096_p1 = scmp.lt.s32.totalorder %s38_s11, %s38_s11 }
   0x6   :  { %p6097_p2 = scmp.lt.s32.totalorder %s6091_s15, %s6091_s15 }
   0x8   :  { %p6098_p3 = por %p6097_p2, %p6096_p1 }
   0xa   :  { %p6099_p4 = pnand %p6098_p3, %p6092_p0 }
   0xc   :  { %6102 = shalt.err (!%p6099_p4)
}
   0xd   :  { %s6195_s16 = smov [#allocation5]   ;;  %s6103_s17 = scalar_lea.vmem %s58_s14, 32 }
   0xe   :  { %40 = dma.vmem_to_smem %s38_s11, 16, %s6195_s16, [#allocation6]  }
   0xf   :  { %p6104_p5 = scmp.ne.s32.totalorder %s58_s14, %s6103_s17  ;;  %p6108_p6 = scmp.lt.s32.totalorder %s58_s14, %s58_s14 }
  0x10   :  { %p6109_p7 = scmp.lt.s32.totalorder %s6103_s17, %s6103_s17 }
  0x12   :  { %p6110_p8 = por %p6109_p7, %p6108_p6 }
  0x14   :  { %p6111_p9 = pnand %p6110_p8, %p6104_p5 }
  0x16   :  { %6114 = shalt.err (!%p6111_p9)
}
  0x17   :  { %s6196_s2 = smov [#allocation8]   ;;  %s27_s19 = sshll.u32 %s11165_s1, 4  ;;  %s28_s19 = int_to_ptr.vmem [resolvable:$true] %s27_s19 }
  0x18   :  { %60 = dma.vmem_to_smem %s58_s14, 32, %s6196_s2, [#allocation9]  }
  0x19   :  { %s47_s22 = sshll.u32 %s11167_s3, 4  ;;  %s6115_s23 = scalar_lea.vmem %s28_s19, 16  ;;  %s48_s22 = int_to_ptr.vmem [resolvable:$true] %s47_s22 }
  0x1a   :  { %p6116_p10 = scmp.ne.s32.totalorder %s28_s19, %s6115_s23  ;;  %p6120_p11 = scmp.lt.s32.totalorder %s28_s19, %s28_s19 }
  0x1b   :  { %p6121_p12 = scmp.lt.s32.totalorder %s6115_s23, %s6115_s23 }
  0x1d   :  { %p6122_p13 = por %p6121_p12, %p6120_p11 }
  0x1f   :  { %p6123_p0 = pnand %p6122_p13, %p6116_p10 }
  0x21   :  { %6126 = shalt.err (!%p6123_p0)
}
  0x22   :  { %s6197_s24 = smov [#allocation2]   ;;  %s6127_s25 = scalar_lea.vmem %s48_s22, 16 }
  0x23   :  { %30 = dma.vmem_to_smem %s28_s19, 16, %s6197_s24, [#allocation4]  }
  0x24   :  { %p6128_p1 = scmp.ne.s32.totalorder %s48_s22, %s6127_s25  ;;  %p6132_p2 = scmp.lt.s32.totalorder %s48_s22, %s48_s22 }
  0x25   :  { %p6133_p3 = scmp.lt.s32.totalorder %s6127_s25, %s6127_s25 }
  0x27   :  { %p6134_p4 = por %p6133_p3, %p6132_p2 }
  0x29   :  { %p6135_p5 = pnand %p6134_p4, %p6128_p1 }
  0x2b   :  { %6138 = shalt.err (!%p6135_p5)
}
  0x2c   :  { %s6198_s1 = smov [#allocation7]   ;;  %s67_s27 = sshll.u32 %s11169_s5, 4  ;;  %s68_s27 = int_to_ptr.vmem [resolvable:$true] %s67_s27 }
  0x2d   :  { %50 = dma.vmem_to_smem %s48_s22, 16, %s6198_s1, [#allocation6]  }
  0x2e   :  { %s77_s30 = sshll.u32 %s11170_s6, 4  ;;  %s6139_s10 = scalar_lea.vmem %s68_s27, 16  ;;  %s78_s30 = int_to_ptr.vmem [resolvable:$true] %s77_s30 }
  0x2f   :  { %p6140_p6 = scmp.ne.s32.totalorder %s68_s27, %s6139_s10  ;;  %p6144_p7 = scmp.lt.s32.totalorder %s68_s27, %s68_s27 }
  0x30   :  { %p6145_p8 = scmp.lt.s32.totalorder %s6139_s10, %s6139_s10 }
  0x32   :  { %p6146_p9 = por %p6145_p8, %p6144_p7 }
  0x34   :  { %p6147_p10 = pnand %p6146_p9, %p6140_p6 }
  0x36   :  { %6150 = shalt.err (!%p6147_p10)
}
  0x37   :  { %s6199_s11 = smov [#allocation10]   ;;  %s6151_s12 = scalar_lea.vmem %s78_s30, 16 }
  0x38   :  { %70 = dma.vmem_to_smem %s68_s27, 16, %s6199_s11, [#allocation9]  }
  0x39   :  { %p6152_p11 = scmp.ne.s32.totalorder %s78_s30, %s6151_s12  ;;  %p6156_p12 = scmp.lt.s32.totalorder %s78_s30, %s78_s30 }
  0x3a   :  { %p6157_p13 = scmp.lt.s32.totalorder %s6151_s12, %s6151_s12 }
  0x3c   :  { %p6158_p0 = por %p6157_p13, %p6156_p12 }
  0x3e   :  { %p6159_p1 = pnand %p6158_p0, %p6152_p11 }
  0x40   :  { %6162 = shalt.err (!%p6159_p1)
}
  0x41   :  { %s6200_s5 = smov [#allocation11]  }
  0x42   :  { %80 = dma.vmem_to_smem %s78_s30, 16, %s6200_s5, [#allocation12]  }
  0x43   :  { %6185 = dma.done.wait [#allocation4], 16  }
  0x44   :  { %6186 = vsyncadd [#allocation4], 4294967280 }
  0x45   :  { %6187 = dma.done.wait [#allocation6], 32  }
  0x46   :  { %6188 = vsyncadd [#allocation6], 4294967264 }
  0x47   :  { %6189 = dma.done.wait [#allocation9], 48  }
  0x48   :  { %6190 = vsyncadd [#allocation9], 4294967248 }
  0x49   :  { %6191 = dma.done.wait [#allocation12], 16  }
  0x4a   :  { %6192 = vsyncadd [#allocation12], 4294967280 }
  0x4b   :  { %103 = sfence }
  0x4c   :  { %s108_s6 = sld [smem:[#allocation2]]  ;;  %s5766_s13 = sld [smem:[#allocation2 + $0x1]]  ;;  %v6276_v0 = vld [vmem:[%s11164_s0 + $0x8] sm:$0x7f]  ;;  %v6281_v1 = vld [vmem:[%s11164_s0] sm:$0xff]  ;;  %v6286_v2 = vld [vmem:[%s11164_s0 + $0x10] sm:$0xff] }
  0x4d   :  { %v6291_v3 = vld [vmem:[%s11164_s0 + $0x18] sm:$0x7f]  ;;  %s5773_s20 = sld [smem:[#allocation2 + $0x2]]  ;;  %v6296_v4 = vld [vmem:[%s11164_s0 + $0x28] sm:$0x7f]  ;;  %s6298_s23 = sld [smem:[#allocation2 + $0x3]] }
  0x4e   :  { %v6303_v6 = vld [vmem:[%s11164_s0 + $0x20] sm:$0xff]  ;;  %v6308_v7 = vld [vmem:[%s11164_s0 + $0x30] sm:$0xff]  ;;  %v6313_v8 = vld [vmem:[%s11164_s0 + $0x38] sm:$0x7f]  ;;  %s6315_s28 = sld [smem:[#allocation2 + $0x4]]  ;;  %s6321_s29 = sld [smem:[#allocation2 + $0x5]] }
  0x4f   :  { %11289 = vst [vmem:[#allocation19_spill] sm:$0xff] %v6308_v7  ;;  %11290 = vst [vmem:[#allocation20_spill] sm:$0xff] %v6313_v8  ;;  %v6326_v14 = vld [vmem:[%s11164_s0 + $0x40] sm:$0xff]  ;;  %v6335_v19 = vld [vmem:[%s11164_s0 + $0x48] sm:$0x7f]  ;;  %s6377_s1 = sld [smem:[#allocation2 + $0x6]] }
  0x50   :  { %11291 = vst [vmem:[#allocation21_spill] sm:$0xff] %v6326_v14  ;;  %11292 = vst [vmem:[#allocation22_spill] sm:$0xff] %v6335_v19  ;;  %v6340_v20 = vld [vmem:[%s11164_s0 + $0x50] sm:$0xff]  ;;  %v6345_v21 = vld [vmem:[%s11164_s0 + $0x58] sm:$0x7f]  ;;  %s6379_s3 = sld [smem:[#allocation2 + $0x7]] }
  0x51   :  { %11293 = vst [vmem:[#allocation23_spill] sm:$0xff] %v6340_v20  ;;  %v6350_v23 = vld [vmem:[%s11164_s0 + $0x60] sm:$0xff]  ;;  %v6355_v24 = vld [vmem:[%s11164_s0 + $0x68] sm:$0x7f]  ;;  %v6360_v25 = vld [vmem:[%s11164_s0 + $0x70] sm:$0xff]  ;;  %s6390_s30 = sld [smem:[#allocation2 + $0x8]] }
  0x52   :  { %v109_v5 = vstv %s108_s6  ;;  %v132_v13 = vstv %s5766_s13  ;;  %v6365_v26 = vld [vmem:[%s11164_s0 + $0x78] sm:$0x7f]  ;;  %v6370_v31 = vld [vmem:[%s11164_s0 + $0x80] sm:$0xff]  ;;  %s6392_s10 = sld [smem:[#allocation2 + $0x12]]  ;;  %vm406_vm0 = vcmask 121856   ;;  %vm408_vm1 = vcmask 120832  }
  0x53   :  { %v110_v9 = vmul.f32 %v109_v5, %v6281_v1  ;;  %v111_v10 = vmul.f32 %v109_v5, %v6276_v0  ;;  %v112_v11 = vmul.f32 %v109_v5, %v6286_v2  ;;  %v113_v12 = vmul.f32 %v109_v5, %v6291_v3  ;;  %v6375_v32 = vld [vmem:[%s11164_s0 + $0x90] sm:$0xff]  ;;  %v6388_v37 = vld [vmem:[%s11164_s0 + $0x88] sm:$0x7f]  ;;  %v6398_v39 = vld [vmem:[%s11164_s0 + $0x98] sm:$0x7f]  ;;  %s6478_s6 = sld [smem:[#allocation2 + $0x13]] }
  0x54   :  { %v133_v15 = vmul.f32 %v6303_v6, %v132_v13  ;;  %v134_v16 = vmul.f32 %v6296_v4, %v132_v13  ;;  %v135_v17 = vmul.f32 %v6308_v7, %v132_v13  ;;  %v136_v18 = vmul.f32 %v6313_v8, %v132_v13  ;;  %v6405_v46 = vld [vmem:[%s11164_s0 + $0xa0] sm:$0xff]  ;;  %v6414_v51 = vld [vmem:[%s11164_s0 + $0xa8] sm:$0x7f]  ;;  %v6419_v52 = vld [vmem:[%s11164_s0 + $0xb0] sm:$0xff]  ;;  %s6487_s13 = sld [smem:[#allocation2 + $0x15]]  ;;  %s6489_s14 = sld [smem:[#allocation2 + $0x16]] }
  0x55   :  { %v167_v22 = vstv %s5773_s20  ;;  %v202_v38 = vstv %s6298_s23  ;;  %v237_v40 = vstv %s6315_s28  ;;  %v272_v41 = vstv %s6321_s29  ;;  %s6480_s23 = sld [smem:[#allocation2 + $0x14]]  ;;  %s6551_s17 = sld [smem:[#allocation2 + $0x18]] }
  0x56   :  { %v137_v27 = vadd.f32 %v133_v15, %v110_v9  ;;  %v138_v28 = vadd.f32 %v134_v16, %v111_v10  ;;  %v139_v29 = vadd.f32 %v135_v17, %v112_v11  ;;  %v140_v30 = vadd.f32 %v136_v18, %v113_v12  ;;  %v6424_v53 = vld [vmem:[%s11164_s0 + $0xb8] sm:$0x7f]  ;;  %v6433_v62 = vld [vmem:[%s11164_s0 + $0xc0] sm:$0xff]  ;;  %v6438_v63 = vld [vmem:[%s11164_s0 + $0xc8] sm:$0x7f]  ;;  %s6553_s2 = sld [smem:[#allocation2 + $0x19]] }
  0x57   :  { %v168_v33 = vmul.f32 %v6326_v14, %v167_v22  ;;  %v169_v34 = vmul.f32 %v6335_v19, %v167_v22  ;;  %v170_v35 = vmul.f32 %v6340_v20, %v167_v22  ;;  %v171_v36 = vmul.f32 %v6345_v21, %v167_v22  ;;  %v6447_v12 = vld [vmem:[%s11164_s0 + $0xd0] sm:$0xff]  ;;  %v6452_v13 = vld [vmem:[%s11164_s0 + $0xd8] sm:$0x7f]  ;;  %v6457_v15 = vld [vmem:[%s11164_s0 + $0xe0] sm:$0xff]  ;;  %s6563_s4 = sld [smem:[#allocation2 + $0x1a]]  ;;  %s6579_s18 = sld [smem:[#allocation2 + $0x9]] }
  0x58   :  { %v203_v47 = vmul.f32 %v6350_v23, %v202_v38  ;;  %v204_v48 = vmul.f32 %v6355_v24, %v202_v38  ;;  %v205_v49 = vmul.f32 %v6360_v25, %v202_v38  ;;  %v206_v50 = vmul.f32 %v6365_v26, %v202_v38  ;;  %s6583_s19 = sld [smem:[#allocation2 + $0xa]]  ;;  %s6585_s21 = sld [smem:[#allocation2 + $0xb]] }
  0x59   :  { %v172_v42 = vadd.f32 %v168_v33, %v137_v27  ;;  %v173_v43 = vadd.f32 %v169_v34, %v138_v28  ;;  %v174_v44 = vadd.f32 %v170_v35, %v139_v29  ;;  %v175_v45 = vadd.f32 %v171_v36, %v140_v30  ;;  %v6462_v27 = vld [vmem:[%s11164_s0 + $0xe8] sm:$0x7f]  ;;  %v6467_v28 = vld [vmem:[%s11164_s0 + $0xf0] sm:$0xff]  ;;  %v6472_v29 = vld [vmem:[%s11164_s0 + $0xf8] sm:$0x7f]  ;;  %s6609_s20 = sld [smem:[#allocation2 + $0xc]] }
  0x5a   :  { %v238_v54 = vmul.f32 %v6370_v31, %v237_v40  ;;  %v239_v55 = vmul.f32 %v6388_v37, %v237_v40  ;;  %v240_v56 = vmul.f32 %v6375_v32, %v237_v40  ;;  %v241_v57 = vmul.f32 %v6398_v39, %v237_v40  ;;  %s6617_s22 = sld [smem:[#allocation2 + $0xd]]  ;;  %s6633_s24 = sld [smem:[#allocation2 + $0xe]] }
  0x5b   :  { %v207_v58 = vadd.f32 %v203_v47, %v172_v42  ;;  %v208_v59 = vadd.f32 %v204_v48, %v173_v43  ;;  %v209_v60 = vadd.f32 %v205_v49, %v174_v44  ;;  %v210_v61 = vadd.f32 %v206_v50, %v175_v45  ;;  %v6485_v42 = vld [vmem:[%s11164_s0 + $0x100] sm:$0xff]  ;;  %v6498_v48 = vld [vmem:[%s11164_s0 + $0x108] sm:$0x7f]  ;;  %v6503_v49 = vld [vmem:[%s11164_s0 + $0x110] sm:$0xff]  ;;  %s6635_s25 = sld [smem:[#allocation2 + $0xf]]  ;;  %s6647_s26 = sld [smem:[#allocation2 + $0x10]] }
  0x5c   :  { %v273_v5 = vmul.f32 %v6405_v46, %v272_v41  ;;  %v274_v9 = vmul.f32 %v6414_v51, %v272_v41  ;;  %v275_v10 = vmul.f32 %v6419_v52, %v272_v41  ;;  %v276_v11 = vmul.f32 %v6424_v53, %v272_v41  ;;  %v6508_v50 = vld [vmem:[%s11164_s0 + $0x118] sm:$0x7f]  ;;  %s6542_s0 = sld [smem:[#allocation2 + $0x17]]  ;;  %s6649_s27 = sld [smem:[#allocation2 + $0x11]] }
  0x5d   :  { %v242_v16 = vadd.f32 %v238_v54, %v207_v58  ;;  %v243_v17 = vadd.f32 %v239_v55, %v208_v59  ;;  %v244_v18 = vadd.f32 %v240_v56, %v209_v60  ;;  %v245_v22 = vadd.f32 %v241_v57, %v210_v61  ;;  %s6201_s29 = smov 0.0  }
  0x5e   :  { %v307_v30 = vstv %s6377_s1  ;;  %v342_v33 = vstv %s6379_s3  ;;  %v377_v34 = vstv %s6390_s30  ;;  %v121_v35 = vstv %s6392_s10  ;;  %s453_s1 = sld [smem:[#allocation5]]  ;;  %s5826_s10 = sld [smem:[#allocation8 + $0x1]] }
  0x5f   :  { %v277_v36 = vadd.f32 %v273_v5, %v242_v16  ;;  %v278_v38 = vadd.f32 %v274_v9, %v243_v17  ;;  %v279_v40 = vadd.f32 %v275_v10, %v244_v18  ;;  %v280_v41 = vadd.f32 %v276_v11, %v245_v22  ;;  %s455_s3 = sld [smem:[#allocation7]] }
  0x60   :  { %v308_v43 = vmul.f32 %v6433_v62, %v307_v30  ;;  %v309_v44 = vmul.f32 %v6438_v63, %v307_v30  ;;  %v310_v45 = vmul.f32 %v6447_v12, %v307_v30  ;;  %v311_v47 = vmul.f32 %v6452_v13, %v307_v30 }
  0x61   :  { %v343_v54 = vmul.f32 %v6457_v15, %v342_v33  ;;  %v344_v55 = vmul.f32 %v6462_v27, %v342_v33  ;;  %v345_v56 = vmul.f32 %v6467_v28, %v342_v33  ;;  %v346_v57 = vmul.f32 %v6472_v29, %v342_v33 }
  0x62   :  { %v312_v58 = vadd.f32 %v308_v43, %v277_v36  ;;  %v313_v59 = vadd.f32 %v309_v44, %v278_v38  ;;  %v314_v60 = vadd.f32 %v310_v45, %v279_v40  ;;  %v315_v61 = vadd.f32 %v311_v47, %v280_v41 }
  0x63   :  { %v378_v5 = vmul.f32 %v6485_v42, %v377_v34  ;;  %v379_v9 = vmul.f32 %v6498_v48, %v377_v34  ;;  %v380_v10 = vmul.f32 %v6503_v49, %v377_v34  ;;  %v381_v11 = vmul.f32 %v6508_v50, %v377_v34 }
  0x64   :  { %v347_v16 = vadd.f32 %v343_v54, %v312_v58  ;;  %v348_v17 = vadd.f32 %v344_v55, %v313_v59  ;;  %v349_v18 = vadd.f32 %v345_v56, %v314_v60  ;;  %v350_v22 = vadd.f32 %v346_v57, %v315_v61 }
  0x65   :  { %v122_v30 = vmul.f32 %v121_v35, %v6281_v1  ;;  %v123_v33 = vmul.f32 %v121_v35, %v6276_v0  ;;  %v124_v36 = vmul.f32 %v121_v35, %v6286_v2  ;;  %v125_v38 = vmul.f32 %v121_v35, %v6291_v3 }
  0x66   :  { %v6522_v40 = vadd.f32 %v378_v5, %v347_v16  ;;  %v6524_v41 = vadd.f32 %v379_v9, %v348_v17  ;;  %v6526_v43 = vadd.f32 %v380_v10, %v349_v18  ;;  %v6528_v34 = vadd.f32 %v381_v11, %v350_v22 }
  0x67   :  { %v152_v44 = vstv %s6478_s6  ;;  %v187_v45 = vstv %s6480_s23  ;;  %v222_v47 = vstv %s6487_s13  ;;  %v257_v54 = vstv %s6489_s14 }
  0x68   :  { %v407_v55 = vsel %vm406_vm0, %v6522_v40, 0.0  ;;  %v409_v56 = vsel %vm408_vm1, %v6524_v41, 0.0  ;;  %v411_v35 = vsel %vm406_vm0, %v6526_v43, 0.0  ;;  %v413_v57 = vsel %vm408_vm1, %v6528_v34, 0.0 }
  0x69   :  { %v410_v58 = vadd.f32 %v409_v56, %v407_v55  ;;  %v153_v59 = vmul.f32 %v6303_v6, %v152_v44  ;;  %v154_v60 = vmul.f32 %v6296_v4, %v152_v44  ;;  %v155_v61 = vmul.f32 %v6308_v7, %v152_v44 }
  0x6a   :  { %v156_v5 = vmul.f32 %v6313_v8, %v152_v44  ;;  %v188_v9 = vmul.f32 %v6326_v14, %v187_v45  ;;  %v189_v10 = vmul.f32 %v6335_v19, %v187_v45  ;;  %v190_v11 = vmul.f32 %v6340_v20, %v187_v45 }
  0x6b   :  { %v412_v16 = vadd.f32 %v411_v35, %v410_v58  ;;  %v157_v17 = vadd.f32 %v153_v59, %v122_v30  ;;  %v158_v18 = vadd.f32 %v154_v60, %v123_v33  ;;  %v159_v22 = vadd.f32 %v155_v61, %v124_v36 }
  0x6c   :  { %v160_v55 = vadd.f32 %v156_v5, %v125_v38  ;;  %v191_v56 = vmul.f32 %v6345_v21, %v187_v45  ;;  %v223_v7 = vmul.f32 %v6350_v23, %v222_v47  ;;  %v224_v44 = vmul.f32 %v6355_v24, %v222_v47 }
  0x6d   :  { %v414_v14 = vadd.f32 %v413_v57, %v412_v16  ;;  %v192_v8 = vadd.f32 %v188_v9, %v157_v17  ;;  %v193_v19 = vadd.f32 %v189_v10, %v158_v18  ;;  %v194_v20 = vadd.f32 %v190_v11, %v159_v22 }
  0x6e   :  { %v195_v35 = vadd.f32 %v191_v56, %v160_v55  ;;  %v225_v30 = vmul.f32 %v6360_v25, %v222_v47  ;;  %v226_v33 = vmul.f32 %v6365_v26, %v222_v47  ;;  %v258_v36 = vmul.f32 %v6370_v31, %v257_v54 }
  0x6f   :  { %415 = vadd.xlane.f32.xlu0 %v414_v14  ;;  %v227_v38 = vadd.f32 %v223_v7, %v192_v8  ;;  %v228_v58 = vadd.f32 %v224_v44, %v193_v19  ;;  %v259_v45 = vmul.f32 %v6388_v37, %v257_v54  ;;  %v260_v59 = vmul.f32 %v6375_v32, %v257_v54 }
  0x70   :  { %v229_v57 = vadd.f32 %v225_v30, %v194_v20  ;;  %v230_v60 = vadd.f32 %v226_v33, %v195_v35  ;;  %v261_v61 = vmul.f32 %v6398_v39, %v257_v54  ;;  %v292_v5 = vstv %s6542_s0 }
  0x71   :  { %v262_v9 = vadd.f32 %v258_v36, %v227_v38  ;;  %v263_v47 = vadd.f32 %v259_v45, %v228_v58  ;;  %v293_v10 = vmul.f32 %v6405_v46, %v292_v5  ;;  %v294_v7 = vmul.f32 %v6414_v51, %v292_v5 }
  0x72   :  { %v264_v8 = vadd.f32 %v260_v59, %v229_v57  ;;  %v265_v14 = vadd.f32 %v261_v61, %v230_v60  ;;  %v295_v19 = vmul.f32 %v6419_v52, %v292_v5  ;;  %v296_v11 = vmul.f32 %v6424_v53, %v292_v5 }
  0x73   :  { %v297_v16 = vadd.f32 %v293_v10, %v262_v9  ;;  %v298_v17 = vadd.f32 %v294_v7, %v263_v47  ;;  %v327_v18 = vstv %s6551_s17  ;;  %v362_v20 = vstv %s6553_s2 }
  0x74   :  { %v299_v22 = vadd.f32 %v295_v19, %v264_v8  ;;  %v300_v55 = vadd.f32 %v296_v11, %v265_v14  ;;  %v328_v54 = vmul.f32 %v6433_v62, %v327_v18  ;;  %v329_v56 = vmul.f32 %v6438_v63, %v327_v18 }
  0x75   :  { %v330_v44 = vmul.f32 %v6447_v12, %v327_v18  ;;  %v331_v35 = vmul.f32 %v6452_v13, %v327_v18  ;;  %v363_v30 = vmul.f32 %v6457_v15, %v362_v20  ;;  %v364_v33 = vmul.f32 %v6462_v27, %v362_v20 }
  0x76   :  { %v332_v36 = vadd.f32 %v328_v54, %v297_v16  ;;  %v333_v38 = vadd.f32 %v329_v56, %v298_v17  ;;  %v365_v58 = vmul.f32 %v6467_v28, %v362_v20  ;;  %v366_v45 = vmul.f32 %v6472_v29, %v362_v20 }
  0x77   :  { %v334_v59 = vadd.f32 %v330_v44, %v299_v22  ;;  %v335_v57 = vadd.f32 %v331_v35, %v300_v55  ;;  %v397_v60 = vstv %s6563_s4  ;;  %v424_v61 = vmul.f32 %v6522_v40, %v6522_v40 }
  0x78   :  { %v367_v5 = vadd.f32 %v363_v30, %v332_v36  ;;  %v368_v9 = vadd.f32 %v364_v33, %v333_v38  ;;  %v398_v47 = vmul.f32 %v6485_v42, %v397_v60  ;;  %v399_v10 = vmul.f32 %v6498_v48, %v397_v60 }
  0x79   :  { %v369_v7 = vadd.f32 %v365_v58, %v334_v59  ;;  %v370_v8 = vadd.f32 %v366_v45, %v335_v57  ;;  %v400_v14 = vmul.f32 %v6503_v49, %v397_v60  ;;  %v401_v19 = vmul.f32 %v6508_v50, %v397_v60 }
  0x7a   :  { %v6594_v11 = vadd.f32 %v398_v47, %v367_v5  ;;  %v6596_v16 = vadd.f32 %v399_v10, %v368_v9  ;;  %v425_v17 = vmul.f32 %v6524_v41, %v6524_v41  ;;  %v426_v18 = vmul.f32 %v6526_v43, %v6526_v43 }
  0x7b   :  { %v6602_v20 = vadd.f32 %v400_v14, %v369_v7  ;;  %v6604_v22 = vadd.f32 %v401_v19, %v370_v8  ;;  %v427_v55 = vmul.f32 %v6528_v34, %v6528_v34  ;;  %v428_v54 = vsel %vm406_vm0, %v424_v61, 0.0 }
  0x7c   :  { %v552_v56 = vsel %vm406_vm0, %v6594_v11, 0.0  ;;  %v553_v44 = vsel %vm408_vm1, %v6596_v16, 0.0  ;;  %v429_v35 = vsel %vm408_vm1, %v425_v17, 0.0  ;;  %v431_v30 = vsel %vm406_vm0, %v426_v18, 0.0  ;;  %v11294_v18 = vld [vmem:[#allocation19_spill] sm:$0xff] }
  0x7d   :  { %v554_v33 = vadd.f32 %v553_v44, %v552_v56  ;;  %v555_v36 = vsel %vm406_vm0, %v6602_v20, 0.0  ;;  %v557_v38 = vsel %vm408_vm1, %v6604_v22, 0.0  ;;  %v430_v58 = vadd.f32 %v429_v35, %v428_v54  ;;  %v11296_v56 = vld [vmem:[#allocation21_spill] sm:$0xff]  ;;  %v11297_v44 = vld [vmem:[#allocation22_spill] sm:$0xff] }
  0x7e   :  { %v433_v45 = vsel %vm408_vm1, %v427_v55, 0.0  ;;  %v115_v59 = vstv %s6579_s18  ;;  %v142_v57 = vstv %s6583_s19  ;;  %v177_v60 = vstv %s6585_s21  ;;  %v11295_v55 = vld [vmem:[#allocation20_spill] sm:$0xff] }
  0x7f   :  { %v556_v61 = vadd.f32 %v555_v36, %v554_v33  ;;  %v432_v5 = vadd.f32 %v431_v30, %v430_v58  ;;  %v116_v9 = vmul.f32 %v115_v59, %v6281_v1  ;;  %v117_v47 = vmul.f32 %v115_v59, %v6276_v0  ;;  %v11298_v30 = vld [vmem:[#allocation23_spill] sm:$0xff] }
  0x80   :  { %v118_v10 = vmul.f32 %v115_v59, %v6286_v2  ;;  %v119_v7 = vmul.f32 %v115_v59, %v6291_v3  ;;  %v143_v8 = vmul.f32 %v6303_v6, %v142_v57  ;;  %v144_v14 = vmul.f32 %v6296_v4, %v142_v57 }
  0x81   :  { %v558_v19 = vadd.f32 %v557_v38, %v556_v61  ;;  %v434_v17 = vadd.f32 %v433_v45, %v432_v5  ;;  %v145_v1 = vmul.f32 %v11294_v18, %v142_v57  ;;  %v146_v0 = vmul.f32 %v11295_v55, %v142_v57 }
  0x82   :  { %v147_v54 = vadd.f32 %v143_v8, %v116_v9  ;;  %v148_v2 = vadd.f32 %v144_v14, %v117_v47  ;;  %v178_v3 = vmul.f32 %v11296_v56, %v177_v60  ;;  %v179_v6 = vmul.f32 %v11297_v44, %v177_v60 }
  0x83   :  { %559 = vadd.xlane.f32.xlu0 %v558_v19  ;;  %v149_v4 = vadd.f32 %v145_v1, %v118_v10  ;;  %v150_v35 = vadd.f32 %v146_v0, %v119_v7  ;;  %v180_v33 = vmul.f32 %v11298_v30, %v177_v60  ;;  %v181_v36 = vmul.f32 %v6345_v21, %v177_v60 }
  0x84   :  { %v182_v38 = vadd.f32 %v178_v3, %v147_v54  ;;  %v183_v58 = vadd.f32 %v179_v6, %v148_v2  ;;  %v212_v45 = vstv %s6609_s20  ;;  %v247_v59 = vstv %s6617_s22  ;;  %s5827_s20 = sld [smem:[#allocation8 + $0x1c]] }
  0x85   :  { %v184_v61 = vadd.f32 %v180_v33, %v149_v4  ;;  %v185_v5 = vadd.f32 %v181_v36, %v150_v35  ;;  %v213_v57 = vmul.f32 %v6350_v23, %v212_v45  ;;  %v214_v9 = vmul.f32 %v6355_v24, %v212_v45 }
  0x86   :  { %v215_v47 = vmul.f32 %v6360_v25, %v212_v45  ;;  %v216_v21 = vmul.f32 %v6365_v26, %v212_v45  ;;  %v248_v60 = vmul.f32 %v6370_v31, %v247_v59  ;;  %v249_v10 = vmul.f32 %v6388_v37, %v247_v59 }
  0x87   :  { %435 = vadd.xlane.f32.xlu0 %v434_v17  ;;  %v217_v7 = vadd.f32 %v213_v57, %v182_v38  ;;  %v218_v8 = vadd.f32 %v214_v9, %v183_v58  ;;  %v250_v23 = vmul.f32 %v6375_v32, %v247_v59  ;;  %v251_v14 = vmul.f32 %v6398_v39, %v247_v59 }
  0x88   :  { %v219_v24 = vadd.f32 %v215_v47, %v184_v61  ;;  %v220_v19 = vadd.f32 %v216_v21, %v185_v5  ;;  %v282_v18 = vstv %s6633_s24  ;;  %v317_v1 = vstv %s6635_s25  ;;  %s5828_s25 = sld [smem:[#allocation8 + $0x37]] }
  0x89   :  { %v252_v55 = vadd.f32 %v248_v60, %v217_v7  ;;  %v253_v0 = vadd.f32 %v249_v10, %v218_v8  ;;  %v283_v25 = vmul.f32 %v6405_v46, %v282_v18  ;;  %v284_v26 = vmul.f32 %v6414_v51, %v282_v18 }
  0x8a   :  { %v254_v31 = vadd.f32 %v250_v23, %v219_v24  ;;  %v255_v37 = vadd.f32 %v251_v14, %v220_v19  ;;  %v285_v17 = vmul.f32 %v6419_v52, %v282_v18  ;;  %v286_v32 = vmul.f32 %v6424_v53, %v282_v18 }
  0x8b   :  { %v287_v54 = vadd.f32 %v283_v25, %v252_v55  ;;  %v288_v39 = vadd.f32 %v284_v26, %v253_v0  ;;  %v318_v2 = vmul.f32 %v6433_v62, %v317_v1  ;;  %v319_v56 = vmul.f32 %v6438_v63, %v317_v1 }
  0x8c   :  { %v289_v3 = vadd.f32 %v285_v17, %v254_v31  ;;  %v290_v44 = vadd.f32 %v286_v32, %v255_v37  ;;  %v320_v46 = vmul.f32 %v6447_v12, %v317_v1  ;;  %v321_v6 = vmul.f32 %v6452_v13, %v317_v1 }
  0x8d   :  { %v322_v51 = vadd.f32 %v318_v2, %v287_v54  ;;  %v323_v4 = vadd.f32 %v319_v56, %v288_v39  ;;  %v352_v35 = vstv %s6647_s26  ;;  %v387_v30 = vstv %s6649_s27  ;;  %s6202_s26 = smov 127   ;;  %s5829_s27 = sld [smem:[#allocation8 + $0x52]] }
  0x8e   :  { %v324_v33 = vadd.f32 %v320_v46, %v289_v3  ;;  %v325_v52 = vadd.f32 %v321_v6, %v290_v44  ;;  %v353_v53 = vmul.f32 %v6457_v15, %v352_v35  ;;  %v354_v36 = vmul.f32 %v6462_v27, %v352_v35 }
  0x8f   :  { %v355_v62 = vmul.f32 %v6467_v28, %v352_v35  ;;  %v356_v63 = vmul.f32 %v6472_v29, %v352_v35  ;;  %v388_v38 = vmul.f32 %v6485_v42, %v387_v30  ;;  %v389_v12 = vmul.f32 %v6498_v48, %v387_v30 }
  0x90   :  { %v357_v58 = vadd.f32 %v353_v53, %v322_v51  ;;  %v358_v13 = vadd.f32 %v354_v36, %v323_v4  ;;  %v390_v45 = vmul.f32 %v6503_v49, %v387_v30  ;;  %v391_v59 = vmul.f32 %v6508_v50, %v387_v30 }
  0x91   :  { %v359_v61 = vadd.f32 %v355_v62, %v324_v33  ;;  %v360_v5 = vadd.f32 %v356_v63, %v325_v52  ;;  %v568_v15 = vmul.f32 %v6594_v11, %v6594_v11  ;;  %v569_v27 = vmul.f32 %v6596_v16, %v6596_v16 }
  0x92   :  { %v6681_v28 = vadd.f32 %v388_v38, %v357_v58  ;;  %v6683_v29 = vadd.f32 %v389_v12, %v358_v13  ;;  %v570_v42 = vmul.f32 %v6602_v20, %v6602_v20  ;;  %v571_v26 = vmul.f32 %v6604_v22, %v6604_v22 }
  0x93   :  { %v6687_v48 = vadd.f32 %v390_v45, %v359_v61  ;;  %v6689_v49 = vadd.f32 %v391_v59, %v360_v5  ;;  %v572_v50 = vsel %vm406_vm0, %v568_v15, 0.0  ;;  %v573_v57 = vsel %vm408_vm1, %v569_v27, 0.0 }
  0x94   :  { %v480_v9 = vsel %vm406_vm0, %v6681_v28, 0.0  ;;  %v481_v47 = vsel %vm408_vm1, %v6683_v29, 0.0  ;;  %v496_v21 = vmul.f32 %v6681_v28, %v6681_v28  ;;  %v497_v60 = vmul.f32 %v6683_v29, %v6683_v29 }
  0x95   :  { %v482_v10 = vadd.f32 %v481_v47, %v480_v9  ;;  %v483_v7 = vsel %vm406_vm0, %v6687_v48, 0.0  ;;  %v498_v8 = vmul.f32 %v6687_v48, %v6687_v48  ;;  %v485_v23 = vsel %vm408_vm1, %v6689_v49, 0.0 }
  0x96   :  { %v499_v14 = vmul.f32 %v6689_v49, %v6689_v49  ;;  %v500_v24 = vsel %vm406_vm0, %v496_v21, 0.0  ;;  %v501_v19 = vsel %vm408_vm1, %v497_v60, 0.0  ;;  %v574_v0 = vadd.f32 %v573_v57, %v572_v50 }
  0x97   :  { %v484_v18 = vadd.f32 %v483_v7, %v482_v10  ;;  %v502_v1 = vadd.f32 %v501_v19, %v500_v24  ;;  %v503_v55 = vsel %vm406_vm0, %v498_v8, 0.0  ;;  %v575_v31 = vsel %vm406_vm0, %v570_v42, 0.0 }
  0x98   :  { %v505_v25 = vsel %vm408_vm1, %v499_v14, 0.0  ;;  %v576_v54 = vadd.f32 %v575_v31, %v574_v0  ;;  %v577_v39 = vsel %vm408_vm1, %v571_v26, 0.0  ;;  %vm924_vm6 = vcmask 1046528  }
  0x99   :  { %v486_v37 = vadd.f32 %v485_v23, %v484_v18  ;;  %v504_v17 = vadd.f32 %v503_v55, %v502_v1  ;;  %vm1365_vm7 = vcmask 1045504   ;;  %vm4178_vm0 = vcmask 102400  }
  0x9a   :  { %v578_v2 = vadd.f32 %v577_v39, %v576_v54  ;;  %vm4176_vm1 = vcmask 105472  }
  0x9b   :  { %487 = vadd.xlane.f32.xlu1 %v486_v37  ;;  %v506_v32 = vadd.f32 %v505_v25, %v504_v17 }
  0x9f   :  { %507 = vadd.xlane.f32.xlu1 %v506_v32 }
  0xa3   :  { %579 = vadd.xlane.f32.xlu1 %v578_v2 }
  0xfc   :  { %v416_v56 = vpop.xlane.xlu0 %415 }
  0xfd   :  { %v417_v3 = vrot.slane %v416_v56, 4 }
  0xff   :  { %v418_v44 = vadd.f32 %v417_v3, %v416_v56 }
 0x101   :  { %v419_v46 = vrot.slane %v418_v44, 2 }
 0x103   :  { %v420_v6 = vadd.f32 %v419_v46, %v418_v44 }
 0x105   :  { %v421_v51 = vrot.slane %v420_v6, 1 }
 0x107   :  { %v422_v4 = vadd.f32 %v421_v51, %v420_v6  ;;  %v681_v6 = vstv %s5827_s20 }
 0x109   :  { %6013 = vpush %v422_v4 }
 0x110   :  { %v560_v35 = vpop.xlane.xlu0 %559 }
 0x111   :  { %v561_v10 = vrot.slane %v560_v35, 4 }
 0x113   :  { %v562_v23 = vadd.f32 %v561_v10, %v560_v35 }
 0x114   :  { %v436_v30 = vpop.xlane.xlu0 %435 }
 0x115   :  { %v437_v33 = vrot.slane %v436_v30, 4  ;;  %v563_v31 = vrot.slane %v562_v23, 2 }
 0x117   :  { %v438_v52 = vadd.f32 %v437_v33, %v436_v30  ;;  %v564_v51 = vadd.f32 %v563_v31, %v562_v23 }
 0x119   :  { %v439_v53 = vrot.slane %v438_v52, 2 }
 0x11b   :  { %v440_v36 = vadd.f32 %v439_v53, %v438_v52  ;;  %v565_v52 = vrot.slane %v564_v51, 1 }
 0x11d   :  { %v441_v62 = vrot.slane %v440_v36, 1 }
 0x11f   :  { %v442_v63 = vadd.f32 %v441_v62, %v440_v36 }
 0x121   :  { %6015 = vpush %v442_v63 }
 0x128   :  { %v488_v38 = vpop.xlane.xlu1 %487 }
 0x129   :  { %v489_v58 = vrot.slane %v488_v38, 4 }
 0x12b   :  { %v490_v45 = vadd.f32 %v489_v58, %v488_v38  ;;  %v566_v38 = vadd.f32 %v565_v52, %v564_v51 }
 0x12c   :  { %v508_v12 = vpop.xlane.xlu1 %507 }
 0x12d   :  { %v509_v13 = vrot.slane %v508_v12, 4  ;;  %v491_v61 = vrot.slane %v490_v45, 2 }
 0x12f   :  { %v510_v59 = vadd.f32 %v509_v13, %v508_v12  ;;  %v492_v27 = vadd.f32 %v491_v61, %v490_v45  ;;  %v707_v12 = vstv %s5828_s25  ;;  %v733_v61 = vstv %s5829_s27  ;;  %s5858_s25 = sld [smem:[#allocation8 + $0x3d]]  ;;  %s5857_s27 = sld [smem:[#allocation8 + $0x22]] }
 0x130   :  { %v580_v60 = vpop.xlane.xlu1 %579 }
 0x131   :  { %v511_v5 = vrot.slane %v510_v59, 2  ;;  %v493_v50 = vrot.slane %v492_v27, 1  ;;  %v581_v7 = vrot.slane %v580_v60, 4 }
 0x133   :  { %v512_v42 = vadd.f32 %v511_v5, %v510_v59  ;;  %v494_v9 = vadd.f32 %v493_v50, %v492_v27  ;;  %v582_v18 = vadd.f32 %v581_v7, %v580_v60 }
 0x135   :  { %v513_v57 = vrot.slane %v512_v42, 1  ;;  %v583_v37 = vrot.slane %v582_v18, 2 }
 0x137   :  { %v514_v47 = vadd.f32 %v513_v57, %v512_v42  ;;  %v584_v3 = vadd.f32 %v583_v37, %v582_v18 }
 0x139   :  { %v585_v30 = vrot.slane %v584_v3, 1 }
 0x13a   :  { %s6014_s11 = spop %6013 }
 0x13b   :  { %s6717_s12 = smul.f32 0.0022222223, %s6014_s11  ;;  %v586_v62 = vadd.f32 %v585_v30, %v584_v3  ;;  %s5830_s11 = sld [smem:[#allocation8 + $0x6d]] }
 0x13d   :  { %s446_s5 = smul.f32 %s6717_s12, %s6717_s12 }
 0x141   :  { %v759_v50 = vstv %s5830_s11  ;;  %s5863_s11 = sld [smem:[#allocation8 + $0x3e]] }
 0x152   :  { %s6016_s6 = spop %6015 }
 0x153   :  { %s445_s23 = smul.f32 0.0022222223, %s6016_s6  ;;  %s6203_s6 = smov 126  }
 0x155   :  { %s447_s28 = ssub.f32 %s445_s23, %s446_s5  ;;  %s5832_s5 = sld [smem:[#allocation8 + $0x1d]] }
 0x156   :  { %s5833_s23 = sld [smem:[#allocation8 + $0x38]] }
 0x157   :  { %s448_s13 = smax.f32 %s6201_s29, %s447_s28  ;;  %s5841_s28 = sld [smem:[#allocation8 + $0x4]] }
 0x158   :  { %s449_s14 = sadd.f32 1e-05, %s448_s13  ;;  %s5846_s13 = sld [smem:[#allocation8 + $0x5]] }
 0x15a   :  { %v450_v15 = vstv %s449_s14  ;;  %s5861_s14 = sld [smem:[#allocation8 + $0x8]] }
 0x15b   :  { %6071 = vrsqrt.f32 %v450_v15 }
 0x165   :  { %v6072_v21 = vpop.eup %6071 }
 0x166   :  { %6017 = vpush %v6072_v21 }
 0x167   :  { %6019 = vpush %v494_v9 }
 0x168   :  { %6021 = vpush %v514_v47 }
 0x197   :  { %s6018_s30 = spop %6017 }
 0x198   :  { %s454_s15 = smul.f32 %s6018_s30, %s453_s1  ;;  %s6020_s16 = spop %6019 }
 0x199   :  { %s6722_s0 = smul.f32 0.0022222223, %s6020_s16  ;;  %s6022_s17 = spop %6021 }
 0x19a   :  { %s456_s2 = smul.f32 %s454_s15, %s6717_s12  ;;  %v458_v8 = vstv %s454_s15  ;;  %s5831_s12 = sld [smem:[#allocation8 + $0x2]] }
 0x19b   :  { %s518_s4 = smul.f32 %s6722_s0, %s6722_s0  ;;  %v459_v14 = vmul.f32 %v458_v8, %v6522_v40  ;;  %v460_v24 = vmul.f32 %v458_v8, %v6524_v41  ;;  %v461_v19 = vmul.f32 %v458_v8, %v6526_v43  ;;  %v462_v26 = vmul.f32 %v458_v8, %v6528_v34  ;;  %s5856_s1 = sld [smem:[#allocation8 + $0x7]] }
 0x19c   :  { %s457_s18 = ssub.f32 %s455_s3, %s456_s2  ;;  %s517_s19 = smul.f32 0.0022222223, %s6022_s17  ;;  %v655_v40 = vstv %s5826_s10 }
 0x19d   :  { %s5847_s30 = sld [smem:[#allocation8 + $0x20]] }
 0x19e   :  { %v463_v1 = vstv %s457_s18  ;;  %s519_s21 = ssub.f32 %s517_s19, %s518_s4  ;;  %s5862_s4 = sld [smem:[#allocation8 + $0x23]] }
 0x19f   :  { %v464_v55 = vadd.f32 %v463_v1, %v459_v14  ;;  %v465_v0 = vadd.f32 %v463_v1, %v460_v24  ;;  %v466_v25 = vadd.f32 %v463_v1, %v461_v19  ;;  %v467_v41 = vadd.f32 %v463_v1, %v462_v26 }
 0x1a0   :  { %s520_s22 = smax.f32 %s6201_s29, %s519_s21  ;;  %v785_v60 = vstv %s5831_s12  ;;  %v811_v14 = vstv %s5832_s5  ;;  %v6794_v26 = vstv %s5841_s28  ;;  %s5843_s21 = sld [smem:[#allocation8 + $0x3a]] }
 0x1a1   :  { %vm468_vm2 = vcmp.ge.f32.partialorder %v464_v55, 0.0  ;;  %vm469_vm3 = vcmp.ge.f32.partialorder %v465_v0, 0.0  ;;  %s521_s24 = sadd.f32 1e-05, %s520_s22  ;;  %v472_v17 = vmul.f32 0.01, %v464_v55 }
 0x1a2   :  { %v473_v43 = vmul.f32 0.01, %v465_v0  ;;  %v474_v32 = vmul.f32 0.01, %v466_v25  ;;  %vm470_vm4 = vcmp.ge.f32.partialorder %v466_v25, 0.0  ;;  %vm471_vm5 = vcmp.ge.f32.partialorder %v467_v41, 0.0 }
 0x1a3   :  { %v522_v54 = vstv %s521_s24  ;;  %v6732_v39 = vsel %vm468_vm2, %v464_v55, %v472_v17  ;;  %v475_v44 = vmul.f32 0.01, %v467_v41  ;;  %v837_v55 = vstv %s5833_s23  ;;  %s5842_s22 = sld [smem:[#allocation8 + $0x1f]]  ;;  %s5848_s24 = sld [smem:[#allocation8 + $0x3b]] }
 0x1a4   :  { %11299 = vst [vmem:[#allocation19_spill] sm:$0xff] %v6732_v39  ;;  %v6734_v2 = vsel %vm469_vm3, %v465_v0, %v473_v43  ;;  %6073 = vrsqrt.f32 %v522_v54  ;;  %v656_v56 = vmul.f32 %v655_v40, %v6732_v39  ;;  %v6738_v46 = vsel %vm470_vm4, %v466_v25, %v474_v32  ;;  %s5818_s12 = sld [smem:[#allocation5 + $0x1]] }
 0x1a5   :  { %11300 = vst [vmem:[#allocation20_spill] sm:$0xff] %v6734_v2  ;;  %v657_v34 = vmul.f32 %v655_v40, %v6734_v2  ;;  %11301 = vst [vmem:[#allocation21_spill] sm:$0xff] %v6738_v46  ;;  %v658_v4 = vmul.f32 %v655_v40, %v6738_v46  ;;  %v682_v35 = vmul.f32 %v681_v6, %v6732_v39  ;;  %v6816_v32 = vstv %s5846_s13  ;;  %s5819_s23 = sld [smem:[#allocation7 + $0x1]]  ;;  %s5871_s13 = sld [smem:[#allocation8 + $0xa]] }
 0x1a6   :  { %664 = vrot.lane.b32.xlu0 %v656_v56, %s6202_s26  ;;  %v6744_v33 = vsel %vm471_vm5, %v467_v41, %v475_v44  ;;  %v684_v36 = vmul.f32 %v681_v6, %v6738_v46  ;;  %v683_v58 = vmul.f32 %v681_v6, %v6734_v2  ;;  %v708_v13 = vmul.f32 %v707_v12, %v6732_v39 }
 0x1a7   :  { %666 = vrot.lane.b32.xlu1 %v657_v34, %s6202_s26  ;;  %11302 = vst [vmem:[#allocation22_spill] sm:$0xff] %v6744_v33  ;;  %v659_v53 = vmul.f32 %v655_v40, %v6744_v33  ;;  %v685_v45 = vmul.f32 %v681_v6, %v6744_v33  ;;  %v710_v59 = vmul.f32 %v707_v12, %v6738_v46  ;;  %v6834_v44 = vstv %s5861_s14  ;;  %s5876_s14 = sld [smem:[#allocation8 + $0xb]] }
 0x1a8   :  { %v709_v5 = vmul.f32 %v707_v12, %v6734_v2  ;;  %v734_v15 = vmul.f32 %v733_v61, %v6732_v39  ;;  %v711_v27 = vmul.f32 %v707_v12, %v6744_v33  ;;  %v736_v42 = vmul.f32 %v733_v61, %v6738_v46 }
 0x1a9   :  { %v735_v57 = vmul.f32 %v733_v61, %v6734_v2  ;;  %v760_v9 = vmul.f32 %v759_v50, %v6732_v39  ;;  %v737_v47 = vmul.f32 %v733_v61, %v6744_v33  ;;  %v762_v21 = vmul.f32 %v759_v50, %v6738_v46 }
 0x1aa   :  { %690 = vrot.lane.b32.xlu0 %v682_v35, %s6202_s26  ;;  %v761_v10 = vmul.f32 %v759_v50, %v6734_v2  ;;  %v786_v7 = vmul.f32 %v785_v60, %v6732_v39  ;;  %v763_v8 = vmul.f32 %v759_v50, %v6744_v33  ;;  %v788_v23 = vmul.f32 %v785_v60, %v6738_v46 }
 0x1ab   :  { %668 = vrot.lane.b32.xlu1 %v658_v4, %s6202_s26  ;;  %v787_v24 = vmul.f32 %v785_v60, %v6734_v2  ;;  %v812_v19 = vmul.f32 %v811_v14, %v6732_v39  ;;  %v789_v18 = vmul.f32 %v785_v60, %v6744_v33  ;;  %v814_v1 = vmul.f32 %v811_v14, %v6738_v46 }
 0x1ac   :  { %v813_v0 = vmul.f32 %v811_v14, %v6734_v2  ;;  %v838_v25 = vmul.f32 %v837_v55, %v6732_v39  ;;  %v815_v31 = vmul.f32 %v811_v14, %v6744_v33  ;;  %v840_v40 = vmul.f32 %v837_v55, %v6738_v46 }
 0x1ad   :  { %v6802_v37 = vmul.f32 %v6794_v26, %v6734_v2  ;;  %v839_v41 = vmul.f32 %v837_v55, %v6734_v2  ;;  %v6812_v43 = vmul.f32 %v6794_v26, %v6744_v33  ;;  %v841_v54 = vmul.f32 %v837_v55, %v6744_v33 }
 0x1ae   :  { %v6074_v63 = vpop.eup %6073  ;;  %694 = vrot.lane.b32.xlu0 %v684_v36, %s6202_s26  ;;  %v6828_v56 = vmul.f32 %v6816_v32, %v6734_v2  ;;  %v6832_v3 = vmul.f32 %v6816_v32, %v6744_v33  ;;  %v6836_v6 = vstv %s5856_s1  ;;  %v6842_v51 = vstv %s5847_s30  ;;  %s5872_s1 = sld [smem:[#allocation8 + $0x25]]  ;;  %s5873_s30 = sld [smem:[#allocation8 + $0x40]] }
 0x1af   :  { %6023 = vpush %v6074_v63  ;;  %670 = vrot.lane.b32.xlu1 %v659_v53, %s6202_s26  ;;  %v1046_v17 = vrot.slane %v6802_v37, 1  ;;  %v1049_v34 = vrot.slane %v6812_v43, 1  ;;  %v6849_v30 = vmul.f32 %v6834_v44, %v6734_v2  ;;  %v6853_v52 = vmul.f32 %v6836_v6, %v6734_v2 }
 0x1b0   :  { %6025 = vpush %v566_v38  ;;  %v1206_v4 = vrot.slane %v6828_v56, 1  ;;  %v1209_v35 = vrot.slane %v6832_v3, 1  ;;  %v6863_v36 = vmul.f32 %v6842_v51, %v6734_v2  ;;  %v6869_v38 = vmul.f32 %v6836_v6, %v6744_v33 }
 0x1b1   :  { %6027 = vpush %v586_v62  ;;  %v1647_v62 = vrot.slane %v6849_v30, 2  ;;  %v1487_v63 = vrot.slane %v6853_v52, 2  ;;  %v6871_v12 = vstv %s5862_s4  ;;  %v6889_v61 = vstv %s5843_s21  ;;  %s5901_s4 = sld [smem:[#allocation8 + $0x10]]  ;;  %s5888_s21 = sld [smem:[#allocation8 + $0x43]] }
 0x1b2   :  { %716 = vrot.lane.b32.xlu0 %v708_v13, %s6202_s26  ;;  %v1490_v13 = vrot.slane %v6869_v38, 2  ;;  %v6941_v14 = vmul.f32 %v6842_v51, %v6744_v33  ;;  %v1640_v56 = vmul.f32 %v6834_v44, %v6738_v46 }
 0x1b3   :  { %692 = vrot.lane.b32.xlu1 %v683_v58, %s6202_s26  ;;  %v11193_v58 = vrot.slane %v6863_v36, 1 }
 0x1b4   :  { %v1649_v30 = vrot.slane %v1640_v56, 2 }
 0x1b6   :  { %720 = vrot.lane.b32.xlu0 %v710_v59, %s6202_s26  ;;  %v6887_v59 = vmul.f32 %v6834_v44, %v6744_v33 }
 0x1b7   :  { %696 = vrot.lane.b32.xlu1 %v685_v45, %s6202_s26  ;;  %v6883_v45 = vmul.f32 %v6871_v12, %v6734_v2 }
 0x1ba   :  { %742 = vrot.lane.b32.xlu0 %v734_v15, %s6202_s26  ;;  %v11189_v15 = vrot.slane %v6883_v45, 2 }
 0x1bb   :  { %718 = vrot.lane.b32.xlu1 %v709_v5, %s6202_s26  ;;  %v6891_v5 = vstv %s5842_s22  ;;  %s5893_s22 = sld [smem:[#allocation8 + $0x44]] }
 0x1bc   :  { %v6907_v50 = vmul.f32 %v6891_v5, %v6734_v2  ;;  %v6923_v60 = vmul.f32 %v6891_v5, %v6744_v33 }
 0x1be   :  { %746 = vrot.lane.b32.xlu0 %v736_v42, %s6202_s26  ;;  %v6903_v42 = vmul.f32 %v6889_v61, %v6734_v2 }
 0x1bf   :  { %722 = vrot.lane.b32.xlu1 %v711_v27, %s6202_s26  ;;  %v11192_v27 = vrot.slane %v6887_v59, 2 }
 0x1c2   :  { %768 = vrot.lane.b32.xlu0 %v760_v9, %s6202_s26  ;;  %v11185_v9 = vrot.slane %v6903_v42, 1 }
 0x1c3   :  { %744 = vrot.lane.b32.xlu1 %v735_v57, %s6202_s26 }
 0x1c6   :  { %772 = vrot.lane.b32.xlu0 %v762_v21, %s6202_s26  ;;  %v6919_v21 = vmul.f32 %v6889_v61, %v6744_v33 }
 0x1c7   :  { %748 = vrot.lane.b32.xlu1 %v737_v47, %s6202_s26  ;;  %v11186_v47 = vrot.slane %v6907_v50, 1 }
 0x1ca   :  { %794 = vrot.lane.b32.xlu0 %v786_v7, %s6203_s6  ;;  %v11181_v7 = vrot.slane %v6919_v21, 1 }
 0x1cb   :  { %770 = vrot.lane.b32.xlu1 %v761_v10, %s6202_s26  ;;  %v6925_v10 = vstv %s5848_s24  ;;  %s5903_s24 = sld [smem:[#allocation8 + $0x46]] }
 0x1ce   :  { %798 = vrot.lane.b32.xlu0 %v788_v23, %s6203_s6  ;;  %v6937_v23 = vmul.f32 %v6925_v10, %v6744_v33 }
 0x1cf   :  { %774 = vrot.lane.b32.xlu1 %v763_v8, %s6202_s26  ;;  %v11184_v8 = vrot.slane %v6923_v60, 1 }
 0x1d2   :  { %820 = vrot.lane.b32.xlu0 %v812_v19, %s6203_s6  ;;  %v6945_v19 = vstv %s5857_s27  ;;  %s5908_s27 = sld [smem:[#allocation8 + $0x47]] }
 0x1d3   :  { %796 = vrot.lane.b32.xlu1 %v787_v24, %s6203_s6  ;;  %v6943_v24 = vstv %s5858_s25  ;;  %s5902_s25 = sld [smem:[#allocation8 + $0x2b]] }
 0x1d4   :  { %v6957_v55 = vmul.f32 %v6943_v24, %v6734_v2 }
 0x1d6   :  { %824 = vrot.lane.b32.xlu0 %v814_v1, %s6203_s6  ;;  %v11180_v1 = vrot.slane %v6941_v14, 1 }
 0x1d7   :  { %800 = vrot.lane.b32.xlu1 %v789_v18, %s6203_s6  ;;  %v11179_v18 = vrot.slane %v6937_v23, 1 }
 0x1da   :  { %846 = vrot.lane.b32.xlu0 %v838_v25, %s6203_s6  ;;  %v11182_v25 = vrot.slane %v6957_v55, 2 }
 0x1db   :  { %822 = vrot.lane.b32.xlu1 %v813_v0, %s6203_s6  ;;  %v6961_v0 = vmul.f32 %v6945_v19, %v6734_v2 }
 0x1de   :  { %850 = vrot.lane.b32.xlu0 %v840_v40, %s6203_s6  ;;  %v6973_v40 = vmul.f32 %v6943_v24, %v6744_v33 }
 0x1df   :  { %826 = vrot.lane.b32.xlu1 %v815_v31, %s6203_s6  ;;  %v11183_v31 = vrot.slane %v6961_v0, 2 }
 0x1e0   :  { %s6806_s3 = spop %6023 }
 0x1e1   :  { %s6026_s10 = spop %6025  ;;  %s526_s5 = smul.f32 %s6806_s3, %s5818_s12 }
 0x1e2   :  { %s6814_s15 = smul.f32 0.0022222223, %s6026_s10  ;;  %s6028_s16 = spop %6027  ;;  %1053 = vrot.lane.b32.xlu0 %v1046_v17, %s6202_s26 }
 0x1e3   :  { %848 = vrot.lane.b32.xlu1 %v839_v41, %s6203_s6  ;;  %s589_s2 = smul.f32 0.0022222223, %s6028_s16  ;;  %v6977_v41 = vmul.f32 %v6945_v19, %v6744_v33  ;;  %s5877_s3 = sld [smem:[#allocation8 + $0x26]] }
 0x1e4   :  { %s590_s17 = smul.f32 %s6814_s15, %s6814_s15  ;;  %s5878_s10 = sld [smem:[#allocation8 + $0x41]] }
 0x1e5   :  { %s528_s28 = smul.f32 %s526_s5, %s6722_s0  ;;  %s5886_s16 = sld [smem:[#allocation8 + $0xd]] }
 0x1e6   :  { %s591_s18 = ssub.f32 %s589_s2, %s590_s17  ;;  %1057 = vrot.lane.b32.xlu0 %v1049_v34, %s6202_s26  ;;  %s5891_s17 = sld [smem:[#allocation8 + $0xe]] }
 0x1e7   :  { %852 = vrot.lane.b32.xlu1 %v841_v54, %s6203_s6  ;;  %v6979_v54 = vstv %s5863_s11  ;;  %s529_s0 = ssub.f32 %s5819_s23, %s528_s28  ;;  %s5906_s2 = sld [smem:[#allocation8 + $0x11]] }
 0x1e8   :  { %s592_s19 = smax.f32 %s6201_s29, %s591_s18  ;;  %s5892_s18 = sld [smem:[#allocation8 + $0x29]] }
 0x1e9   :  { %s593_s20 = sadd.f32 1e-05, %s592_s19  ;;  %s5907_s19 = sld [smem:[#allocation8 + $0x2c]] }
 0x1ea   :  { %1217 = vrot.lane.b32.xlu0 %v1209_v35, %s6203_s6  ;;  %s5820_s11 = sld [smem:[#allocation5 + $0x2]] }
 0x1eb   :  { %1213 = vrot.lane.b32.xlu1 %v1206_v4, %s6203_s6  ;;  %v594_v53 = vstv %s593_s20  ;;  %s5887_s20 = sld [smem:[#allocation8 + $0x28]]  ;;  %s5821_s23 = sld [smem:[#allocation7 + $0x2]] }
 0x1ec   :  { %6075 = vrsqrt.f32 %v594_v53  ;;  %v11187_v53 = vrot.slane %v6973_v40, 2 }
 0x1ee   :  { %1494 = vrot.lane.b32.xlu0 %v1487_v63, %s6202_s26 }
 0x1ef   :  { %1654 = vrot.lane.b32.xlu1 %v1647_v62, %s6203_s6 }
 0x1f2   :  { %1498 = vrot.lane.b32.xlu0 %v1490_v13, %s6202_s26 }
 0x1f3   :  { %1245 = vrot.lane.b32.xlu1 %v11193_v58, %s6203_s6 }
 0x1f6   :  { %v6076_v57 = vpop.eup %6075  ;;  %1658 = vrot.lane.b32.xlu0 %v11192_v27, %s6203_s6 }
 0x1f7   :  { %1686 = vrot.lane.b32.xlu1 %v11189_v15, %s6203_s6  ;;  %6029 = vpush %v6076_v57  ;;  %v11188_v57 = vrot.slane %v6977_v41, 2 }
 0x1fa   :  { %1085 = vrot.lane.b32.xlu0 %v11186_v47, %s6202_s26  ;;  %v1039_v47 = vmul.f32 %v6794_v26, %v6738_v46 }
 0x1fb   :  { %1117 = vrot.lane.b32.xlu1 %v11185_v9, %s6202_s26 }
 0x1fc   :  { %v1048_v15 = vrot.slane %v1039_v47, 1 }
 0x1fe   :  { %1089 = vrot.lane.b32.xlu0 %v11184_v8, %s6202_s26  ;;  %v7009_v8 = vmul.f32 %v6925_v10, %v6734_v2  ;;  %v1050_v58 = vsel %vm924_vm6, %v1048_v15, %v1049_v34  ;;  %v1480_v34 = vmul.f32 %v6836_v6, %v6738_v46 }
 0x1ff   :  { %1121 = vrot.lane.b32.xlu1 %v11181_v7, %s6202_s26  ;;  %v1037_v7 = vmul.f32 %v6794_v26, %v6732_v39 }
 0x201   :  { %v1045_v9 = vrot.slane %v1037_v7, 1  ;;  %v1199_v7 = vmul.f32 %v6816_v32, %v6738_v46 }
 0x202   :  { %1249 = vrot.lane.b32.xlu0 %v11180_v1, %s6203_s6  ;;  %v6995_v1 = vmul.f32 %v6871_v12, %v6744_v33 }
 0x203   :  { %1281 = vrot.lane.b32.xlu1 %v11179_v18, %s6203_s6  ;;  %v6991_v18 = vmul.f32 %v6979_v54, %v6744_v33  ;;  %v1047_v26 = vsel %vm924_vm6, %v1045_v9, %v1046_v17  ;;  %v1208_v27 = vrot.slane %v1199_v7, 1  ;;  %v1478_v17 = vmul.f32 %v6836_v6, %v6732_v39 }
 0x204   :  { %v1229_v7 = vmul.f32 %v6842_v51, %v6732_v39 }
 0x205   :  { %v1210_v43 = vsel %vm924_vm6, %v1208_v27, %v1209_v35  ;;  %v1489_v27 = vrot.slane %v1480_v34, 2  ;;  %v1101_v34 = vmul.f32 %v6889_v61, %v6732_v39 }
 0x206   :  { %1526 = vrot.lane.b32.xlu0 %v11183_v31, %s6202_s26  ;;  %v11191_v31 = vrot.slane %v6995_v1, 2 }
 0x207   :  { %1558 = vrot.lane.b32.xlu1 %v11182_v25, %s6202_s26  ;;  %v11190_v25 = vrot.slane %v6991_v18, 2  ;;  %v1491_v52 = vsel %vm1365_vm7, %v1489_v27, %v1490_v13  ;;  %v1109_v56 = vrot.slane %v1101_v34, 1  ;;  %v11319_v34 = vrot.slane %v6919_v21, 1 }
 0x20a   :  { %1530 = vrot.lane.b32.xlu0 %v11188_v57, %s6202_s26  ;;  %v7022_v57 = vmul.f32 %v6979_v54, %v6734_v2 }
 0x20b   :  { %1562 = vrot.lane.b32.xlu1 %v11187_v53, %s6202_s26  ;;  %v1270_v53 = vrot.slane %v7009_v8, 1 }
 0x20e   :  { %1690 = vrot.lane.b32.xlu0 %v11191_v31, %s6203_s6  ;;  %v1711_v31 = vrot.slane %v7022_v57, 2 }
 0x20f   :  { %1722 = vrot.lane.b32.xlu1 %v11190_v25, %s6203_s6  ;;  %v1197_v25 = vmul.f32 %v6816_v32, %v6732_v39  ;;  %v1638_v32 = vmul.f32 %v6834_v44, %v6732_v39 }
 0x211   :  { %v1205_v37 = vrot.slane %v1197_v25, 1  ;;  %v1646_v25 = vrot.slane %v1638_v32, 2 }
 0x212   :  { %1277 = vrot.lane.b32.xlu0 %v1270_v53, %s6203_s6 }
 0x213   :  { %1051 = vrot.lane.b32.xlu1 %v1047_v26, %s6202_s26  ;;  %v1207_v15 = vsel %vm924_vm6, %v1205_v37, %v1206_v4  ;;  %v1648_v4 = vsel %vm1365_vm7, %v1646_v25, %v1647_v62  ;;  %v1237_v26 = vrot.slane %v1229_v7, 1  ;;  %v1670_v37 = vmul.f32 %v6871_v12, %v6732_v39 }
 0x214   :  { %v11307_v62 = vrot.slane %v6863_v36, 1  ;;  %v11311_v25 = vrot.slane %v6883_v45, 2  ;;  %v1231_v45 = vmul.f32 %v6842_v51, %v6738_v46 }
 0x215   :  { %v1678_v32 = vrot.slane %v1670_v37, 2 }
 0x216   :  { %1718 = vrot.lane.b32.xlu0 %v1711_v31, %s6203_s6 }
 0x217   :  { %1055 = vrot.lane.b32.xlu1 %v1050_v58, %s6202_s26  ;;  %v1486_v58 = vrot.slane %v1478_v17, 2  ;;  %v1680_v7 = vsel %vm1365_vm7, %v1678_v32, %v11311_v25  ;;  %v1510_v32 = vmul.f32 %v6945_v19, %v6732_v39  ;;  %v530_v25 = vstv %s526_s5 }
 0x218   :  { %v7049_v47 = vpop.permute.xlu0 %664 }
 0x219   :  { %v7047_v9 = vpop.permute.xlu1 %666  ;;  %v1488_v6 = vsel %vm1365_vm7, %v1486_v58, %v1487_v63  ;;  %v1239_v63 = vsel %vm924_vm6, %v1237_v26, %v11307_v62  ;;  %v1071_v58 = vmul.f32 %v6891_v5, %v6738_v46  ;;  %v11314_v26 = vrot.slane %v6907_v50, 1 }
 0x21a   :  { %1211 = vrot.lane.b32.xlu0 %v1207_v15, %s6203_s6  ;;  %v11310_v15 = vrot.slane %v6887_v59, 2  ;;  %v1263_v62 = vmul.f32 %v6925_v10, %v6738_v46  ;;  %v1240_v50 = vrot.slane %v1231_v45, 1  ;;  %v11323_v45 = vrot.slane %v6937_v23, 1 }
 0x21b   :  { %1215 = vrot.lane.b32.xlu1 %v1210_v43, %s6203_s6  ;;  %v1069_v43 = vmul.f32 %v6891_v5, %v6732_v39  ;;  %v1080_v5 = vrot.slane %v1071_v58, 1  ;;  %v1542_v58 = vmul.f32 %v6943_v24, %v6732_v39 }
 0x21c   :  { %v7065_v35 = vpop.permute.xlu0 %690  ;;  %v1651_v36 = vsel %vm1365_vm7, %v1649_v30, %v11310_v15 }
 0x21d   :  { %v7063_v3 = vpop.permute.xlu1 %668  ;;  %11304 = vst [vmem:[#allocation24_spill] sm:$0xff] %v7065_v35  ;;  %v1077_v27 = vrot.slane %v1069_v43, 1 }
 0x21e   :  { %11303 = vst [vmem:[#allocation23_spill] sm:$0xff] %v7063_v3  ;;  %1652 = vrot.lane.b32.xlu0 %v1648_v4, %s6203_s6 }
 0x21f   :  { %1492 = vrot.lane.b32.xlu1 %v1488_v6, %s6202_s26  ;;  %v1103_v6 = vmul.f32 %v6889_v61, %v6738_v46  ;;  %v1079_v37 = vsel %vm924_vm6, %v1077_v27, %v11314_v26  ;;  %v11315_v61 = vrot.slane %v6903_v42, 1  ;;  %v11318_v42 = vrot.slane %v6923_v60, 1 }
 0x220   :  { %v7081_v44 = vpop.permute.xlu0 %694  ;;  %v11322_v60 = vrot.slane %v6941_v14, 1 }
 0x221   :  { %v7079_v17 = vpop.permute.xlu1 %670  ;;  %11306 = vst [vmem:[#allocation26_spill] sm:$0xff] %v7081_v44  ;;  %v1112_v30 = vrot.slane %v1103_v6, 1  ;;  %v1082_v43 = vsel %vm924_vm6, %v1080_v5, %v11318_v42  ;;  %v1512_v6 = vmul.f32 %v6945_v19, %v6738_v46  ;;  %v532_v5 = vmul.f32 %v530_v25, %v6683_v29 }
 0x222   :  { %11305 = vst [vmem:[#allocation25_spill] sm:$0xff] %v7079_v17  ;;  %1243 = vrot.lane.b32.xlu0 %v1239_v63, %s6203_s6  ;;  %v1242_v21 = vsel %vm924_vm6, %v1240_v50, %v11322_v60  ;;  %v11326_v29 = vrot.slane %v6961_v0, 2  ;;  %v531_v50 = vmul.f32 %v530_v25, %v6681_v28  ;;  %v11327_v42 = vrot.slane %v6957_v55, 2 }
 0x223   :  { %1496 = vrot.lane.b32.xlu1 %v1491_v52, %s6202_s26  ;;  %v1111_v52 = vsel %vm924_vm6, %v1109_v56, %v11315_v61  ;;  %v1114_v15 = vsel %vm924_vm6, %v1112_v30, %v11319_v34  ;;  %v1518_v56 = vrot.slane %v1510_v32, 2  ;;  %v1544_v61 = vmul.f32 %v6943_v24, %v6738_v46 }
 0x224   :  { %v7097_v13 = vpop.permute.xlu0 %716  ;;  %v1521_v19 = vrot.slane %v1512_v6, 2  ;;  %v1704_v24 = vmul.f32 %v6979_v54, %v6738_v46  ;;  %v1261_v55 = vmul.f32 %v6925_v10, %v6732_v39  ;;  %v534_v60 = vmul.f32 %v530_v25, %v6689_v49 }
 0x225   :  { %v7095_v38 = vpop.permute.xlu1 %692  ;;  %11309 = vst [vmem:[#allocation28_spill] sm:$0xff] %v7097_v13  ;;  %v1520_v23 = vsel %vm1365_vm7, %v1518_v56, %v11326_v29  ;;  %v1553_v34 = vrot.slane %v1544_v61, 2  ;;  %v11331_v6 = vrot.slane %v6973_v40, 2  ;;  %v11333_v10 = vrot.slane %v6995_v1, 2 }
 0x226   :  { %11308 = vst [vmem:[#allocation27_spill] sm:$0xff] %v7095_v38  ;;  %1684 = vrot.lane.b32.xlu0 %v1680_v7, %s6203_s6  ;;  %v1713_v28 = vrot.slane %v1704_v24, 2  ;;  %v1269_v61 = vrot.slane %v1261_v55, 1  ;;  %v1702_v29 = vmul.f32 %v6979_v54, %v6732_v39 }
 0x227   :  { %1656 = vrot.lane.b32.xlu1 %v1651_v36, %s6203_s6  ;;  %v1272_v36 = vrot.slane %v1263_v62, 1  ;;  %v1672_v62 = vmul.f32 %v6871_v12, %v6738_v46  ;;  %v11330_v12 = vrot.slane %v6977_v41, 2  ;;  %v1847_v41 = vstv %s5871_s13  ;;  %s5921_s13 = sld [smem:[#allocation8 + $0x14]] }
 0x228   :  { %v7114_v4 = vpop.permute.xlu0 %720  ;;  %s6030_s12 = spop %6029 }
 0x229   :  { %v7112_v59 = vpop.permute.xlu1 %696  ;;  %11313 = vst [vmem:[#allocation30_spill] sm:$0xff] %v7114_v4  ;;  %v1274_v26 = vsel %vm924_vm6, %v1272_v36, %v11323_v45  ;;  %v1523_v36 = vsel %vm1365_vm7, %v1521_v19, %v11330_v12  ;;  %s598_s5 = smul.f32 %s6030_s12, %s5820_s11  ;;  %s8174_s11 = sld [smem:[#allocation8 + $0x6]] }
 0x22a   :  { %11312 = vst [vmem:[#allocation29_spill] sm:$0xff] %v7112_v59  ;;  %1115 = vrot.lane.b32.xlu0 %v1111_v52, %s6202_s26  ;;  %v535_v52 = vstv %s529_s0  ;;  %s5916_s0 = sld [smem:[#allocation8 + $0x13]]  ;;  %s8176_s12 = sld [smem:[#allocation8 + $0x1e]] }
 0x22b   :  { %1083 = vrot.lane.b32.xlu1 %v1079_v37, %s6202_s26  ;;  %v1550_v37 = vrot.slane %v1542_v58, 2  ;;  %v537_v32 = vadd.f32 %v535_v52, %v532_v5  ;;  %v1681_v58 = vrot.slane %v1672_v62, 2  ;;  %v1555_v5 = vsel %vm1365_vm7, %v1553_v34, %v11331_v6  ;;  %s600_s28 = smul.f32 %s598_s5, %s6814_s15 }
 0x22c   :  { %v7131_v51 = vpop.permute.xlu0 %742  ;;  %v539_v19 = vadd.f32 %v535_v52, %v534_v60 }
 0x22d   :  { %v7129_v63 = vpop.permute.xlu1 %718  ;;  %11317 = vst [vmem:[#allocation32_spill] sm:$0xff] %v7131_v51  ;;  %v545_v56 = vmul.f32 0.01, %v537_v32  ;;  %vm541_vm8 = vcmp.ge.f32.partialorder %v537_v32, 0.0  ;;  %v1683_v49 = vsel %vm1365_vm7, %v1681_v58, %v11333_v10  ;;  %v7355_v51 = vstv %s5901_s4  ;;  %s601_s15 = ssub.f32 %s5821_s23, %s600_s28  ;;  %s5937_s4 = sld [smem:[#allocation8 + $0x32]] }
 0x22e   :  { %11316 = vst [vmem:[#allocation31_spill] sm:$0xff] %v7129_v63  ;;  %1119 = vrot.lane.b32.xlu0 %v1114_v15, %s6202_s26  ;;  %v547_v34 = vmul.f32 0.01, %v539_v19  ;;  %vm543_vm10 = vcmp.ge.f32.partialorder %v539_v19, 0.0  ;;  %s5834_s23 = sld [smem:[#allocation8 + $0x53]]  ;;  %s8198_s28 = sld [smem:[#allocation8 + $0x55]] }
 0x22f   :  { %1087 = vrot.lane.b32.xlu1 %v1082_v43, %s6202_s26  ;;  %v1552_v43 = vsel %vm1365_vm7, %v1550_v37, %v11327_v42  ;;  %v11334_v37 = vrot.slane %v6991_v18, 2  ;;  %v7207_v24 = vsel %vm541_vm8, %v537_v32, %v545_v56  ;;  %v1710_v42 = vrot.slane %v1702_v29, 2 }
 0x230   :  { %v7147_v27 = vpop.permute.xlu0 %746  ;;  %11335 = vst [vmem:[#allocation40_spill] sm:$0xff] %v7207_v24 }
 0x231   :  { %v7145_v7 = vpop.permute.xlu1 %722  ;;  %11321 = vst [vmem:[#allocation34_spill] sm:$0xff] %v7147_v27  ;;  %v1715_v40 = vsel %vm1365_vm7, %v1713_v28, %v11334_v37  ;;  %v1712_v8 = vsel %vm1365_vm7, %v1710_v42, %v1711_v31 }
 0x232   :  { %11320 = vst [vmem:[#allocation33_spill] sm:$0xff] %v7145_v7  ;;  %1279 = vrot.lane.b32.xlu0 %v1274_v26, %s6203_s6 }
 0x233   :  { %1247 = vrot.lane.b32.xlu1 %v1242_v21, %s6203_s6  ;;  %v536_v21 = vadd.f32 %v535_v52, %v531_v50  ;;  %v1849_v50 = vmul.f32 %v1847_v41, %v7207_v24 }
 0x234   :  { %v7164_v30 = vpop.permute.xlu0 %768 }
 0x235   :  { %v7162_v14 = vpop.permute.xlu1 %744  ;;  %11325 = vst [vmem:[#allocation36_spill] sm:$0xff] %v7164_v30  ;;  %v544_v62 = vmul.f32 0.01, %v536_v21  ;;  %vm540_vm9 = vcmp.ge.f32.partialorder %v536_v21, 0.0 }
 0x236   :  { %11324 = vst [vmem:[#allocation35_spill] sm:$0xff] %v7162_v14  ;;  %1556 = vrot.lane.b32.xlu0 %v1552_v43, %s6202_s26  ;;  %v1977_v43 = vstv %s5876_s14  ;;  %s5917_s14 = sld [smem:[#allocation8 + $0x2e]] }
 0x237   :  { %1524 = vrot.lane.b32.xlu1 %v1520_v23, %s6202_s26  ;;  %v533_v23 = vmul.f32 %v530_v25, %v6687_v48  ;;  %v7216_v48 = vsel %vm540_vm9, %v536_v21, %v544_v62  ;;  %v1271_v25 = vsel %vm924_vm6, %v1269_v61, %v1270_v53  ;;  %v1979_v37 = vmul.f32 %v1977_v43, %v7207_v24 }
 0x238   :  { %v7181_v15 = vpop.permute.xlu0 %772  ;;  %11338 = vst [vmem:[#allocation43_spill] sm:$0xff] %v7216_v48  ;;  %v1848_v55 = vmul.f32 %v1847_v41, %v7216_v48  ;;  %v2003_v61 = vstv %s5877_s3  ;;  %s5918_s3 = sld [smem:[#allocation8 + $0x49]] }
 0x239   :  { %v7179_v0 = vpop.permute.xlu1 %748  ;;  %11329 = vst [vmem:[#allocation38_spill] sm:$0xff] %v7181_v15  ;;  %v538_v54 = vadd.f32 %v535_v52, %v533_v23  ;;  %v7228_v52 = vsel %vm543_vm10, %v539_v19, %v547_v34  ;;  %v2004_v19 = vmul.f32 %v2003_v61, %v7216_v48 }
 0x23a   :  { %11328 = vst [vmem:[#allocation37_spill] sm:$0xff] %v7179_v0  ;;  %1560 = vrot.lane.b32.xlu0 %v1555_v5, %s6202_s26  ;;  %11340 = vst [vmem:[#allocation45_spill] sm:$0xff] %v7228_v52  ;;  %v1851_v60 = vmul.f32 %v1847_v41, %v7228_v52  ;;  %v1981_v6 = vmul.f32 %v1977_v43, %v7228_v52  ;;  %v1873_v5 = vstv %s5872_s1  ;;  %s5922_s1 = sld [smem:[#allocation8 + $0x2f]] }
 0x23b   :  { %1528 = vrot.lane.b32.xlu1 %v1523_v36, %s6202_s26  ;;  %v1978_v36 = vmul.f32 %v1977_v43, %v7216_v48  ;;  %v546_v58 = vmul.f32 0.01, %v538_v54  ;;  %vm542_vm11 = vcmp.ge.f32.partialorder %v538_v54, 0.0  ;;  %v1874_v42 = vmul.f32 %v1873_v5, %v7216_v48 }
 0x23c   :  { %v7196_v26 = vpop.permute.xlu0 %794 }
 0x23d   :  { %v7194_v45 = vpop.permute.xlu1 %770  ;;  %v7241_v21 = vsel %vm542_vm11, %v538_v54, %v546_v58  ;;  %v1877_v54 = vmul.f32 %v1873_v5, %v7228_v52  ;;  %v1899_v58 = vstv %s5873_s30  ;;  %s5923_s30 = sld [smem:[#allocation8 + $0x4a]] }
 0x23e   :  { %11332 = vst [vmem:[#allocation39_spill] sm:$0xff] %v7194_v45  ;;  %1720 = vrot.lane.b32.xlu0 %v1715_v40, %s6203_s6  ;;  %11343 = vst [vmem:[#allocation48_spill] sm:$0xff] %v7241_v21  ;;  %v1850_v56 = vmul.f32 %v1847_v41, %v7241_v21  ;;  %v1875_v40 = vmul.f32 %v1873_v5, %v7207_v24  ;;  %v1980_v23 = vmul.f32 %v1977_v43, %v7241_v21 }
 0x23f   :  { %1688 = vrot.lane.b32.xlu1 %v1683_v49, %s6203_s6  ;;  %v7333_v45 = vstv %s5891_s17  ;;  %s5951_s17 = sld [smem:[#allocation8 + $0x1a]] }
 0x240   :  { %v7213_v18 = vpop.permute.xlu0 %798  ;;  %v7347_v27 = vmul.f32 %v7333_v45, %v7207_v24  ;;  %v7351_v14 = vmul.f32 %v7333_v45, %v7228_v52 }
 0x241   :  { %v7211_v1 = vpop.permute.xlu1 %774  ;;  %11337 = vst [vmem:[#allocation42_spill] sm:$0xff] %v7213_v18 }
 0x242   :  { %11336 = vst [vmem:[#allocation41_spill] sm:$0xff] %v7211_v1  ;;  %1858 = vrot.lane.b32.xlu0 %v1849_v50, %s6202_s26  ;;  %v1903_v1 = vmul.f32 %v1899_v58, %v7228_v52 }
 0x243   :  { %1275 = vrot.lane.b32.xlu1 %v1271_v25, %s6203_s6  ;;  %v1876_v25 = vmul.f32 %v1873_v5, %v7241_v21 }
 0x244   :  { %v7225_v12 = vpop.permute.xlu0 %820 }
 0x245   :  { %v7223_v32 = vpop.permute.xlu1 %796  ;;  %11339 = vst [vmem:[#allocation44_spill] sm:$0xff] %v7225_v12 }
 0x246   :  { %1986 = vrot.lane.b32.xlu0 %v1978_v36, %s6203_s6  ;;  %v2007_v36 = vmul.f32 %v2003_v61, %v7228_v52 }
 0x247   :  { %1716 = vrot.lane.b32.xlu1 %v1712_v8, %s6203_s6 }
 0x248   :  { %v7237_v28 = vpop.permute.xlu0 %824 }
 0x249   :  { %v7235_v53 = vpop.permute.xlu1 %800  ;;  %11342 = vst [vmem:[#allocation47_spill] sm:$0xff] %v7237_v28 }
 0x24a   :  { %11341 = vst [vmem:[#allocation46_spill] sm:$0xff] %v7235_v53  ;;  %1862 = vrot.lane.b32.xlu0 %v1851_v60, %s6202_s26  ;;  %v2005_v60 = vmul.f32 %v2003_v61, %v7207_v24 }
 0x24b   :  { %1856 = vrot.lane.b32.xlu1 %v1848_v55, %s6202_s26 }
 0x24c   :  { %v7247_v57 = vpop.permute.xlu0 %846 }
 0x24d   :  { %v7245_v31 = vpop.permute.xlu1 %822  ;;  %11345 = vst [vmem:[#allocation50_spill] sm:$0xff] %v7247_v57  ;;  %v7395_v57 = vmul.f32 %v7355_v51, %v7228_v52 }
 0x24e   :  { %11344 = vst [vmem:[#allocation49_spill] sm:$0xff] %v7245_v31  ;;  %1992 = vrot.lane.b32.xlu0 %v1981_v6, %s6203_s6 }
 0x24f   :  { %1860 = vrot.lane.b32.xlu1 %v1850_v56, %s6202_s26  ;;  %v1900_v56 = vmul.f32 %v1899_v58, %v7216_v48  ;;  %v11201_v13 = vrot.slane %v7395_v57, 2 }
 0x250   :  { %v7255_v49 = vpop.permute.xlu0 %850 }
 0x251   :  { %v7253_v10 = vpop.permute.xlu1 %826  ;;  %11347 = vst [vmem:[#allocation52_spill] sm:$0xff] %v7255_v49  ;;  %v7373_v49 = vmul.f32 %v7355_v51, %v7207_v24 }
 0x252   :  { %11346 = vst [vmem:[#allocation51_spill] sm:$0xff] %v7253_v10  ;;  %1884 = vrot.lane.b32.xlu0 %v1875_v40, %s6202_s26  ;;  %v1902_v40 = vmul.f32 %v1899_v58, %v7241_v21 }
 0x253   :  { %1988 = vrot.lane.b32.xlu1 %v1979_v37, %s6203_s6  ;;  %v2006_v37 = vmul.f32 %v2003_v61, %v7241_v21  ;;  %v11199_v4 = vrot.slane %v7373_v49, 2 }
 0x254   :  { %v7263_v29 = vpop.permute.xlu0 %1053 }
 0x255   :  { %v7261_v41 = vpop.permute.xlu1 %848 }
 0x256   :  { %11348 = vst [vmem:[#allocation53_spill] sm:$0xff] %v7261_v41  ;;  %2012 = vrot.lane.b32.xlu0 %v2004_v19, %s6203_s6 }
 0x257   :  { %1990 = vrot.lane.b32.xlu1 %v1980_v23, %s6203_s6  ;;  %v2029_v23 = vstv %s5878_s10  ;;  %s5931_s10 = sld [smem:[#allocation8 + $0x16]] }
 0x258   :  { %v7271_v50 = vpop.permute.xlu0 %1057 }
 0x259   :  { %v7269_v62 = vpop.permute.xlu1 %852  ;;  %11350 = vst [vmem:[#allocation55_spill] sm:$0xff] %v7271_v50 }
 0x25a   :  { %11349 = vst [vmem:[#allocation54_spill] sm:$0xff] %v7269_v62  ;;  %1888 = vrot.lane.b32.xlu0 %v1877_v54, %s6202_s26  ;;  %v1901_v54 = vmul.f32 %v1899_v58, %v7207_v24  ;;  %v2033_v58 = vmul.f32 %v2029_v23, %v7228_v52 }
 0x25b   :  { %1882 = vrot.lane.b32.xlu1 %v1874_v42, %s6202_s26 }
 0x25c   :  { %v7279_v34 = vpop.permute.xlu0 %1217 }
 0x25d   :  { %v7277_v43 = vpop.permute.xlu1 %1213  ;;  %11351 = vst [vmem:[#allocation56_spill] sm:$0xff] %v7279_v34 }
 0x25e   :  { %2018 = vrot.lane.b32.xlu0 %v2007_v36, %s6203_s6  ;;  %v7307_v36 = vstv %s5886_s16  ;;  %s5936_s16 = sld [smem:[#allocation8 + $0x17]] }
 0x25f   :  { %1886 = vrot.lane.b32.xlu1 %v1876_v25, %s6202_s26  ;;  %v2031_v25 = vmul.f32 %v2029_v23, %v7207_v24  ;;  %v7331_v15 = vmul.f32 %v7307_v36, %v7228_v52 }
 0x260   :  { %v7287_v55 = vpop.permute.xlu0 %1494 }
 0x261   :  { %v7285_v8 = vpop.permute.xlu1 %1654  ;;  %11353 = vst [vmem:[#allocation58_spill] sm:$0xff] %v7287_v55  ;;  %v11195_v0 = vrot.slane %v7331_v15, 1 }
 0x262   :  { %11352 = vst [vmem:[#allocation57_spill] sm:$0xff] %v7285_v8  ;;  %1908 = vrot.lane.b32.xlu0 %v1900_v56, %s6202_s26  ;;  %v2030_v56 = vmul.f32 %v2029_v23, %v7216_v48 }
 0x263   :  { %2014 = vrot.lane.b32.xlu1 %v2005_v60, %s6203_s6 }
 0x264   :  { %v7295_v5 = vpop.permute.xlu0 %1498 }
 0x265   :  { %v7293_v6 = vpop.permute.xlu1 %1245  ;;  %11355 = vst [vmem:[#allocation60_spill] sm:$0xff] %v7295_v5 }
 0x266   :  { %11354 = vst [vmem:[#allocation59_spill] sm:$0xff] %v7293_v6  ;;  %1912 = vrot.lane.b32.xlu0 %v1902_v40, %s6202_s26  ;;  %v7319_v40 = vmul.f32 %v7307_v36, %v7207_v24 }
 0x267   :  { %2016 = vrot.lane.b32.xlu1 %v2006_v37, %s6203_s6  ;;  %v2032_v37 = vmul.f32 %v2029_v23, %v7241_v21 }
 0x268   :  { %v7303_v42 = vpop.permute.xlu0 %1658  ;;  %v11194_v30 = vrot.slane %v7319_v40, 1 }
 0x269   :  { %v7301_v19 = vpop.permute.xlu1 %1686  ;;  %11357 = vst [vmem:[#allocation62_spill] sm:$0xff] %v7303_v42 }
 0x26a   :  { %11356 = vst [vmem:[#allocation61_spill] sm:$0xff] %v7301_v19  ;;  %2040 = vrot.lane.b32.xlu0 %v2031_v25, %s6203_s6 }
 0x26b   :  { %1910 = vrot.lane.b32.xlu1 %v1901_v54, %s6202_s26 }
 0x26c   :  { %v7313_v60 = vpop.permute.xlu0 %1085 }
 0x26d   :  { %v7311_v61 = vpop.permute.xlu1 %1117  ;;  %11359 = vst [vmem:[#allocation64_spill] sm:$0xff] %v7313_v60  ;;  %v7487_v60 = vstv %s5902_s25  ;;  %s8168_s25 = sld [smem:[#allocation8 + $0x1b]] }
 0x26e   :  { %11358 = vst [vmem:[#allocation63_spill] sm:$0xff] %v7311_v61  ;;  %2042 = vrot.lane.b32.xlu0 %v2032_v37, %s6203_s6  ;;  %v7507_v12 = vmul.f32 %v7487_v60, %v7207_v24  ;;  %v7527_v31 = vmul.f32 %v7487_v60, %v7228_v52 }
 0x26f   :  { %2038 = vrot.lane.b32.xlu1 %v2030_v56, %s6203_s6 }
 0x270   :  { %v7325_v25 = vpop.permute.xlu0 %1089  ;;  %v11213_v35 = vrot.slane %v7527_v31, 2 }
 0x271   :  { %v7323_v54 = vpop.permute.xlu1 %1121  ;;  %11361 = vst [vmem:[#allocation66_spill] sm:$0xff] %v7325_v25 }
 0x272   :  { %11360 = vst [vmem:[#allocation65_spill] sm:$0xff] %v7323_v54  ;;  %2244 = vrot.lane.b32.xlu0 %v11194_v30, %s6202_s26  ;;  %v11197_v54 = vrot.slane %v7351_v14, 1 }
 0x273   :  { %1914 = vrot.lane.b32.xlu1 %v1903_v1, %s6202_s26  ;;  %v7353_v1 = vstv %s5906_s2  ;;  %s5946_s2 = sld [smem:[#allocation8 + $0x19]] }
 0x274   :  { %v7341_v37 = vpop.permute.xlu0 %1249  ;;  %v7369_v62 = vmul.f32 %v7353_v1, %v7207_v24 }
 0x275   :  { %v7339_v56 = vpop.permute.xlu1 %1281  ;;  %11363 = vst [vmem:[#allocation68_spill] sm:$0xff] %v7341_v37  ;;  %v7421_v37 = vstv %s5887_s20  ;;  %s5952_s20 = sld [smem:[#allocation8 + $0x35]] }
 0x276   :  { %11362 = vst [vmem:[#allocation67_spill] sm:$0xff] %v7339_v56  ;;  %2248 = vrot.lane.b32.xlu0 %v11195_v0, %s6202_s26  ;;  %v11196_v56 = vrot.slane %v7347_v27, 1  ;;  %v11198_v7 = vrot.slane %v7369_v62, 2  ;;  %v7441_v28 = vmul.f32 %v7421_v37, %v7207_v24  ;;  %v7461_v42 = vmul.f32 %v7421_v37, %v7228_v52 }
 0x277   :  { %2044 = vrot.lane.b32.xlu1 %v2033_v58, %s6203_s6  ;;  %v7375_v58 = vstv %s5892_s18  ;;  %s5947_s18 = sld [smem:[#allocation8 + $0x34]] }
 0x278   :  { %v7363_v30 = vpop.permute.xlu0 %1526  ;;  %v7391_v61 = vmul.f32 %v7375_v58, %v7207_v24  ;;  %v11207_v59 = vrot.slane %v7461_v42, 1  ;;  %v7483_v44 = vmul.f32 %v7375_v58, %v7228_v52 }
 0x279   :  { %v7361_v23 = vpop.permute.xlu1 %1558  ;;  %11365 = vst [vmem:[#allocation70_spill] sm:$0xff] %v7363_v30  ;;  %v11205_v30 = vrot.slane %v7441_v28, 1 }
 0x27a   :  { %11364 = vst [vmem:[#allocation69_spill] sm:$0xff] %v7361_v23  ;;  %2408 = vrot.lane.b32.xlu0 %v11197_v54, %s6203_s6  ;;  %v11200_v41 = vrot.slane %v7391_v61, 1 }
 0x27b   :  { %2404 = vrot.lane.b32.xlu1 %v11196_v56, %s6203_s6  ;;  %v7397_v56 = vstv %s5907_s19  ;;  %s5932_s19 = sld [smem:[#allocation8 + $0x31]] }
 0x27c   :  { %v7385_v23 = vpop.permute.xlu0 %1530  ;;  %v7413_v63 = vmul.f32 %v7397_v56, %v7207_v24  ;;  %v7549_v18 = vmul.f32 %v7397_v56, %v7228_v52 }
 0x27d   :  { %v7383_v0 = vpop.permute.xlu1 %1562  ;;  %11367 = vst [vmem:[#allocation72_spill] sm:$0xff] %v7385_v23  ;;  %v7417_v23 = vmul.f32 %v7353_v1, %v7228_v52 }
 0x27e   :  { %11366 = vst [vmem:[#allocation71_spill] sm:$0xff] %v7383_v0  ;;  %2684 = vrot.lane.b32.xlu0 %v11199_v4, %s6202_s26  ;;  %v11215_v53 = vrot.slane %v7549_v18, 2 }
 0x27f   :  { %2844 = vrot.lane.b32.xlu1 %v11198_v7, %s6203_s6  ;;  %v7419_v7 = vstv %s5888_s21  ;;  %v11203_v25 = vrot.slane %v7417_v23, 2  ;;  %s5933_s21 = sld [smem:[#allocation8 + $0x4c]] }
 0x280   :  { %v7407_v0 = vpop.permute.xlu0 %1690  ;;  %v7437_v19 = vmul.f32 %v7419_v7, %v7207_v24  ;;  %v7457_v10 = vmul.f32 %v7419_v7, %v7228_v52 }
 0x281   :  { %v7405_v54 = vpop.permute.xlu1 %1722  ;;  %11369 = vst [vmem:[#allocation74_spill] sm:$0xff] %v7407_v0  ;;  %v11202_v0 = vrot.slane %v7413_v63, 2 }
 0x282   :  { %11368 = vst [vmem:[#allocation73_spill] sm:$0xff] %v7405_v54  ;;  %2688 = vrot.lane.b32.xlu0 %v11201_v13, %s6202_s26  ;;  %v11206_v5 = vrot.slane %v7457_v10, 1 }
 0x283   :  { %2436 = vrot.lane.b32.xlu1 %v11200_v41, %s6203_s6 }
 0x284   :  { %v7431_v54 = vpop.permute.xlu0 %1277 }
 0x285   :  { %v7429_v4 = vpop.permute.xlu1 %1051  ;;  %11371 = vst [vmem:[#allocation76_spill] sm:$0xff] %v7431_v54  ;;  %v11204_v54 = vrot.slane %v7437_v19, 1 }
 0x286   :  { %11370 = vst [vmem:[#allocation75_spill] sm:$0xff] %v7429_v4  ;;  %2848 = vrot.lane.b32.xlu0 %v11203_v25, %s6203_s6 }
 0x287   :  { %2876 = vrot.lane.b32.xlu1 %v11202_v0, %s6203_s6  ;;  %v7463_v0 = vstv %s5893_s22  ;;  %s5938_s22 = sld [smem:[#allocation8 + $0x4d]] }
 0x288   :  { %v7451_v13 = vpop.permute.xlu0 %1718  ;;  %v7479_v6 = vmul.f32 %v7463_v0, %v7228_v52  ;;  %v7567_v38 = vmul.f32 %v7463_v0, %v7207_v24 }
 0x289   :  { %v7449_v41 = vpop.permute.xlu1 %1055  ;;  %11373 = vst [vmem:[#allocation78_spill] sm:$0xff] %v7451_v13 }
 0x28a   :  { %11372 = vst [vmem:[#allocation77_spill] sm:$0xff] %v7449_v41  ;;  %2276 = vrot.lane.b32.xlu0 %v11205_v30, %s6202_s26  ;;  %v11208_v34 = vrot.slane %v7479_v6, 1  ;;  %v11209_v41 = vrot.slane %v7483_v44, 1 }
 0x28b   :  { %2308 = vrot.lane.b32.xlu1 %v11204_v54, %s6202_s26  ;;  %v7485_v54 = vstv %s5903_s24  ;;  %s8160_s24 = sld [smem:[#allocation8]] }
 0x28c   :  { %v7473_v13 = vpop.permute.xlu0 %1211  ;;  %v7503_v50 = vmul.f32 %v7485_v54, %v7207_v24  ;;  %v7523_v8 = vmul.f32 %v7485_v54, %v7228_v52 }
 0x28d   :  { %v7471_v25 = vpop.permute.xlu1 %1215  ;;  %11375 = vst [vmem:[#allocation80_spill] sm:$0xff] %v7473_v13 }
 0x28e   :  { %11374 = vst [vmem:[#allocation79_spill] sm:$0xff] %v7471_v25  ;;  %2280 = vrot.lane.b32.xlu0 %v11207_v59, %s6202_s26 }
 0x28f   :  { %2312 = vrot.lane.b32.xlu1 %v11206_v5, %s6202_s26 }
 0x290   :  { %v7497_v25 = vpop.permute.xlu0 %1652 }
 0x291   :  { %v7495_v30 = vpop.permute.xlu1 %1492  ;;  %11377 = vst [vmem:[#allocation82_spill] sm:$0xff] %v7497_v25  ;;  %v11210_v25 = vrot.slane %v7503_v50, 2 }
 0x292   :  { %11376 = vst [vmem:[#allocation81_spill] sm:$0xff] %v7495_v30  ;;  %2440 = vrot.lane.b32.xlu0 %v11209_v41, %s6203_s6  ;;  %v11211_v30 = vrot.slane %v7507_v12, 2 }
 0x293   :  { %2472 = vrot.lane.b32.xlu1 %v11208_v34, %s6203_s6  ;;  %v7529_v34 = vstv %s5908_s27  ;;  %s8170_s27 = sld [smem:[#allocation8 + $0x3]] }
 0x294   :  { %v7517_v59 = vpop.permute.xlu0 %1243  ;;  %v7545_v55 = vmul.f32 %v7529_v34, %v7228_v52 }
 0x295   :  { %v7515_v5 = vpop.permute.xlu1 %1496  ;;  %11379 = vst [vmem:[#allocation84_spill] sm:$0xff] %v7517_v59 }
 0x296   :  { %11378 = vst [vmem:[#allocation83_spill] sm:$0xff] %v7515_v5  ;;  %2716 = vrot.lane.b32.xlu0 %v11211_v30, %s6202_s26  ;;  %v11212_v5 = vrot.slane %v7523_v8, 2 }
 0x297   :  { %2748 = vrot.lane.b32.xlu1 %v11210_v25, %s6202_s26  ;;  %v2228_v25 = vmul.f32 %v7307_v36, %v7216_v48 }
 0x298   :  { %v7539_v59 = vpop.permute.xlu0 %1684 }
 0x299   :  { %v7537_v41 = vpop.permute.xlu1 %1656  ;;  %11381 = vst [vmem:[#allocation86_spill] sm:$0xff] %v7539_v59  ;;  %v2236_v3 = vrot.slane %v2228_v25, 1  ;;  %v7584_v25 = vmul.f32 %v7529_v34, %v7207_v24 }
 0x29a   :  { %11380 = vst [vmem:[#allocation85_spill] sm:$0xff] %v7537_v41  ;;  %2720 = vrot.lane.b32.xlu0 %v11213_v35, %s6202_s26  ;;  %v11214_v41 = vrot.slane %v7545_v55, 2 }
 0x29b   :  { %2752 = vrot.lane.b32.xlu1 %v11212_v5, %s6202_s26  ;;  %v2230_v5 = vmul.f32 %v7307_v36, %v7241_v21  ;;  %v11386_v36 = vrot.slane %v7319_v40, 1  ;;  %v11217_v40 = vrot.slane %v7584_v25, 2 }
 0x29c   :  { %v7561_v59 = vpop.permute.xlu0 %1115 }
 0x29d   :  { %v7559_v30 = vpop.permute.xlu1 %1083  ;;  %11383 = vst [vmem:[#allocation88_spill] sm:$0xff] %v7561_v59  ;;  %v2238_v17 = vsel %vm924_vm6, %v2236_v3, %v11386_v36  ;;  %v2239_v13 = vrot.slane %v2230_v5, 1  ;;  %v2668_v3 = vmul.f32 %v7355_v51, %v7216_v48  ;;  %v11389_v5 = vrot.slane %v7331_v15, 1 }
 0x29e   :  { %11382 = vst [vmem:[#allocation87_spill] sm:$0xff] %v7559_v30  ;;  %2880 = vrot.lane.b32.xlu0 %v11215_v53, %s6203_s6  ;;  %v11216_v30 = vrot.slane %v7567_v38, 1  ;;  %v2388_v53 = vmul.f32 %v7333_v45, %v7216_v48  ;;  %v2670_v15 = vmul.f32 %v7355_v51, %v7241_v21  ;;  %v11396_v51 = vrot.slane %v7373_v49, 2 }
 0x29f   :  { %2912 = vrot.lane.b32.xlu1 %v11214_v41, %s6203_s6  ;;  %v2390_v41 = vmul.f32 %v7333_v45, %v7241_v21  ;;  %v2241_v36 = vsel %vm924_vm6, %v2239_v13, %v11389_v5  ;;  %v11392_v13 = vrot.slane %v7351_v14, 1 }
 0x2a0   :  { %v7579_v59 = vpop.permute.xlu0 %1119  ;;  %v2396_v4 = vrot.slane %v2388_v53, 1 }
 0x2a1   :  { %v7577_v35 = vpop.permute.xlu1 %1087  ;;  %11385 = vst [vmem:[#allocation90_spill] sm:$0xff] %v7579_v59  ;;  %v2399_v45 = vrot.slane %v2390_v41, 1  ;;  %v11393_v41 = vrot.slane %v7347_v27, 1  ;;  %v11397_v27 = vrot.slane %v7369_v62, 2  ;;  %v11400_v62 = vrot.slane %v7395_v57, 2 }
 0x2a2   :  { %11384 = vst [vmem:[#allocation89_spill] sm:$0xff] %v7577_v35  ;;  %2468 = vrot.lane.b32.xlu0 %v11216_v30, %s6203_s6 }
 0x2a3   :  { %2242 = vrot.lane.b32.xlu1 %v2238_v17, %s6202_s26  ;;  %v2828_v17 = vmul.f32 %v7353_v1, %v7216_v48  ;;  %v2401_v53 = vsel %vm924_vm6, %v2399_v45, %v11392_v13  ;;  %v2398_v5 = vsel %vm924_vm6, %v2396_v4, %v11393_v41  ;;  %v2679_v45 = vrot.slane %v2670_v15, 2 }
 0x2a4   :  { %v7599_v35 = vpop.permute.xlu0 %1279  ;;  %v2830_v13 = vmul.f32 %v7353_v1, %v7241_v21  ;;  %v11401_v1 = vrot.slane %v7391_v61, 1  ;;  %v2262_v61 = vmul.f32 %v7421_v37, %v7241_v21 }
 0x2a5   :  { %v7597_v59 = vpop.permute.xlu1 %1247  ;;  %11388 = vst [vmem:[#allocation92_spill] sm:$0xff] %v7599_v35  ;;  %v2681_v15 = vsel %vm1365_vm7, %v2679_v45, %v11400_v62  ;;  %v2294_v62 = vmul.f32 %v7419_v7, %v7241_v21 }
 0x2a6   :  { %11387 = vst [vmem:[#allocation91_spill] sm:$0xff] %v7597_v59  ;;  %2908 = vrot.lane.b32.xlu0 %v11217_v40, %s6203_s6  ;;  %v2676_v59 = vrot.slane %v2668_v3, 2  ;;  %v2420_v40 = vmul.f32 %v7375_v58, %v7216_v48 }
 0x2a7   :  { %2246 = vrot.lane.b32.xlu1 %v2241_v36, %s6202_s26  ;;  %v2836_v36 = vrot.slane %v2828_v17, 2 }
 0x2a8   :  { %v7615_v35 = vpop.permute.xlu0 %1556  ;;  %v2678_v14 = vsel %vm1365_vm7, %v2676_v59, %v11396_v51  ;;  %v2428_v17 = vrot.slane %v2420_v40, 1  ;;  %v2260_v40 = vmul.f32 %v7421_v37, %v7216_v48  ;;  %v2292_v51 = vmul.f32 %v7419_v7, %v7216_v48 }
 0x2a9   :  { %v7613_v30 = vpop.permute.xlu1 %1524  ;;  %11391 = vst [vmem:[#allocation94_spill] sm:$0xff] %v7615_v35  ;;  %v2838_v4 = vsel %vm1365_vm7, %v2836_v36, %v11397_v27  ;;  %v11403_v27 = vrot.slane %v7417_v23, 2  ;;  %v11408_v7 = vrot.slane %v7437_v19, 1 }
 0x2aa   :  { %11390 = vst [vmem:[#allocation93_spill] sm:$0xff] %v7613_v30  ;;  %2402 = vrot.lane.b32.xlu0 %v2398_v5, %s6203_s6  ;;  %v2430_v41 = vsel %vm924_vm6, %v2428_v17, %v11401_v1  ;;  %v2839_v5 = vrot.slane %v2830_v13, 2  ;;  %v2268_v45 = vrot.slane %v2260_v40, 1  ;;  %v11404_v17 = vrot.slane %v7413_v63, 2 }
 0x2ab   :  { %2406 = vrot.lane.b32.xlu1 %v2401_v53, %s6203_s6  ;;  %v2860_v53 = vmul.f32 %v7397_v56, %v7216_v48  ;;  %v2422_v63 = vmul.f32 %v7375_v58, %v7241_v21  ;;  %v11407_v40 = vrot.slane %v7441_v28, 1  ;;  %v11411_v28 = vrot.slane %v7461_v42, 1 }
 0x2ac   :  { %v7631_v35 = vpop.permute.xlu0 %1560  ;;  %v602_v42 = vstv %s598_s5  ;;  %s8178_s5 = sld [smem:[#allocation8 + $0x21]] }
 0x2ad   :  { %v7629_v3 = vpop.permute.xlu1 %1528  ;;  %11395 = vst [vmem:[#allocation96_spill] sm:$0xff] %v7631_v35  ;;  %v2868_v36 = vrot.slane %v2860_v53, 2  ;;  %v2300_v53 = vrot.slane %v2292_v51, 1  ;;  %v2270_v1 = vsel %vm924_vm6, %v2268_v45, %v11407_v40  ;;  %v2431_v19 = vrot.slane %v2422_v63, 1 }
 0x2ae   :  { %11394 = vst [vmem:[#allocation95_spill] sm:$0xff] %v7629_v3  ;;  %2842 = vrot.lane.b32.xlu0 %v2838_v4, %s6203_s6  ;;  %v2841_v4 = vsel %vm1365_vm7, %v2839_v5, %v11403_v27  ;;  %v2303_v5 = vrot.slane %v2294_v62, 1  ;;  %v11415_v63 = vrot.slane %v7483_v44, 1 }
 0x2af   :  { %2682 = vrot.lane.b32.xlu1 %v2678_v14, %s6202_s26  ;;  %v2870_v13 = vsel %vm1365_vm7, %v2868_v36, %v11404_v17  ;;  %v2454_v36 = vmul.f32 %v7463_v0, %v7241_v21  ;;  %v2700_v17 = vmul.f32 %v7487_v60, %v7216_v48 }
 0x2b0   :  { %v7647_v59 = vpop.permute.xlu0 %1720  ;;  %v2433_v40 = vsel %vm924_vm6, %v2431_v19, %v11415_v63  ;;  %v2452_v63 = vmul.f32 %v7463_v0, %v7216_v48  ;;  %v11426_v0 = vrot.slane %v7549_v18, 2  ;;  %v605_v18 = vmul.f32 %v602_v42, %v6602_v20 }
 0x2b1   :  { %v7645_v49 = vpop.permute.xlu1 %1688  ;;  %11399 = vst [vmem:[#allocation98_spill] sm:$0xff] %v7647_v59 }
 0x2b2   :  { %11398 = vst [vmem:[#allocation97_spill] sm:$0xff] %v7645_v49  ;;  %2434 = vrot.lane.b32.xlu0 %v2430_v41, %s6203_s6  ;;  %v2302_v41 = vsel %vm924_vm6, %v2300_v53, %v11408_v7 }
 0x2b3   :  { %2686 = vrot.lane.b32.xlu1 %v2681_v15, %s6202_s26  ;;  %v2271_v15 = vrot.slane %v2262_v61, 1  ;;  %v11412_v61 = vrot.slane %v7457_v10, 1  ;;  %v2702_v10 = vmul.f32 %v7487_v60, %v7241_v21  ;;  %v604_v60 = vmul.f32 %v602_v42, %v6596_v16 }
 0x2b4   :  { %v7663_v14 = vpop.permute.xlu0 %1858  ;;  %v2894_v16 = vmul.f32 %v7529_v34, %v7241_v21 }
 0x2b5   :  { %v7661_v57 = vpop.permute.xlu1 %1275  ;;  %v2273_v45 = vsel %vm924_vm6, %v2271_v15, %v11411_v28  ;;  %v2305_v27 = vsel %vm924_vm6, %v2303_v5, %v11412_v61  ;;  %v2734_v15 = vmul.f32 %v7485_v54, %v7241_v21  ;;  %v2711_v44 = vrot.slane %v2702_v10, 2 }
 0x2b6   :  { %11402 = vst [vmem:[#allocation99_spill] sm:$0xff] %v7661_v57  ;;  %2874 = vrot.lane.b32.xlu0 %v2870_v13, %s6203_s6  ;;  %v2732_v13 = vmul.f32 %v7485_v54, %v7216_v48  ;;  %v11418_v61 = vrot.slane %v7507_v12, 2  ;;  %v11422_v12 = vrot.slane %v7527_v31, 2  ;;  %v606_v31 = vmul.f32 %v602_v42, %v6604_v22 }
 0x2b7   :  { %2846 = vrot.lane.b32.xlu1 %v2841_v4, %s6203_s6  ;;  %v2463_v4 = vrot.slane %v2454_v36, 1  ;;  %v607_v36 = vstv %s601_s15  ;;  %s8207_s15 = sld [smem:[#allocation8 + $0x4f]] }
 0x2b8   :  { %v7679_v23 = vpop.permute.xlu0 %1986  ;;  %v2740_v5 = vrot.slane %v2732_v13, 2  ;;  %v609_v19 = vadd.f32 %v607_v36, %v604_v60  ;;  %v603_v13 = vmul.f32 %v602_v42, %v6594_v11  ;;  %v2903_v11 = vrot.slane %v2894_v16, 2 }
 0x2b9   :  { %v7677_v37 = vpop.permute.xlu1 %1716  ;;  %11406 = vst [vmem:[#allocation101_spill] sm:$0xff] %v7679_v23 }
 0x2ba   :  { %11405 = vst [vmem:[#allocation100_spill] sm:$0xff] %v7677_v37  ;;  %2306 = vrot.lane.b32.xlu0 %v2302_v41, %s6202_s26  ;;  %v2708_v41 = vrot.slane %v2700_v17, 2  ;;  %vm613_vm12 = vcmp.ge.f32.partialorder %v609_v19, 0.0  ;;  %v7920_v37 = vstv %s5946_s2  ;;  %s8667_s2 = sld [smem:[#allocation8 + $0x59]] }
 0x2bb   :  { %2274 = vrot.lane.b32.xlu1 %v2270_v1, %s6202_s26  ;;  %v11416_v1 = vrot.slane %v7479_v6, 1  ;;  %v2862_v6 = vmul.f32 %v7397_v56, %v7241_v21 }
 0x2bc   :  { %v7696_v58 = vpop.permute.xlu0 %1862 }
 0x2bd   :  { %v7694_v51 = vpop.permute.xlu1 %1856  ;;  %11410 = vst [vmem:[#allocation103_spill] sm:$0xff] %v7696_v58  ;;  %v2465_v7 = vsel %vm924_vm6, %v2463_v4, %v11416_v1  ;;  %v11419_v4 = vrot.slane %v7503_v50, 2  ;;  %v2871_v50 = vrot.slane %v2862_v6, 2  ;;  %v617_v1 = vmul.f32 0.01, %v609_v19 }
 0x2be   :  { %11409 = vst [vmem:[#allocation102_spill] sm:$0xff] %v7694_v51  ;;  %2310 = vrot.lane.b32.xlu0 %v2305_v27, %s6202_s26  ;;  %v2710_v27 = vsel %vm1365_vm7, %v2708_v41, %v11418_v61  ;;  %v2460_v6 = vrot.slane %v2452_v63, 1  ;;  %v611_v61 = vadd.f32 %v607_v36, %v606_v31  ;;  %v11432_v63 = vrot.slane %v7567_v38, 1 }
 0x2bf   :  { %2278 = vrot.lane.b32.xlu1 %v2273_v45, %s6202_s26  ;;  %v2743_v45 = vrot.slane %v2734_v15, 2  ;;  %v2742_v17 = vsel %vm1365_vm7, %v2740_v5, %v11419_v4  ;;  %v2713_v15 = vsel %vm1365_vm7, %v2711_v44, %v11422_v12  ;;  %v2873_v44 = vsel %vm1365_vm7, %v2871_v50, %v11426_v0 }
 0x2c0   :  { %v7712_v62 = vpop.permute.xlu0 %1992  ;;  %v7768_v4 = vsel %vm613_vm12, %v609_v19, %v617_v1  ;;  %v3167_v19 = vstv %s5921_s13  ;;  %v619_v50 = vmul.f32 0.01, %v611_v61  ;;  %v2462_v1 = vsel %vm924_vm6, %v2460_v6, %v11432_v63  ;;  %s8343_s13 = sld [smem:[#allocation8 + $0x9]] }
 0x2c1   :  { %v7710_v53 = vpop.permute.xlu1 %1860  ;;  %11414 = vst [vmem:[#allocation105_spill] sm:$0xff] %v7712_v62  ;;  %11427 = vst [vmem:[#allocation111_spill] sm:$0xff] %v7768_v4  ;;  %vm615_vm14 = vcmp.ge.f32.partialorder %v611_v61, 0.0 }
 0x2c2   :  { %11413 = vst [vmem:[#allocation104_spill] sm:$0xff] %v7710_v53  ;;  %2470 = vrot.lane.b32.xlu0 %v2465_v7, %s6203_s6  ;;  %v11423_v7 = vrot.slane %v7523_v8, 2  ;;  %v3037_v8 = vstv %s5916_s0  ;;  %s8282_s0 = sld [smem:[#allocation8 + $0x50]] }
 0x2c3   :  { %2438 = vrot.lane.b32.xlu1 %v2433_v40, %s6203_s6  ;;  %v608_v40 = vadd.f32 %v607_v36, %v603_v13 }
 0x2c4   :  { %v7729_v54 = vpop.permute.xlu0 %1884  ;;  %v2745_v41 = vsel %vm1365_vm7, %v2743_v45, %v11423_v7  ;;  %v2892_v45 = vmul.f32 %v7529_v34, %v7216_v48  ;;  %v3039_v34 = vmul.f32 %v3037_v8, %v7768_v4 }
 0x2c5   :  { %v7727_v28 = vpop.permute.xlu1 %1988  ;;  %11417 = vst [vmem:[#allocation106_spill] sm:$0xff] %v7729_v54  ;;  %vm612_vm13 = vcmp.ge.f32.partialorder %v608_v40, 0.0 }
 0x2c6   :  { %2746 = vrot.lane.b32.xlu0 %v2742_v17, %s6202_s26  ;;  %v11428_v17 = vrot.slane %v7545_v55, 2  ;;  %v2900_v12 = vrot.slane %v2892_v45, 2 }
 0x2c7   :  { %2714 = vrot.lane.b32.xlu1 %v2710_v27, %s6202_s26  ;;  %v616_v27 = vmul.f32 0.01, %v608_v40 }
 0x2c8   :  { %v7746_v10 = vpop.permute.xlu0 %2012  ;;  %v2905_v22 = vsel %vm1365_vm7, %v2903_v11, %v11428_v17  ;;  %v3063_v17 = vstv %s5917_s14  ;;  %s8345_s14 = sld [smem:[#allocation8 + $0x24]] }
 0x2c9   :  { %v7744_v56 = vpop.permute.xlu1 %1990  ;;  %11421 = vst [vmem:[#allocation108_spill] sm:$0xff] %v7746_v10  ;;  %v7781_v55 = vsel %vm612_vm13, %v608_v40, %v616_v27  ;;  %v11436_v40 = vrot.slane %v7584_v25, 2 }
 0x2ca   :  { %11420 = vst [vmem:[#allocation107_spill] sm:$0xff] %v7744_v56  ;;  %2750 = vrot.lane.b32.xlu0 %v2745_v41, %s6202_s26  ;;  %11431 = vst [vmem:[#allocation114_spill] sm:$0xff] %v7781_v55  ;;  %v3168_v7 = vmul.f32 %v3167_v19, %v7781_v55  ;;  %v3038_v0 = vmul.f32 %v3037_v8, %v7781_v55 }
 0x2cb   :  { %2718 = vrot.lane.b32.xlu1 %v2713_v15, %s6202_s26  ;;  %v610_v15 = vadd.f32 %v607_v36, %v605_v18  ;;  %v7793_v36 = vsel %vm615_vm14, %v611_v61, %v619_v50  ;;  %v2902_v38 = vsel %vm1365_vm7, %v2900_v12, %v11436_v40  ;;  %v3065_v12 = vmul.f32 %v3063_v17, %v7768_v4 }
 0x2cc   :  { %v7761_v60 = vpop.permute.xlu0 %1888  ;;  %11435 = vst [vmem:[#allocation117_spill] sm:$0xff] %v7793_v36  ;;  %v3171_v27 = vmul.f32 %v3167_v19, %v7793_v36  ;;  %v3064_v40 = vmul.f32 %v3063_v17, %v7781_v55 }
 0x2cd   :  { %v7759_v5 = vpop.permute.xlu1 %1882  ;;  %11425 = vst [vmem:[#allocation110_spill] sm:$0xff] %v7761_v60  ;;  %v618_v41 = vmul.f32 0.01, %v610_v15  ;;  %vm614_vm15 = vcmp.ge.f32.partialorder %v610_v15, 0.0 }
 0x2ce   :  { %11424 = vst [vmem:[#allocation109_spill] sm:$0xff] %v7759_v5  ;;  %2910 = vrot.lane.b32.xlu0 %v2905_v22, %s6203_s6 }
 0x2cf   :  { %2878 = vrot.lane.b32.xlu1 %v2873_v44, %s6203_s6  ;;  %v3041_v44 = vmul.f32 %v3037_v8, %v7793_v36  ;;  %v7806_v6 = vsel %vm614_vm15, %v610_v15, %v618_v41  ;;  %v3193_v15 = vstv %s5922_s1  ;;  %s8352_s1 = sld [smem:[#allocation8 + $0xc]] }
 0x2d0   :  { %v7778_v13 = vpop.permute.xlu0 %2018  ;;  %11439 = vst [vmem:[#allocation120_spill] sm:$0xff] %v7806_v6  ;;  %v3040_v61 = vmul.f32 %v3037_v8, %v7806_v6  ;;  %v3170_v63 = vmul.f32 %v3167_v19, %v7806_v6 }
 0x2d1   :  { %v7776_v16 = vpop.permute.xlu1 %1886  ;;  %11430 = vst [vmem:[#allocation113_spill] sm:$0xff] %v7778_v13  ;;  %v7960_v13 = vmul.f32 %v7920_v37, %v7793_v36 }
 0x2d2   :  { %11429 = vst [vmem:[#allocation112_spill] sm:$0xff] %v7776_v16  ;;  %3048 = vrot.lane.b32.xlu0 %v3039_v34, %s6202_s26  ;;  %v3169_v34 = vmul.f32 %v3167_v19, %v7768_v4 }
 0x2d3   :  { %2466 = vrot.lane.b32.xlu1 %v2462_v1, %s6203_s6  ;;  %v3194_v1 = vmul.f32 %v3193_v15, %v7781_v55 }
 0x2d4   :  { %v7790_v42 = vpop.permute.xlu0 %1908 }
 0x2d5   :  { %v7788_v20 = vpop.permute.xlu1 %2014  ;;  %11434 = vst [vmem:[#allocation116_spill] sm:$0xff] %v7790_v42  ;;  %v7898_v42 = vstv %s5936_s16  ;;  %s8421_s16 = sld [smem:[#allocation8 + $0x56]] }
 0x2d6   :  { %11433 = vst [vmem:[#allocation115_spill] sm:$0xff] %v7788_v20  ;;  %3176 = vrot.lane.b32.xlu0 %v3168_v7, %s6203_s6  ;;  %v7912_v35 = vmul.f32 %v7898_v42, %v7768_v4 }
 0x2d7   :  { %2906 = vrot.lane.b32.xlu1 %v2902_v38, %s6203_s6  ;;  %v3067_v38 = vmul.f32 %v3063_v17, %v7793_v36 }
 0x2d8   :  { %v7802_v31 = vpop.permute.xlu0 %1912 }
 0x2d9   :  { %v7800_v11 = vpop.permute.xlu1 %2016  ;;  %11438 = vst [vmem:[#allocation119_spill] sm:$0xff] %v7802_v31 }
 0x2da   :  { %11437 = vst [vmem:[#allocation118_spill] sm:$0xff] %v7800_v11  ;;  %3052 = vrot.lane.b32.xlu0 %v3041_v44, %s6202_s26  ;;  %v3066_v44 = vmul.f32 %v3063_v17, %v7806_v6 }
 0x2db   :  { %3046 = vrot.lane.b32.xlu1 %v3038_v0, %s6202_s26 }
 0x2dc   :  { %v7812_v45 = vpop.permute.xlu0 %2040 }
 0x2dd   :  { %v7810_v25 = vpop.permute.xlu1 %1910  ;;  %11441 = vst [vmem:[#allocation122_spill] sm:$0xff] %v7812_v45 }
 0x2de   :  { %11440 = vst [vmem:[#allocation121_spill] sm:$0xff] %v7810_v25  ;;  %3182 = vrot.lane.b32.xlu0 %v3171_v27, %s6203_s6  ;;  %v3089_v27 = vstv %s5918_s3  ;;  %v7916_v25 = vmul.f32 %v7898_v42, %v7793_v36  ;;  %s8361_s3 = sld [smem:[#allocation8 + $0xf]] }
 0x2df   :  { %3050 = vrot.lane.b32.xlu1 %v3040_v61, %s6202_s26  ;;  %v3197_v61 = vmul.f32 %v3193_v15, %v7793_v36 }
 0x2e0   :  { %v7820_v18 = vpop.permute.xlu0 %2042  ;;  %v11221_v57 = vrot.slane %v7916_v25, 1 }
 0x2e1   :  { %v7818_v22 = vpop.permute.xlu1 %2038  ;;  %11443 = vst [vmem:[#allocation124_spill] sm:$0xff] %v7820_v18  ;;  %v7872_v18 = vstv %s5931_s10  ;;  %s8394_s10 = sld [smem:[#allocation8 + $0x2a]] }
 0x2e2   :  { %11442 = vst [vmem:[#allocation123_spill] sm:$0xff] %v7818_v22  ;;  %3074 = vrot.lane.b32.xlu0 %v3065_v12, %s6202_s26  ;;  %v7884_v22 = vmul.f32 %v7872_v18, %v7768_v4  ;;  %v7896_v59 = vmul.f32 %v7872_v18, %v7793_v36 }
 0x2e3   :  { %3178 = vrot.lane.b32.xlu1 %v3169_v34, %s6203_s6 }
 0x2e4   :  { %v7828_v50 = vpop.permute.xlu0 %2244  ;;  %v11218_v45 = vrot.slane %v7884_v22, 1 }
 0x2e5   :  { %v7826_v8 = vpop.permute.xlu1 %1914  ;;  %11445 = vst [vmem:[#allocation126_spill] sm:$0xff] %v7828_v50 }
 0x2e6   :  { %11444 = vst [vmem:[#allocation125_spill] sm:$0xff] %v7826_v8  ;;  %3202 = vrot.lane.b32.xlu0 %v3194_v1, %s6203_s6  ;;  %v3090_v1 = vmul.f32 %v3089_v27, %v7781_v55 }
 0x2e7   :  { %3180 = vrot.lane.b32.xlu1 %v3170_v63, %s6203_s6  ;;  %v3195_v63 = vmul.f32 %v3193_v15, %v7768_v4 }
 0x2e8   :  { %v7836_v41 = vpop.permute.xlu0 %2248 }
 0x2e9   :  { %v7834_v7 = vpop.permute.xlu1 %2044  ;;  %11447 = vst [vmem:[#allocation128_spill] sm:$0xff] %v7836_v41 }
 0x2ea   :  { %11446 = vst [vmem:[#allocation127_spill] sm:$0xff] %v7834_v7  ;;  %3078 = vrot.lane.b32.xlu0 %v3067_v38, %s6202_s26  ;;  %v3196_v38 = vmul.f32 %v3193_v15, %v7806_v6 }
 0x2eb   :  { %3072 = vrot.lane.b32.xlu1 %v3064_v40, %s6202_s26 }
 0x2ec   :  { %v7844_v0 = vpop.permute.xlu0 %2408 }
 0x2ed   :  { %v7842_v19 = vpop.permute.xlu1 %2404  ;;  %11449 = vst [vmem:[#allocation130_spill] sm:$0xff] %v7844_v0 }
 0x2ee   :  { %11448 = vst [vmem:[#allocation129_spill] sm:$0xff] %v7842_v19  ;;  %3208 = vrot.lane.b32.xlu0 %v3197_v61, %s6203_s6  ;;  %v3219_v61 = vstv %s5923_s30  ;;  %s8366_s30 = sld [smem:[#allocation8 + $0x27]] }
 0x2ef   :  { %3076 = vrot.lane.b32.xlu1 %v3066_v44, %s6202_s26  ;;  %v3092_v44 = vmul.f32 %v3089_v27, %v7806_v6  ;;  %v3222_v31 = vmul.f32 %v3219_v61, %v7806_v6 }
 0x2f0   :  { %v7852_v12 = vpop.permute.xlu0 %2684 }
 0x2f1   :  { %v7850_v34 = vpop.permute.xlu1 %2844  ;;  %11451 = vst [vmem:[#allocation132_spill] sm:$0xff] %v7852_v12 }
 0x2f2   :  { %11450 = vst [vmem:[#allocation131_spill] sm:$0xff] %v7850_v34  ;;  %3098 = vrot.lane.b32.xlu0 %v3090_v1, %s6202_s26  ;;  %v3221_v1 = vmul.f32 %v3219_v61, %v7768_v4 }
 0x2f3   :  { %3204 = vrot.lane.b32.xlu1 %v3195_v63, %s6203_s6  ;;  %v3091_v63 = vmul.f32 %v3089_v27, %v7768_v4 }
 0x2f4   :  { %v7860_v40 = vpop.permute.xlu0 %2688 }
 0x2f5   :  { %v7858_v17 = vpop.permute.xlu1 %2436  ;;  %11453 = vst [vmem:[#allocation134_spill] sm:$0xff] %v7860_v40 }
 0x2f6   :  { %11452 = vst [vmem:[#allocation133_spill] sm:$0xff] %v7858_v17  ;;  %3102 = vrot.lane.b32.xlu0 %v3092_v44, %s6202_s26  ;;  %v3220_v44 = vmul.f32 %v3219_v61, %v7781_v55  ;;  %v7984_v17 = vstv %s5932_s19  ;;  %s8815_s19 = sld [smem:[#allocation8 + $0x15]] }
 0x2f7   :  { %3206 = vrot.lane.b32.xlu1 %v3196_v38, %s6203_s6  ;;  %v8026_v34 = vmul.f32 %v7984_v17, %v7793_v36 }
 0x2f8   :  { %v7868_v8 = vpop.permute.xlu0 %2848 }
 0x2f9   :  { %v7866_v7 = vpop.permute.xlu1 %2876  ;;  %11455 = vst [vmem:[#allocation136_spill] sm:$0xff] %v7868_v8 }
 0x2fa   :  { %11454 = vst [vmem:[#allocation135_spill] sm:$0xff] %v7866_v7  ;;  %3230 = vrot.lane.b32.xlu0 %v3221_v1, %s6203_s6 }
 0x2fb   :  { %3100 = vrot.lane.b32.xlu1 %v3091_v63, %s6202_s26 }
 0x2fc   :  { %v7878_v38 = vpop.permute.xlu0 %2276 }
 0x2fd   :  { %v7876_v15 = vpop.permute.xlu1 %2308  ;;  %11457 = vst [vmem:[#allocation138_spill] sm:$0xff] %v7878_v38  ;;  %v8004_v38 = vmul.f32 %v7984_v17, %v7768_v4 }
 0x2fe   :  { %11456 = vst [vmem:[#allocation137_spill] sm:$0xff] %v7876_v15  ;;  %3232 = vrot.lane.b32.xlu0 %v3222_v31, %s6203_s6  ;;  %v3093_v15 = vmul.f32 %v3089_v27, %v7793_v36  ;;  %v3223_v27 = vmul.f32 %v3219_v61, %v7793_v36 }
 0x2ff   :  { %3228 = vrot.lane.b32.xlu1 %v3220_v44, %s6203_s6  ;;  %v11229_v49 = vrot.slane %v8004_v38, 1 }
 0x300   :  { %v7890_v1 = vpop.permute.xlu0 %2280 }
 0x301   :  { %v7888_v63 = vpop.permute.xlu1 %2312  ;;  %11459 = vst [vmem:[#allocation140_spill] sm:$0xff] %v7890_v1 }
 0x302   :  { %11458 = vst [vmem:[#allocation139_spill] sm:$0xff] %v7888_v63  ;;  %3434 = vrot.lane.b32.xlu0 %v11218_v45, %s6202_s26  ;;  %v11219_v63 = vrot.slane %v7896_v59, 1 }
 0x303   :  { %3104 = vrot.lane.b32.xlu1 %v3093_v15, %s6202_s26  ;;  %v7918_v15 = vstv %s5951_s17  ;;  %s8449_s17 = sld [smem:[#allocation8 + $0x58]] }
 0x304   :  { %v7906_v44 = vpop.permute.xlu0 %2440  ;;  %v7934_v7 = vmul.f32 %v7918_v15, %v7768_v4  ;;  %v7980_v8 = vmul.f32 %v7918_v15, %v7793_v36 }
 0x305   :  { %v7904_v31 = vpop.permute.xlu1 %2472  ;;  %11461 = vst [vmem:[#allocation142_spill] sm:$0xff] %v7906_v44  ;;  %v7938_v44 = vmul.f32 %v7920_v37, %v7768_v4 }
 0x306   :  { %11460 = vst [vmem:[#allocation141_spill] sm:$0xff] %v7904_v31  ;;  %3438 = vrot.lane.b32.xlu0 %v11219_v63, %s6202_s26  ;;  %v11220_v31 = vrot.slane %v7912_v35, 1  ;;  %v11222_v1 = vrot.slane %v7934_v7, 2  ;;  %v11227_v60 = vrot.slane %v7980_v8, 2 }
 0x307   :  { %3234 = vrot.lane.b32.xlu1 %v3223_v27, %s6203_s6  ;;  %v7940_v27 = vstv %s5937_s4  ;;  %s8771_s4 = sld [smem:[#allocation8 + $0x12]] }
 0x308   :  { %v7928_v45 = vpop.permute.xlu0 %2716  ;;  %v7956_v11 = vmul.f32 %v7940_v27, %v7768_v4  ;;  %v7976_v16 = vmul.f32 %v7940_v27, %v7793_v36 }
 0x309   :  { %v7926_v61 = vpop.permute.xlu1 %2748  ;;  %11463 = vst [vmem:[#allocation144_spill] sm:$0xff] %v7928_v45  ;;  %v11223_v45 = vrot.slane %v7938_v44, 2 }
 0x30a   :  { %11462 = vst [vmem:[#allocation143_spill] sm:$0xff] %v7926_v61  ;;  %3598 = vrot.lane.b32.xlu0 %v11221_v57, %s6203_s6 }
 0x30b   :  { %3594 = vrot.lane.b32.xlu1 %v11220_v31, %s6203_s6 }
 0x30c   :  { %v7950_v61 = vpop.permute.xlu0 %2720 }
 0x30d   :  { %v7948_v63 = vpop.permute.xlu1 %2752  ;;  %11465 = vst [vmem:[#allocation146_spill] sm:$0xff] %v7950_v61  ;;  %v11225_v61 = vrot.slane %v7960_v13, 2 }
 0x30e   :  { %11464 = vst [vmem:[#allocation145_spill] sm:$0xff] %v7948_v63  ;;  %3874 = vrot.lane.b32.xlu0 %v11223_v45, %s6202_s26  ;;  %v11224_v63 = vrot.slane %v7956_v11, 1 }
 0x30f   :  { %4034 = vrot.lane.b32.xlu1 %v11222_v1, %s6203_s6  ;;  %v7982_v1 = vstv %s5947_s18  ;;  %s8803_s18 = sld [smem:[#allocation8 + $0x2d]] }
 0x310   :  { %v7970_v57 = vpop.permute.xlu0 %2880  ;;  %v8000_v40 = vmul.f32 %v7982_v1, %v7768_v4 }
 0x311   :  { %v7968_v31 = vpop.permute.xlu1 %2912  ;;  %11467 = vst [vmem:[#allocation148_spill] sm:$0xff] %v7970_v57  ;;  %v11226_v57 = vrot.slane %v7976_v16, 1 }
 0x312   :  { %11466 = vst [vmem:[#allocation147_spill] sm:$0xff] %v7968_v31  ;;  %3878 = vrot.lane.b32.xlu0 %v11225_v61, %s6202_s26  ;;  %v11228_v10 = vrot.slane %v8000_v40, 2 }
 0x313   :  { %3626 = vrot.lane.b32.xlu1 %v11224_v63, %s6203_s6  ;;  %v8006_v63 = vstv %s5933_s21  ;;  %s8862_s21 = sld [smem:[#allocation8 + $0x18]] }
 0x314   :  { %v7994_v31 = vpop.permute.xlu0 %2468  ;;  %v8022_v3 = vmul.f32 %v8006_v63, %v7768_v4 }
 0x315   :  { %v7992_v45 = vpop.permute.xlu1 %2242  ;;  %11469 = vst [vmem:[#allocation150_spill] sm:$0xff] %v7994_v31 }
 0x316   :  { %11468 = vst [vmem:[#allocation149_spill] sm:$0xff] %v7992_v45  ;;  %4038 = vrot.lane.b32.xlu0 %v11227_v60, %s6203_s6  ;;  %v8030_v60 = vstv %s5952_s20  ;;  %v11230_v5 = vrot.slane %v8022_v3, 1  ;;  %s8921_s20 = sld [smem:[#allocation8 + $0x30]] }
 0x317   :  { %3630 = vrot.lane.b32.xlu1 %v11226_v57, %s6203_s6  ;;  %v3418_v57 = vmul.f32 %v7872_v18, %v7781_v55  ;;  %v8046_v41 = vmul.f32 %v8030_v60, %v7768_v4 }
 0x318   :  { %v8016_v31 = vpop.permute.xlu0 %2908 }
 0x319   :  { %v8014_v61 = vpop.permute.xlu1 %2246  ;;  %11471 = vst [vmem:[#allocation152_spill] sm:$0xff] %v8016_v31  ;;  %v3426_v20 = vrot.slane %v3418_v57, 1  ;;  %v11232_v12 = vrot.slane %v8046_v41, 2  ;;  %v8063_v57 = vmul.f32 %v7982_v1, %v7793_v36 }
 0x31a   :  { %11470 = vst [vmem:[#allocation151_spill] sm:$0xff] %v8014_v61  ;;  %3466 = vrot.lane.b32.xlu0 %v11229_v49, %s6202_s26  ;;  %v11231_v61 = vrot.slane %v8026_v34, 1 }
 0x31b   :  { %3906 = vrot.lane.b32.xlu1 %v11228_v10, %s6202_s26  ;;  %v3420_v10 = vmul.f32 %v7872_v18, %v7806_v6  ;;  %v11476_v18 = vrot.slane %v7884_v22, 1  ;;  %v8081_v22 = vmul.f32 %v8030_v60, %v7793_v36 }
 0x31c   :  { %v8040_v0 = vpop.permute.xlu0 %2402 }
 0x31d   :  { %v8038_v31 = vpop.permute.xlu1 %2406  ;;  %11473 = vst [vmem:[#allocation154_spill] sm:$0xff] %v8040_v0  ;;  %v3428_v54 = vsel %vm924_vm6, %v3426_v20, %v11476_v18  ;;  %v3429_v0 = vrot.slane %v3420_v10, 1  ;;  %v11479_v10 = vrot.slane %v7896_v59, 1  ;;  %v3860_v59 = vmul.f32 %v7920_v37, %v7806_v6 }
 0x31e   :  { %11472 = vst [vmem:[#allocation153_spill] sm:$0xff] %v8038_v31  ;;  %3470 = vrot.lane.b32.xlu0 %v11231_v61, %s6202_s26 }
 0x31f   :  { %3498 = vrot.lane.b32.xlu1 %v11230_v5, %s6202_s26  ;;  %v3580_v5 = vmul.f32 %v7898_v42, %v7806_v6  ;;  %v3431_v20 = vsel %vm924_vm6, %v3429_v0, %v11479_v10 }
 0x320   :  { %v8058_v31 = vpop.permute.xlu0 %2842 }
 0x321   :  { %v8056_v49 = vpop.permute.xlu1 %2682  ;;  %11475 = vst [vmem:[#allocation156_spill] sm:$0xff] %v8058_v31  ;;  %v3589_v18 = vrot.slane %v3580_v5, 1  ;;  %v11482_v5 = vrot.slane %v7916_v25, 1  ;;  %v11485_v25 = vrot.slane %v7938_v44, 2  ;;  %v11489_v44 = vrot.slane %v7960_v13, 2 }
 0x322   :  { %11474 = vst [vmem:[#allocation155_spill] sm:$0xff] %v8056_v49  ;;  %4066 = vrot.lane.b32.xlu0 %v11232_v12, %s6203_s6  ;;  %v3902_v49 = vrot.slane %v8063_v57, 2  ;;  %v3578_v12 = vmul.f32 %v7898_v42, %v7781_v55  ;;  %v4018_v42 = vmul.f32 %v7918_v15, %v7781_v55 }
 0x323   :  { %3432 = vrot.lane.b32.xlu1 %v3428_v54, %s6202_s26  ;;  %v3858_v54 = vmul.f32 %v7920_v37, %v7781_v55  ;;  %v3591_v0 = vsel %vm924_vm6, %v3589_v18, %v11482_v5  ;;  %v4020_v37 = vmul.f32 %v7918_v15, %v7806_v6 }
 0x324   :  { %v8076_v31 = vpop.permute.xlu0 %2434  ;;  %v3586_v45 = vrot.slane %v3578_v12, 1  ;;  %v11486_v12 = vrot.slane %v7912_v35, 1  ;;  %v4026_v5 = vrot.slane %v4018_v42, 2  ;;  %v11490_v35 = vrot.slane %v7934_v7, 2 }
 0x325   :  { %v8074_v61 = vpop.permute.xlu1 %2686  ;;  %11478 = vst [vmem:[#allocation158_spill] sm:$0xff] %v8076_v31  ;;  %v3866_v10 = vrot.slane %v3858_v54, 2 }
 0x326   :  { %11477 = vst [vmem:[#allocation157_spill] sm:$0xff] %v8074_v61  ;;  %3910 = vrot.lane.b32.xlu0 %v3902_v49, %s6202_s26  ;;  %v4062_v61 = vrot.slane %v8081_v22, 2  ;;  %v3869_v22 = vrot.slane %v3860_v59, 2  ;;  %v3588_v54 = vsel %vm924_vm6, %v3586_v45, %v11486_v12  ;;  %v4028_v45 = vsel %vm1365_vm7, %v4026_v5, %v11490_v35 }
 0x327   :  { %3436 = vrot.lane.b32.xlu1 %v3431_v20, %s6202_s26  ;;  %v3868_v18 = vsel %vm1365_vm7, %v3866_v10, %v11485_v25  ;;  %v4029_v10 = vrot.slane %v4020_v37, 2  ;;  %v3450_v25 = vmul.f32 %v7984_v17, %v7781_v55  ;;  %v3452_v37 = vmul.f32 %v7984_v17, %v7806_v6 }
 0x328   :  { %v8094_v31 = vpop.permute.xlu0 %2874  ;;  %v3871_v15 = vsel %vm1365_vm7, %v3869_v22, %v11489_v44  ;;  %v11493_v22 = vrot.slane %v7980_v8, 2  ;;  %v3612_v17 = vmul.f32 %v7940_v27, %v7806_v6 }
 0x329   :  { %v8092_v57 = vpop.permute.xlu1 %2846  ;;  %11481 = vst [vmem:[#allocation160_spill] sm:$0xff] %v8094_v31 }
 0x32a   :  { %11480 = vst [vmem:[#allocation159_spill] sm:$0xff] %v8092_v57  ;;  %4070 = vrot.lane.b32.xlu0 %v4062_v61, %s6203_s6  ;;  %v4031_v7 = vsel %vm1365_vm7, %v4029_v10, %v11493_v22  ;;  %v3461_v10 = vrot.slane %v3452_v37, 1  ;;  %v3890_v37 = vmul.f32 %v7982_v1, %v7781_v55 }
 0x32b   :  { %3596 = vrot.lane.b32.xlu1 %v3591_v0, %s6203_s6  ;;  %v3610_v0 = vmul.f32 %v7940_v27, %v7781_v55  ;;  %v11500_v27 = vrot.slane %v8026_v34, 1 }
 0x32c   :  { %v8108_v31 = vpop.permute.xlu0 %2306 }
 0x32d   :  { %v8106_v20 = vpop.permute.xlu1 %2274  ;;  %11484 = vst [vmem:[#allocation162_spill] sm:$0xff] %v8108_v31  ;;  %v3618_v42 = vrot.slane %v3610_v0, 1  ;;  %v3458_v0 = vrot.slane %v3450_v25, 1  ;;  %v3463_v22 = vsel %vm924_vm6, %v3461_v10, %v11500_v27  ;;  %v3641_v10 = vstv %s5938_s22  ;;  %s8990_s22 = sld [smem:[#allocation8 + $0x33]] }
 0x32e   :  { %11483 = vst [vmem:[#allocation161_spill] sm:$0xff] %v8106_v20  ;;  %3592 = vrot.lane.b32.xlu0 %v3588_v54, %s6203_s6  ;;  %v11494_v54 = vrot.slane %v7956_v11, 1  ;;  %v11497_v11 = vrot.slane %v8004_v38, 1  ;;  %v915_v27 = vstv %s8170_s27  ;;  %s5889_s27 = sld [smem:[#allocation8 + $0x5e]] }
 0x32f   :  { %3872 = vrot.lane.b32.xlu1 %v3868_v18, %s6202_s26  ;;  %v3892_v18 = vmul.f32 %v7982_v1, %v7806_v6 }
 0x330   :  { %v8124_v31 = vpop.permute.xlu0 %2310  ;;  %v3620_v5 = vsel %vm924_vm6, %v3618_v42, %v11494_v54 }
 0x331   :  { %v8122_v59 = vpop.permute.xlu1 %2278  ;;  %11488 = vst [vmem:[#allocation164_spill] sm:$0xff] %v8124_v31  ;;  %v3901_v44 = vrot.slane %v3892_v18, 2  ;;  %v3482_v18 = vmul.f32 %v8006_v63, %v7781_v55 }
 0x332   :  { %11487 = vst [vmem:[#allocation163_spill] sm:$0xff] %v8122_v59  ;;  %4032 = vrot.lane.b32.xlu0 %v4028_v45, %s6203_s6  ;;  %v3460_v45 = vsel %vm924_vm6, %v3458_v0, %v11497_v11  ;;  %v3484_v0 = vmul.f32 %v8006_v63, %v7806_v6  ;;  %v3642_v59 = vmul.f32 %v3641_v10, %v7781_v55 }
 0x333   :  { %3876 = vrot.lane.b32.xlu1 %v3871_v15, %s6202_s26  ;;  %v4052_v15 = vmul.f32 %v8030_v60, %v7806_v6  ;;  %v3903_v42 = vsel %vm1365_vm7, %v3901_v44, %v3902_v49  ;;  %v8194_v44 = vmul.f32 %v8006_v63, %v7793_v36 }
 0x334   :  { %v8140_v13 = vpop.permute.xlu0 %2470  ;;  %v3650_v57 = vrot.slane %v3642_v59, 1 }
 0x335   :  { %v8138_v12 = vpop.permute.xlu1 %2438  ;;  %11492 = vst [vmem:[#allocation166_spill] sm:$0xff] %v8140_v13  ;;  %v4061_v25 = vrot.slane %v4052_v15, 2  ;;  %v3898_v15 = vrot.slane %v3890_v37, 2  ;;  %v8223_v37 = vstv %s8178_s5  ;;  %v11515_v59 = vrot.slane %v8194_v44, 1  ;;  %s5838_s5 = sld [smem:[#allocation8 + $0x39]] }
 0x336   :  { %11491 = vst [vmem:[#allocation165_spill] sm:$0xff] %v8138_v12  ;;  %3624 = vrot.lane.b32.xlu0 %v3620_v5, %s6203_s6  ;;  %v3490_v5 = vrot.slane %v3482_v18, 1  ;;  %v625_v18 = vstv %s8160_s24  ;;  %v1382_v30 = vmul.f32 %v8223_v37, %v6732_v39  ;;  %s5874_s24 = sld [smem:[#allocation8 + $0x5b]] }
 0x337   :  { %4036 = vrot.lane.b32.xlu1 %v4031_v7, %s6203_s6  ;;  %v3621_v7 = vrot.slane %v3612_v17, 1  ;;  %v4063_v54 = vsel %vm1365_vm7, %v4061_v25, %v4062_v61  ;;  %v11503_v61 = vrot.slane %v7976_v16, 1  ;;  %v11504_v17 = vrot.slane %v8022_v3, 1 }
 0x338   :  { %v8156_v8 = vpop.permute.xlu0 %2746  ;;  %v4050_v25 = vmul.f32 %v8030_v60, %v7781_v55  ;;  %v631_v16 = vstv %s8168_s25  ;;  %v8271_v13 = vmul.f32 %v625_v18, %v6744_v33  ;;  %s5879_s25 = sld [smem:[#allocation8 + $0x5c]] }
 0x339   :  { %v8154_v35 = vpop.permute.xlu1 %2714  ;;  %11496 = vst [vmem:[#allocation168_spill] sm:$0xff] %v8156_v8  ;;  %v3623_v63 = vsel %vm924_vm6, %v3621_v7, %v11503_v61  ;;  %v3492_v11 = vsel %vm924_vm6, %v3490_v5, %v11504_v17  ;;  %v940_v7 = vstv %s8176_s12  ;;  %v11507_v5 = vrot.slane %v8000_v40, 2  ;;  %s5823_s12 = sld [smem:[#allocation8 + $0x36]] }
 0x33a   :  { %11495 = vst [vmem:[#allocation167_spill] sm:$0xff] %v8154_v35  ;;  %3908 = vrot.lane.b32.xlu0 %v3903_v42, %s6202_s26  ;;  %v11233_v42 = vrot.slane %v8194_v44, 1  ;;  %v8235_v61 = vstv %s5834_s23  ;;  %v4058_v17 = vrot.slane %v4050_v25, 2  ;;  %v8245_v40 = vmul.f32 %v625_v18, %v6734_v2  ;;  %s5853_s23 = sld [smem:[#allocation8 + $0x3c]] }
 0x33b   :  { %3464 = vrot.lane.b32.xlu1 %v3460_v45, %s6202_s26  ;;  %v3493_v45 = vrot.slane %v3484_v0, 1  ;;  %v3900_v60 = vsel %vm1365_vm7, %v3898_v15, %v11507_v5  ;;  %v8233_v0 = vmul.f32 %v3641_v10, %v7768_v4  ;;  %v8248_v15 = vmul.f32 %v625_v18, %v6732_v39 }
 0x33c   :  { %v8182_v49 = vpop.permute.xlu0 %2750  ;;  %v8251_v5 = vmul.f32 %v915_v27, %v6734_v2  ;;  %v8259_v25 = vmul.f32 %v625_v18, %v6738_v46  ;;  %v8290_v20 = vmul.f32 %v631_v16, %v6734_v2  ;;  %v941_v62 = vmul.f32 %v940_v7, %v6732_v39 }
 0x33d   :  { %v8180_v38 = vpop.permute.xlu1 %2718  ;;  %11499 = vst [vmem:[#allocation170_spill] sm:$0xff] %v8182_v49  ;;  %v8265_v49 = vmul.f32 %v915_v27, %v6744_v33  ;;  %v943_v53 = vmul.f32 %v940_v7, %v6738_v46 }
 0x33e   :  { %11498 = vst [vmem:[#allocation169_spill] sm:$0xff] %v8180_v38  ;;  %4068 = vrot.lane.b32.xlu0 %v4063_v54, %s6203_s6  ;;  %v11510_v38 = vrot.slane %v8046_v41, 2 }
 0x33f   :  { %3468 = vrot.lane.b32.xlu1 %v3463_v22, %s6202_s26  ;;  %v1356_v22 = vstv %s8174_s11  ;;  %s5894_s11 = sld [smem:[#allocation8 + $0x5f]] }
 0x340   :  { %v8202_v1 = vpop.permute.xlu0 %2910  ;;  %v8268_v8 = vmul.f32 %v1356_v22, %v6734_v2  ;;  %v4060_v35 = vsel %vm1365_vm7, %v4058_v17, %v11510_v38  ;;  %v918_v17 = vmul.f32 %v915_v27, %v6738_v46 }
 0x341   :  { %v8200_v34 = vpop.permute.xlu1 %2878  ;;  %11502 = vst [vmem:[#allocation172_spill] sm:$0xff] %v8202_v1  ;;  %v8242_v1 = vmul.f32 %v3641_v10, %v7793_v36 }
 0x342   :  { %11501 = vst [vmem:[#allocation171_spill] sm:$0xff] %v8200_v34  ;;  %3496 = vrot.lane.b32.xlu0 %v3492_v11, %s6202_s26  ;;  %v3644_v11 = vmul.f32 %v3641_v10, %v7806_v6  ;;  %v3921_v34 = vstv %s8207_s15  ;;  %v916_v10 = vmul.f32 %v915_v27, %v6732_v39  ;;  %v8327_v27 = vmul.f32 %v8223_v37, %v6734_v2  ;;  %s5909_s15 = sld [smem:[#allocation8 + $0x62]] }
 0x343   :  { %3628 = vrot.lane.b32.xlu1 %v3623_v63, %s6203_s6  ;;  %v3495_v63 = vsel %vm924_vm6, %v3493_v45, %v11233_v42  ;;  %v8256_v45 = vstv %s8198_s28  ;;  %v8262_v42 = vmul.f32 %v631_v16, %v6732_v39  ;;  %v3654_v18 = vrot.slane %v8242_v1, 1  ;;  %s5904_s28 = sld [smem:[#allocation8 + $0x61]] }
 0x344   :  { %v8227_v54 = vpop.permute.xlu0 %3048  ;;  %v3653_v12 = vrot.slane %v3644_v11, 1  ;;  %v8304_v1 = vmul.f32 %v940_v7, %v6734_v2  ;;  %v8317_v41 = vmul.f32 %v3921_v34, %v7793_v36  ;;  %v8322_v56 = vmul.f32 %v3921_v34, %v7768_v4 }
 0x345   :  { %v8225_v3 = vpop.permute.xlu1 %2466  ;;  %11506 = vst [vmem:[#allocation174_spill] sm:$0xff] %v8227_v54  ;;  %v3922_v54 = vmul.f32 %v3921_v34, %v7781_v55  ;;  %v928_v58 = vrot.slane %v918_v17, 1 }
 0x346   :  { %11505 = vst [vmem:[#allocation173_spill] sm:$0xff] %v8225_v3  ;;  %3500 = vrot.lane.b32.xlu0 %v3495_v63, %s6202_s26  ;;  %v3651_v3 = vrot.slane %v8233_v0, 1  ;;  %v3655_v38 = vsel %vm924_vm6, %v3653_v12, %v3654_v18  ;;  %v925_v12 = vrot.slane %v916_v10, 1  ;;  %v4081_v10 = vstv %s8282_s0  ;;  %s9203_s0 = sld [smem:[#allocation8 + $0x3f]] }
 0x347   :  { %3904 = vrot.lane.b32.xlu1 %v3900_v60, %s6202_s26  ;;  %v8274_v60 = vmul.f32 %v631_v16, %v6738_v46  ;;  %v3930_v17 = vrot.slane %v3922_v54, 2  ;;  %v949_v54 = vrot.slane %v941_v62, 1 }
 0x348   :  { %v8278_v31 = vpop.permute.xlu0 %3176 }
 0x349   :  { %v8276_v63 = vpop.permute.xlu1 %2906  ;;  %11509 = vst [vmem:[#allocation176_spill] sm:$0xff] %v8278_v31  ;;  %v8297_v31 = vmul.f32 %v1356_v22, %v6744_v33 }
 0x34a   :  { %11508 = vst [vmem:[#allocation175_spill] sm:$0xff] %v8276_v63  ;;  %v8293_v63 = vmul.f32 %v631_v16, %v6744_v33  ;;  %3658 = vrot.lane.b32.xlu0 %v3651_v3, %s6203_s6  ;;  %v8308_v16 = vmul.f32 %v940_v7, %v6744_v33  ;;  %v11234_v7 = vrot.slane %v8317_v41, 2 }
 0x34b   :  { %4064 = vrot.lane.b32.xlu1 %v4060_v35, %s6203_s6  ;;  %v3924_v35 = vmul.f32 %v3921_v34, %v7806_v6  ;;  %v1359_v34 = vmul.f32 %v1356_v22, %v6738_v46 }
 0x34c   :  { %11511 = vst [vmem:[#allocation177_spill] sm:$0xff] %v8308_v16  ;;  %v8313_v0 = vpop.permute.xlu0 %3052 }
 0x34d   :  { %v8311_v11 = vpop.permute.xlu1 %3046  ;;  %11513 = vst [vmem:[#allocation179_spill] sm:$0xff] %v8313_v0  ;;  %v8331_v0 = vmul.f32 %v8223_v37, %v6744_v33 }
 0x34e   :  { %11512 = vst [vmem:[#allocation178_spill] sm:$0xff] %v8311_v11  ;;  %v1357_v11 = vmul.f32 %v1356_v22, %v6732_v39  ;;  %3660 = vrot.lane.b32.xlu0 %v3655_v38, %s6203_s6  ;;  %v3933_v38 = vrot.slane %v3924_v35, 2  ;;  %v3652_v22 = vsel %vm924_vm6, %v3650_v57, %v3651_v3  ;;  %v1369_v3 = vrot.slane %v1359_v34, 2 }
 0x34f   :  { %11514 = vst [vmem:[#allocation180_spill] sm:$0xff] %v8331_v0  ;;  %3502 = vrot.lane.b32.xlu1 %v11515_v59, %s6202_s26  ;;  %v3931_v59 = vrot.slane %v8322_v56, 2  ;;  %v952_v35 = vrot.slane %v943_v53, 1  ;;  %v11521_v34 = vrot.slane %v8265_v49, 1 }
 0x350   :  { %v8349_v44 = vpop.permute.xlu0 %3182  ;;  %v1366_v51 = vrot.slane %v1357_v11, 2  ;;  %v11518_v11 = vrot.slane %v8251_v5, 1  ;;  %v3935_v62 = vsel %vm1365_vm7, %v3933_v38, %v11234_v7  ;;  %v8402_v38 = vmul.f32 %v8256_v45, %v6734_v2 }
 0x351   :  { %v8347_v19 = vpop.permute.xlu1 %3050  ;;  %11517 = vst [vmem:[#allocation182_spill] sm:$0xff] %v8349_v44  ;;  %v8382_v53 = vsel %vm924_vm6, %v928_v58, %v11521_v34  ;;  %v1133_v58 = vmul.f32 %v8256_v45, %v6732_v39  ;;  %v11524_v34 = vrot.slane %v8304_v1, 1  ;;  %v11527_v7 = vrot.slane %v8327_v27, 2 }
 0x352   :  { %11516 = vst [vmem:[#allocation181_spill] sm:$0xff] %v8347_v19  ;;  %v1384_v19 = vmul.f32 %v8223_v37, %v6738_v46  ;;  %3662 = vrot.lane.b32.xlu0 %v3654_v18, %s6203_s6  ;;  %v8372_v23 = vsel %vm924_vm6, %v925_v12, %v11518_v11  ;;  %v1390_v37 = vrot.slane %v1382_v30, 2  ;;  %v4083_v18 = vmul.f32 %v4081_v10, %v7768_v4 }
 0x353   :  { %3656 = vrot.lane.b32.xlu1 %v3652_v22, %s6203_s6  ;;  %v3932_v12 = vsel %vm1365_vm7, %v3930_v17, %v3931_v59  ;;  %v4082_v30 = vmul.f32 %v4081_v10, %v7781_v55  ;;  %v11522_v11 = vrot.slane %v8268_v8, 2  ;;  %v677_v17 = vadd.f32 %v7047_v9, %v8245_v40 }
 0x354   :  { %v8376_v22 = vpop.permute.xlu0 %3074  ;;  %v1393_v57 = vrot.slane %v1384_v19, 2  ;;  %v8426_v9 = vsel %vm1365_vm7, %v1390_v37, %v11527_v7  ;;  %v1797_v40 = vstv %s8343_s13  ;;  %v8437_v44 = vmul.f32 %v4081_v10, %v7793_v36  ;;  %s9219_s13 = sld [smem:[#allocation8 + $0x42]] }
 0x355   :  { %v8374_v50 = vpop.permute.xlu1 %3178  ;;  %11520 = vst [vmem:[#allocation184_spill] sm:$0xff] %v8376_v22  ;;  %v8392_v56 = vsel %vm1365_vm7, %v1366_v51, %v11522_v11  ;;  %v11523_v51 = vrot.slane %v8297_v31, 2  ;;  %v4084_v22 = vmul.f32 %v4081_v10, %v7806_v6  ;;  %v676_v7 = vadd.f32 %v7049_v47, %v8248_v15 }
 0x356   :  { %11519 = vst [vmem:[#allocation183_spill] sm:$0xff] %v8374_v50  ;;  %3936 = vrot.lane.b32.xlu0 %v3932_v12, %s6202_s26  ;;  %v11525_v12 = vrot.slane %v8308_v16, 1  ;;  %v11530_v37 = vrot.slane %v8331_v0, 2  ;;  %v8452_v10 = vstv %s8352_s1  ;;  %v8458_v47 = vstv %s8366_s30  ;;  %s9245_s1 = sld [smem:[#allocation8 + $0x45]]  ;;  %s9278_s30 = sld [smem:[#allocation8 + $0x67]] }
 0x357   :  { %3940 = vrot.lane.b32.xlu1 %v3935_v62, %s6202_s26  ;;  %v8409_v19 = vsel %vm1365_vm7, %v1369_v3, %v11523_v51  ;;  %v8414_v62 = vsel %vm924_vm6, %v949_v54, %v11524_v34  ;;  %v1807_v3 = vstv %s8345_s14  ;;  %v4091_v34 = vrot.slane %v4083_v18, 2  ;;  %s9226_s14 = sld [smem:[#allocation8 + $0x64]] }
 0x358   :  { %v8419_v11 = vsel %vm924_vm6, %v952_v35, %v11525_v12  ;;  %v8432_v54 = vpop.permute.xlu0 %3202  ;;  %v807_v35 = vadd.f32 %v7223_v32, %v677_v17  ;;  %v4090_v12 = vrot.slane %v4082_v30, 2  ;;  %v8444_v50 = vsel %vm1365_vm7, %v1393_v57, %v11530_v37 }
 0x359   :  { %11526 = vst [vmem:[#allocation185_spill] sm:$0xff] %v8419_v11  ;;  %v8430_v51 = vpop.permute.xlu1 %3180  ;;  %11529 = vst [vmem:[#allocation187_spill] sm:$0xff] %v8432_v54  ;;  %v1141_v18 = vrot.slane %v1133_v58, 1  ;;  %v8455_v30 = vstv %s8361_s3  ;;  %v864_v15 = vmul.f32 %v8235_v61, %v6732_v39  ;;  %v806_v57 = vadd.f32 %v7196_v26, %v676_v7  ;;  %v11548_v11 = vld [vmem:[#allocation80_spill] sm:$0xff]  ;;  %s9248_s3 = sld [smem:[#allocation8 + $0x65]] }
 0x35a   :  { %11528 = vst [vmem:[#allocation186_spill] sm:$0xff] %v8430_v51  ;;  %11531 = vst [vmem:[#allocation188_spill] sm:$0xff] %v8444_v50  ;;  %3938 = vrot.lane.b32.xlu0 %v3931_v59, %s6202_s26  ;;  %v866_v58 = vmul.f32 %v8235_v61, %v6738_v46  ;;  %v8471_v37 = vmul.f32 %v8235_v61, %v6734_v2  ;;  %v8475_v32 = vmul.f32 %v8235_v61, %v6744_v33 }
 0x35b   :  { %4098 = vrot.lane.b32.xlu1 %v4091_v34, %s6203_s6  ;;  %v11534_v54 = vrot.slane %v8251_v5, 1  ;;  %v4092_v26 = vsel %vm1365_vm7, %v4090_v12, %v4091_v34  ;;  %v4093_v7 = vrot.slane %v4084_v22, 2  ;;  %v11535_v6 = vrot.slane %v8317_v41, 2 }
 0x35c   :  { %v8465_v59 = vpop.permute.xlu0 %3078  ;;  %v11536_v36 = vrot.slane %v8402_v38, 1  ;;  %v8493_v5 = vmul.f32 %v8256_v45, %v6738_v46  ;;  %v8497_v22 = vmul.f32 %v8256_v45, %v6744_v33  ;;  %v8507_v41 = vstv %s8421_s16  ;;  %s9337_s16 = sld [smem:[#allocation8 + $0x48]] }
 0x35d   :  { %v8463_v17 = vpop.permute.xlu1 %3072  ;;  %11533 = vst [vmem:[#allocation190_spill] sm:$0xff] %v8465_v59  ;;  %v936_v51 = vadd.f32 %v11534_v54, %v807_v35  ;;  %v4094_v59 = vrot.slane %v8437_v44, 2  ;;  %v8501_v54 = vmul.f32 %v1797_v40, %v7207_v24  ;;  %v8513_v34 = vmul.f32 %v1797_v40, %v7241_v21 }
 0x35e   :  { %11532 = vst [vmem:[#allocation189_spill] sm:$0xff] %v8463_v17  ;;  %v8482_v17 = vstv %s8394_s10  ;;  %4096 = vrot.lane.b32.xlu0 %v4092_v26, %s6203_s6  ;;  %v1143_v61 = vsel %vm924_vm6, %v1141_v18, %v11536_v36  ;;  %v8510_v36 = vmul.f32 %v1797_v40, %v7228_v52  ;;  %v8517_v45 = vmul.f32 %v8452_v10, %v7207_v24  ;;  %s9284_s10 = sld [smem:[#allocation8 + $0x68]] }
 0x35f   :  { %3942 = vrot.lane.b32.xlu1 %v11535_v6, %s6202_s26  ;;  %v1064_v44 = vadd.f32 %v7263_v29, %v936_v51  ;;  %v8504_v6 = vmul.f32 %v1797_v40, %v7216_v48  ;;  %11537 = vst [vmem:[#allocation191_spill] sm:$0xff] %v8513_v34  ;;  %v8521_v29 = vmul.f32 %v8452_v10, %v7228_v52  ;;  %v11547_v0 = vrot.slane %v8268_v8, 2  ;;  %v11550_v8 = vld [vmem:[#allocation23_spill] sm:$0xff] }
 0x360   :  { %v8525_v35 = vpop.permute.xlu0 %3208  ;;  %v935_v18 = vadd.f32 %v8372_v23, %v806_v57  ;;  %v8531_v40 = vmul.f32 %v8455_v30, %v7207_v24  ;;  %v4095_v26 = vsel %vm1365_vm7, %v4093_v7, %v4094_v59  ;;  %v8535_v55 = vmul.f32 %v1807_v3, %v7207_v24  ;;  %v11541_v23 = vld [vmem:[#allocation75_spill] sm:$0xff] }
 0x361   :  { %v8523_v51 = vpop.permute.xlu1 %3076  ;;  %11539 = vst [vmem:[#allocation193_spill] sm:$0xff] %v8525_v35  ;;  %v1224_v12 = vadd.f32 %v7277_v43, %v1064_v44  ;;  %v8539_v4 = vmul.f32 %v8455_v30, %v7228_v52  ;;  %v8543_v35 = vmul.f32 %v8458_v47, %v7207_v24  ;;  %v8548_v43 = vstv %s8449_s17  ;;  %s9342_s17 = sld [smem:[#allocation8 + $0x4b]] }
 0x362   :  { %11538 = vst [vmem:[#allocation192_spill] sm:$0xff] %v8523_v51  ;;  %11540 = vst [vmem:[#allocation194_spill] sm:$0xff] %v8535_v55  ;;  %872 = vrot.lane.b32.xlu0 %v864_v15, %s6203_s6  ;;  %v1063_v57 = vadd.f32 %v11541_v23, %v935_v18  ;;  %v8552_v7 = vmul.f32 %v1807_v3, %v7216_v48  ;;  %v8556_v44 = vmul.f32 %v8458_v47, %v7228_v52 }
 0x363   :  { %4100 = vrot.lane.b32.xlu1 %v4095_v26, %s6203_s6  ;;  %v2108_v51 = vmul.f32 %v8452_v10, %v7216_v48  ;;  %v8561_v50 = vmul.f32 %v1807_v3, %v7228_v52  ;;  %v8564_v26 = vmul.f32 %v1807_v3, %v7241_v21  ;;  %v8569_v18 = vmul.f32 %v8482_v17, %v7207_v24  ;;  %v11552_v24 = vld [vmem:[#allocation46_spill] sm:$0xff] }
 0x364   :  { %11542 = vst [vmem:[#allocation75_spill] sm:$0xff] %v8552_v7  ;;  %v8573_v7 = vpop.permute.xlu0 %3098  ;;  %v1377_v55 = vadd.f32 %v11547_v0, %v1224_v12  ;;  %v1223_v16 = vadd.f32 %v11548_v11, %v1063_v57  ;;  %v678_v0 = vadd.f32 %v11550_v8, %v8259_v25  ;;  %v11551_v57 = vld [vmem:[#allocation27_spill] sm:$0xff]  ;;  %v1144_v25 = vrot.slane %v8493_v5, 1  ;;  %v11554_v8 = vld [vmem:[#allocation42_spill] sm:$0xff] }
 0x365   :  { %11543 = vst [vmem:[#allocation195_spill] sm:$0xff] %v8561_v50  ;;  %11544 = vst [vmem:[#allocation196_spill] sm:$0xff] %v8564_v26  ;;  %v8571_v23 = vpop.permute.xlu1 %3204  ;;  %v11549_v26 = vld [vmem:[#allocation25_spill] sm:$0xff]  ;;  %v2116_v12 = vrot.slane %v2108_v51, 1  ;;  %v11555_v51 = vld [vmem:[#allocation58_spill] sm:$0xff]  ;;  %v1294_v5 = vmul.f32 %v8507_v41, %v6734_v2 }
 0x366   :  { %11545 = vst [vmem:[#allocation197_spill] sm:$0xff] %v8571_v23  ;;  %11546 = vst [vmem:[#allocation198_spill] sm:$0xff] %v8573_v7  ;;  %v679_v15 = vadd.f32 %v11549_v26, %v8271_v13  ;;  %v8586_v23 = vmul.f32 %v8482_v17, %v7228_v52  ;;  %876 = vrot.lane.b32.xlu0 %v866_v58, %s6203_s6  ;;  %v8595_v13 = vmul.f32 %v8452_v10, %v7241_v21 }
 0x367   :  { %4102 = vrot.lane.b32.xlu1 %v4094_v59, %s6203_s6  ;;  %v703_v26 = vadd.f32 %v11551_v57, %v8290_v20  ;;  %v808_v11 = vadd.f32 %v11554_v8, %v678_v0  ;;  %v1505_v50 = vadd.f32 %v11555_v51, %v1377_v55  ;;  %v1376_v10 = vadd.f32 %v8392_v56, %v1223_v16  ;;  %v11556_v20 = vld [vmem:[#allocation24_spill] sm:$0xff] }
 0x368   :  { %v809_v34 = vadd.f32 %v11552_v24, %v679_v15  ;;  %v8603_v58 = vpop.permute.xlu0 %3102  ;;  %v1145_v7 = vrot.slane %v8497_v22, 1  ;;  %v702_v57 = vadd.f32 %v11556_v20, %v8262_v42  ;;  %v11557_v24 = vld [vmem:[#allocation49_spill] sm:$0xff]  ;;  %v11558_v55 = vrot.slane %v8517_v45, 1 }
 0x369   :  { %v8601_v59 = vpop.permute.xlu1 %3206  ;;  %11553 = vst [vmem:[#allocation80_spill] sm:$0xff] %v8603_v58  ;;  %v833_v15 = vadd.f32 %v11557_v24, %v703_v26  ;;  %v2119_v56 = vrot.slane %v8595_v13, 1  ;;  %v8627_v42 = vmul.f32 %v8455_v30, %v7216_v48  ;;  %v1293_v0 = vmul.f32 %v8507_v41, %v6732_v39  ;;  %v11562_v20 = vld [vmem:[#allocation57_spill] sm:$0xff] }
 0x36a   :  { %1147 = vrot.lane.b32.xlu0 %v1143_v61, %s6202_s26  ;;  %v8622_v16 = vsel %vm924_vm6, %v2116_v12, %v11558_v55  ;;  %v8635_v26 = vmul.f32 %v8455_v30, %v7241_v21  ;;  %v1295_v13 = vmul.f32 %v8507_v41, %v6738_v46  ;;  %v8645_v51 = vmul.f32 %v8507_v41, %v6744_v33 }
 0x36b   :  { %874 = vrot.lane.b32.xlu1 %v8471_v37, %s6203_s6  ;;  %v11559_v37 = vrot.slane %v8265_v49, 1  ;;  %v1665_v24 = vadd.f32 %v11562_v20, %v1505_v50  ;;  %v937_v49 = vadd.f32 %v8382_v53, %v808_v11  ;;  %v1146_v30 = vsel %vm924_vm6, %v1144_v25, %v1145_v7  ;;  %v11567_v53 = vld [vmem:[#allocation77_spill] sm:$0xff] }
 0x36c   :  { %v8639_v12 = vpop.permute.xlu0 %3230  ;;  %v1302_v50 = vrot.slane %v1294_v5, 1  ;;  %v1301_v11 = vrot.slane %v1293_v0, 1  ;;  %v8665_v25 = vmul.f32 %v8548_v43, %v6734_v2  ;;  %v1304_v5 = vrot.slane %v1295_v13, 1 }
 0x36d   :  { %v938_v61 = vadd.f32 %v11559_v37, %v809_v34  ;;  %v8637_v8 = vpop.permute.xlu1 %3100  ;;  %11561 = vst [vmem:[#allocation23_spill] sm:$0xff] %v8639_v12  ;;  %v11563_v34 = vld [vmem:[#allocation81_spill] sm:$0xff]  ;;  %v11564_v37 = vld [vmem:[#allocation44_spill] sm:$0xff]  ;;  %v11565_v12 = vld [vmem:[#allocation55_spill] sm:$0xff]  ;;  %v1065_v41 = vadd.f32 %v11567_v53, %v937_v49  ;;  %v1305_v0 = vrot.slane %v8645_v51, 1  ;;  %v11575_v13 = vrot.slane %v8402_v38, 1 }
 0x36e   :  { %11560 = vst [vmem:[#allocation25_spill] sm:$0xff] %v8637_v8  ;;  %v1504_v55 = vadd.f32 %v11563_v34, %v1376_v10  ;;  %v832_v3 = vadd.f32 %v11564_v37, %v702_v57  ;;  %v11566_v8 = vrot.slane %v8304_v1, 1  ;;  %1151 = vrot.lane.b32.xlu0 %v1146_v30, %s6202_s26  ;;  %v1574_v10 = vmul.f32 %v8548_v43, %v6732_v39  ;;  %v11568_v1 = vld [vmem:[#allocation56_spill] sm:$0xff]  ;;  %v11573_v49 = vld [vmem:[#allocation82_spill] sm:$0xff] }
 0x36f   :  { %v1066_v58 = vadd.f32 %v11565_v12, %v938_v61  ;;  %878 = vrot.lane.b32.xlu1 %v8475_v32, %s6203_s6  ;;  %v11572_v12 = vld [vmem:[#allocation79_spill] sm:$0xff]  ;;  %v1803_v30 = vadd.f32 %v8501_v54, %v1665_v24  ;;  %v8681_v37 = vmul.f32 %v8458_v47, %v7216_v48  ;;  %v1576_v54 = vmul.f32 %v8548_v43, %v6738_v46  ;;  %v11674_v46 = vld [vmem:[#allocation181_spill] sm:$0xff] }
 0x370   :  { %v960_v52 = vadd.f32 %v11566_v8, %v833_v15  ;;  %v11569_v15 = vld [vmem:[#allocation64_spill] sm:$0xff]  ;;  %v8673_v8 = vpop.permute.xlu0 %3232  ;;  %v1225_v20 = vadd.f32 %v11572_v12, %v1065_v41  ;;  %v1664_v34 = vadd.f32 %v11573_v49, %v1504_v55  ;;  %v959_v53 = vadd.f32 %v8414_v62, %v832_v3  ;;  %v11578_v12 = vld [vmem:[#allocation87_spill] sm:$0xff] }
 0x371   :  { %v1226_v57 = vadd.f32 %v11568_v1, %v1066_v58  ;;  %v8671_v32 = vpop.permute.xlu1 %3228  ;;  %11571 = vst [vmem:[#allocation46_spill] sm:$0xff] %v8673_v8  ;;  %v11574_v58 = vld [vmem:[#allocation26_spill] sm:$0xff]  ;;  %v2556_v1 = vrot.slane %v8627_v42, 2  ;;  %v1869_v24 = vadd.f32 %v7663_v14, %v1803_v30  ;;  %v1303_v55 = vsel %vm924_vm6, %v1301_v11, %v1302_v50  ;;  %v11577_v42 = vld [vmem:[#allocation59_spill] sm:$0xff] }
 0x372   :  { %v1096_v61 = vadd.f32 %v11569_v15, %v960_v52  ;;  %11570 = vst [vmem:[#allocation27_spill] sm:$0xff] %v8671_v32  ;;  %v704_v52 = vadd.f32 %v11574_v58, %v8274_v60  ;;  %1309 = vrot.lane.b32.xlu0 %v1302_v50, %s6203_s6  ;;  %v1582_v41 = vrot.slane %v1574_v10, 2  ;;  %v1583_v60 = vrot.slane %v8665_v25, 2  ;;  %v11659_v32 = vld [vmem:[#allocation133_spill] sm:$0xff] }
 0x373   :  { %1149 = vrot.lane.b32.xlu1 %v11575_v13, %s6202_s26  ;;  %v11576_v62 = vrot.slane %v8297_v31, 2  ;;  %v1095_v38 = vadd.f32 %v11578_v12, %v959_v53  ;;  %v1306_v14 = vsel %vm924_vm6, %v1304_v5, %v1305_v0  ;;  %v1378_v50 = vadd.f32 %v8409_v19, %v1225_v20 }
 0x374   :  { %v1256_v15 = vadd.f32 %v11577_v42, %v1096_v61  ;;  %v8702_v58 = vpop.permute.xlu0 %3434  ;;  %v1802_v11 = vadd.f32 %v8504_v6, %v1664_v34  ;;  %v1999_v31 = vadd.f32 %v7727_v28, %v1869_v24  ;;  %v8712_v10 = vmul.f32 %v8548_v43, %v6744_v33  ;;  %v11583_v28 = vld [vmem:[#allocation60_spill] sm:$0xff]  ;;  %v11584_v43 = vld [vmem:[#allocation83_spill] sm:$0xff] }
 0x375   :  { %v1379_v3 = vadd.f32 %v11576_v62, %v1226_v57  ;;  %v8700_v49 = vpop.permute.xlu1 %3104  ;;  %v11581_v57 = vld [vmem:[#allocation29_spill] sm:$0xff]  ;;  %v11582_v30 = vrot.slane %v8521_v29, 1  ;;  %v2559_v5 = vrot.slane %v8635_v26, 2  ;;  %v8724_v19 = vmul.f32 %v8458_v47, %v7241_v21  ;;  %v11588_v62 = vld [vmem:[#allocation84_spill] sm:$0xff] }
 0x376   :  { %11579 = vst [vmem:[#allocation42_spill] sm:$0xff] %v8700_v49  ;;  %11580 = vst [vmem:[#allocation58_spill] sm:$0xff] %v8712_v10  ;;  %v705_v61 = vadd.f32 %v11581_v57, %v8293_v63  ;;  %1311 = vrot.lane.b32.xlu0 %v1306_v14, %s6203_s6  ;;  %v1506_v20 = vadd.f32 %v11584_v43, %v1378_v50  ;;  %v11585_v63 = vld [vmem:[#allocation102_spill] sm:$0xff]  ;;  %v8732_v13 = vstv %s8667_s2  ;;  %v11591_v57 = vld [vmem:[#allocation85_spill] sm:$0xff]  ;;  %v11623_v25 = vrot.slane %v8556_v44, 1  ;;  %s9364_s2 = sld [smem:[#allocation8 + $0x6a]] }
 0x377   :  { %v8719_v53 = vsel %vm924_vm6, %v2119_v56, %v11582_v30  ;;  %1307 = vrot.lane.b32.xlu1 %v1303_v55, %s6203_s6  ;;  %v1507_v6 = vadd.f32 %v11583_v28, %v1379_v3  ;;  %v1868_v34 = vadd.f32 %v11585_v63, %v1802_v11  ;;  %11586 = vst [vmem:[#allocation24_spill] sm:$0xff] %v8732_v13  ;;  %v11587_v56 = vrot.slane %v8327_v27, 2  ;;  %v11590_v14 = vld [vmem:[#allocation62_spill] sm:$0xff] }
 0x378   :  { %v1255_v42 = vadd.f32 %v11588_v62, %v1095_v38  ;;  %v8739_v47 = vpop.permute.xlu0 %3438  ;;  %v1584_v55 = vsel %vm1365_vm7, %v1582_v41, %v1583_v60  ;;  %v1585_v3 = vrot.slane %v1576_v54, 2  ;;  %v1666_v11 = vadd.f32 %v11591_v57, %v1506_v20  ;;  %v11594_v43 = vld [vmem:[#allocation70_spill] sm:$0xff] }
 0x379   :  { %v1401_v24 = vadd.f32 %v11587_v56, %v1256_v15  ;;  %v8737_v12 = vpop.permute.xlu1 %3234  ;;  %v1667_v50 = vadd.f32 %v11590_v14, %v1507_v6  ;;  %v11592_v30 = vrot.slane %v8517_v45, 1  ;;  %v11250_v27 = vrot.slane %v8712_v10, 2  ;;  %v11593_v15 = vld [vmem:[#allocation51_spill] sm:$0xff]  ;;  %v11596_v45 = vld [vmem:[#allocation101_spill] sm:$0xff]  ;;  %v11657_v49 = vld [vmem:[#allocation110_spill] sm:$0xff] }
 0x37a   :  { %11589 = vst [vmem:[#allocation49_spill] sm:$0xff] %v8737_v12  ;;  %v835_v38 = vadd.f32 %v11593_v15, %v705_v61  ;;  %v11595_v56 = vrot.slane %v8531_v40, 2  ;;  %v2140_v54 = vrot.slane %v8681_v37, 1  ;;  %1588 = vrot.lane.b32.xlu0 %v1584_v55, %s6202_s26  ;;  %v1998_v41 = vadd.f32 %v11596_v45, %v1868_v34  ;;  %v11600_v14 = vld [vmem:[#allocation191_spill] sm:$0xff]  ;;  %v11605_v45 = vld [vmem:[#allocation93_spill] sm:$0xff] }
 0x37b   :  { %v2127_v28 = vadd.f32 %v11592_v30, %v1999_v31  ;;  %v1537_v63 = vadd.f32 %v11594_v43, %v1401_v24  ;;  %1153 = vrot.lane.b32.xlu1 %v1145_v7, %s6202_s26  ;;  %v11597_v31 = vld [vmem:[#allocation126_spill] sm:$0xff]  ;;  %v2572_v61 = vmul.f32 %v8482_v17, %v7216_v48  ;;  %v8767_v20 = vmul.f32 %v8482_v17, %v7241_v21  ;;  %v11604_v43 = vld [vmem:[#allocation61_spill] sm:$0xff] }
 0x37c   :  { %v8754_v62 = vsel %vm1365_vm7, %v2556_v1, %v11595_v56  ;;  %v11598_v1 = vld [vmem:[#allocation47_spill] sm:$0xff]  ;;  %v1400_v37 = vadd.f32 %v8426_v9, %v1255_v42  ;;  %v8775_v7 = vpop.permute.xlu0 %3598  ;;  %v1734_v34 = vmul.f32 %v8732_v13, %v6732_v39  ;;  %v8781_v55 = vmul.f32 %v8732_v13, %v6734_v2  ;;  %v11602_v42 = vld [vmem:[#allocation177_spill] sm:$0xff] }
 0x37d   :  { %v2255_v6 = vadd.f32 %v11597_v31, %v2127_v28  ;;  %v834_v24 = vadd.f32 %v11598_v1, %v704_v52  ;;  %v8773_v22 = vpop.permute.xlu1 %3594  ;;  %v1805_v17 = vadd.f32 %v8510_v36, %v1667_v50  ;;  %v1804_v57 = vadd.f32 %v11600_v14, %v1666_v11  ;;  %v11601_v52 = vld [vmem:[#allocation129_spill] sm:$0xff]  ;;  %v11606_v36 = vld [vmem:[#allocation103_spill] sm:$0xff]  ;;  %v11607_v11 = vld [vmem:[#allocation104_spill] sm:$0xff] }
 0x37e   :  { %11599 = vst [vmem:[#allocation57_spill] sm:$0xff] %v8781_v55  ;;  %v1587_v9 = vsel %vm1365_vm7, %v1585_v3, %v11250_v27  ;;  %v11603_v28 = vrot.slane %v11602_v42, 1  ;;  %v1697_v56 = vadd.f32 %v11604_v43, %v1537_v63  ;;  %v1536_v31 = vadd.f32 %v11605_v45, %v1400_v37  ;;  %v11609_v63 = vld [vmem:[#allocation185_spill] sm:$0xff] }
 0x37f   :  { %v2415_v30 = vadd.f32 %v11601_v52, %v2255_v6  ;;  %v2143_v1 = vrot.slane %v8724_v19, 1  ;;  %1313 = vrot.lane.b32.xlu1 %v1305_v0, %s6203_s6  ;;  %1592 = vrot.lane.b32.xlu0 %v1587_v9, %s6202_s26  ;;  %v1871_v50 = vadd.f32 %v11606_v36, %v1805_v17  ;;  %v1870_v6 = vadd.f32 %v11607_v11, %v1804_v57  ;;  %v11610_v9 = vld [vmem:[#allocation105_spill] sm:$0xff]  ;;  %v11616_v11 = vld [vmem:[#allocation86_spill] sm:$0xff] }
 0x380   :  { %v962_v15 = vadd.f32 %v11603_v28, %v835_v38  ;;  %v2126_v3 = vadd.f32 %v8622_v16, %v1998_v41  ;;  %v2580_v14 = vrot.slane %v2572_v61, 2  ;;  %v11608_v38 = vld [vmem:[#allocation66_spill] sm:$0xff]  ;;  %v961_v42 = vadd.f32 %v11609_v63, %v834_v24  ;;  %v8807_v37 = vpop.permute.xlu0 %3874  ;;  %v11611_v28 = vld [vmem:[#allocation107_spill] sm:$0xff]  ;;  %v11613_v61 = vld [vmem:[#allocation149_spill] sm:$0xff] }
 0x381   :  { %v8805_v19 = vpop.permute.xlu1 %4034  ;;  %v1742_v51 = vrot.slane %v1734_v34, 2  ;;  %v11249_v0 = vrot.slane %v8781_v55, 2  ;;  %v2001_v17 = vadd.f32 %v11610_v9, %v1871_v50  ;;  %v2000_v57 = vadd.f32 %v11611_v28, %v1870_v6  ;;  %v11614_v24 = vld [vmem:[#allocation68_spill] sm:$0xff]  ;;  %v11615_v45 = vld [vmem:[#allocation89_spill] sm:$0xff]  ;;  %v11618_v50 = vld [vmem:[#allocation154_spill] sm:$0xff] }
 0x382   :  { %v1098_v52 = vadd.f32 %v11608_v38, %v962_v15  ;;  %v11612_v16 = vrot.slane %v8531_v40, 2  ;;  %v2254_v15 = vadd.f32 %v11613_v61, %v2126_v3  ;;  %v1097_v36 = vadd.f32 %v11615_v45, %v961_v42  ;;  %v11617_v38 = vld [vmem:[#allocation194_spill] sm:$0xff]  ;;  %v11621_v42 = vld [vmem:[#allocation91_spill] sm:$0xff]  ;;  %v11646_v27 = vld [vmem:[#allocation117_spill] sm:$0xff] }
 0x383   :  { %v1696_v34 = vadd.f32 %v11616_v11, %v1536_v31  ;;  %v1813_v63 = vadd.f32 %v11617_v38, %v1697_v56  ;;  %1590 = vrot.lane.b32.xlu1 %v1583_v60, %s6202_s26  ;;  %v11620_v3 = vrot.slane %v8543_v35, 1  ;;  %v2583_v31 = vrot.slane %v8767_v20, 2  ;;  %v11622_v9 = vld [vmem:[#allocation106_spill] sm:$0xff]  ;;  %v11628_v38 = vld [vmem:[#allocation75_spill] sm:$0xff]  ;;  %v11661_v55 = vld [vmem:[#allocation136_spill] sm:$0xff] }
 0x384   :  { %v2567_v41 = vadd.f32 %v11612_v16, %v2415_v30  ;;  %v1258_v43 = vadd.f32 %v11614_v24, %v1098_v52  ;;  %v2414_v40 = vadd.f32 %v11618_v50, %v2254_v15  ;;  %v11619_v30 = vrot.slane %v8539_v4, 2  ;;  %v8844_v26 = vpop.permute.xlu0 %3878  ;;  %v11629_v50 = vld [vmem:[#allocation115_spill] sm:$0xff] }
 0x385   :  { %v2142_v52 = vsel %vm924_vm6, %v2140_v54, %v11620_v3  ;;  %v1257_v56 = vadd.f32 %v11621_v42, %v1097_v36  ;;  %v1895_v28 = vadd.f32 %v11622_v9, %v1813_v63  ;;  %v8839_v60 = vsel %vm924_vm6, %v2143_v1, %v11623_v25  ;;  %v8842_v61 = vpop.permute.xlu1 %3626  ;;  %v11625_v54 = vld [vmem:[#allocation132_spill] sm:$0xff]  ;;  %v11636_v25 = vld [vmem:[#allocation109_spill] sm:$0xff] }
 0x386   :  { %v2561_v6 = vsel %vm1365_vm7, %v2559_v5, %v11619_v30  ;;  %v2987_v16 = vstv %s8771_s4  ;;  %v11624_v5 = vrot.slane %v8521_v29, 1  ;;  %v2695_v24 = vadd.f32 %v11625_v54, %v2567_v41  ;;  %v11626_v36 = vld [vmem:[#allocation180_spill] sm:$0xff]  ;;  %s9374_s4 = sld [smem:[#allocation8 + $0x4e]] }
 0x387   :  { %v2128_v20 = vadd.f32 %v8719_v53, %v2000_v57  ;;  %v1744_v45 = vsel %vm1365_vm7, %v1742_v51, %v11249_v0  ;;  %v11627_v1 = vrot.slane %v11626_v36, 2  ;;  %v1812_v63 = vadd.f32 %v11628_v38, %v1696_v34  ;;  %v11631_v53 = vld [vmem:[#allocation128_spill] sm:$0xff]  ;;  %v11632_v51 = vld [vmem:[#allocation151_spill] sm:$0xff] }
 0x388   :  { %v2129_v15 = vadd.f32 %v11624_v5, %v2001_v17  ;;  %v2025_v30 = vadd.f32 %v11629_v50, %v1895_v28  ;;  %v11630_v3 = vrot.slane %v8569_v18, 2  ;;  %1748 = vrot.lane.b32.xlu1 %v1744_v45, %s6203_s6  ;;  %v2566_v41 = vadd.f32 %v8754_v62, %v2414_v40  ;;  %v11634_v42 = vld [vmem:[#allocation72_spill] sm:$0xff]  ;;  %v11638_v62 = vld [vmem:[#allocation131_spill] sm:$0xff]  ;;  %v11640_v50 = vld [vmem:[#allocation74_spill] sm:$0xff] }
 0x389   :  { %v1403_v11 = vadd.f32 %v11627_v1, %v1258_v43  ;;  %v2256_v57 = vadd.f32 %v11632_v51, %v2128_v20  ;;  %v11633_v43 = vrot.slane %v8586_v23, 2  ;;  %v1894_v5 = vadd.f32 %v11636_v25, %v1812_v63  ;;  %v8879_v45 = vpop.permute.xlu1 %3630  ;;  %v11637_v20 = vld [vmem:[#allocation130_spill] sm:$0xff]  ;;  %v11639_v1 = vld [vmem:[#allocation153_spill] sm:$0xff]  ;;  %v11643_v51 = vld [vmem:[#allocation111_spill] sm:$0xff] }
 0x38a   :  { %v8860_v29 = vsel %vm1365_vm7, %v2580_v14, %v11630_v3  ;;  %v2257_v17 = vadd.f32 %v11631_v53, %v2129_v15  ;;  %v11635_v14 = vld [vmem:[#allocation188_spill] sm:$0xff]  ;;  %v8877_v54 = vstv %s8803_s18  ;;  %v8881_v15 = vpop.permute.xlu0 %4038  ;;  %v2855_v40 = vadd.f32 %v11638_v62, %v2695_v24  ;;  %v11645_v25 = vld [vmem:[#allocation114_spill] sm:$0xff]  ;;  %s5954_s18 = sld [smem:[#allocation8 + $0x6b]] }
 0x38b   :  { %v8871_v34 = vsel %vm1365_vm7, %v2583_v31, %v11633_v43  ;;  %v1539_v9 = vadd.f32 %v11634_v42, %v1403_v11  ;;  %v1402_v28 = vadd.f32 %v11635_v14, %v1257_v56  ;;  %v2416_v38 = vadd.f32 %v11639_v1, %v2256_v57  ;;  %v11641_v11 = vld [vmem:[#allocation95_spill] sm:$0xff]  ;;  %v11647_v24 = vld [vmem:[#allocation120_spill] sm:$0xff]  ;;  %v11648_v57 = vld [vmem:[#allocation97_spill] sm:$0xff] }
 0x38c   :  { %v2417_v36 = vadd.f32 %v11637_v20, %v2257_v17  ;;  %v3297_v31 = vstv %s8815_s19  ;;  %v11642_v56 = vrot.slane %v8543_v35, 1  ;;  %v2989_v43 = vmul.f32 %v2987_v16, %v11643_v51  ;;  %v11644_v42 = vld [vmem:[#allocation155_spill] sm:$0xff]  ;;  %v11649_v1 = vld [vmem:[#allocation108_spill] sm:$0xff]  ;;  %s5835_s19 = sld [smem:[#allocation8 + $0x6e]] }
 0x38d   :  { %v1699_v3 = vadd.f32 %v11640_v50, %v1539_v9  ;;  %v1538_v53 = vadd.f32 %v11641_v11, %v1402_v28  ;;  %v2694_v14 = vadd.f32 %v11644_v42, %v2566_v41  ;;  %v2988_v0 = vmul.f32 %v2987_v16, %v11645_v25  ;;  %v11650_v50 = vld [vmem:[#allocation138_spill] sm:$0xff] }
 0x38e   :  { %v2151_v63 = vadd.f32 %v11642_v56, %v2025_v30  ;;  %v2991_v17 = vmul.f32 %v2987_v16, %v11646_v27  ;;  %v2990_v20 = vmul.f32 %v2987_v16, %v11647_v24  ;;  %v2024_v9 = vadd.f32 %v11649_v1, %v1894_v5  ;;  %v8903_v30 = vpop.permute.xlu1 %3906  ;;  %v8905_v41 = vpop.permute.xlu0 %3466  ;;  %v11652_v5 = vld [vmem:[#allocation195_spill] sm:$0xff] }
 0x38f   :  { %v1698_v62 = vadd.f32 %v11648_v57, %v1538_v53  ;;  %v8901_v35 = vmul.f32 %v8877_v54, %v11643_v51  ;;  %v11651_v11 = vrot.slane %v8539_v4, 2  ;;  %v2568_v42 = vadd.f32 %v2561_v6, %v2416_v38 }
 0x390   :  { %v2287_v28 = vadd.f32 %v11650_v50, %v2151_v63  ;;  %v2993_v12 = vadd.f32 %v2989_v43, %v2855_v40  ;;  %v8911_v16 = vmul.f32 %v8877_v54, %v11645_v25  ;;  %v1815_v53 = vadd.f32 %v11652_v5, %v1699_v3  ;;  %v11653_v50 = vld [vmem:[#allocation134_spill] sm:$0xff]  ;;  %v11655_v40 = vld [vmem:[#allocation157_spill] sm:$0xff]  ;;  %v11658_v3 = vld [vmem:[#allocation196_spill] sm:$0xff] }
 0x391   :  { %v2569_v56 = vadd.f32 %v11651_v11, %v2417_v36  ;;  %v8915_v63 = vmul.f32 %v3297_v31, %v11643_v51  ;;  %v8918_v57 = vmul.f32 %v3297_v31, %v11646_v27  ;;  %v3737_v1 = vstv %s8862_s21  ;;  %v11654_v36 = vld [vmem:[#allocation156_spill] sm:$0xff]  ;;  %v11656_v43 = vld [vmem:[#allocation174_spill] sm:$0xff]  ;;  %s5845_s21 = sld [smem:[#allocation8 + $0x70]] }
 0x392   :  { %v2854_v6 = vadd.f32 %v11654_v36, %v2694_v14  ;;  %v2696_v38 = vadd.f32 %v11655_v40, %v2568_v42  ;;  %v3059_v11 = vadd.f32 %v11656_v43, %v2993_v12  ;;  %v1897_v8 = vadd.f32 %v11657_v49, %v1815_v53  ;;  %v8930_v21 = vpop.permute.xlu1 %3498  ;;  %v8932_v48 = vpop.permute.xlu0 %3470  ;;  %v11663_v14 = vld [vmem:[#allocation183_spill] sm:$0xff]  ;;  %v11664_v49 = vld [vmem:[#allocation112_spill] sm:$0xff] }
 0x393   :  { %v2697_v4 = vadd.f32 %v11653_v50, %v2569_v56  ;;  %v1814_v5 = vadd.f32 %v11658_v3, %v1698_v62  ;;  %v2447_v39 = vadd.f32 %v11659_v32, %v2287_v28  ;;  %v2150_v2 = vadd.f32 %v2142_v52, %v2024_v9  ;;  %11660 = vst [vmem:[#allocation81_spill] sm:$0xff] %v8930_v21  ;;  %v11662_v56 = vld [vmem:[#allocation159_spill] sm:$0xff]  ;;  %v11665_v62 = vld [vmem:[#allocation113_spill] sm:$0xff] }
 0x394   :  { %v2856_v50 = vadd.f32 %v11662_v56, %v2696_v38  ;;  %v3189_v36 = vadd.f32 %v11663_v14, %v3059_v11  ;;  %v8939_v12 = vmul.f32 %v8877_v54, %v11646_v27  ;;  %v2027_v53 = vadd.f32 %v11665_v62, %v1897_v8  ;;  %v11666_v32 = vld [vmem:[#allocation161_spill] sm:$0xff]  ;;  %v11667_v38 = vld [vmem:[#allocation118_spill] sm:$0xff] }
 0x395   :  { %v2857_v10 = vadd.f32 %v11661_v55, %v2697_v4  ;;  %v1896_v42 = vadd.f32 %v11664_v49, %v1814_v5  ;;  %v2286_v52 = vadd.f32 %v11666_v32, %v2150_v2  ;;  %v3307_v9 = vrot.slane %v8915_v63, 1  ;;  %v11669_v63 = vld [vmem:[#allocation178_spill] sm:$0xff] }
 0x396   :  { %v2992_v28 = vadd.f32 %v2988_v0, %v2854_v6  ;;  %v3310_v40 = vrot.slane %v8918_v57, 1  ;;  %v8947_v55 = vmul.f32 %v3737_v1, %v11643_v51  ;;  %v3298_v4 = vmul.f32 %v3297_v31, %v11645_v25  ;;  %v3433_v2 = vpop.permute.xlu1 %3432  ;;  %v8956_v5 = vpop.permute.xlu0 %4066 }
 0x397   :  { %v2026_v43 = vadd.f32 %v11667_v38, %v1896_v42  ;;  %v11668_v11 = vrot.slane %v8569_v18, 2  ;;  %v8954_v8 = vmul.f32 %v3737_v1, %v11646_v27  ;;  %v3300_v0 = vmul.f32 %v3297_v31, %v11647_v24  ;;  %v11671_v42 = vld [vmem:[#allocation144_spill] sm:$0xff]  ;;  %v11672_v18 = vld [vmem:[#allocation158_spill] sm:$0xff] }
 0x398   :  { %v3058_v57 = vadd.f32 %v11669_v63, %v2992_v28  ;;  %v2995_v6 = vadd.f32 %v2991_v17, %v2857_v10  ;;  %v2994_v56 = vadd.f32 %v2990_v20, %v2856_v50  ;;  %v3317_v14 = vadd.f32 %v3307_v9, %v3189_v36  ;;  %v11675_v28 = vld [vmem:[#allocation140_spill] sm:$0xff] }
 0x399   :  { %v2591_v3 = vadd.f32 %v11668_v11, %v2447_v39  ;;  %v11670_v49 = vrot.slane %v8556_v44, 1  ;;  %v2446_v39 = vadd.f32 %v11672_v18, %v2286_v52  ;;  %v8965_v38 = vstv %s8921_s20  ;;  %v11673_v11 = vld [vmem:[#allocation179_spill] sm:$0xff]  ;;  %s5850_s20 = sld [smem:[#allocation8 + $0x71]] }
 0x39a   :  { %v3061_v21 = vadd.f32 %v11673_v11, %v2995_v6  ;;  %v3060_v13 = vadd.f32 %v11674_v46, %v2994_v56  ;;  %v3445_v31 = vadd.f32 %v8702_v58, %v3317_v14  ;;  %v3306_v33 = vrot.slane %v3298_v4, 1  ;;  %v3437_v44 = vpop.permute.xlu1 %3436  ;;  %v8972_v50 = vpop.permute.xlu0 %3910  ;;  %v11678_v6 = vld [vmem:[#allocation186_spill] sm:$0xff]  ;;  %v11680_v56 = vld [vmem:[#allocation135_spill] sm:$0xff] }
 0x39b   :  { %v2153_v62 = vadd.f32 %v11670_v49, %v2027_v53  ;;  %v2727_v32 = vadd.f32 %v11671_v42, %v2591_v3  ;;  %v2152_v17 = vadd.f32 %v8839_v60, %v2026_v43  ;;  %v3309_v20 = vrot.slane %v3300_v0, 1  ;;  %v11676_v53 = vld [vmem:[#allocation176_spill] sm:$0xff]  ;;  %v11677_v3 = vld [vmem:[#allocation182_spill] sm:$0xff] }
 0x39c   :  { %v3738_v36 = vmul.f32 %v3737_v1, %v11645_v25  ;;  %v3188_v52 = vadd.f32 %v11676_v53, %v3058_v57  ;;  %v3191_v63 = vadd.f32 %v11677_v3, %v3061_v21  ;;  %v3190_v49 = vadd.f32 %v11678_v6, %v3060_v13  ;;  %v11679_v58 = vld [vmem:[#allocation142_spill] sm:$0xff] }
 0x39d   :  { %v2289_v10 = vadd.f32 %v11675_v28, %v2153_v62  ;;  %v3605_v46 = vadd.f32 %v8773_v22, %v3445_v31  ;;  %v2887_v14 = vadd.f32 %v11680_v56, %v2727_v32  ;;  %v11681_v62 = vld [vmem:[#allocation163_spill] sm:$0xff]  ;;  %v2590_v43 = vadd.f32 %v8860_v29, %v2446_v39  ;;  %v11682_v22 = vld [vmem:[#allocation165_spill] sm:$0xff]  ;;  %v11685_v56 = vld [vmem:[#allocation146_spill] sm:$0xff] }
 0x39e   :  { %v2288_v60 = vadd.f32 %v11681_v62, %v2152_v17  ;;  %v3000_v0 = vmul.f32 %v8877_v54, %v11647_v24  ;;  %v3747_v42 = vrot.slane %v8947_v55, 2  ;;  %v8988_v21 = vmul.f32 %v8965_v38, %v11643_v51  ;;  %v11683_v32 = vld [vmem:[#allocation167_spill] sm:$0xff]  ;;  %v3597_v39 = vpop.permute.xlu1 %3596  ;;  %v8997_v54 = vpop.permute.xlu0 %4070 }
 0x39f   :  { %v2449_v4 = vadd.f32 %v11679_v58, %v2289_v10  ;;  %v3740_v13 = vmul.f32 %v3737_v1, %v11647_v24  ;;  %v2726_v18 = vadd.f32 %v11683_v32, %v2590_v43  ;;  %v3308_v11 = vsel %vm924_vm6, %v3306_v33, %v3307_v9  ;;  %v11690_v43 = vld [vmem:[#allocation197_spill] sm:$0xff] }
 0x3a0   :  { %v2448_v57 = vadd.f32 %v11682_v22, %v2288_v60  ;;  %v3311_v29 = vsel %vm924_vm6, %v3309_v20, %v3310_v40  ;;  %v3319_v55 = vadd.f32 %v3310_v40, %v3191_v63  ;;  %v3757_v31 = vadd.f32 %v3747_v42, %v3605_v46  ;;  %v11686_v60 = vld [vmem:[#allocation160_spill] sm:$0xff] }
 0x3a1   :  { %v3316_v28 = vadd.f32 %v3308_v11, %v3188_v52  ;;  %v3318_v10 = vadd.f32 %v3311_v29, %v3190_v49  ;;  %v11684_v17 = vrot.slane %v8586_v23, 2  ;;  %v3003_v1 = vadd.f32 %v8901_v35, %v2887_v14  ;;  %v11687_v63 = vld [vmem:[#allocation184_spill] sm:$0xff] }
 0x3a2   :  { %v3750_v3 = vrot.slane %v8954_v8, 2  ;;  %v3746_v6 = vrot.slane %v3738_v36, 2  ;;  %v3447_v58 = vadd.f32 %v8739_v47, %v3319_v55  ;;  %v3749_v20 = vrot.slane %v3740_v13, 2  ;;  %v3873_v49 = vpop.permute.xlu1 %3872  ;;  %v3593_v46 = vpop.permute.xlu0 %3592 }
 0x3a3   :  { %v2593_v53 = vadd.f32 %v11684_v17, %v2449_v4  ;;  %v3444_v33 = vadd.f32 %v3433_v2, %v3316_v28  ;;  %v3446_v9 = vadd.f32 %v3437_v44, %v3318_v10  ;;  %v2886_v40 = vadd.f32 %v11686_v60, %v2726_v18  ;;  %v11688_v2 = vld [vmem:[#allocation148_spill] sm:$0xff]  ;;  %v11689_v4 = vld [vmem:[#allocation169_spill] sm:$0xff] }
 0x3a4   :  { %v2592_v52 = vadd.f32 %v8871_v34, %v2448_v57  ;;  %v3085_v23 = vadd.f32 %v11687_v63, %v3003_v1  ;;  %v3607_v35 = vadd.f32 %v8775_v7, %v3447_v58  ;;  %v3885_v8 = vadd.f32 %v8807_v37, %v3757_v31  ;;  %v11691_v7 = vld [vmem:[#allocation171_spill] sm:$0xff]  ;;  %v11693_v1 = vld [vmem:[#allocation189_spill] sm:$0xff] }
 0x3a5   :  { %v2729_v62 = vadd.f32 %v11685_v56, %v2593_v53  ;;  %v3606_v36 = vadd.f32 %v3597_v39, %v3446_v9  ;;  %v3604_v47 = vadd.f32 %v3593_v46, %v3444_v33  ;;  %v3748_v22 = vsel %vm1365_vm7, %v3746_v6, %v3747_v42  ;;  %v11695_v9 = vld [vmem:[#allocation190_spill] sm:$0xff] }
 0x3a6   :  { %v2728_v14 = vadd.f32 %v11689_v4, %v2592_v52  ;;  %v3215_v13 = vadd.f32 %v11690_v43, %v3085_v23  ;;  %v3331_v34 = vrot.slane %v8988_v21, 1  ;;  %v3325_v57 = vmul.f32 %v8965_v38, %v11646_v27  ;;  %v3877_v39 = vpop.permute.xlu1 %3876  ;;  %v4033_v53 = vpop.permute.xlu0 %4032 }
 0x3a7   :  { %v2889_v44 = vadd.f32 %v11688_v2, %v2729_v62  ;;  %v3761_v32 = vstv %s8990_s22  ;;  %v3756_v18 = vadd.f32 %v3748_v22, %v3604_v47  ;;  %v3002_v37 = vadd.f32 %v8911_v16, %v2886_v40  ;;  %s5860_s22 = sld [smem:[#allocation8 + $0x73]] }
 0x3a8   :  { %v2888_v11 = vadd.f32 %v11691_v7, %v2728_v14  ;;  %v3751_v29 = vsel %vm1365_vm7, %v3749_v20, %v3750_v3  ;;  %v3322_v55 = vmul.f32 %v8965_v38, %v11645_v25  ;;  %v9024_v31 = vadd.f32 %v8805_v19, %v3885_v8 }
 0x3a9   :  { %v3759_v42 = vadd.f32 %v3750_v3, %v3607_v35  ;;  %v3758_v21 = vadd.f32 %v3751_v29, %v3606_v36  ;;  %v3884_v28 = vadd.f32 %v3873_v49, %v3756_v18  ;;  %v3005_v10 = vadd.f32 %v8939_v12, %v2889_v44  ;;  %v11699_v49 = vld [vmem:[#allocation192_spill] sm:$0xff] }
 0x3aa   :  { %11692 = vst [vmem:[#allocation44_spill] sm:$0xff] %v9024_v31  ;;  %v3341_v17 = vadd.f32 %v3331_v34, %v3215_v13  ;;  %v3084_v16 = vadd.f32 %v11693_v1, %v3002_v37  ;;  %v3004_v19 = vadd.f32 %v3000_v0, %v2888_v11  ;;  %v4037_v56 = vpop.permute.xlu1 %4036  ;;  %v3324_v12 = vmul.f32 %v8965_v38, %v11647_v24  ;;  %v11700_v38 = vld [vmem:[#allocation193_spill] sm:$0xff]  ;;  %v3625_v22 = vpop.permute.xlu0 %3624 }
 0x3ab   :  { %v3887_v6 = vadd.f32 %v8844_v26, %v3759_v42  ;;  %v3886_v58 = vadd.f32 %v3877_v39, %v3758_v21  ;;  %v9029_v33 = vadd.f32 %v4033_v53, %v3884_v28  ;;  %v3087_v20 = vadd.f32 %v11695_v9, %v3005_v10 }
 0x3ac   :  { %v3477_v3 = vadd.f32 %v8905_v41, %v3341_v17  ;;  %v4179_v60 = vsel %vm4178_vm0, %v9024_v31, 0.0  ;;  %v3763_v52 = vmul.f32 %v3761_v32, %v11643_v51  ;;  %v3330_v63 = vrot.slane %v3322_v55, 1  ;;  %v11698_v41 = vld [vmem:[#allocation187_spill] sm:$0xff] }
 0x3ad   :  { %11694 = vst [vmem:[#allocation55_spill] sm:$0xff] %v9029_v33  ;;  %v9036_v62 = vadd.f32 %v8881_v15, %v3887_v6  ;;  %v4177_v26 = vsel %vm4176_vm1, %v9029_v33, 0.0  ;;  %v9042_v40 = vadd.f32 %v4037_v56, %v3886_v58  ;;  %v3214_v23 = vadd.f32 %v11698_v41, %v3084_v16 }
 0x3ae   :  { %v4180_v0 = vadd.f32 %v4179_v60, %v4177_v26  ;;  %v3086_v46 = vadd.f32 %v11699_v49, %v3004_v19  ;;  %v3217_v35 = vadd.f32 %v11700_v38, %v3087_v20  ;;  %v3637_v8 = vadd.f32 %v8842_v61, %v3477_v3  ;;  %v3465_v47 = vpop.permute.xlu1 %3464  ;;  %v3909_v53 = vpop.permute.xlu0 %3908 }
 0x3af   :  { %11696 = vst [vmem:[#allocation77_spill] sm:$0xff] %v9036_v62  ;;  %11697 = vst [vmem:[#allocation56_spill] sm:$0xff] %v9042_v40  ;;  %v4181_v15 = vsel %vm4176_vm1, %v9042_v40, 0.0  ;;  %v3334_v36 = vrot.slane %v3325_v57, 1  ;;  %v3333_v2 = vrot.slane %v3324_v12, 1  ;;  %v3765_v14 = vmul.f32 %v3761_v32, %v11646_v27 }
 0x3b0   :  { %v4182_v44 = vadd.f32 %v4181_v15, %v4180_v0  ;;  %v3216_v4 = vadd.f32 %v8601_v59, %v3086_v46  ;;  %v4183_v43 = vsel %vm4178_vm0, %v9036_v62, 0.0  ;;  %v3771_v13 = vrot.slane %v3763_v52, 2 }
 0x3b1   :  { %v3332_v18 = vsel %vm924_vm6, %v3330_v63, %v3331_v34  ;;  %v3764_v11 = vmul.f32 %v3761_v32, %v11647_v24  ;;  %v3343_v37 = vadd.f32 %v3334_v36, %v3217_v35  ;;  %v3335_v29 = vsel %vm924_vm6, %v3333_v2, %v3334_v36 }
 0x3b2   :  { %v4184_v7 = vadd.f32 %v4183_v43, %v4182_v44  ;;  %v3340_v61 = vadd.f32 %v3332_v18, %v3214_v23  ;;  %v3781_v57 = vadd.f32 %v3771_v13, %v3637_v8  ;;  %v3469_v39 = vpop.permute.xlu1 %3468  ;;  %v3762_v59 = vmul.f32 %v3761_v32, %v11645_v25  ;;  %v4069_v26 = vpop.permute.xlu0 %4068 }
 0x3b3   :  { %v3479_v55 = vadd.f32 %v8932_v48, %v3343_v37  ;;  %v3342_v21 = vadd.f32 %v3335_v29, %v3216_v4  ;;  %v3774_v28 = vrot.slane %v3765_v14, 2  ;;  %v3773_v10 = vrot.slane %v3764_v11, 2 }
 0x3b4   :  { %4185 = vadd.xlane.f32.xlu0 %v4184_v7  ;;  %v3476_v42 = vadd.f32 %v3465_v47, %v3340_v61  ;;  %v3917_v34 = vadd.f32 %v8903_v30, %v3781_v57  ;;  %v3770_v16 = vrot.slane %v3762_v59, 2  ;;  %v4194_v30 = vmul.f32 %v9029_v33, %v9029_v33 }
 0x3b5   :  { %v3478_v17 = vadd.f32 %v3469_v39, %v3342_v21  ;;  %v3639_v6 = vadd.f32 %v8879_v45, %v3479_v55  ;;  %v3775_v20 = vsel %vm1365_vm7, %v3773_v10, %v3774_v28  ;;  %v4195_v45 = vmul.f32 %v9024_v31, %v9024_v31  ;;  %v11706_v21 = vld [vmem:[#allocation24_spill] sm:$0xff]  ;;  %v11707_v10 = vld [vmem:[#allocation21_spill] sm:$0xff] }
 0x3b6   :  { %v3629_v1 = vpop.permute.xlu1 %3628  ;;  %v3636_v58 = vadd.f32 %v3625_v22, %v3476_v42  ;;  %v9064_v32 = vadd.f32 %v8956_v5, %v3917_v34  ;;  %v3772_v48 = vsel %vm1365_vm7, %v3770_v16, %v3771_v13  ;;  %v4198_v49 = vsel %vm4176_vm1, %v4194_v30, 0.0  ;;  %v11705_v42 = vld [vmem:[#allocation22_spill] sm:$0xff]  ;;  %v11713_v30 = vld [vmem:[#allocation43_spill] sm:$0xff] }
 0x3b7   :  { %v3638_v9 = vadd.f32 %v3629_v1, %v3478_v17  ;;  %v3783_v56 = vadd.f32 %v3774_v28, %v3639_v6  ;;  %v4196_v46 = vmul.f32 %v9042_v40, %v9042_v40  ;;  %v4199_v35 = vsel %vm4178_vm0, %v4195_v45, 0.0  ;;  %v11708_v34 = vld [vmem:[#allocation58_spill] sm:$0xff]  ;;  %v11710_v6 = vld [vmem:[#allocation57_spill] sm:$0xff] }
 0x3b8   :  { %11701 = vst [vmem:[#allocation64_spill] sm:$0xff] %v9064_v32  ;;  %v3780_v60 = vadd.f32 %v3772_v48, %v3636_v58  ;;  %v4502_v5 = vmul.f32 %v9064_v32, %v9064_v32  ;;  %v4200_v2 = vadd.f32 %v4199_v35, %v4198_v49  ;;  %v4197_v18 = vmul.f32 %v9036_v62, %v9036_v62  ;;  %v11712_v48 = vld [vmem:[#allocation40_spill] sm:$0xff]  ;;  %v11768_v40 = vld [vmem:[#allocation198_spill] sm:$0xff] }
 0x3b9   :  { %v3782_v19 = vadd.f32 %v3775_v20, %v3638_v9  ;;  %v3919_v52 = vadd.f32 %v8972_v50, %v3783_v56  ;;  %v4486_v50 = vsel %vm4178_vm0, %v9064_v32, 0.0  ;;  %v4201_v43 = vsel %vm4176_vm1, %v4196_v46, 0.0  ;;  %v9117_v20 = vpop.permute.xlu0 %3496 }
 0x3ba   :  { %v3905_v3 = vpop.permute.xlu1 %3904  ;;  %v4506_v36 = vsel %vm4178_vm0, %v4502_v5, 0.0  ;;  %v4202_v57 = vadd.f32 %v4201_v43, %v4200_v2  ;;  %v4203_v59 = vsel %vm4178_vm0, %v4197_v18, 0.0  ;;  %v1737_v28 = vmul.f32 %v11706_v21, %v11705_v42  ;;  %v11716_v18 = vld [vmem:[#allocation20_spill] sm:$0xff] }
 0x3bb   :  { %v3918_v12 = vadd.f32 %v3909_v53, %v3782_v19  ;;  %v3916_v63 = vadd.f32 %v3905_v3, %v3780_v60  ;;  %v9077_v23 = vadd.f32 %v8997_v54, %v3919_v52  ;;  %v1736_v17 = vmul.f32 %v11706_v21, %v11707_v10 }
 0x3bc   :  { %v4204_v55 = vadd.f32 %v4203_v59, %v4202_v57  ;;  %v11709_v53 = vrot.slane %v11708_v34, 2  ;;  %v1746_v1 = vrot.slane %v1737_v28, 2  ;;  %v11711_v58 = vrot.slane %v11710_v6, 2  ;;  %v11717_v57 = vld [vmem:[#allocation19_spill] sm:$0xff]  ;;  %v11719_v34 = vld [vmem:[#allocation28_spill] sm:$0xff] }
 0x3bd   :  { %v9072_v0 = vadd.f32 %v4069_v26, %v3918_v12  ;;  %11703 = vst [vmem:[#allocation82_spill] sm:$0xff] %v9077_v23  ;;  %v4504_v44 = vmul.f32 %v9077_v23, %v9077_v23  ;;  %v4490_v7 = vsel %vm4178_vm0, %v9077_v23, 0.0  ;;  %v1745_v16 = vrot.slane %v1736_v17, 2  ;;  %v9125_v60 = vpop.permute.xlu0 %3500  ;;  %v11714_v26 = vld [vmem:[#allocation48_spill] sm:$0xff]  ;;  %v11718_v59 = vld [vmem:[#allocation31_spill] sm:$0xff] }
 0x3be   :  { %v4065_v41 = vpop.permute.xlu1 %4064  ;;  %v1925_v9 = vstv %s5874_s24  ;;  %v2055_v56 = vstv %s5879_s25  ;;  %v2483_v46 = vstv %s5894_s11  ;;  %v964_v2 = vstv %s5838_s5  ;;  %v11755_v23 = vld [vmem:[#allocation164_spill] sm:$0xff]  ;;  %s5865_s24 = sld [smem:[#allocation8 + $0x74]] }
 0x3bf   :  { %11702 = vst [vmem:[#allocation79_spill] sm:$0xff] %v9072_v0  ;;  %v9082_v38 = vadd.f32 %v4065_v41, %v3916_v63  ;;  %v4503_v54 = vmul.f32 %v9072_v0, %v9072_v0  ;;  %v4488_v14 = vsel %vm4176_vm1, %v9072_v0, 0.0  ;;  %v4510_v29 = vsel %vm4178_vm0, %v4504_v44, 0.0  ;;  %v11715_v63 = vld [vmem:[#allocation45_spill] sm:$0xff]  ;;  %v11748_v0 = vld [vmem:[#allocation162_spill] sm:$0xff] }
 0x3c0   :  { %v1747_v19 = vsel %vm1365_vm7, %v1745_v16, %v1746_v1  ;;  %v1927_v3 = vmul.f32 %v1925_v9, %v11712_v48  ;;  %v1926_v12 = vmul.f32 %v1925_v9, %v11713_v30  ;;  %v2056_v45 = vmul.f32 %v2055_v56, %v11713_v30 }
 0x3c1   :  { %11704 = vst [vmem:[#allocation26_spill] sm:$0xff] %v9082_v38  ;;  %v4485_v15 = vsel %vm4176_vm1, %v9082_v38, 0.0  ;;  %v4501_v8 = vmul.f32 %v9082_v38, %v9082_v38  ;;  %v4508_v11 = vsel %vm4176_vm1, %v4503_v54, 0.0  ;;  %v1928_v52 = vmul.f32 %v1925_v9, %v11714_v26  ;;  %v9133_v49 = vpop.permute.xlu0 %3658 }
 0x3c2   :  { %v4487_v47 = vadd.f32 %v4486_v50, %v4485_v15  ;;  %v1929_v5 = vmul.f32 %v1925_v9, %v11715_v63  ;;  %v2323_v41 = vstv %s5889_s27  ;;  %v2057_v35 = vmul.f32 %v2055_v56, %v11712_v48  ;;  %s5875_s27 = sld [smem:[#allocation8 + $0x76]] }
 0x3c3   :  { %v4505_v4 = vsel %vm4176_vm1, %v4501_v8, 0.0  ;;  %v2059_v50 = vmul.f32 %v2055_v56, %v11715_v63  ;;  %v2325_v15 = vmul.f32 %v2323_v41, %v11712_v48  ;;  %v2324_v8 = vmul.f32 %v2323_v41, %v11713_v30 }
 0x3c4   :  { %v4489_v13 = vadd.f32 %v4488_v14, %v4487_v47  ;;  %v4507_v22 = vadd.f32 %v4506_v36, %v4505_v4  ;;  %v2484_v54 = vmul.f32 %v2483_v46, %v11713_v30  ;;  %v2485_v36 = vmul.f32 %v2483_v46, %v11712_v48 }
 0x3c5   :  { %v9143_v47 = vstv %s5823_s12  ;;  %v2058_v44 = vmul.f32 %v2055_v56, %v11714_v26  ;;  %v9147_v4 = vpop.permute.xlu0 %3660  ;;  %v2333_v14 = vrot.slane %v2325_v15, 1  ;;  %v2332_v43 = vrot.slane %v2324_v8, 1  ;;  %s5880_s12 = sld [smem:[#allocation8 + $0x77]] }
 0x3c6   :  { %v4491_v37 = vadd.f32 %v4490_v7, %v4489_v13  ;;  %v4509_v61 = vadd.f32 %v4508_v11, %v4507_v22  ;;  %v2326_v13 = vmul.f32 %v2323_v41, %v11714_v26  ;;  %v2327_v22 = vmul.f32 %v2323_v41, %v11715_v63 }
 0x3c7   :  { %v639_v7 = vmul.f32 %v9143_v47, %v11716_v18  ;;  %v2492_v11 = vrot.slane %v2484_v54, 1  ;;  %v2334_v21 = vsel %vm924_vm6, %v2332_v43, %v2333_v14  ;;  %v9180_v54 = vpop.permute.xlu1 %3502 }
 0x3c8   :  { %4492 = vadd.xlane.f32.xlu1 %v4491_v37  ;;  %v4511_v39 = vadd.f32 %v4510_v29, %v4509_v61  ;;  %v2493_v37 = vrot.slane %v2485_v36, 1  ;;  %v966_v61 = vmul.f32 %v964_v2, %v11716_v18  ;;  %v965_v29 = vmul.f32 %v964_v2, %v11717_v57 }
 0x3c9   :  { %v2335_v28 = vrot.slane %v2326_v13, 1  ;;  %v2336_v17 = vrot.slane %v2327_v22, 1  ;;  %v2923_v36 = vstv %s5909_s15 }
 0x3ca   :  { %4512 = vadd.xlane.f32.xlu0 %v4511_v39  ;;  %v638_v39 = vmul.f32 %v9143_v47, %v11717_v57  ;;  %v2494_v6 = vsel %vm924_vm6, %v2492_v11, %v2493_v37  ;;  %v973_v9 = vrot.slane %v965_v29, 1 }
 0x3cc   :  { %4205 = vadd.xlane.f32.xlu1 %v4204_v55  ;;  %v729_v55 = vadd.f32 %v11718_v59, %v639_v7 }
 0x3dd   :  { %1594 = vrot.lane.b32.xlu1 %v11709_v53, %s6202_s26  ;;  %v728_v53 = vadd.f32 %v11719_v34, %v638_v39  ;;  %v11724_v39 = vld [vmem:[#allocation88_spill] sm:$0xff]  ;;  %v967_v34 = vmul.f32 %v964_v2, %v11707_v10 }
 0x3e0   :  { %1750 = vrot.lane.b32.xlu0 %v11711_v58, %s6203_s6  ;;  %v974_v58 = vrot.slane %v966_v61, 1  ;;  %v11723_v61 = vld [vmem:[#allocation76_spill] sm:$0xff] }
 0x3e1   :  { %1754 = vrot.lane.b32.xlu1 %v1746_v1, %s6203_s6  ;;  %v11720_v1 = vld [vmem:[#allocation53_spill] sm:$0xff] }
 0x3e2   :  { %v859_v16 = vadd.f32 %v11720_v1, %v729_v55  ;;  %v975_v15 = vsel %vm924_vm6, %v973_v9, %v974_v58  ;;  %v2924_v55 = vmul.f32 %v2923_v36, %v11713_v30  ;;  %v640_v1 = vmul.f32 %v9143_v47, %v11707_v10  ;;  %v9206_v9 = vpop.permute.xlu1 %3656 }
 0x3e4   :  { %1752 = vrot.lane.b32.xlu0 %v1747_v19, %s6203_s6  ;;  %v9165_v19 = vpop.permute.xlu0 %3662  ;;  %v984_v41 = vadd.f32 %v974_v58, %v859_v16  ;;  %v641_v16 = vmul.f32 %v9143_v47, %v11705_v42  ;;  %v2932_v47 = vrot.slane %v2924_v55, 2  ;;  %v11730_v55 = vld [vmem:[#allocation69_spill] sm:$0xff] }
 0x3e5   :  { %1936 = vrot.lane.b32.xlu1 %v1927_v3, %s6202_s26  ;;  %v11721_v3 = vld [vmem:[#allocation50_spill] sm:$0xff] }
 0x3e6   :  { %v858_v56 = vadd.f32 %v11721_v3, %v728_v53 }
 0x3e8   :  { %1934 = vrot.lane.b32.xlu0 %v1926_v12, %s6202_s26  ;;  %v9169_v12 = vstv %s5853_s23  ;;  %v9184_v43 = vpop.permute.xlu0 %3936 }
 0x3e9   :  { %2064 = vrot.lane.b32.xlu1 %v2056_v45, %s6203_s6  ;;  %v2337_v45 = vsel %vm924_vm6, %v2335_v28, %v2336_v17  ;;  %v1406_v8 = vmul.f32 %v9169_v12, %v11717_v57  ;;  %v968_v28 = vmul.f32 %v964_v2, %v11705_v42 }
 0x3eb   :  { %v1414_v53 = vrot.slane %v1406_v8, 2 }
 0x3ec   :  { %1938 = vrot.lane.b32.xlu0 %v1928_v52, %s6202_s26  ;;  %v2487_v52 = vmul.f32 %v2483_v46, %v11715_v63 }
 0x3ed   :  { %1940 = vrot.lane.b32.xlu1 %v1929_v5, %s6202_s26  ;;  %v2486_v5 = vmul.f32 %v2483_v46, %v11714_v26  ;;  %v983_v46 = vadd.f32 %v975_v15, %v858_v56  ;;  %v11727_v15 = vld [vmem:[#allocation33_spill] sm:$0xff] }
 0x3ee   :  { %v2496_v13 = vrot.slane %v2487_v52, 1  ;;  %v11726_v52 = vld [vmem:[#allocation30_spill] sm:$0xff]  ;;  %v731_v8 = vadd.f32 %v11727_v15, %v641_v16  ;;  %v11734_v15 = vld [vmem:[#allocation65_spill] sm:$0xff] }
 0x3ef   :  { %v2495_v22 = vrot.slane %v2486_v5, 1  ;;  %v1127_v59 = vadd.f32 %v11724_v39, %v983_v46  ;;  %v730_v5 = vadd.f32 %v11726_v52, %v640_v1  ;;  %v9233_v1 = vpop.permute.xlu1 %3940  ;;  %v2926_v52 = vmul.f32 %v2923_v36, %v11714_v26 }
 0x3f0   :  { %2066 = vrot.lane.b32.xlu0 %v2057_v35, %s6203_s6  ;;  %v2763_v35 = vstv %s5904_s28 }
 0x3f1   :  { %2070 = vrot.lane.b32.xlu1 %v2059_v50, %s6203_s6  ;;  %v1407_v50 = vmul.f32 %v9169_v12, %v11716_v18  ;;  %v2765_v7 = vmul.f32 %v2763_v35, %v11712_v48  ;;  %v2764_v11 = vmul.f32 %v2763_v35, %v11713_v30  ;;  %v2766_v58 = vmul.f32 %v2763_v35, %v11714_v26 }
 0x3f2   :  { %v2497_v3 = vsel %vm924_vm6, %v2495_v22, %v2496_v13 }
 0x3f3   :  { %v2773_v2 = vrot.slane %v2765_v7, 2  ;;  %v2772_v56 = vrot.slane %v2764_v11, 2  ;;  %v11729_v7 = vld [vmem:[#allocation54_spill] sm:$0xff]  ;;  %v2775_v39 = vrot.slane %v2766_v58, 2  ;;  %v1817_v58 = vstv %s9203_s0 }
 0x3f4   :  { %2068 = vrot.lane.b32.xlu0 %v2058_v44, %s6203_s6  ;;  %v11722_v44 = vld [vmem:[#allocation63_spill] sm:$0xff]  ;;  %v861_v11 = vadd.f32 %v11729_v7, %v731_v8  ;;  %v2155_v7 = vstv %s9219_s13 }
 0x3f5   :  { %2340 = vrot.lane.b32.xlu1 %v2333_v14, %s6202_s26  ;;  %v1128_v14 = vadd.f32 %v11722_v44, %v984_v41  ;;  %v977_v44 = vrot.slane %v968_v28, 1 }
 0x3f7   :  { %v1288_v29 = vadd.f32 %v11723_v61, %v1128_v14  ;;  %v976_v14 = vrot.slane %v967_v34, 1  ;;  %v9215_v61 = vpop.permute.xlu0 %3938 }
 0x3f8   :  { %2338 = vrot.lane.b32.xlu0 %v2334_v21, %s6202_s26  ;;  %v9193_v21 = vmul.f32 %v2923_v36, %v11712_v48 }
 0x3f9   :  { %2498 = vrot.lane.b32.xlu1 %v2494_v6, %s6203_s6  ;;  %v978_v34 = vsel %vm924_vm6, %v976_v14, %v977_v44 }
 0x3fc   :  { %2342 = vrot.lane.b32.xlu0 %v2337_v45, %s6202_s26  ;;  %v2767_v45 = vmul.f32 %v2763_v35, %v11715_v63 }
 0x3fd   :  { %2344 = vrot.lane.b32.xlu1 %v2336_v17, %s6202_s26  ;;  %v1415_v17 = vrot.slane %v1407_v50, 2  ;;  %v2933_v50 = vrot.slane %v9193_v21, 2 }
 0x3ff   :  { %v1425_v41 = vadd.f32 %v1415_v17, %v1288_v29  ;;  %v1416_v46 = vsel %vm1365_vm7, %v1414_v53, %v1415_v17  ;;  %v2774_v29 = vsel %vm1365_vm7, %v2772_v56, %v2773_v2  ;;  %v2934_v28 = vsel %vm1365_vm7, %v2932_v47, %v2933_v50 }
 0x400   :  { %2500 = vrot.lane.b32.xlu0 %v2493_v37, %s6203_s6  ;;  %v11725_v37 = vld [vmem:[#allocation99_spill] sm:$0xff]  ;;  %v1409_v17 = vmul.f32 %v9169_v12, %v11705_v42  ;;  %v1408_v53 = vmul.f32 %v9169_v12, %v11707_v10 }
 0x401   :  { %2504 = vrot.lane.b32.xlu1 %v2496_v13, %s6203_s6  ;;  %v1287_v6 = vadd.f32 %v11725_v37, %v1127_v59  ;;  %v11728_v13 = vld [vmem:[#allocation52_spill] sm:$0xff]  ;;  %v2776_v59 = vrot.slane %v2767_v45, 2  ;;  %v1569_v21 = vadd.f32 %v11730_v55, %v1425_v41  ;;  %v11731_v37 = vld [vmem:[#allocation94_spill] sm:$0xff]  ;;  %v2927_v45 = vmul.f32 %v2923_v36, %v11715_v63 }
 0x402   :  { %v860_v35 = vadd.f32 %v11728_v13, %v730_v5  ;;  %v11732_v5 = vld [vmem:[#allocation78_spill] sm:$0xff]  ;;  %v1417_v14 = vrot.slane %v1408_v53, 2  ;;  %v11736_v36 = vld [vmem:[#allocation100_spill] sm:$0xff]  ;;  %v2157_v53 = vmul.f32 %v2155_v7, %v11712_v48 }
 0x403   :  { %v1424_v22 = vadd.f32 %v1416_v46, %v1287_v6  ;;  %v2777_v56 = vsel %vm1365_vm7, %v2775_v39, %v2776_v59  ;;  %v1729_v12 = vadd.f32 %v11732_v5, %v1569_v21  ;;  %v11733_v41 = vld [vmem:[#allocation90_spill] sm:$0xff]  ;;  %v11735_v46 = vld [vmem:[#allocation92_spill] sm:$0xff]  ;;  %v9257_v39 = vpop.permute.xlu1 %4098  ;;  %v2936_v55 = vrot.slane %v2927_v45, 2 }
 0x404   :  { %2502 = vrot.lane.b32.xlu0 %v2497_v3, %s6203_s6  ;;  %v985_v16 = vadd.f32 %v978_v34, %v860_v35  ;;  %v986_v3 = vadd.f32 %v977_v44, %v861_v11  ;;  %v1418_v44 = vrot.slane %v1409_v17, 2  ;;  %v11737_v11 = vld [vmem:[#allocation67_spill] sm:$0xff]  ;;  %v2935_v21 = vrot.slane %v2926_v52, 2 }
 0x405   :  { %2780 = vrot.lane.b32.xlu1 %v2773_v2, %s6202_s26  ;;  %v1568_v6 = vadd.f32 %v11731_v37, %v1424_v22  ;;  %v9238_v2 = vpop.permute.xlu0 %4096  ;;  %v1819_v22 = vmul.f32 %v1817_v58, %v11712_v48 }
 0x406   :  { %v1129_v47 = vadd.f32 %v11733_v41, %v985_v16  ;;  %v1130_v8 = vadd.f32 %v11734_v15, %v986_v3  ;;  %v1419_v17 = vsel %vm1365_vm7, %v1417_v14, %v1418_v44  ;;  %v2156_v16 = vmul.f32 %v2155_v7, %v11713_v30 }
 0x407   :  { %v1728_v35 = vadd.f32 %v11736_v36, %v1568_v6  ;;  %v1823_v34 = vadd.f32 %v1819_v22, %v1729_v12  ;;  %v2937_v5 = vsel %vm1365_vm7, %v2935_v21, %v2936_v55  ;;  %v11739_v12 = vld [vmem:[#allocation96_spill] sm:$0xff]  ;;  %v9276_v14 = vstv %s9248_s3  ;;  %v11742_v22 = vld [vmem:[#allocation98_spill] sm:$0xff]  ;;  %v11744_v21 = vld [vmem:[#allocation123_spill] sm:$0xff]  ;;  %s5839_s3 = sld [smem:[#allocation8 + $0x54]] }
 0x408   :  { %2778 = vrot.lane.b32.xlu0 %v2774_v29, %s6202_s26  ;;  %v1289_v13 = vadd.f32 %v11735_v46, %v1129_v47  ;;  %v1290_v29 = vadd.f32 %v11737_v11, %v1130_v8  ;;  %v11740_v47 = vld [vmem:[#allocation116_spill] sm:$0xff]  ;;  %v2595_v8 = vstv %s9245_s1  ;;  %v11741_v46 = vld [vmem:[#allocation71_spill] sm:$0xff]  ;;  %v2165_v36 = vrot.slane %v2157_v53, 1  ;;  %s5895_s1 = sld [smem:[#allocation8 + $0x7a]] }
 0x409   :  { %2938 = vrot.lane.b32.xlu1 %v2934_v28, %s6203_s6  ;;  %v1818_v28 = vmul.f32 %v1817_v58, %v11713_v30  ;;  %v9265_v37 = vpop.permute.xlu0 %872  ;;  %v2597_v53 = vmul.f32 %v2595_v8, %v11712_v48 }
 0x40a   :  { %v1426_v6 = vadd.f32 %v1419_v17, %v1289_v13  ;;  %v1427_v52 = vadd.f32 %v1418_v44, %v1290_v29  ;;  %v9281_v44 = vpop.permute.xlu1 %3942  ;;  %v11743_v29 = vld [vmem:[#allocation122_spill] sm:$0xff]  ;;  %v11745_v17 = vld [vmem:[#allocation73_spill] sm:$0xff] }
 0x40b   :  { %v1822_v3 = vadd.f32 %v1818_v28, %v1728_v35  ;;  %v2164_v35 = vrot.slane %v2156_v16, 1 }
 0x40c   :  { %2782 = vrot.lane.b32.xlu0 %v2777_v56, %s6202_s26  ;;  %v11738_v56 = vld [vmem:[#allocation121_spill] sm:$0xff]  ;;  %v1570_v41 = vadd.f32 %v11739_v12, %v1426_v6  ;;  %v1571_v13 = vadd.f32 %v11741_v46, %v1427_v52  ;;  %v1820_v52 = vmul.f32 %v1817_v58, %v11714_v26  ;;  %v2596_v12 = vmul.f32 %v2595_v8, %v11713_v30 }
 0x40d   :  { %2784 = vrot.lane.b32.xlu1 %v2776_v59, %s6202_s26  ;;  %v3115_v59 = vstv %s9226_s14  ;;  %v1921_v45 = vadd.f32 %v11738_v56, %v1823_v34  ;;  %v1920_v15 = vadd.f32 %v11740_v47, %v1822_v3  ;;  %v2159_v3 = vmul.f32 %v2155_v7, %v11715_v63  ;;  %v9293_v16 = vpop.permute.xlu0 %876  ;;  %s5890_s14 = sld [smem:[#allocation8 + $0x79]] }
 0x40e   :  { %v1730_v11 = vadd.f32 %v11742_v22, %v1570_v41  ;;  %v3116_v34 = vmul.f32 %v3115_v59, %v11645_v25  ;;  %v1731_v6 = vadd.f32 %v11745_v17, %v1571_v13  ;;  %v3246_v56 = vmul.f32 %v9276_v14, %v11645_v25 }
 0x40f   :  { %v2050_v28 = vadd.f32 %v11744_v21, %v1920_v15  ;;  %v3118_v46 = vmul.f32 %v3115_v59, %v11647_v24  ;;  %v2168_v22 = vrot.slane %v2159_v3, 1  ;;  %v9305_v21 = vpop.permute.xlu1 %4100  ;;  %v3673_v3 = vstv %s9284_s10  ;;  %s5905_s10 = sld [smem:[#allocation8 + $0x7c]] }
 0x410   :  { %2940 = vrot.lane.b32.xlu0 %v2933_v50, %s6203_s6  ;;  %v3117_v50 = vmul.f32 %v3115_v59, %v11643_v51  ;;  %v1824_v41 = vadd.f32 %v1820_v52, %v1730_v11 }
 0x411   :  { %2944 = vrot.lane.b32.xlu1 %v2936_v55, %s6203_s6  ;;  %v2051_v55 = vadd.f32 %v11743_v29, %v1921_v45  ;;  %v1821_v45 = vmul.f32 %v1817_v58, %v11715_v63  ;;  %v2605_v29 = vrot.slane %v2597_v53, 2  ;;  %v3119_v58 = vmul.f32 %v3115_v59, %v11646_v27  ;;  %v11749_v59 = vld [vmem:[#allocation124_spill] sm:$0xff] }
 0x413   :  { %v2175_v47 = vadd.f32 %v2165_v36, %v2051_v55  ;;  %v1825_v13 = vadd.f32 %v1821_v45, %v1731_v6  ;;  %v2604_v55 = vrot.slane %v2596_v12, 2  ;;  %v3247_v6 = vmul.f32 %v9276_v14, %v11643_v51  ;;  %v11751_v45 = vld [vmem:[#allocation150_spill] sm:$0xff] }
 0x414   :  { %2942 = vrot.lane.b32.xlu0 %v2937_v5, %s6203_s6  ;;  %v2166_v5 = vsel %vm924_vm6, %v2164_v35, %v2165_v36  ;;  %v11746_v35 = vld [vmem:[#allocation119_spill] sm:$0xff]  ;;  %v3513_v36 = vstv %s9278_s30  ;;  %s5824_s30 = sld [smem:[#allocation8 + $0x51]] }
 0x415   :  { %3126 = vrot.lane.b32.xlu1 %v3117_v50, %s6202_s26  ;;  %v2158_v50 = vmul.f32 %v2155_v7, %v11714_v26  ;;  %v2174_v15 = vadd.f32 %v2166_v5, %v2050_v28  ;;  %v1922_v7 = vadd.f32 %v11746_v35, %v1824_v41  ;;  %v9313_v28 = vpop.permute.xlu0 %1147  ;;  %v3515_v12 = vmul.f32 %v3513_v36, %v11643_v51 }
 0x416   :  { %v9331_v35 = vmul.f32 %v3673_v3, %v11643_v51 }
 0x417   :  { %v2318_v38 = vadd.f32 %v11748_v0, %v2174_v15  ;;  %v2167_v11 = vrot.slane %v2158_v50, 1  ;;  %v2052_v53 = vadd.f32 %v11749_v59, %v1922_v7  ;;  %v11752_v0 = vld [vmem:[#allocation173_spill] sm:$0xff]  ;;  %v3249_v50 = vmul.f32 %v9276_v14, %v11646_v27  ;;  %v11753_v15 = vld [vmem:[#allocation127_spill] sm:$0xff] }
 0x418   :  { %3124 = vrot.lane.b32.xlu0 %v3116_v34, %s6202_s26  ;;  %v11747_v34 = vld [vmem:[#allocation137_spill] sm:$0xff]  ;;  %v2598_v7 = vmul.f32 %v2595_v8, %v11714_v26 }
 0x419   :  { %3254 = vrot.lane.b32.xlu1 %v3246_v56, %s6203_s6  ;;  %v2319_v17 = vadd.f32 %v11747_v34, %v2175_v47  ;;  %v11750_v56 = vld [vmem:[#allocation125_spill] sm:$0xff]  ;;  %v2478_v41 = vadd.f32 %v11752_v0, %v2318_v38  ;;  %v3514_v47 = vmul.f32 %v3513_v36, %v11645_v25  ;;  %v2169_v38 = vsel %vm924_vm6, %v2167_v11, %v2168_v22 }
 0x41a   :  { %v1923_v52 = vadd.f32 %v11750_v56, %v1825_v13  ;;  %v2599_v13 = vmul.f32 %v2595_v8, %v11715_v63  ;;  %v2606_v34 = vsel %vm1365_vm7, %v2604_v55, %v2605_v29  ;;  %v2176_v59 = vadd.f32 %v2169_v38, %v2052_v53  ;;  %v11758_v38 = vld [vmem:[#allocation166_spill] sm:$0xff] }
 0x41b   :  { %v2479_v5 = vadd.f32 %v11751_v45, %v2319_v17  ;;  %v9339_v17 = vpop.permute.xlu1 %4102  ;;  %v2614_v56 = vadd.f32 %v2606_v34, %v2478_v41  ;;  %v9346_v45 = vpop.permute.xlu0 %1151  ;;  %v3523_v11 = vrot.slane %v3515_v12, 1  ;;  %v3522_v8 = vrot.slane %v3514_v47, 1  ;;  %v11757_v12 = vld [vmem:[#allocation143_spill] sm:$0xff] }
 0x41c   :  { %3128 = vrot.lane.b32.xlu0 %v3118_v46, %s6202_s26  ;;  %v2053_v46 = vadd.f32 %v11753_v15, %v1923_v52  ;;  %v3248_v52 = vmul.f32 %v9276_v14, %v11647_v24  ;;  %11754 = vst [vmem:[#allocation59_spill] sm:$0xff] %v9346_v45  ;;  %v3516_v55 = vmul.f32 %v3513_v36, %v11647_v24  ;;  %v3683_v53 = vrot.slane %v9331_v35, 1  ;;  %v11756_v14 = vld [vmem:[#allocation139_spill] sm:$0xff] }
 0x41d   :  { %3130 = vrot.lane.b32.xlu1 %v3119_v58, %s6202_s26  ;;  %v3674_v58 = vmul.f32 %v3673_v3, %v11645_v25  ;;  %v3517_v0 = vmul.f32 %v3513_v36, %v11646_v27  ;;  %v2320_v32 = vadd.f32 %v11755_v23, %v2176_v59  ;;  %v2607_v41 = vrot.slane %v2598_v7, 2  ;;  %v11759_v36 = vld [vmem:[#allocation168_spill] sm:$0xff] }
 0x41e   :  { %v2177_v15 = vadd.f32 %v2168_v22, %v2053_v46  ;;  %v2758_v22 = vadd.f32 %v11759_v36, %v2614_v56  ;;  %v3524_v46 = vsel %vm924_vm6, %v3522_v8, %v3523_v11  ;;  %v11761_v56 = vld [vmem:[#allocation152_spill] sm:$0xff]  ;;  %v11762_v8 = vld [vmem:[#allocation175_spill] sm:$0xff] }
 0x41f   :  { %v2480_v34 = vadd.f32 %v11758_v38, %v2320_v32  ;;  %v9358_v23 = vpop.permute.xlu1 %874  ;;  %v3526_v35 = vrot.slane %v3517_v0, 1  ;;  %v3007_v32 = vstv %s9337_s16  ;;  %v3345_v0 = vstv %s9342_s17  ;;  %s5910_s16 = sld [smem:[#allocation8 + $0x7d]]  ;;  %s5854_s17 = sld [smem:[#allocation8 + $0x57]] }
 0x420   :  { %3256 = vrot.lane.b32.xlu0 %v3247_v6, %s6203_s6  ;;  %v2615_v6 = vadd.f32 %v2605_v29, %v2479_v5  ;;  %v3682_v29 = vrot.slane %v3674_v58, 1  ;;  %v2608_v5 = vrot.slane %v2599_v13, 2  ;;  %v3525_v58 = vrot.slane %v3516_v55, 1  ;;  %v11760_v13 = vld [vmem:[#allocation141_spill] sm:$0xff] }
 0x421   :  { %3260 = vrot.lane.b32.xlu1 %v3249_v50, %s6203_s6  ;;  %v2321_v50 = vadd.f32 %v11756_v14, %v2177_v15  ;;  %v2918_v55 = vadd.f32 %v11762_v8, %v2758_v22  ;;  %v3008_v36 = vmul.f32 %v3007_v32, %v11645_v25 }
 0x422   :  { %v2759_v47 = vadd.f32 %v11757_v12, %v2615_v6  ;;  %v3684_v7 = vsel %vm924_vm6, %v3682_v29, %v3683_v53  ;;  %v2609_v6 = vsel %vm1365_vm7, %v2607_v41, %v2608_v5  ;;  %v3527_v14 = vsel %vm924_vm6, %v3525_v58, %v3526_v35  ;;  %v11763_v12 = vld [vmem:[#allocation170_spill] sm:$0xff]  ;;  %v11764_v58 = vld [vmem:[#allocation145_spill] sm:$0xff] }
 0x423   :  { %v2481_v59 = vadd.f32 %v11760_v13, %v2321_v50  ;;  %v3676_v29 = vmul.f32 %v3673_v3, %v11647_v24  ;;  %v3677_v50 = vmul.f32 %v3673_v3, %v11646_v27  ;;  %v9385_v22 = vpop.permute.xlu1 %878 }
 0x424   :  { %3258 = vrot.lane.b32.xlu0 %v3248_v52, %s6203_s6  ;;  %v9368_v52 = vpop.permute.xlu0 %1309  ;;  %v2919_v15 = vadd.f32 %v11761_v56, %v2759_v47  ;;  %v3347_v47 = vmul.f32 %v3345_v0, %v11643_v51  ;;  %v3348_v56 = vmul.f32 %v3345_v0, %v11647_v24 }
 0x425   :  { %3530 = vrot.lane.b32.xlu1 %v3523_v11, %s6202_s26  ;;  %v2616_v11 = vadd.f32 %v2609_v6, %v2480_v34  ;;  %v2617_v41 = vadd.f32 %v2608_v5, %v2481_v59  ;;  %v3346_v34 = vmul.f32 %v3345_v0, %v11645_v25  ;;  %v11765_v5 = vld [vmem:[#allocation172_spill] sm:$0xff]  ;;  %v3012_v59 = vadd.f32 %v3008_v36, %v2918_v55 }
 0x426   :  { %v3010_v6 = vmul.f32 %v3007_v32, %v11647_v24  ;;  %v3685_v8 = vrot.slane %v3676_v29, 1  ;;  %v3011_v29 = vmul.f32 %v3007_v32, %v11646_v27 }
 0x427   :  { %v2760_v38 = vadd.f32 %v11763_v12, %v2616_v11  ;;  %v2761_v3 = vadd.f32 %v11764_v58, %v2617_v41  ;;  %v11767_v12 = vld [vmem:[#allocation147_spill] sm:$0xff]  ;;  %v3110_v31 = vadd.f32 %v11768_v40, %v3012_v59  ;;  %v9399_v41 = vstv %s9364_s2  ;;  %s9708_s2 = sld [smem:[#allocation8 + $0x5a]] }
 0x428   :  { %3528 = vrot.lane.b32.xlu0 %v3524_v46, %s6202_s26  ;;  %v3009_v46 = vmul.f32 %v3007_v32, %v11643_v51  ;;  %v9392_v11 = vpop.permute.xlu0 %1311  ;;  %v3354_v55 = vrot.slane %v3346_v34, 1  ;;  %v11772_v59 = vld [vmem:[#allocation23_spill] sm:$0xff] }
 0x429   :  { %3688 = vrot.lane.b32.xlu1 %v3684_v7, %s6203_s6  ;;  %v2920_v13 = vadd.f32 %v11765_v5, %v2760_v38  ;;  %11766 = vst [vmem:[#allocation87_spill] sm:$0xff] %v9392_v11  ;;  %v2921_v62 = vadd.f32 %v11767_v12, %v2761_v3  ;;  %v3349_v38 = vmul.f32 %v3345_v0, %v11646_v27  ;;  %v9405_v5 = vpop.permute.xlu1 %1149  ;;  %v11775_v11 = vld [vmem:[#allocation42_spill] sm:$0xff] }
 0x42a   :  { %v3013_v7 = vadd.f32 %v3009_v46, %v2919_v15  ;;  %v3355_v15 = vrot.slane %v3347_v47, 1  ;;  %v11770_v46 = vld [vmem:[#allocation27_spill] sm:$0xff]  ;;  %v3954_v3 = vmul.f32 %v9399_v41, %v11645_v25  ;;  %v11771_v47 = vld [vmem:[#allocation80_spill] sm:$0xff] }
 0x42b   :  { %v3014_v36 = vadd.f32 %v3010_v6, %v2920_v13  ;;  %v3240_v58 = vadd.f32 %v11770_v46, %v3110_v31  ;;  %v3015_v13 = vadd.f32 %v3011_v29, %v2921_v62  ;;  %v3358_v32 = vrot.slane %v3349_v38, 1  ;;  %v11776_v62 = vld [vmem:[#allocation49_spill] sm:$0xff] }
 0x42c   :  { %3532 = vrot.lane.b32.xlu0 %v3527_v14, %s6202_s26  ;;  %v3686_v14 = vrot.slane %v3677_v50, 1  ;;  %v3785_v50 = vstv %s9374_s4  ;;  %v3356_v31 = vsel %vm924_vm6, %v3354_v55, %v3355_v15  ;;  %v9418_v12 = vpop.permute.xlu0 %1588  ;;  %s9712_s4 = sld [smem:[#allocation8 + $0x5d]] }
 0x42d   :  { %3534 = vrot.lane.b32.xlu1 %v3526_v35, %s6202_s26  ;;  %v11769_v35 = vld [vmem:[#allocation25_spill] sm:$0xff]  ;;  %v3112_v34 = vadd.f32 %v11771_v47, %v3014_v36  ;;  %v3786_v6 = vmul.f32 %v3785_v50, %v11645_v25  ;;  %11773 = vst [vmem:[#allocation29_spill] sm:$0xff] %v9418_v12  ;;  %v3113_v45 = vadd.f32 %v11775_v11, %v3015_v13  ;;  %v3962_v47 = vrot.slane %v3954_v3, 2 }
 0x42e   :  { %v3111_v33 = vadd.f32 %v11769_v35, %v3013_v7  ;;  %v3687_v40 = vsel %vm924_vm6, %v3685_v8, %v3686_v14  ;;  %v3357_v7 = vrot.slane %v3348_v56, 1  ;;  %v3787_v8 = vmul.f32 %v3785_v50, %v11643_v51  ;;  %v11774_v35 = vld [vmem:[#allocation46_spill] sm:$0xff]  ;;  %v11777_v11 = vld [vmem:[#allocation81_spill] sm:$0xff] }
 0x42f   :  { %v3242_v46 = vadd.f32 %v11774_v35, %v3112_v34  ;;  %v3364_v36 = vadd.f32 %v3356_v31, %v3240_v58  ;;  %v3243_v56 = vadd.f32 %v11776_v62, %v3113_v45  ;;  %v3788_v55 = vmul.f32 %v3785_v50, %v11647_v24  ;;  %v9428_v35 = vpop.permute.xlu1 %1307 }
 0x430   :  { %3690 = vrot.lane.b32.xlu0 %v3683_v53, %s6203_s6  ;;  %v3955_v53 = vmul.f32 %v9399_v41, %v11643_v51  ;;  %v3241_v0 = vadd.f32 %v11772_v59, %v3111_v33  ;;  %v3359_v38 = vsel %vm924_vm6, %v3357_v7, %v3358_v32  ;;  %v3789_v59 = vmul.f32 %v3785_v50, %v11646_v27 }
 0x431   :  { %v3794_v12 = vrot.slane %v3786_v6, 2  ;;  %v3795_v34 = vrot.slane %v3787_v8, 2  ;;  %v3366_v3 = vadd.f32 %v3359_v38, %v3242_v46  ;;  %v3797_v50 = vrot.slane %v3788_v55, 2 }
 0x432   :  { %v3963_v33 = vrot.slane %v3955_v53, 2  ;;  %v3365_v29 = vadd.f32 %v3355_v15, %v3241_v0  ;;  %v9432_v15 = vpop.permute.xlu0 %1592  ;;  %v3367_v0 = vadd.f32 %v3358_v32, %v3243_v56  ;;  %v3798_v13 = vrot.slane %v3789_v59, 2 }
 0x433   :  { %v3510_v53 = vadd.f32 %v9125_v60, %v3366_v3  ;;  %v3796_v7 = vsel %vm1365_vm7, %v3794_v12, %v3795_v34  ;;  %v9441_v8 = vpop.permute.xlu1 %1153 }
 0x434   :  { %3692 = vrot.lane.b32.xlu0 %v3687_v40, %s6203_s6  ;;  %v3508_v40 = vadd.f32 %v9117_v20, %v3364_v36  ;;  %v3509_v58 = vadd.f32 %v11777_v11, %v3365_v29  ;;  %v3964_v20 = vsel %vm1365_vm7, %v3962_v47, %v3963_v33  ;;  %v3511_v31 = vadd.f32 %v9180_v54, %v3367_v0 }
 0x435   :  { %v3670_v6 = vadd.f32 %v9147_v4, %v3510_v53 }
 0x436   :  { %v3668_v45 = vadd.f32 %v9206_v9, %v3508_v40  ;;  %v3671_v36 = vadd.f32 %v9165_v19, %v3511_v31 }
 0x437   :  { %v9452_v19 = vpop.permute.xlu1 %1313 }
 0x438   :  { %3694 = vrot.lane.b32.xlu0 %v3686_v14, %s6203_s6  ;;  %v3669_v14 = vadd.f32 %v9133_v49, %v3509_v58  ;;  %v3804_v9 = vadd.f32 %v3796_v7, %v3668_v45  ;;  %v3799_v49 = vsel %vm1365_vm7, %v3797_v50, %v3798_v13  ;;  %v3807_v56 = vadd.f32 %v3798_v13, %v3671_v36 }
 0x439   :  { %v3806_v32 = vadd.f32 %v3799_v49, %v3670_v6  ;;  %v3957_v36 = vmul.f32 %v9399_v41, %v11646_v27 }
 0x43a   :  { %v3805_v60 = vadd.f32 %v3795_v34, %v3669_v14  ;;  %v3948_v62 = vadd.f32 %v9184_v43, %v3804_v9 }
 0x43b   :  { %v3950_v4 = vadd.f32 %v9233_v1, %v3806_v32 }
 0x43c   :  { %3968 = vrot.lane.b32.xlu0 %v3964_v20, %s6202_s26  ;;  %v3949_v12 = vadd.f32 %v9215_v61, %v3805_v60  ;;  %v9450_v29 = vadd.f32 %v9238_v2, %v3948_v62 }
 0x43d   :  { %v9459_v38 = vadd.f32 %v9305_v21, %v3950_v4  ;;  %v3966_v4 = vrot.slane %v3957_v36, 2 }
 0x43e   :  { %11778 = vst [vmem:[#allocation60_spill] sm:$0xff] %v9450_v29  ;;  %v9455_v55 = vadd.f32 %v9257_v39, %v3949_v12  ;;  %v4792_v61 = vsel %vm4176_vm1, %v9450_v29, 0.0 }
 0x43f   :  { %11780 = vst [vmem:[#allocation102_spill] sm:$0xff] %v9459_v38  ;;  %v4795_v39 = vsel %vm4176_vm1, %v9459_v38, 0.0  ;;  %v4810_v53 = vmul.f32 %v9459_v38, %v9459_v38 }
 0x440   :  { %3970 = vrot.lane.b32.xlu0 %v3963_v33, %s6202_s26  ;;  %11779 = vst [vmem:[#allocation83_spill] sm:$0xff] %v9455_v55  ;;  %v3951_v33 = vadd.f32 %v9281_v44, %v3807_v56  ;;  %v4793_v59 = vsel %vm4178_vm0, %v9455_v55, 0.0  ;;  %v9470_v44 = vpop.permute.xlu1 %1590  ;;  %v4809_v20 = vmul.f32 %v9455_v55, %v9455_v55  ;;  %v4113_v56 = vstv %s5954_s18  ;;  %s9716_s18 = sld [smem:[#allocation8 + $0x7f]] }
 0x441   :  { %v4186_v46 = vpop.xlane.xlu0 %4185  ;;  %v4794_v11 = vadd.f32 %v4793_v59, %v4792_v61  ;;  %v4815_v31 = vsel %vm4176_vm1, %v4810_v53, 0.0  ;;  %v2355_v55 = vstv %s5890_s14 }
 0x442   :  { %v4187_v47 = vrot.slane %v4186_v46, 4  ;;  %v9464_v1 = vadd.f32 %v9339_v17, %v3951_v33  ;;  %v4808_v17 = vmul.f32 %v9450_v29, %v9450_v29  ;;  %v4813_v7 = vsel %vm4178_vm0, %v4809_v20, 0.0 }
 0x443   :  { %v4796_v58 = vadd.f32 %v4795_v39, %v4794_v11 }
 0x444   :  { %v4188_v54 = vadd.f32 %v4187_v47, %v4186_v46  ;;  %11781 = vst [vmem:[#allocation84_spill] sm:$0xff] %v9464_v1  ;;  %v4797_v21 = vsel %vm4178_vm0, %v9464_v1, 0.0  ;;  %v9474_v45 = vpop.permute.xlu1 %1748  ;;  %v4812_v0 = vsel %vm4176_vm1, %v4808_v17, 0.0  ;;  %v4811_v50 = vmul.f32 %v9464_v1, %v9464_v1 }
 0x445   :  { %v4798_v3 = vadd.f32 %v4797_v21, %v4796_v58  ;;  %v4814_v9 = vadd.f32 %v4813_v7, %v4812_v0  ;;  %v3956_v46 = vmul.f32 %v9399_v41, %v11647_v24  ;;  %v4116_v21 = vmul.f32 %v4113_v56, %v11647_v24 }
 0x446   :  { %v4189_v40 = vrot.slane %v4188_v54, 2  ;;  %v4817_v47 = vsel %vm4178_vm0, %v4811_v50, 0.0  ;;  %v4117_v58 = vmul.f32 %v4113_v56, %v11646_v27  ;;  %v4114_v0 = vmul.f32 %v4113_v56, %v11645_v25 }
 0x447   :  { %v4816_v32 = vadd.f32 %v4815_v31, %v4814_v9  ;;  %v4125_v17 = vrot.slane %v4116_v21, 2  ;;  %v889_v9 = vstv %s5835_s19  ;;  %s9735_s19 = sld [smem:[#allocation8 + $0x80]] }
 0x448   :  { %v4190_v43 = vadd.f32 %v4189_v40, %v4188_v54  ;;  %v3965_v54 = vrot.slane %v3956_v46, 2  ;;  %v4126_v20 = vrot.slane %v4117_v58, 2 }
 0x449   :  { %v4818_v12 = vadd.f32 %v4817_v47, %v4816_v32  ;;  %v1164_v47 = vstv %s5845_s21  ;;  %s9737_s21 = sld [smem:[#allocation8 + $0x60]] }
 0x44a   :  { %v4191_v2 = vrot.slane %v4190_v43, 1  ;;  %v3967_v41 = vsel %vm1365_vm7, %v3965_v54, %v3966_v4  ;;  %v4127_v50 = vsel %vm1365_vm7, %v4125_v17, %v4126_v20  ;;  %v893_v54 = vmul.f32 %v889_v9, %v11705_v42 }
 0x44b   :  { %v1167_v21 = vmul.f32 %v1164_v47, %v11707_v10  ;;  %v1168_v58 = vmul.f32 %v1164_v47, %v11705_v42 }
 0x44c   :  { %v4192_v34 = vadd.f32 %v4191_v2, %v4190_v43  ;;  %v4115_v43 = vmul.f32 %v4113_v56, %v11643_v51  ;;  %v1165_v56 = vmul.f32 %v1164_v47, %v11717_v57 }
 0x44e   :  { %6031 = vpush %v4192_v34  ;;  %v4123_v34 = vrot.slane %v4115_v43, 2 }
 0x451   :  { %4799 = vadd.xlane.f32.xlu1 %v4798_v3 }
 0x455   :  { %v9482_v14 = vpop.xlane.xlu1 %4492 }
 0x457   :  { %v9487_v13 = vpop.xlane.xlu0 %4512 }
 0x459   :  { %v4206_v6 = vpop.xlane.xlu1 %4205 }
 0x45a   :  { %v4207_v60 = vrot.slane %v4206_v6, 4 }
 0x45b   :  { %v9496_v49 = vpop.permute.xlu0 %1750 }
 0x45c   :  { %v4208_v62 = vadd.f32 %v4207_v60, %v4206_v6  ;;  %v4122_v6 = vrot.slane %v4114_v0, 2  ;;  %v891_v60 = vmul.f32 %v889_v9, %v11716_v18 }
 0x45d   :  { %v9502_v2 = vpop.permute.xlu1 %1594 }
 0x45e   :  { %v4209_v40 = vrot.slane %v4208_v62, 2  ;;  %v4124_v36 = vsel %vm1365_vm7, %v4122_v6, %v4123_v34  ;;  %v1176_v6 = vrot.slane %v1167_v21, 1 }
 0x45f   :  { %4819 = vadd.xlane.f32.xlu0 %v4818_v12  ;;  %v9498_v33 = vpop.permute.xlu0 %1752  ;;  %v890_v12 = vmul.f32 %v889_v9, %v11717_v57 }
 0x460   :  { %v4210_v61 = vadd.f32 %v4209_v40, %v4208_v62  ;;  %v1324_v62 = vstv %s5850_s20  ;;  %s9758_s20 = sld [smem:[#allocation8 + $0x82]] }
 0x461   :  { %v9510_v3 = vpop.permute.xlu1 %1754  ;;  %v1325_v40 = vmul.f32 %v1324_v62, %v11717_v57  ;;  %v1326_v43 = vmul.f32 %v1324_v62, %v11716_v18 }
 0x462   :  { %3972 = vrot.lane.b32.xlu1 %v3967_v41, %s6202_s26  ;;  %v4211_v59 = vrot.slane %v4210_v61, 1  ;;  %v892_v41 = vmul.f32 %v889_v9, %v11707_v10  ;;  %v1177_v9 = vrot.slane %v1168_v58, 1 }
 0x463   :  { %v9505_v39 = vpop.permute.xlu0 %1934  ;;  %v1333_v17 = vrot.slane %v1325_v40, 1  ;;  %v1765_v40 = vstv %s5865_s24  ;;  %s9809_s24 = sld [smem:[#allocation8 + $0x63]] }
 0x464   :  { %v4212_v11 = vadd.f32 %v4211_v59, %v4210_v61  ;;  %v1767_v58 = vmul.f32 %v1765_v40, %v11716_v18 }
 0x465   :  { %v9517_v7 = vpop.permute.xlu1 %1936 }
 0x466   :  { %4130 = vrot.lane.b32.xlu1 %v4123_v34, %s6203_s6  ;;  %6033 = vpush %v4212_v11  ;;  %v1173_v11 = vrot.slane %v1165_v56, 1 }
 0x467   :  { %v9512_v53 = vpop.permute.xlu0 %1938 }
 0x469   :  { %v9523_v46 = vpop.permute.xlu1 %2064 }
 0x46a   :  { %3974 = vrot.lane.b32.xlu1 %v3966_v4, %s6202_s26  ;;  %v1166_v4 = vmul.f32 %v1164_v47, %v11716_v18  ;;  %v1178_v47 = vsel %vm924_vm6, %v1176_v6, %v1177_v9 }
 0x46b   :  { %v9520_v31 = vpop.permute.xlu0 %2066 }
 0x46c   :  { %v1174_v34 = vrot.slane %v1166_v4, 1  ;;  %v1605_v4 = vstv %s5860_s22  ;;  %s9776_s22 = sld [smem:[#allocation8 + $0x83]] }
 0x46d   :  { %v9538_v61 = vpop.permute.xlu1 %1940  ;;  %v1606_v21 = vmul.f32 %v1605_v4, %v11717_v57 }
 0x46e   :  { %4132 = vrot.lane.b32.xlu1 %v4127_v50, %s6203_s6  ;;  %v1175_v50 = vsel %vm924_vm6, %v1173_v11, %v1174_v34 }
 0x46f   :  { %v9528_v32 = vpop.permute.xlu0 %2068 }
 0x471   :  { %v9548_v0 = vpop.permute.xlu1 %2070 }
 0x472   :  { %4134 = vrot.lane.b32.xlu1 %v4126_v20, %s6203_s6  ;;  %v1334_v20 = vrot.slane %v1326_v43, 1  ;;  %11782 = vst [vmem:[#allocation62_spill] sm:$0xff] %v9548_v0  ;;  %v1607_v43 = vmul.f32 %v1605_v4, %v11716_v18 }
 0x473   :  { %v9542_v59 = vpop.permute.xlu0 %2338 }
 0x475   :  { %4128 = vrot.lane.b32.xlu0 %v4124_v36, %s6203_s6  ;;  %v1335_v36 = vsel %vm924_vm6, %v1333_v17, %v1334_v20  ;;  %v9560_v56 = vpop.permute.xlu1 %2340  ;;  %v1615_v17 = vrot.slane %v1607_v43, 2 }
 0x476   :  { %900 = vrot.lane.b32.xlu1 %v891_v60, %s6203_s6  ;;  %11784 = vst [vmem:[#allocation51_spill] sm:$0xff] %v9560_v56 }
 0x477   :  { %v9553_v60 = vpop.permute.xlu0 %2342 }
 0x478   :  { %11783 = vst [vmem:[#allocation85_spill] sm:$0xff] %v9553_v60 }
 0x479   :  { %898 = vrot.lane.b32.xlu0 %v890_v12, %s6203_s6  ;;  %v1328_v12 = vmul.f32 %v1324_v62, %v11705_v42 }
 0x47a   :  { %904 = vrot.lane.b32.xlu1 %v893_v54, %s6203_s6  ;;  %v1327_v54 = vmul.f32 %v1324_v62, %v11707_v10  ;;  %v1766_v62 = vmul.f32 %v1765_v40, %v11717_v57 }
 0x47c   :  { %v1336_v11 = vrot.slane %v1327_v54, 1 }
 0x47d   :  { %902 = vrot.lane.b32.xlu0 %v892_v41, %s6203_s6  ;;  %v9564_v41 = vpop.permute.xlu0 %2500 }
 0x47e   :  { %1181 = vrot.lane.b32.xlu1 %v1174_v34, %s6202_s26  ;;  %11785 = vst [vmem:[#allocation70_spill] sm:$0xff] %v9564_v41  ;;  %v1337_v34 = vrot.slane %v1328_v12, 1  ;;  %v1774_v12 = vrot.slane %v1766_v62, 2  ;;  %v1769_v62 = vmul.f32 %v1765_v40, %v11705_v42 }
 0x47f   :  { %s6032_s25 = spop %6031 }
 0x480   :  { %v1338_v6 = vsel %vm924_vm6, %v1336_v11, %v1337_v34  ;;  %s9586_s11 = smul.f32 0.00295858, %s6032_s25  ;;  %s9811_s25 = sld [smem:[#allocation8 + $0x66]] }
 0x481   :  { %1179 = vrot.lane.b32.xlu0 %v1175_v50, %s6202_s26  ;;  %v9571_v50 = vpop.permute.xlu1 %2498  ;;  %v9577_v54 = vpop.permute.xlu0 %2502 }
 0x482   :  { %1339 = vrot.lane.b32.xlu1 %v1335_v36, %s6203_s6  ;;  %11786 = vst [vmem:[#allocation101_spill] sm:$0xff] %v9571_v50  ;;  %v1608_v36 = vmul.f32 %v1605_v4, %v11707_v10  ;;  %11787 = vst [vmem:[#allocation126_spill] sm:$0xff] %v9577_v54  ;;  %s4216_s5 = smul.f32 %s9586_s11, %s9586_s11  ;;  %v2359_v54 = vmul.f32 %v2355_v55, %v11715_v63 }
 0x484   :  { %v1617_v38 = vrot.slane %v1608_v36, 2 }
 0x485   :  { %1183 = vrot.lane.b32.xlu0 %v1178_v47, %s6202_s26  ;;  %v1609_v47 = vmul.f32 %v1605_v4, %v11705_v42  ;;  %v9583_v11 = vpop.permute.xlu1 %2344  ;;  %v9588_v4 = vpop.permute.xlu0 %2778 }
 0x486   :  { %1185 = vrot.lane.b32.xlu1 %v1177_v9, %s6202_s26  ;;  %v1614_v9 = vrot.slane %v1606_v21, 2  ;;  %11788 = vst [vmem:[#allocation47_spill] sm:$0xff] %v9583_v11  ;;  %11789 = vst [vmem:[#allocation191_spill] sm:$0xff] %v9588_v4 }
 0x487   :  { %v1618_v29 = vrot.slane %v1609_v47, 2 }
 0x488   :  { %v1616_v43 = vsel %vm1365_vm7, %v1614_v9, %v1615_v17 }
 0x489   :  { %1341 = vrot.lane.b32.xlu0 %v1334_v20, %s6203_s6  ;;  %v1775_v20 = vrot.slane %v1767_v58, 2  ;;  %v1619_v21 = vsel %vm1365_vm7, %v1617_v38, %v1618_v29  ;;  %v1768_v58 = vmul.f32 %v1765_v40, %v11707_v10  ;;  %v9599_v9 = vpop.permute.xlu1 %2504  ;;  %v1778_v38 = vrot.slane %v1769_v62, 2 }
 0x48a   :  { %1345 = vrot.lane.b32.xlu1 %v1337_v34, %s6203_s6  ;;  %11790 = vst [vmem:[#allocation129_spill] sm:$0xff] %v9599_v9  ;;  %v1951_v40 = vstv %s5875_s27 }
 0x48b   :  { %v1776_v34 = vsel %vm1365_vm7, %v1774_v12, %v1775_v20  ;;  %v1777_v36 = vrot.slane %v1768_v58, 2  ;;  %v9603_v12 = vpop.permute.xlu0 %2782  ;;  %v1955_v1 = vmul.f32 %v1951_v40, %v11715_v63 }
 0x48c   :  { %11791 = vst [vmem:[#allocation177_spill] sm:$0xff] %v9603_v12 }
 0x48d   :  { %1343 = vrot.lane.b32.xlu0 %v1338_v6, %s6203_s6  ;;  %v4514_v6 = vrot.slane %v9487_v13, 4 }
 0x48e   :  { %1622 = vrot.lane.b32.xlu1 %v1615_v17, %s6202_s26  ;;  %v4494_v17 = vrot.slane %v9482_v14, 4 }
 0x490   :  { %v4495_v47 = vadd.f32 %v4494_v17, %v9482_v14  ;;  %v9615_v17 = vpop.permute.xlu0 %2940 }
 0x491   :  { %1620 = vrot.lane.b32.xlu0 %v1616_v43, %s6202_s26  ;;  %v1779_v43 = vsel %vm1365_vm7, %v1777_v36, %v1778_v38  ;;  %11793 = vst [vmem:[#allocation93_spill] sm:$0xff] %v9615_v17  ;;  %v1954_v36 = vmul.f32 %v1951_v40, %v11714_v26  ;;  %v2515_v17 = vstv %s5895_s1 }
 0x492   :  { %1780 = vrot.lane.b32.xlu1 %v1776_v34, %s6203_s6  ;;  %v1953_v34 = vmul.f32 %v1951_v40, %v11712_v48  ;;  %v4496_v14 = vrot.slane %v4495_v47, 2 }
 0x494   :  { %v9625_v12 = vpop.permute.xlu0 %2942 }
 0x495   :  { %1624 = vrot.lane.b32.xlu0 %v1619_v21, %s6202_s26  ;;  %v9611_v21 = vpop.permute.xlu1 %2780  ;;  %11795 = vst [vmem:[#allocation104_spill] sm:$0xff] %v9625_v12 }
 0x496   :  { %1626 = vrot.lane.b32.xlu1 %v1618_v29, %s6202_s26  ;;  %v4515_v29 = vadd.f32 %v4514_v6, %v9487_v13  ;;  %11792 = vst [vmem:[#allocation61_spill] sm:$0xff] %v9611_v21  ;;  %v1952_v13 = vmul.f32 %v1951_v40, %v11713_v30  ;;  %v2356_v40 = vmul.f32 %v2355_v55, %v11713_v30 }
 0x497   :  { %s6034_s23 = spop %6033 }
 0x498   :  { %s4215_s28 = smul.f32 0.00295858, %s6034_s23  ;;  %v4516_v58 = vrot.slane %v4515_v29, 2  ;;  %v9639_v21 = vpop.permute.xlu0 %3124  ;;  %v2364_v4 = vrot.slane %v2356_v40, 1 }
 0x499   :  { %1782 = vrot.lane.b32.xlu0 %v1775_v20, %s6203_s6  ;;  %v2081_v20 = vstv %s5880_s12  ;;  %11797 = vst [vmem:[#allocation185_spill] sm:$0xff] %v9639_v21  ;;  %s9858_s12 = sld [smem:[#allocation8 + $0x69]] }
 0x49a   :  { %s4217_s15 = ssub.f32 %s4215_s28, %s4216_s5  ;;  %1786 = vrot.lane.b32.xlu1 %v1778_v38, %s6203_s6  ;;  %v2082_v6 = vmul.f32 %v2081_v20, %v11713_v30  ;;  %v4497_v38 = vadd.f32 %v4496_v14, %v4495_v47  ;;  %v2357_v14 = vmul.f32 %v2355_v55, %v11712_v48 }
 0x49c   :  { %s4218_s0 = smax.f32 %s6201_s29, %s4217_s15  ;;  %v2365_v11 = vrot.slane %v2357_v14, 1  ;;  %v9652_v14 = vpop.permute.xlu0 %3128 }
 0x49d   :  { %s4219_s13 = sadd.f32 1e-05, %s4218_s0  ;;  %1784 = vrot.lane.b32.xlu0 %v1779_v43, %s6203_s6  ;;  %v4517_v43 = vadd.f32 %v4516_v58, %v4515_v29  ;;  %v2085_v29 = vmul.f32 %v2081_v20, %v11715_v63  ;;  %v2516_v58 = vmul.f32 %v2515_v17, %v11713_v30  ;;  %11799 = vst [vmem:[#allocation107_spill] sm:$0xff] %v9652_v14 }
 0x49e   :  { %1962 = vrot.lane.b32.xlu1 %v1953_v34, %s6202_s26  ;;  %v9621_v34 = vpop.permute.xlu1 %2938 }
 0x49f   :  { %v4220_v62 = vstv %s4219_s13  ;;  %11794 = vst [vmem:[#allocation103_spill] sm:$0xff] %v9621_v34  ;;  %v4518_v47 = vrot.slane %v4517_v43, 1  ;;  %v2084_v34 = vmul.f32 %v2081_v20, %v11714_v26  ;;  %s9885_s13 = sld [smem:[#allocation8 + $0x85]] }
 0x4a0   :  { %6077 = vrsqrt.f32 %v4220_v62  ;;  %v4498_v62 = vrot.slane %v4497_v38, 1 }
 0x4a1   :  { %1960 = vrot.lane.b32.xlu0 %v1952_v13, %s6202_s26  ;;  %v2083_v13 = vmul.f32 %v2081_v20, %v11712_v48  ;;  %v4519_v9 = vadd.f32 %v4518_v47, %v4517_v43  ;;  %v643_v20 = vstv %s5824_s30  ;;  %v2368_v47 = vrot.slane %v2359_v54, 1  ;;  %s5955_s30 = sld [smem:[#allocation8 + $0x86]] }
 0x4a2   :  { %2090 = vrot.lane.b32.xlu1 %v2082_v6, %s6203_s6  ;;  %v2517_v6 = vmul.f32 %v2515_v17, %v11712_v48  ;;  %v4499_v12 = vadd.f32 %v4498_v62, %v4497_v38  ;;  %v988_v38 = vstv %s5839_s3  ;;  %v644_v40 = vmul.f32 %v643_v20, %v11717_v57 }
 0x4a3   :  { %v2519_v54 = vmul.f32 %v2515_v17, %v11715_v63 }
 0x4a5   :  { %1964 = vrot.lane.b32.xlu0 %v1954_v36, %s6202_s26  ;;  %v9635_v36 = vpop.permute.xlu1 %2784 }
 0x4a6   :  { %1966 = vrot.lane.b32.xlu1 %v1955_v1, %s6202_s26  ;;  %11796 = vst [vmem:[#allocation66_spill] sm:$0xff] %v9635_v36  ;;  %v2524_v36 = vrot.slane %v2516_v58, 1  ;;  %v645_v58 = vmul.f32 %v643_v20, %v11716_v18 }
 0x4a9   :  { %2092 = vrot.lane.b32.xlu0 %v2083_v13, %s6203_s6  ;;  %v2358_v13 = vmul.f32 %v2355_v55, %v11714_v26  ;;  %v9645_v43 = vpop.permute.xlu1 %2944 }
 0x4aa   :  { %v6078_v1 = vpop.eup %6077  ;;  %2096 = vrot.lane.b32.xlu1 %v2085_v29, %s6203_s6  ;;  %v2525_v29 = vrot.slane %v2517_v6, 1  ;;  %11798 = vst [vmem:[#allocation105_spill] sm:$0xff] %v9645_v43  ;;  %v2795_v6 = vstv %s5905_s10 }
 0x4ab   :  { %6035 = vpush %v6078_v1  ;;  %v2367_v62 = vrot.slane %v2358_v13, 1  ;;  %v11800_v1 = vld [vmem:[#allocation32_spill] sm:$0xff]  ;;  %v11801_v13 = vld [vmem:[#allocation35_spill] sm:$0xff] }
 0x4ac   :  { %6037 = vpush %v4499_v12  ;;  %v2366_v12 = vsel %vm924_vm6, %v2364_v4, %v2365_v11  ;;  %v2526_v55 = vsel %vm924_vm6, %v2524_v36, %v2525_v29  ;;  %v2518_v4 = vmul.f32 %v2515_v17, %v11714_v26  ;;  %v754_v36 = vadd.f32 %v11800_v1, %v644_v40 }
 0x4ad   :  { %6039 = vpush %v4519_v9  ;;  %2094 = vrot.lane.b32.xlu0 %v2084_v34, %s6203_s6  ;;  %v989_v9 = vmul.f32 %v988_v38, %v11717_v57  ;;  %v990_v34 = vmul.f32 %v988_v38, %v11716_v18  ;;  %v9664_v21 = vpop.permute.xlu1 %3126  ;;  %v9671_v17 = vmul.f32 %v988_v38, %v11705_v42  ;;  %v1429_v40 = vstv %s5854_s17 }
 0x4ae   :  { %2372 = vrot.lane.b32.xlu1 %v2365_v11, %s6202_s26  ;;  %v2369_v11 = vsel %vm924_vm6, %v2367_v62, %v2368_v47  ;;  %11802 = vst [vmem:[#allocation149_spill] sm:$0xff] %v9664_v21  ;;  %v9667_v62 = vstv %s5910_s16  ;;  %v884_v60 = vadd.f32 %v9265_v37, %v754_v36  ;;  %v2527_v1 = vrot.slane %v2518_v4, 1  ;;  %v11804_v36 = vld [vmem:[#allocation34_spill] sm:$0xff] }
 0x4af   :  { %v997_v14 = vrot.slane %v989_v9, 1  ;;  %v998_v43 = vrot.slane %v990_v34, 1  ;;  %v9675_v9 = vpop.permute.xlu0 %3256  ;;  %v2528_v34 = vrot.slane %v2519_v54, 1  ;;  %v2956_v37 = vmul.f32 %v9667_v62, %v11713_v30 }
 0x4b0   :  { %11803 = vst [vmem:[#allocation68_spill] sm:$0xff] %v9675_v9  ;;  %v1430_v54 = vmul.f32 %v1429_v40, %v11717_v57  ;;  %v1431_v4 = vmul.f32 %v1429_v40, %v11716_v18 }
 0x4b1   :  { %2370 = vrot.lane.b32.xlu0 %v2366_v12, %s6202_s26  ;;  %v755_v12 = vadd.f32 %v11801_v13, %v645_v58  ;;  %v2797_v58 = vmul.f32 %v2795_v6, %v11712_v48  ;;  %v2796_v13 = vmul.f32 %v2795_v6, %v11713_v30  ;;  %v999_v41 = vsel %vm924_vm6, %v997_v14, %v998_v43  ;;  %v9692_v0 = vpop.permute.xlu1 %3254 }
 0x4b2   :  { %2530 = vrot.lane.b32.xlu1 %v2526_v55, %s6203_s6  ;;  %v991_v55 = vmul.f32 %v988_v38, %v11707_v10  ;;  %v9684_v38 = vmul.f32 %v9667_v62, %v11712_v48  ;;  %v2529_v50 = vsel %vm924_vm6, %v2527_v1, %v2528_v34  ;;  %v2799_v14 = vmul.f32 %v2795_v6, %v11715_v63 }
 0x4b3   :  { %v2805_v9 = vrot.slane %v2797_v58, 2  ;;  %v2804_v56 = vrot.slane %v2796_v13, 2  ;;  %v2964_v18 = vrot.slane %v2956_v37, 2  ;;  %v9701_v58 = vpop.permute.xlu0 %3258 }
 0x4b5   :  { %2374 = vrot.lane.b32.xlu0 %v2369_v11, %s6202_s26  ;;  %v646_v11 = vmul.f32 %v643_v20, %v11707_v10 }
 0x4b6   :  { %2376 = vrot.lane.b32.xlu1 %v2368_v47, %s6202_s26  ;;  %v885_v47 = vadd.f32 %v9358_v23, %v755_v12  ;;  %v1007_v23 = vadd.f32 %v999_v41, %v884_v60  ;;  %v1000_v12 = vrot.slane %v991_v55, 1  ;;  %v2965_v60 = vrot.slane %v9684_v38, 2 }
 0x4b7   :  { %v756_v21 = vadd.f32 %v11804_v36, %v646_v11  ;;  %v2798_v11 = vmul.f32 %v2795_v6, %v11714_v26  ;;  %v647_v41 = vmul.f32 %v643_v20, %v11705_v42  ;;  %v1438_v55 = vrot.slane %v1430_v54, 2  ;;  %v9726_v54 = vpop.permute.xlu0 %3528 }
 0x4b8   :  { %v1159_v36 = vadd.f32 %v9313_v28, %v1007_v23  ;;  %v1008_v57 = vadd.f32 %v998_v43, %v885_v47  ;;  %v11805_v43 = vld [vmem:[#allocation37_spill] sm:$0xff]  ;;  %v2808_v20 = vrot.slane %v2799_v14, 2  ;;  %v11807_v14 = vld [vmem:[#allocation87_spill] sm:$0xff] }
 0x4b9   :  { %2532 = vrot.lane.b32.xlu0 %v2525_v29, %s6203_s6  ;;  %v1001_v29 = vrot.slane %v9671_v17, 1  ;;  %v1439_v17 = vrot.slane %v1431_v4, 2  ;;  %v757_v1 = vadd.f32 %v11805_v43, %v647_v41  ;;  %v2807_v13 = vrot.slane %v2798_v11, 2  ;;  %v11808_v41 = vld [vmem:[#allocation29_spill] sm:$0xff] }
 0x4ba   :  { %2536 = vrot.lane.b32.xlu1 %v2528_v34, %s6203_s6  ;;  %v886_v34 = vadd.f32 %v9293_v16, %v756_v21  ;;  %v1160_v6 = vadd.f32 %v9405_v5, %v1008_v57  ;;  %v1319_v28 = vadd.f32 %v9428_v35, %v1159_v36  ;;  %v2966_v16 = vsel %vm1365_vm7, %v2964_v18, %v2965_v60  ;;  %v9722_v21 = vpop.permute.xlu1 %3130 }
 0x4bb   :  { %v1002_v47 = vsel %vm924_vm6, %v1000_v12, %v1001_v29  ;;  %v887_v57 = vadd.f32 %v9385_v22, %v757_v1  ;;  %v1440_v5 = vsel %vm1365_vm7, %v1438_v55, %v1439_v17  ;;  %v1432_v35 = vmul.f32 %v1429_v40, %v11707_v10 }
 0x4bc   :  { %v1320_v37 = vadd.f32 %v9368_v52, %v1160_v6  ;;  %v1448_v38 = vadd.f32 %v1440_v5, %v1319_v28  ;;  %v2809_v18 = vsel %vm1365_vm7, %v2807_v13, %v2808_v20  ;;  %v2959_v22 = vmul.f32 %v9667_v62, %v11715_v63 }
 0x4bd   :  { %2534 = vrot.lane.b32.xlu0 %v2529_v50, %s6203_s6  ;;  %v2806_v50 = vsel %vm1365_vm7, %v2804_v56, %v2805_v9  ;;  %v1433_v56 = vmul.f32 %v1429_v40, %v11705_v42  ;;  %v2958_v4 = vmul.f32 %v9667_v62, %v11714_v26  ;;  %v11806_v40 = vld [vmem:[#allocation59_spill] sm:$0xff]  ;;  %v1010_v52 = vadd.f32 %v1001_v29, %v887_v57 }
 0x4be   :  { %2812 = vrot.lane.b32.xlu1 %v2805_v9, %s6202_s26  ;;  %v1009_v9 = vadd.f32 %v1002_v47, %v886_v34  ;;  %v1441_v12 = vrot.slane %v1432_v35, 2  ;;  %v1600_v55 = vadd.f32 %v11808_v41, %v1448_v38  ;;  %v1449_v62 = vadd.f32 %v1439_v17, %v1320_v37  ;;  %v9744_v28 = vpop.permute.xlu1 %3260 }
 0x4bf   :  { %v1442_v11 = vrot.slane %v1433_v56, 2  ;;  %v1162_v34 = vadd.f32 %v9441_v8, %v1010_v52  ;;  %v1827_v6 = vstv %s9708_s2  ;;  %v2968_v43 = vrot.slane %v2959_v22, 2 }
 0x4c0   :  { %v1161_v23 = vadd.f32 %v11806_v40, %v1009_v9  ;;  %v2967_v1 = vrot.slane %v2958_v4, 2  ;;  %v1601_v29 = vadd.f32 %v9470_v44, %v1449_v62  ;;  %v2179_v13 = vstv %s9712_s4 }
 0x4c1   :  { %2810 = vrot.lane.b32.xlu0 %v2806_v50, %s6202_s26  ;;  %v1760_v50 = vadd.f32 %v9474_v45, %v1600_v55  ;;  %v1322_v47 = vadd.f32 %v9452_v19, %v1162_v34  ;;  %v1443_v17 = vsel %vm1365_vm7, %v1441_v12, %v1442_v11  ;;  %v1828_v44 = vmul.f32 %v1827_v6, %v11713_v30 }
 0x4c2   :  { %2970 = vrot.lane.b32.xlu1 %v2966_v16, %s6203_s6  ;;  %v1321_v36 = vadd.f32 %v11807_v14, %v1161_v23  ;;  %v9753_v16 = vpop.permute.xlu0 %3532  ;;  %v1761_v57 = vadd.f32 %v9496_v49, %v1601_v29  ;;  %v2180_v45 = vmul.f32 %v2179_v13, %v11713_v30  ;;  %v2969_v19 = vsel %vm1365_vm7, %v2967_v1, %v2968_v43  ;;  %v9773_v4 = vpop.permute.xlu1 %3530 }
 0x4c3   :  { %v1832_v56 = vadd.f32 %v1828_v44, %v1760_v50  ;;  %v1829_v9 = vmul.f32 %v1827_v6, %v11712_v48  ;;  %v9768_v49 = vstv %s9735_s19  ;;  %v1451_v37 = vadd.f32 %v1442_v11, %v1322_v47 }
 0x4c4   :  { %v1450_v8 = vadd.f32 %v1443_v17, %v1321_v36  ;;  %v1830_v38 = vmul.f32 %v1827_v6, %v11714_v26  ;;  %v2619_v22 = vstv %s9737_s21  ;;  %v2188_v11 = vrot.slane %v2180_v45, 1 }
 0x4c5   :  { %2814 = vrot.lane.b32.xlu0 %v2809_v18, %s6202_s26  ;;  %v2182_v18 = vmul.f32 %v2179_v13, %v11714_v26  ;;  %v1946_v40 = vadd.f32 %v9505_v39, %v1832_v56  ;;  %v1833_v23 = vadd.f32 %v1829_v9, %v1761_v57  ;;  %v1603_v12 = vadd.f32 %v9502_v2, %v1451_v37 }
 0x4c6   :  { %2816 = vrot.lane.b32.xlu1 %v2808_v20, %s6202_s26  ;;  %v3141_v20 = vstv %s9716_s18  ;;  %v1602_v35 = vadd.f32 %v9432_v15, %v1450_v8  ;;  %v9782_v36 = vpop.permute.xlu0 %3690  ;;  %v3272_v41 = vmul.f32 %v9768_v49, %v11645_v25  ;;  %v2620_v39 = vmul.f32 %v2619_v22, %v11713_v30  ;;  %v9803_v47 = vpop.permute.xlu1 %3688 }
 0x4c7   :  { %v3143_v5 = vmul.f32 %v3141_v20, %v11643_v51  ;;  %v3142_v52 = vmul.f32 %v3141_v20, %v11645_v25  ;;  %v1947_v55 = vadd.f32 %v9517_v7, %v1833_v23  ;;  %v2076_v62 = vadd.f32 %v9523_v46, %v1946_v40  ;;  %v11810_v40 = vld [vmem:[#allocation101_spill] sm:$0xff] }
 0x4c8   :  { %v1762_v15 = vadd.f32 %v9498_v33, %v1602_v35  ;;  %v9789_v33 = vmul.f32 %v2179_v13, %v11715_v63  ;;  %v1763_v2 = vadd.f32 %v9510_v3, %v1603_v12  ;;  %v1831_v34 = vmul.f32 %v1827_v6, %v11715_v63 }
 0x4c9   :  { %2972 = vrot.lane.b32.xlu0 %v2965_v60, %s6203_s6  ;;  %v2181_v60 = vmul.f32 %v2179_v13, %v11712_v48  ;;  %v2077_v1 = vadd.f32 %v9520_v31, %v1947_v55  ;;  %v3144_v7 = vmul.f32 %v3141_v20, %v11647_v24  ;;  %v3545_v29 = vstv %s9758_s20  ;;  %s5840_s20 = sld [smem:[#allocation8 + $0x6f]] }
 0x4ca   :  { %2976 = vrot.lane.b32.xlu1 %v2968_v43, %s6203_s6  ;;  %v1834_v43 = vadd.f32 %v1830_v38, %v1762_v15  ;;  %v2191_v50 = vrot.slane %v2182_v18, 1  ;;  %v9801_v13 = vmul.f32 %v2619_v22, %v11712_v48  ;;  %v3145_v3 = vmul.f32 %v3141_v20, %v11646_v27  ;;  %v9813_v44 = vpop.permute.xlu0 %3692  ;;  %v11809_v18 = vld [vmem:[#allocation51_spill] sm:$0xff] }
 0x4cb   :  { %v2189_v14 = vrot.slane %v2181_v60, 1  ;;  %v2192_v8 = vrot.slane %v9789_v33, 1  ;;  %v2628_v31 = vrot.slane %v2620_v39, 2  ;;  %v1835_v57 = vadd.f32 %v1831_v34, %v1763_v2 }
 0x4cc   :  { %v1948_v6 = vadd.f32 %v9512_v53, %v1834_v43  ;;  %v3273_v20 = vmul.f32 %v9768_v49, %v11643_v51  ;;  %v3547_v53 = vmul.f32 %v3545_v29, %v11643_v51  ;;  %v9820_v45 = vstv %s9776_s22  ;;  %s5855_s22 = sld [smem:[#allocation8 + $0x72]] }
 0x4cd   :  { %2974 = vrot.lane.b32.xlu0 %v2969_v19, %s6203_s6  ;;  %v2190_v46 = vsel %vm924_vm6, %v2188_v11, %v2189_v14  ;;  %v3546_v35 = vmul.f32 %v3545_v29, %v11645_v25  ;;  %v1949_v56 = vadd.f32 %v9538_v61, %v1835_v57  ;;  %v2629_v9 = vrot.slane %v9801_v13, 2  ;;  %v11811_v61 = vld [vmem:[#allocation62_spill] sm:$0xff] }
 0x4ce   :  { %3152 = vrot.lane.b32.xlu1 %v3143_v5, %s6202_s26  ;;  %v2198_v17 = vadd.f32 %v2190_v46, %v2076_v62  ;;  %v2078_v60 = vadd.f32 %v9528_v32, %v1948_v6  ;;  %v2199_v5 = vadd.f32 %v2189_v14, %v2077_v1  ;;  %v2622_v37 = vmul.f32 %v2619_v22, %v11714_v26  ;;  %v9844_v14 = vpop.permute.xlu1 %3534  ;;  %v11812_v62 = vld [vmem:[#allocation70_spill] sm:$0xff]  ;;  %v9851_v1 = vpop.permute.xlu0 %3694  ;;  %v11813_v46 = vld [vmem:[#allocation85_spill] sm:$0xff] }
 0x4cf   :  { %v3275_v38 = vmul.f32 %v9768_v49, %v11646_v27  ;;  %v3706_v32 = vmul.f32 %v9820_v45, %v11645_v25  ;;  %v2193_v12 = vsel %vm924_vm6, %v2191_v50, %v2192_v8  ;;  %v9842_v11 = vmul.f32 %v2619_v22, %v11715_v63 }
 0x4d0   :  { %v2350_v19 = vadd.f32 %v9542_v59, %v2198_v17  ;;  %v2351_v15 = vadd.f32 %v11809_v18, %v2199_v5  ;;  %v9837_v59 = vmul.f32 %v9820_v45, %v11643_v51  ;;  %v2200_v55 = vadd.f32 %v2193_v12, %v2078_v60  ;;  %v11815_v60 = vld [vmem:[#allocation191_spill] sm:$0xff] }
 0x4d1   :  { %3150 = vrot.lane.b32.xlu0 %v3142_v52, %s6202_s26  ;;  %v2079_v52 = vadd.f32 %v11811_v61, %v1949_v56  ;;  %v3555_v39 = vrot.slane %v3547_v53, 1  ;;  %v3554_v2 = vrot.slane %v3546_v35, 1  ;;  %v2630_v34 = vsel %vm1365_vm7, %v2628_v31, %v2629_v9  ;;  %v11816_v35 = vld [vmem:[#allocation47_spill] sm:$0xff]  ;;  %v11819_v61 = vld [vmem:[#allocation129_spill] sm:$0xff] }
 0x4d2   :  { %3280 = vrot.lane.b32.xlu1 %v3272_v41, %s6203_s6  ;;  %v2510_v23 = vadd.f32 %v11810_v40, %v2350_v19  ;;  %v3274_v41 = vmul.f32 %v9768_v49, %v11647_v24  ;;  %v2511_v33 = vadd.f32 %v11812_v62, %v2351_v15  ;;  %v2631_v43 = vrot.slane %v2622_v37, 2  ;;  %v11817_v15 = vld [vmem:[#allocation61_spill] sm:$0xff] }
 0x4d3   :  { %v3548_v22 = vmul.f32 %v3545_v29, %v11647_v24  ;;  %v2352_v49 = vadd.f32 %v11813_v46, %v2200_v55  ;;  %v3714_v13 = vrot.slane %v3706_v32, 1  ;;  %v2201_v6 = vadd.f32 %v2192_v8, %v2079_v52  ;;  %v9892_v55 = vpop.permute.xlu0 %3968 }
 0x4d4   :  { %v2638_v50 = vadd.f32 %v2630_v34, %v2510_v23  ;;  %v2632_v17 = vrot.slane %v9842_v11, 2  ;;  %v9864_v31 = vstv %s9809_s24  ;;  %v3369_v57 = vstv %s9811_s25  ;;  %v11818_v23 = vld [vmem:[#allocation103_spill] sm:$0xff]  ;;  %s5870_s24 = sld [smem:[#allocation8 + $0x75]]  ;;  %s5885_s25 = sld [smem:[#allocation8 + $0x78]] }
 0x4d5   :  { %3154 = vrot.lane.b32.xlu0 %v3144_v7, %s6202_s26  ;;  %v3549_v7 = vmul.f32 %v3545_v29, %v11646_v27  ;;  %v2639_v5 = vadd.f32 %v2629_v9, %v2511_v33  ;;  %v3556_v8 = vsel %vm924_vm6, %v3554_v2, %v3555_v39  ;;  %v2353_v56 = vadd.f32 %v11816_v35, %v2201_v6 }
 0x4d6   :  { %3156 = vrot.lane.b32.xlu1 %v3145_v3, %s6202_s26  ;;  %v3715_v3 = vrot.slane %v9837_v59, 1  ;;  %v2790_v19 = vadd.f32 %v11815_v60, %v2638_v50  ;;  %v2633_v12 = vsel %vm1365_vm7, %v2631_v43, %v2632_v17  ;;  %v3018_v11 = vmul.f32 %v9864_v31, %v11645_v25  ;;  %v11821_v50 = vld [vmem:[#allocation177_spill] sm:$0xff] }
 0x4d7   :  { %v3558_v18 = vrot.slane %v3549_v7, 1  ;;  %v2791_v40 = vadd.f32 %v11817_v15, %v2639_v5  ;;  %v2513_v52 = vadd.f32 %v11819_v61, %v2353_v56  ;;  %v3019_v34 = vmul.f32 %v9864_v31, %v11643_v51  ;;  %v11823_v56 = vld [vmem:[#allocation185_spill] sm:$0xff] }
 0x4d8   :  { %v2950_v32 = vadd.f32 %v11818_v23, %v2790_v19  ;;  %v3716_v9 = vsel %vm924_vm6, %v3714_v13, %v3715_v3  ;;  %v3371_v43 = vmul.f32 %v3369_v57, %v11643_v51  ;;  %v3708_v46 = vmul.f32 %v9820_v45, %v11647_v24  ;;  %v9926_v23 = vpop.permute.xlu0 %3970  ;;  %v11825_v61 = vld [vmem:[#allocation149_spill] sm:$0xff] }
 0x4d9   :  { %3282 = vrot.lane.b32.xlu0 %v3273_v20, %s6203_s6  ;;  %v11814_v20 = vld [vmem:[#allocation126_spill] sm:$0xff]  ;;  %v3372_v19 = vmul.f32 %v3369_v57, %v11647_v24  ;;  %v9918_v5 = vmul.f32 %v3369_v57, %v11646_v27  ;;  %v3021_v59 = vmul.f32 %v9864_v31, %v11646_v27 }
 0x4da   :  { %3286 = vrot.lane.b32.xlu1 %v3275_v38, %s6203_s6  ;;  %v2512_v53 = vadd.f32 %v11814_v20, %v2352_v49  ;;  %v3557_v38 = vrot.slane %v3548_v22, 1  ;;  %v9906_v49 = vmul.f32 %v9820_v45, %v11646_v27  ;;  %v3022_v6 = vadd.f32 %v3018_v11, %v2950_v32 }
 0x4db   :  { %v3020_v20 = vmul.f32 %v9864_v31, %v11647_v24  ;;  %v3379_v15 = vrot.slane %v3371_v43, 1  ;;  %v3717_v32 = vrot.slane %v3708_v46, 1  ;;  %v9935_v11 = vstv %s9885_s13 }
 0x4dc   :  { %s9853_s27 = spop %6035  ;;  %v2640_v33 = vadd.f32 %v2633_v12, %v2512_v53  ;;  %v3559_v7 = vsel %vm924_vm6, %v3557_v38, %v3558_v18  ;;  %v9912_v53 = vstv %s9858_s12  ;;  %s5900_s12 = sld [smem:[#allocation8 + $0x7b]] }
 0x4dd   :  { %s6038_s5 = spop %6037  ;;  %3284 = vrot.lane.b32.xlu0 %v3274_v41, %s6203_s6  ;;  %v3370_v41 = vmul.f32 %v3369_v57, %v11645_v25  ;;  %v3718_v57 = vrot.slane %v9906_v49, 1 }
 0x4de   :  { %s9867_s23 = smul.f32 0.00295858, %s6038_s5  ;;  %s9869_s28 = spop %6039  ;;  %3562 = vrot.lane.b32.xlu1 %v3555_v39, %s6202_s26  ;;  %v4800_v29 = vpop.xlane.xlu1 %4799  ;;  %v11820_v39 = vld [vmem:[#allocation93_spill] sm:$0xff]  ;;  %v2792_v13 = vadd.f32 %v11821_v50, %v2640_v33 }
 0x4df   :  { %v4801_v37 = vrot.slane %v4800_v29, 4  ;;  %s4522_s0 = smul.f32 0.00295858, %s9869_s28  ;;  %v2951_v2 = vadd.f32 %v11820_v39, %v2791_v40  ;;  %v3378_v60 = vrot.slane %v3370_v41, 1  ;;  %v11824_v40 = vld [vmem:[#allocation66_spill] sm:$0xff]  ;;  %v11826_v41 = vld [vmem:[#allocation105_spill] sm:$0xff]  ;;  %v3810_v39 = vmul.f32 %v9912_v53, %v11645_v25 }
 0x4e0   :  { %s4523_s15 = smul.f32 %s9867_s23, %s9867_s23  ;;  %v3719_v49 = vsel %vm924_vm6, %v3717_v32, %v3718_v57  ;;  %s5915_s5 = sld [smem:[#allocation8 + $0x7e]] }
 0x4e1   :  { %3560 = vrot.lane.b32.xlu0 %v3556_v8, %s6202_s26  ;;  %v4802_v22 = vadd.f32 %v4801_v37, %v4800_v29  ;;  %v2641_v29 = vadd.f32 %v2632_v17, %v2513_v52  ;;  %v11822_v8 = vld [vmem:[#allocation104_spill] sm:$0xff]  ;;  %v3136_v37 = vadd.f32 %v11823_v56, %v3022_v6  ;;  %v3023_v38 = vadd.f32 %v3019_v34, %v2951_v2  ;;  %s5930_s28 = sld [smem:[#allocation8 + $0x81]] }
 0x4e2   :  { %3720 = vrot.lane.b32.xlu1 %v3716_v9, %s6203_s6  ;;  %v9895_v62 = vpop.permute.xlu1 %3972  ;;  %s4524_s14 = ssub.f32 %s4522_s0, %s4523_s15  ;;  %v2952_v35 = vadd.f32 %v11822_v8, %v2792_v13  ;;  %v3811_v2 = vmul.f32 %v9912_v53, %v11643_v51  ;;  %v3986_v13 = vmul.f32 %v9935_v11, %v11645_v25  ;;  %v3987_v6 = vmul.f32 %v9935_v11, %v11643_v51  ;;  %s4223_s15 = sld [smem:[#allocation10]] }
 0x4e3   :  { %v2793_v17 = vadd.f32 %v11824_v40, %v2641_v29  ;;  %v4803_v9 = vrot.slane %v4802_v22, 2  ;;  %v3266_v52 = vadd.f32 %v9692_v0, %v3136_v37  ;;  %v11827_v0 = vld [vmem:[#allocation68_spill] sm:$0xff]  ;;  %v11828_v29 = vld [vmem:[#allocation107_spill] sm:$0xff]  ;;  %v3818_v37 = vrot.slane %v3810_v39, 2  ;;  %s5945_s0 = sld [smem:[#allocation8 + $0x84]] }
 0x4e4   :  { %s4525_s1 = smax.f32 %s6201_s29, %s4524_s14  ;;  %v3024_v43 = vadd.f32 %v3020_v20, %v2952_v35  ;;  %v3381_v35 = vrot.slane %v3372_v19, 1  ;;  %v3994_v19 = vrot.slane %v3986_v13, 2  ;;  %s10245_s14 = sld [smem:[#allocation11]] }
 0x4e5   :  { %3564 = vrot.lane.b32.xlu0 %v3559_v7, %s6202_s26  ;;  %s4526_s3 = sadd.f32 1e-05, %s4525_s1  ;;  %v2953_v33 = vadd.f32 %v11826_v41, %v2793_v17  ;;  %v4804_v50 = vadd.f32 %v4803_v9, %v4802_v22 }
 0x4e6   :  { %3566 = vrot.lane.b32.xlu1 %v3558_v18, %s6202_s26  ;;  %v9921_v45 = vpop.permute.xlu1 %4130  ;;  %v3137_v18 = vadd.f32 %v11825_v61, %v3023_v38  ;;  %v3138_v8 = vadd.f32 %v11828_v29, %v3024_v43  ;;  %v3819_v38 = vrot.slane %v3811_v2, 2 }
 0x4e7   :  { %v4527_v12 = vstv %s4526_s3  ;;  %v3025_v31 = vadd.f32 %v3021_v59, %v2953_v33 }
 0x4e8   :  { %6079 = vrsqrt.f32 %v4527_v12  ;;  %v3267_v7 = vadd.f32 %v11827_v0, %v3137_v18  ;;  %v3268_v22 = vadd.f32 %v9701_v58, %v3138_v8  ;;  %v3995_v12 = vrot.slane %v3987_v6, 2  ;;  %s10243_s13 = smul.f32 %s9853_s27, %s4223_s15 }
 0x4e9   :  { %3722 = vrot.lane.b32.xlu0 %v3715_v3, %s6203_s6  ;;  %v3380_v3 = vsel %vm924_vm6, %v3378_v60, %v3379_v15  ;;  %v3382_v60 = vrot.slane %v9918_v5, 1  ;;  %v3139_v61 = vadd.f32 %v9722_v21, %v3025_v31  ;;  %v3813_v21 = vmul.f32 %v9912_v53, %v11646_v27 }
 0x4ea   :  { %v9942_v34 = vpop.permute.xlu1 %3974  ;;  %v3388_v20 = vadd.f32 %v3380_v3, %v3266_v52  ;;  %v3389_v32 = vadd.f32 %v3379_v15, %v3267_v7  ;;  %v4805_v52 = vrot.slane %v4804_v50, 1  ;;  %s4226_s27 = smul.f32 %s10243_s13, %s9586_s11  ;;  %s10262_s11 = sld [smem:[#allocation10 + $0x1]] }
 0x4eb   :  { %v3269_v39 = vadd.f32 %v9744_v28, %v3139_v61  ;;  %v3383_v58 = vsel %vm924_vm6, %v3381_v35, %v3382_v60  ;;  %v3996_v28 = vsel %vm1365_vm7, %v3994_v19, %v3995_v12  ;;  %v3822_v13 = vrot.slane %v3813_v21, 2 }
 0x4ec   :  { %v4820_v46 = vpop.xlane.xlu0 %4819  ;;  %v3540_v17 = vadd.f32 %v9726_v54, %v3388_v20  ;;  %v3541_v41 = vadd.f32 %v9773_v4, %v3389_v32  ;;  %v3812_v54 = vmul.f32 %v9912_v53, %v11647_v24  ;;  %v3390_v2 = vadd.f32 %v3383_v58, %v3268_v22  ;;  %s4227_s1 = ssub.f32 %s10245_s14, %s4226_s27  ;;  %s5976_s14 = sld [smem:[#allocation10 + $0x2]] }
 0x4ed   :  { %v4821_v56 = vrot.slane %v4820_v46, 4  ;;  %3724 = vrot.lane.b32.xlu0 %v3719_v49, %s6203_s6 }
 0x4ee   :  { %v4133_v40 = vpop.permute.xlu1 %4132  ;;  %v3700_v33 = vadd.f32 %v9803_v47, %v3540_v17  ;;  %v3701_v43 = vadd.f32 %v9782_v36, %v3541_v41  ;;  %v3820_v47 = vsel %vm1365_vm7, %v3818_v37, %v3819_v38  ;;  %v3542_v59 = vadd.f32 %v9753_v16, %v3390_v2 }
 0x4ef   :  { %v4822_v9 = vadd.f32 %v4821_v56, %v4820_v46  ;;  %v3391_v46 = vadd.f32 %v3382_v60, %v3269_v39  ;;  %v3821_v49 = vrot.slane %v3812_v54, 2 }
 0x4f0   :  { %v4129_v18 = vpop.permute.xlu0 %4128  ;;  %v3828_v3 = vadd.f32 %v3820_v47, %v3700_v33  ;;  %v3702_v6 = vadd.f32 %v9813_v44, %v3542_v59  ;;  %v3829_v29 = vadd.f32 %v3819_v38, %v3701_v43  ;;  %v3988_v59 = vmul.f32 %v9935_v11, %v11647_v24 }
 0x4f1   :  { %3726 = vrot.lane.b32.xlu0 %v3718_v57, %s6203_s6  ;;  %v4823_v5 = vrot.slane %v4822_v9, 2  ;;  %v4806_v57 = vadd.f32 %v4805_v52, %v4804_v50  ;;  %v3543_v16 = vadd.f32 %v9844_v14, %v3391_v46  ;;  %v3823_v31 = vsel %vm1365_vm7, %v3821_v49, %v3822_v13 }
 0x4f2   :  { %v4135_v15 = vpop.permute.xlu1 %4134  ;;  %v6080_v0 = vpop.eup %6079  ;;  %v3980_v50 = vadd.f32 %v9892_v55, %v3828_v3  ;;  %v3981_v35 = vadd.f32 %v9926_v23, %v3829_v29  ;;  %v3830_v55 = vadd.f32 %v3823_v31, %v3702_v6  ;;  %v3989_v3 = vmul.f32 %v9935_v11, %v11646_v27 }
 0x4f3   :  { %v4824_v4 = vadd.f32 %v4823_v5, %v4822_v9  ;;  %6041 = vpush %v6080_v0  ;;  %v3703_v44 = vadd.f32 %v9851_v1, %v3543_v16  ;;  %v3997_v6 = vrot.slane %v3988_v59, 2  ;;  %v4145_v29 = vstv %s5955_s30  ;;  %s10280_s30 = sld [smem:[#allocation11 + $0x1]] }
 0x4f4   :  { %v9970_v7 = vpop.permute.xlu0 %898  ;;  %6043 = vpush %v4806_v57  ;;  %v9983_v56 = vadd.f32 %v4129_v18, %v3980_v50  ;;  %v9991_v37 = vadd.f32 %v9921_v45, %v3981_v35  ;;  %v3982_v14 = vadd.f32 %v9895_v62, %v3830_v55  ;;  %v3998_v50 = vrot.slane %v3989_v3, 2 }
 0x4f5   :  { %4000 = vrot.lane.b32.xlu0 %v3996_v28, %s6202_s26  ;;  %v4825_v53 = vrot.slane %v4824_v4, 1  ;;  %v3831_v32 = vadd.f32 %v3822_v13, %v3703_v44  ;;  %v4147_v16 = vmul.f32 %v4145_v29, %v11643_v51  ;;  %v4148_v55 = vmul.f32 %v4145_v29, %v11647_v24 }
 0x4f6   :  { %v9975_v36 = vpop.permute.xlu1 %900  ;;  %11829 = vst [vmem:[#allocation89_spill] sm:$0xff] %v9983_v56  ;;  %11830 = vst [vmem:[#allocation86_spill] sm:$0xff] %v9991_v37  ;;  %v5099_v23 = vsel %vm4176_vm1, %v9983_v56, 0.0  ;;  %v5100_v17 = vsel %vm4178_vm0, %v9991_v37, 0.0  ;;  %v10002_v9 = vadd.f32 %v4133_v40, %v3982_v14  ;;  %v5115_v40 = vmul.f32 %v9983_v56, %v9983_v56 }
 0x4f7   :  { %v4826_v8 = vadd.f32 %v4825_v53, %v4824_v4  ;;  %v5101_v1 = vadd.f32 %v5100_v17, %v5099_v23  ;;  %v3983_v45 = vadd.f32 %v9942_v34, %v3831_v32  ;;  %v5116_v39 = vmul.f32 %v9991_v37, %v9991_v37 }
 0x4f8   :  { %v9979_v20 = vpop.permute.xlu0 %902  ;;  %11831 = vst [vmem:[#allocation194_spill] sm:$0xff] %v10002_v9  ;;  %v5102_v62 = vsel %vm4176_vm1, %v10002_v9, 0.0  ;;  %v5119_v54 = vsel %vm4176_vm1, %v5115_v40, 0.0  ;;  %v5117_v2 = vmul.f32 %v10002_v9, %v10002_v9  ;;  %v3999_v35 = vsel %vm1365_vm7, %v3997_v6, %v3998_v50 }
 0x4f9   :  { %4002 = vrot.lane.b32.xlu0 %v3995_v12, %s6202_s26  ;;  %6045 = vpush %v4826_v8  ;;  %v10011_v52 = vadd.f32 %v4135_v15, %v3983_v45  ;;  %v5103_v12 = vadd.f32 %v5102_v62, %v5101_v1  ;;  %v5120_v15 = vsel %vm4178_vm0, %v5116_v39, 0.0  ;;  %v4155_v44 = vrot.slane %v4147_v16, 2 }
 0x4fa   :  { %v9987_v60 = vpop.permute.xlu1 %904  ;;  %v5121_v43 = vadd.f32 %v5120_v15, %v5119_v54  ;;  %v5122_v57 = vsel %vm4176_vm1, %v5117_v2, 0.0  ;;  %v4149_v14 = vmul.f32 %v4145_v29, %v11646_v27  ;;  %v4157_v32 = vrot.slane %v4148_v55, 2  ;;  %v11846_v27 = vld [vmem:[#allocation19_spill] sm:$0xff] }
 0x4fb   :  { %11832 = vst [vmem:[#allocation154_spill] sm:$0xff] %v10011_v52  ;;  %v5104_v33 = vsel %vm4178_vm0, %v10011_v52, 0.0  ;;  %v5118_v47 = vmul.f32 %v10011_v52, %v10011_v52  ;;  %v4146_v45 = vmul.f32 %v4145_v29, %v11645_v25 }
 0x4fc   :  { %v9993_v38 = vpop.permute.xlu0 %1179  ;;  %v5105_v34 = vadd.f32 %v5104_v33, %v5103_v12  ;;  %v5123_v28 = vadd.f32 %v5122_v57, %v5121_v43  ;;  %v4158_v1 = vrot.slane %v4149_v14, 2 }
 0x4fd   :  { %v5124_v49 = vsel %vm4178_vm0, %v5118_v47, 0.0  ;;  %v4154_v33 = vrot.slane %v4146_v45, 2  ;;  %v11842_v45 = vld [vmem:[#allocation20_spill] sm:$0xff] }
 0x4fe   :  { %v9998_v22 = vpop.permute.xlu1 %1181  ;;  %v5125_v13 = vadd.f32 %v5124_v49, %v5123_v28  ;;  %v4159_v62 = vsel %vm1365_vm7, %v4157_v32, %v4158_v1 }
 0x4ff   :  { %v4156_v39 = vsel %vm1365_vm7, %v4154_v33, %v4155_v44  ;;  %v11843_v33 = vld [vmem:[#allocation39_spill] sm:$0xff] }
 0x500   :  { %v10004_v61 = vpop.permute.xlu0 %1183 }
 0x502   :  { %v10007_v18 = vpop.permute.xlu1 %1339 }
 0x504   :  { %v10013_v19 = vpop.permute.xlu0 %1341 }
 0x506   :  { %v10015_v41 = vpop.permute.xlu1 %1185 }
 0x508   :  { %v10021_v5 = vpop.permute.xlu0 %1343 }
 0x50a   :  { %v10025_v58 = vpop.permute.xlu1 %1345  ;;  %5106 = vadd.xlane.f32.xlu1 %v5105_v34 }
 0x50c   :  { %v10028_v21 = vpop.permute.xlu0 %1620 }
 0x50e   :  { %v10033_v4 = vpop.permute.xlu1 %1622 }
 0x510   :  { %v10035_v0 = vpop.permute.xlu0 %1624 }
 0x512   :  { %v10046_v46 = vpop.permute.xlu1 %1780 }
 0x514   :  { %v10044_v53 = vpop.permute.xlu0 %1782 }
 0x516   :  { %v10053_v31 = vpop.permute.xlu1 %1626 }
 0x518   :  { %5126 = vadd.xlane.f32.xlu0 %v5125_v13  ;;  %v10049_v8 = vpop.permute.xlu0 %1784 }
 0x51a   :  { %v10061_v23 = vpop.permute.xlu1 %1786 }
 0x51b   :  { %4004 = vrot.lane.b32.xlu1 %v3999_v35, %s6202_s26 }
 0x51c   :  { %v10056_v11 = vpop.permute.xlu0 %1960 }
 0x51e   :  { %v10070_v12 = vpop.permute.xlu1 %1962 }
 0x51f   :  { %4162 = vrot.lane.b32.xlu1 %v4155_v44, %s6203_s6 }
 0x520   :  { %v10063_v17 = vpop.permute.xlu0 %1964 }
 0x522   :  { %v10080_v34 = vpop.permute.xlu1 %2090 }
 0x523   :  { %4006 = vrot.lane.b32.xlu1 %v3998_v50, %s6202_s26 }
 0x524   :  { %s10067_s10 = spop %6041  ;;  %v10075_v40 = vpop.permute.xlu0 %2092 }
 0x525   :  { %s6044_s16 = spop %6043  ;;  %s10278_s3 = smul.f32 %s10067_s10, %s10262_s11 }
 0x526   :  { %s10073_s17 = smul.f32 0.00295858, %s6044_s16  ;;  %v10087_v15 = vpop.permute.xlu1 %1966 }
 0x527   :  { %4164 = vrot.lane.b32.xlu1 %v4159_v62, %s6203_s6  ;;  %s4533_s10 = smul.f32 %s10278_s3, %s9867_s23 }
 0x528   :  { %s4830_s2 = smul.f32 %s10073_s17, %s10073_s17  ;;  %v10083_v54 = vpop.permute.xlu0 %2094 }
 0x529   :  { %s4534_s23 = ssub.f32 %s10280_s30, %s4533_s10 }
 0x52a   :  { %s6046_s26 = spop %6045  ;;  %v10091_v47 = vpop.permute.xlu1 %2096 }
 0x52b   :  { %s4829_s4 = smul.f32 0.00295858, %s6046_s26  ;;  %4166 = vrot.lane.b32.xlu1 %v4158_v1, %s6203_s6  ;;  %v1012_v1 = vstv %s5840_s20 }
 0x52c   :  { %v10089_v43 = vpop.permute.xlu0 %2370  ;;  %v1016_v52 = vmul.f32 %v1012_v1, %v11705_v42  ;;  %v1013_v24 = vmul.f32 %v1012_v1, %v11846_v27 }
 0x52d   :  { %s4831_s18 = ssub.f32 %s4829_s4, %s4830_s2  ;;  %s6001_s2 = sld [smem:[#allocation11 + $0x4]] }
 0x52e   :  { %4160 = vrot.lane.b32.xlu0 %v4156_v39, %s6203_s6  ;;  %v10095_v59 = vpop.permute.xlu1 %2372  ;;  %s5825_s6 = sld [smem:[#allocation8 + $0x6c]]  ;;  %v1025_v51 = vrot.slane %v1016_v52, 1 }
 0x52f   :  { %s4832_s19 = smax.f32 %s6201_s29, %s4831_s18 }
 0x530   :  { %s4833_s21 = sadd.f32 1e-05, %s4832_s19  ;;  %v10093_v57 = vpop.permute.xlu0 %2374 }
 0x532   :  { %v4834_v2 = vstv %s4833_s21  ;;  %v10099_v49 = vpop.permute.xlu1 %2530 }
 0x533   :  { %6081 = vrsqrt.f32 %v4834_v2  ;;  %11833 = vst [vmem:[#allocation91_spill] sm:$0xff] %v10099_v49  ;;  %v1014_v2 = vmul.f32 %v1012_v1, %v11842_v45 }
 0x534   :  { %v10097_v3 = vpop.permute.xlu0 %2532  ;;  %v649_v14 = vstv %s5825_s6 }
 0x535   :  { %v651_v62 = vmul.f32 %v649_v14, %v11842_v45  ;;  %v652_v37 = vmul.f32 %v649_v14, %v11707_v10 }
 0x536   :  { %v10103_v6 = vpop.permute.xlu1 %2376 }
 0x537   :  { %11834 = vst [vmem:[#allocation106_spill] sm:$0xff] %v10103_v6  ;;  %v781_v39 = vadd.f32 %v11843_v33, %v651_v62  ;;  %v1022_v33 = vrot.slane %v1014_v2, 1  ;;  %v1021_v6 = vrot.slane %v1013_v24, 1 }
 0x538   :  { %v10101_v13 = vpop.permute.xlu0 %2534 }
 0x539   :  { %v911_v25 = vadd.f32 %v9975_v36, %v781_v39  ;;  %v11849_v36 = vld [vmem:[#allocation41_spill] sm:$0xff] }
 0x53a   :  { %v10107_v29 = vpop.permute.xlu1 %2536 }
 0x53b   :  { %11836 = vst [vmem:[#allocation180_spill] sm:$0xff] %v10107_v29 }
 0x53c   :  { %v10105_v50 = vpop.permute.xlu0 %2810 }
 0x53d   :  { %v6082_v28 = vpop.eup %6081  ;;  %11835 = vst [vmem:[#allocation132_spill] sm:$0xff] %v10105_v50 }
 0x53e   :  { %6047 = vpush %v6082_v28  ;;  %v10111_v35 = vpop.permute.xlu1 %2812  ;;  %v1015_v28 = vmul.f32 %v1012_v1, %v11707_v10 }
 0x53f   :  { %11838 = vst [vmem:[#allocation115_spill] sm:$0xff] %v10111_v35 }
 0x540   :  { %v10109_v16 = vpop.permute.xlu0 %2814  ;;  %v1024_v50 = vrot.slane %v1015_v28, 1 }
 0x541   :  { %11837 = vst [vmem:[#allocation75_spill] sm:$0xff] %v10109_v16  ;;  %v1453_v16 = vstv %s5855_s22 }
 0x542   :  { %v10115_v55 = vpop.permute.xlu1 %2970 }
 0x543   :  { %11840 = vst [vmem:[#allocation151_spill] sm:$0xff] %v10115_v55  ;;  %v650_v55 = vmul.f32 %v649_v14, %v11846_v27 }
 0x544   :  { %v10113_v44 = vpop.permute.xlu0 %2972 }
 0x545   :  { %11839 = vst [vmem:[#allocation128_spill] sm:$0xff] %v10113_v44  ;;  %v11848_v44 = vld [vmem:[#allocation36_spill] sm:$0xff] }
 0x546   :  { %v10124_v9 = vpop.permute.xlu1 %2816  ;;  %v780_v29 = vadd.f32 %v11848_v44, %v650_v55  ;;  %v1026_v44 = vsel %vm924_vm6, %v1024_v50, %v1025_v51  ;;  %v1456_v55 = vmul.f32 %v1453_v16, %v11707_v10 }
 0x547   :  { %11844 = vst [vmem:[#allocation188_spill] sm:$0xff] %v10124_v9  ;;  %v653_v9 = vmul.f32 %v649_v14, %v11705_v42 }
 0x548   :  { %v10117_v32 = vpop.permute.xlu0 %2974  ;;  %v910_v39 = vadd.f32 %v9970_v7, %v780_v29  ;;  %v1454_v29 = vmul.f32 %v1453_v16, %v11846_v27 }
 0x549   :  { %11841 = vst [vmem:[#allocation72_spill] sm:$0xff] %v10117_v32  ;;  %v11847_v32 = vld [vmem:[#allocation38_spill] sm:$0xff]  ;;  %v783_v1 = vadd.f32 %v11849_v36, %v653_v9  ;;  %v1023_v9 = vsel %vm924_vm6, %v1021_v6, %v1022_v33 }
 0x54a   :  { %v782_v62 = vadd.f32 %v11847_v32, %v652_v37  ;;  %v10136_v49 = vpop.permute.xlu1 %2976  ;;  %v1455_v37 = vmul.f32 %v1453_v16, %v11842_v45  ;;  %v1031_v14 = vadd.f32 %v1023_v9, %v910_v39  ;;  %v1462_v6 = vrot.slane %v1454_v29, 2 }
 0x54c   :  { %v10127_v56 = vpop.permute.xlu0 %3150  ;;  %v912_v35 = vadd.f32 %v9979_v20, %v782_v62  ;;  %v1457_v20 = vmul.f32 %v1453_v16, %v11705_v42  ;;  %v1191_v42 = vadd.f32 %v9993_v38, %v1031_v14  ;;  %v1837_v38 = vstv %s5870_s24 }
 0x54d   :  { %11845 = vst [vmem:[#allocation109_spill] sm:$0xff] %v10127_v56  ;;  %v1032_v56 = vadd.f32 %v1022_v33, %v911_v25  ;;  %v913_v25 = vadd.f32 %v9987_v60, %v783_v1 }
 0x54e   :  { %v1033_v24 = vadd.f32 %v1026_v44, %v912_v35  ;;  %v1466_v50 = vrot.slane %v1457_v20, 2  ;;  %v10152_v2 = vpop.permute.xlu1 %3152  ;;  %v1351_v27 = vadd.f32 %v10007_v18, %v1191_v42  ;;  %v1840_v20 = vmul.f32 %v1837_v38, %v11714_v26 }
 0x54f   :  { %v1192_v52 = vadd.f32 %v9998_v22, %v1032_v56  ;;  %v1463_v56 = vrot.slane %v1455_v37, 2  ;;  %v1465_v22 = vrot.slane %v1456_v55, 2  ;;  %v1034_v10 = vadd.f32 %v1025_v51, %v913_v25 }
 0x550   :  { %v10141_v32 = vpop.permute.xlu0 %3154  ;;  %v1193_v45 = vadd.f32 %v10004_v61, %v1033_v24 }
 0x551   :  { %v1352_v7 = vadd.f32 %v10013_v19, %v1192_v52  ;;  %v1194_v16 = vadd.f32 %v10015_v41, %v1034_v10  ;;  %v1467_v28 = vsel %vm1365_vm7, %v1465_v22, %v1466_v50  ;;  %v1464_v51 = vsel %vm1365_vm7, %v1462_v6, %v1463_v56 }
 0x552   :  { %v1353_v60 = vadd.f32 %v10021_v5, %v1193_v45  ;;  %v10165_v36 = vpop.permute.xlu1 %3280  ;;  %v1472_v1 = vadd.f32 %v1464_v51, %v1351_v27  ;;  %v1839_v41 = vmul.f32 %v1837_v38, %v11712_v48  ;;  %v2203_v52 = vstv %s5885_s25 }
 0x553   :  { %v1473_v19 = vadd.f32 %v1463_v56, %v1352_v7  ;;  %v1354_v62 = vadd.f32 %v10025_v58, %v1194_v16  ;;  %v2205_v25 = vmul.f32 %v2203_v52, %v11712_v48  ;;  %v2206_v24 = vmul.f32 %v2203_v52, %v11714_v26 }
 0x554   :  { %v10156_v35 = vpop.permute.xlu0 %3282  ;;  %v1474_v33 = vadd.f32 %v1467_v28, %v1353_v60  ;;  %v2207_v9 = vmul.f32 %v2203_v52, %v11715_v63  ;;  %v1838_v7 = vmul.f32 %v1837_v38, %v11713_v30  ;;  %v2204_v14 = vmul.f32 %v2203_v52, %v11713_v30  ;;  %v11850_v52 = vld [vmem:[#allocation91_spill] sm:$0xff] }
 0x555   :  { %v1633_v61 = vadd.f32 %v10033_v4, %v1473_v19  ;;  %v1632_v4 = vadd.f32 %v10028_v21, %v1472_v1  ;;  %v1475_v37 = vadd.f32 %v1466_v50, %v1354_v62  ;;  %v1841_v56 = vmul.f32 %v1837_v38, %v11715_v63 }
 0x556   :  { %v1634_v39 = vadd.f32 %v10035_v0, %v1474_v33  ;;  %v10180_v21 = vpop.permute.xlu1 %3156  ;;  %v2213_v22 = vrot.slane %v2205_v25, 1  ;;  %v2215_v50 = vrot.slane %v2206_v24, 1  ;;  %v2216_v42 = vrot.slane %v2207_v9, 1 }
 0x557   :  { %v1793_v5 = vadd.f32 %v10044_v53, %v1633_v61  ;;  %v1792_v55 = vadd.f32 %v10046_v46, %v1632_v4  ;;  %v1635_v53 = vadd.f32 %v10053_v31, %v1475_v37  ;;  %v2643_v10 = vstv %s5900_s12 }
 0x558   :  { %v10168_v18 = vpop.permute.xlu0 %3284  ;;  %v1794_v58 = vadd.f32 %v10049_v8, %v1634_v39  ;;  %v2212_v19 = vrot.slane %v2204_v14, 1  ;;  %v2217_v33 = vsel %vm924_vm6, %v2215_v50, %v2216_v42 }
 0x559   :  { %v1843_v44 = vadd.f32 %v1839_v41, %v1793_v5  ;;  %v1795_v8 = vadd.f32 %v10061_v23, %v1635_v53 }
 0x55a   :  { %v1844_v29 = vadd.f32 %v1840_v20, %v1794_v58  ;;  %v10192_v16 = vpop.permute.xlu1 %3286 }
 0x55b   :  { %v1973_v0 = vadd.f32 %v10070_v12, %v1843_v44  ;;  %v1842_v12 = vadd.f32 %v1838_v7, %v1792_v55  ;;  %v1845_v60 = vadd.f32 %v1841_v56, %v1795_v8  ;;  %v11851_v44 = vld [vmem:[#allocation106_spill] sm:$0xff] }
 0x55c   :  { %v10184_v46 = vpop.permute.xlu0 %3560  ;;  %v1974_v45 = vadd.f32 %v10063_v17, %v1844_v29  ;;  %v2645_v17 = vmul.f32 %v2643_v10, %v11712_v48  ;;  %v2644_v48 = vmul.f32 %v2643_v10, %v11713_v30 }
 0x55d   :  { %v2103_v31 = vadd.f32 %v10075_v40, %v1973_v0  ;;  %v1972_v23 = vadd.f32 %v10056_v11, %v1842_v12  ;;  %v1975_v61 = vadd.f32 %v10087_v15, %v1845_v60  ;;  %v2646_v11 = vmul.f32 %v2643_v10, %v11714_v26  ;;  %v11853_v0 = vld [vmem:[#allocation180_spill] sm:$0xff] }
 0x55e   :  { %v2104_v6 = vadd.f32 %v10083_v54, %v1974_v45  ;;  %v2647_v54 = vmul.f32 %v2643_v10, %v11715_v63  ;;  %v10208_v4 = vpop.permute.xlu1 %3562  ;;  %v2652_v58 = vrot.slane %v2644_v48, 2  ;;  %v11856_v45 = vld [vmem:[#allocation111_spill] sm:$0xff]  ;;  %v11858_v10 = vld [vmem:[#allocation72_spill] sm:$0xff]  ;;  %v3393_v60 = vstv %s5930_s28  ;;  %v11863_v48 = vld [vmem:[#allocation114_spill] sm:$0xff] }
 0x55f   :  { %v2223_v27 = vadd.f32 %v2213_v22, %v2103_v31  ;;  %v2102_v40 = vadd.f32 %v10080_v34, %v1972_v23  ;;  %v2105_v38 = vadd.f32 %v10091_v47, %v1975_v61  ;;  %v2214_v34 = vsel %vm924_vm6, %v2212_v19, %v2213_v22  ;;  %v11855_v31 = vld [vmem:[#allocation75_spill] sm:$0xff]  ;;  %v11857_v22 = vld [vmem:[#allocation132_spill] sm:$0xff] }
 0x560   :  { %v10197_v28 = vpop.permute.xlu0 %3564  ;;  %v2224_v51 = vadd.f32 %v2217_v33, %v2104_v6  ;;  %v2655_v39 = vrot.slane %v2646_v11, 2  ;;  %v2656_v41 = vrot.slane %v2647_v54, 2  ;;  %v11859_v19 = vld [vmem:[#allocation151_spill] sm:$0xff]  ;;  %v3395_v11 = vmul.f32 %v3393_v60, %v11856_v45 }
 0x561   :  { %v2383_v62 = vadd.f32 %v10095_v59, %v2223_v27  ;;  %v2222_v5 = vadd.f32 %v2214_v34, %v2102_v40  ;;  %v2653_v59 = vrot.slane %v2645_v17, 2  ;;  %v2225_v63 = vadd.f32 %v2216_v42, %v2105_v38  ;;  %v11860_v40 = vld [vmem:[#allocation188_spill] sm:$0xff]  ;;  %v11862_v38 = vld [vmem:[#allocation117_spill] sm:$0xff] }
 0x562   :  { %v2384_v1 = vadd.f32 %v10093_v57, %v2224_v51  ;;  %v11852_v57 = vld [vmem:[#allocation115_spill] sm:$0xff]  ;;  %v2657_v20 = vsel %vm1365_vm7, %v2655_v39, %v2656_v41  ;;  %v10221_v7 = vpop.permute.xlu1 %3720  ;;  %v11861_v17 = vld [vmem:[#allocation120_spill] sm:$0xff]  ;;  %v3397_v51 = vmul.f32 %v3393_v60, %v11862_v38 }
 0x563   :  { %v2543_v15 = vadd.f32 %v10097_v3, %v2383_v62  ;;  %v2382_v26 = vadd.f32 %v10089_v43, %v2222_v5  ;;  %v2385_v55 = vadd.f32 %v11851_v44, %v2225_v63  ;;  %v3027_v43 = vstv %s5915_s5 }
 0x564   :  { %v2544_v47 = vadd.f32 %v10101_v13, %v2384_v1  ;;  %v10212_v37 = vpop.permute.xlu0 %3722  ;;  %v2654_v9 = vsel %vm1365_vm7, %v2652_v58, %v2653_v59  ;;  %v11854_v13 = vld [vmem:[#allocation128_spill] sm:$0xff]  ;;  %v3029_v56 = vmul.f32 %v3027_v43, %v11856_v45  ;;  %v3030_v62 = vmul.f32 %v3027_v43, %v11861_v17 }
 0x565   :  { %v2663_v3 = vadd.f32 %v2653_v59, %v2543_v15  ;;  %v2542_v30 = vadd.f32 %v11850_v52, %v2382_v26  ;;  %v2545_v25 = vadd.f32 %v11853_v0, %v2385_v55  ;;  %v3396_v54 = vmul.f32 %v3393_v60, %v11861_v17 }
 0x566   :  { %v2664_v24 = vadd.f32 %v2657_v20, %v2544_v47  ;;  %v3567_v34 = vpop.permute.xlu1 %3566  ;;  %v3028_v5 = vmul.f32 %v3027_v43, %v11863_v48  ;;  %v3031_v63 = vmul.f32 %v3027_v43, %v11862_v38  ;;  %v3403_v47 = vrot.slane %v3395_v11, 1 }
 0x567   :  { %v2823_v53 = vadd.f32 %v11852_v57, %v2663_v3  ;;  %v2662_v29 = vadd.f32 %v2654_v9, %v2542_v30  ;;  %v2665_v42 = vadd.f32 %v2656_v41, %v2545_v25  ;;  %v3394_v41 = vmul.f32 %v3393_v60, %v11863_v48  ;;  %v11864_v30 = vld [vmem:[#allocation109_spill] sm:$0xff] }
 0x568   :  { %v2824_v14 = vadd.f32 %v11855_v31, %v2664_v24  ;;  %v10224_v12 = vpop.permute.xlu0 %3724  ;;  %v3406_v58 = vrot.slane %v3397_v51, 1  ;;  %v3833_v3 = vstv %s5945_s0  ;;  %v4233_v11 = vstv %s4227_s1 }
 0x569   :  { %v2983_v8 = vadd.f32 %v11854_v13, %v2823_v53  ;;  %v2822_v50 = vadd.f32 %v11857_v22, %v2662_v29  ;;  %v2825_v61 = vadd.f32 %v11860_v40, %v2665_v42  ;;  %v3835_v25 = vmul.f32 %v3833_v3, %v11856_v45 }
 0x56a   :  { %v2984_v23 = vadd.f32 %v11858_v10, %v2824_v14  ;;  %v4228_v40 = vstv %s10243_s13  ;;  %s5988_s13 = sld [smem:[#allocation10 + $0x3]] }
 0x56b   :  { %v3033_v6 = vadd.f32 %v3029_v56, %v2983_v8  ;;  %v2982_v27 = vadd.f32 %v11859_v19, %v2822_v50  ;;  %v2985_v15 = vadd.f32 %v10136_v49, %v2825_v61  ;;  %v3405_v49 = vrot.slane %v3396_v54, 1 }
 0x56c   :  { %v3034_v1 = vadd.f32 %v3030_v62, %v2984_v23  ;;  %v3727_v59 = vpop.permute.xlu0 %3726  ;;  %v3836_v8 = vmul.f32 %v3833_v3, %v11861_v17  ;;  %v3834_v56 = vmul.f32 %v3833_v3, %v11863_v48  ;;  %v3843_v42 = vrot.slane %v3835_v25, 2 }
 0x56d   :  { %v3163_v33 = vadd.f32 %v10152_v2, %v3033_v6  ;;  %v3032_v26 = vadd.f32 %v3028_v5, %v2982_v27  ;;  %v3035_v44 = vadd.f32 %v3031_v63, %v2985_v15  ;;  %v3407_v13 = vsel %vm924_vm6, %v3405_v49, %v3406_v58  ;;  %v11866_v5 = vld [vmem:[#allocation44_spill] sm:$0xff]  ;;  %v11868_v49 = vld [vmem:[#allocation77_spill] sm:$0xff] }
 0x56e   :  { %v3164_v2 = vadd.f32 %v10141_v32, %v3034_v1  ;;  %v3402_v32 = vrot.slane %v3394_v41, 1  ;;  %v3845_v10 = vrot.slane %v3836_v8, 2  ;;  %v3842_v61 = vrot.slane %v3834_v56, 2 }
 0x56f   :  { %v3293_v39 = vadd.f32 %v10156_v35, %v3163_v33  ;;  %v3162_v35 = vadd.f32 %v11864_v30, %v3032_v26  ;;  %v3165_v0 = vadd.f32 %v10180_v21, %v3035_v44  ;;  %v4230_v1 = vmul.f32 %v4228_v40, %v11866_v5  ;;  %v5957_v5 = vld [vmem:[%s11171_s7 + $0x18] sm:$0x1f]  ;;  %s6048_s27 = spop %6047 }
 0x570   :  { %v3294_v55 = vadd.f32 %v10168_v18, %v3164_v2  ;;  %v4001_v24 = vpop.permute.xlu0 %4000  ;;  %v3837_v18 = vmul.f32 %v3833_v3, %v11862_v38  ;;  %v3404_v21 = vsel %vm924_vm6, %v3402_v32, %v3403_v47  ;;  %s4838_s10 = smul.f32 %s6048_s27, %s5976_s14  ;;  %s5989_s14 = sld [smem:[#allocation11 + $0x3]] }
 0x571   :  { %v3413_v53 = vadd.f32 %v3403_v47, %v3293_v39  ;;  %v3292_v20 = vadd.f32 %v10165_v36, %v3162_v35  ;;  %v3295_v31 = vadd.f32 %v10192_v16, %v3165_v0  ;;  %v3844_v39 = vsel %vm1365_vm7, %v3842_v61, %v3843_v42 }
 0x572   :  { %v3414_v36 = vadd.f32 %v3407_v13, %v3294_v55  ;;  %v3846_v23 = vrot.slane %v3837_v18, 2  ;;  %v4235_v3 = vadd.f32 %v4233_v11, %v4230_v1  ;;  %s4840_s16 = smul.f32 %s4838_s10, %s10073_s17 }
 0x573   :  { %v3573_v9 = vadd.f32 %v10208_v4, %v3413_v53  ;;  %v3412_v4 = vadd.f32 %v3404_v21, %v3292_v20  ;;  %v3415_v6 = vadd.f32 %v3406_v58, %v3295_v31  ;;  %v4232_v58 = vmul.f32 %v4228_v40, %v11868_v49 }
 0x574   :  { %v3574_v22 = vadd.f32 %v10197_v28, %v3414_v36  ;;  %v3847_v38 = vsel %vm1365_vm7, %v3845_v10, %v3846_v23  ;;  %v4243_v13 = vmul.f32 0.01, %v4235_v3  ;;  %v4535_v10 = vstv %s10278_s3 }
 0x575   :  { %v3733_v45 = vadd.f32 %v10212_v37, %v3573_v9  ;;  %v3572_v60 = vadd.f32 %v10184_v46, %v3412_v4  ;;  %v4003_v37 = vpop.permute.xlu0 %4002  ;;  %v3575_v28 = vadd.f32 %v3567_v34, %v3415_v6  ;;  %v11865_v46 = vld [vmem:[#allocation55_spill] sm:$0xff]  ;;  %v4237_v32 = vadd.f32 %v4233_v11, %v4232_v58  ;;  %v4250_v6 = vld [vmem:[%s11171_s7] sm:$0xff] }
 0x576   :  { %v3734_v19 = vadd.f32 %v10224_v12, %v3574_v22  ;;  %v4229_v15 = vmul.f32 %v4228_v40, %v11865_v46  ;;  %vm4239_vm4 = vcmp.ge.f32.partialorder %v4235_v3, 0.0 }
 0x577   :  { %v3853_v17 = vadd.f32 %v3843_v42, %v3733_v45  ;;  %v3732_v62 = vadd.f32 %v10221_v7, %v3572_v60  ;;  %v3735_v48 = vadd.f32 %v3727_v59, %v3575_v28  ;;  %v11867_v59 = vld [vmem:[#allocation56_spill] sm:$0xff]  ;;  %v4245_v21 = vmul.f32 0.01, %v4237_v32 }
 0x578   :  { %v3854_v12 = vadd.f32 %v3847_v38, %v3734_v19  ;;  %v4234_v26 = vadd.f32 %v4233_v11, %v4229_v15  ;;  %v4231_v47 = vmul.f32 %v4228_v40, %v11867_v59  ;;  %vm4241_vm3 = vcmp.ge.f32.partialorder %v4237_v32, 0.0  ;;  %v11869_v38 = vld [vmem:[#allocation64_spill] sm:$0xff]  ;;  %v11871_v59 = vld [vmem:[#allocation26_spill] sm:$0xff] }
 0x579   :  { %v4013_v54 = vadd.f32 %v4003_v37, %v3853_v17  ;;  %v3852_v34 = vadd.f32 %v3844_v39, %v3732_v62  ;;  %v3855_v35 = vadd.f32 %v3846_v23, %v3735_v48  ;;  %v10320_v17 = vsel %vm4241_vm3, %v4237_v32, %v4245_v21  ;;  %v4251_v62 = vld [vmem:[%s11171_s7 + $0x8] sm:$0x1f]  ;;  %v11872_v32 = vld [vmem:[#allocation79_spill] sm:$0xff] }
 0x57a   :  { %v4242_v0 = vmul.f32 0.01, %v4234_v26  ;;  %vm4238_vm2 = vcmp.ge.f32.partialorder %v4234_v26, 0.0  ;;  %v4540_v28 = vstv %s4534_s23  ;;  %v10328_v15 = vsel %vm4239_vm4, %v4235_v3, %v4243_v13  ;;  %s5977_s23 = sld [smem:[#allocation11 + $0x2]] }
 0x57b   :  { %v4012_v30 = vadd.f32 %v4001_v24, %v3852_v34  ;;  %v4255_v48 = vmul.f32 %v4251_v62, %v10320_v17  ;;  %v4253_v39 = vmul.f32 %v4251_v62, %v10328_v15  ;;  %vm4283_vm4 = vcmask 130112  }
 0x57c   :  { %v10311_v60 = vsel %vm4238_vm2, %v4234_v26, %v4242_v0 }
 0x57d   :  { %v4259_v3 = vsel %vm4178_vm0, %v4253_v39, 0.0 }
 0x580   :  { %s4841_s17 = ssub.f32 %s5977_s23, %s4840_s16 }
 0x597   :  { %v5107_v52 = vpop.xlane.xlu1 %5106 }
 0x598   :  { %v5108_v57 = vrot.slane %v5107_v52, 4 }
 0x59a   :  { %v5109_v43 = vadd.f32 %v5108_v57, %v5107_v52  ;;  %v4236_v57 = vadd.f32 %v4233_v11, %v4231_v47  ;;  %v4252_v11 = vmul.f32 %v4250_v6, %v10311_v60  ;;  %v4536_v47 = vmul.f32 %v4535_v10, %v11871_v59 }
 0x59b   :  { %v4005_v29 = vpop.permute.xlu1 %4004 }
 0x59c   :  { %v5110_v14 = vrot.slane %v5109_v43, 2  ;;  %v4014_v2 = vadd.f32 %v4005_v29, %v3854_v12  ;;  %vm4240_vm5 = vcmp.ge.f32.partialorder %v4236_v57, 0.0  ;;  %v4256_v1 = vsel %vm4176_vm1, %v4252_v11, 0.0 }
 0x59e   :  { %v5111_v50 = vadd.f32 %v5110_v14, %v5109_v43 }
 0x59f   :  { %v4163_v16 = vpop.permute.xlu1 %4162 }
 0x5a0   :  { %v5112_v27 = vrot.slane %v5111_v50, 1  ;;  %v10274_v41 = vadd.f32 %v4163_v16, %v4013_v54  ;;  %v4244_v54 = vmul.f32 0.01, %v4236_v57 }
 0x5a2   :  { %v5113_v33 = vadd.f32 %v5112_v27, %v5111_v50  ;;  %v5423_v53 = vmul.f32 %v10274_v41, %v10274_v41  ;;  %v5407_v24 = vsel %vm4178_vm0, %v10274_v41, 0.0  ;;  %v10337_v34 = vsel %vm4240_vm5, %v4236_v57, %v4244_v54 }
 0x5a3   :  { %v4007_v51 = vpop.permute.xlu1 %4006  ;;  %v4307_v57 = vmul.f32 %v5957_v5, %v10320_v17  ;;  %vm4294_vm5 = vcmask 1041409  }
 0x5a4   :  { %6049 = vpush %v5113_v33  ;;  %v4015_v25 = vadd.f32 %v4007_v51, %v3855_v35  ;;  %v5427_v45 = vsel %vm4178_vm0, %v5423_v53, 0.0  ;;  %v4537_v51 = vmul.f32 %v4535_v10, %v11869_v38  ;;  %v5956_v35 = vld [vmem:[%s11171_s7 + $0x10] sm:$0xff]  ;;  %v4538_v53 = vmul.f32 %v4535_v10, %v11872_v32 }
 0x5a5   :  { %v5127_v7 = vpop.xlane.xlu0 %5126  ;;  %v4304_v13 = vmul.f32 %v5956_v35, %v10311_v60  ;;  %v4306_v21 = vmul.f32 %v5956_v35, %v10337_v34  ;;  %v4842_v35 = vstv %s4838_s10  ;;  %v4847_v32 = vstv %s4841_s17 }
 0x5a6   :  { %v5128_v63 = vrot.slane %v5127_v7, 4  ;;  %v4542_v12 = vadd.f32 %v4540_v28, %v4537_v51 }
 0x5a7   :  { %v4165_v52 = vpop.permute.xlu1 %4164 }
 0x5a8   :  { %v5129_v44 = vadd.f32 %v5128_v63, %v5127_v7  ;;  %v10284_v55 = vadd.f32 %v4165_v52, %v4014_v2  ;;  %v11870_v7 = vld [vmem:[#allocation82_spill] sm:$0xff]  ;;  %v4265_v2 = vsel %vm4178_vm0, %v4255_v48, 0.0  ;;  %v4305_v63 = vmul.f32 %v5957_v5, %v10328_v15  ;;  %v5958_v48 = vld [vmem:[%s11171_s7 + $0x20] sm:$0xff] }
 0x5a9   :  { %v4161_v20 = vpop.permute.xlu0 %4160  ;;  %v4539_v26 = vmul.f32 %v4535_v10, %v11870_v7  ;;  %v4550_v58 = vmul.f32 0.01, %v4542_v12  ;;  %v4254_v52 = vmul.f32 %v4250_v6, %v10337_v34  ;;  %vm4546_vm6 = vcmp.ge.f32.partialorder %v4542_v12, 0.0 }
 0x5aa   :  { %v10290_v43 = vadd.f32 %v4161_v20, %v4012_v30  ;;  %v5130_v9 = vrot.slane %v5129_v44, 2  ;;  %v5424_v8 = vmul.f32 %v10284_v55, %v10284_v55  ;;  %v5409_v4 = vsel %vm4176_vm1, %v10284_v55, 0.0 }
 0x5ab   :  { %v4167_v18 = vpop.permute.xlu1 %4166  ;;  %v4544_v49 = vadd.f32 %v4540_v28, %v4539_v26  ;;  %v4541_v30 = vadd.f32 %v4540_v28, %v4536_v47  ;;  %v10350_v0 = vsel %vm4546_vm6, %v4542_v12, %v4550_v58  ;;  %v4314_v10 = vsel %vm4176_vm1, %v4306_v21, 0.0  ;;  %v5970_v47 = vld [vmem:[%s11171_s7 + $0x70] sm:$0xff] }
 0x5ac   :  { %v5406_v29 = vsel %vm4176_vm1, %v10290_v43, 0.0  ;;  %v5422_v31 = vmul.f32 %v10290_v43, %v10290_v43  ;;  %v10300_v36 = vadd.f32 %v4167_v18, %v4015_v25  ;;  %v5131_v14 = vadd.f32 %v5130_v9, %v5129_v44  ;;  %v5967_v25 = vld [vmem:[%s11171_s7 + $0x58] sm:$0x1f] }
 0x5ad   :  { %v5408_v56 = vadd.f32 %v5407_v24, %v5406_v29  ;;  %v5429_v27 = vsel %vm4176_vm1, %v5424_v8, 0.0  ;;  %v4311_v44 = vsel %vm4178_vm0, %v4305_v63, 0.0  ;;  %v4552_v20 = vmul.f32 0.01, %v4544_v49 }
 0x5ae   :  { %v5426_v22 = vsel %vm4176_vm1, %v5422_v31, 0.0  ;;  %v5425_v50 = vmul.f32 %v10300_v36, %v10300_v36  ;;  %v5132_v42 = vrot.slane %v5131_v14, 1  ;;  %v5411_v37 = vsel %vm4178_vm0, %v10300_v36, 0.0 }
 0x5af   :  { %v5410_v23 = vadd.f32 %v5409_v4, %v5408_v56  ;;  %v5428_v16 = vadd.f32 %v5427_v45, %v5426_v22  ;;  %v4262_v9 = vsel %vm4176_vm1, %v4254_v52, 0.0  ;;  %vm4548_vm7 = vcmp.ge.f32.partialorder %v4544_v49, 0.0  ;;  %v5966_v4 = vld [vmem:[%s11171_s7 + $0x50] sm:$0xff] }
 0x5b0   :  { %v5133_v19 = vadd.f32 %v5132_v42, %v5131_v14  ;;  %v5431_v33 = vsel %vm4178_vm0, %v5425_v50, 0.0  ;;  %v4543_v24 = vadd.f32 %v4540_v28, %v4538_v53  ;;  %v4549_v8 = vmul.f32 0.01, %v4541_v30  ;;  %v5969_v42 = vld [vmem:[%s11171_s7 + $0x68] sm:$0x1f] }
 0x5b1   :  { %v5412_v40 = vadd.f32 %v5411_v37, %v5410_v23  ;;  %v5430_v61 = vadd.f32 %v5429_v27, %v5428_v16  ;;  %v4317_v18 = vsel %vm4178_vm0, %v4307_v57, 0.0  ;;  %v4561_v29 = vmul.f32 %v5967_v25, %v10350_v0  ;;  %v5959_v28 = vld [vmem:[%s11171_s7 + $0x28] sm:$0x1f] }
 0x5b2   :  { %6051 = vpush %v5133_v19  ;;  %vm4545_vm8 = vcmp.ge.f32.partialorder %v4541_v30, 0.0  ;;  %v10359_v31 = vsel %vm4548_vm7, %v4544_v49, %v4552_v20  ;;  %v4308_v14 = vsel %vm4176_vm1, %v4304_v13, 0.0  ;;  %v4551_v45 = vmul.f32 0.01, %v4543_v24  ;;  %v5960_v13 = vld [vmem:[%s11171_s7 + $0x30] sm:$0xff] }
 0x5b3   :  { %5413 = vadd.xlane.f32.xlu0 %v5412_v40  ;;  %v5432_v46 = vadd.f32 %v5431_v33, %v5430_v61  ;;  %v10363_v56 = vsel %vm4545_vm8, %v4541_v30, %v4549_v8  ;;  %v4567_v22 = vsel %vm4178_vm0, %v4561_v29, 0.0  ;;  %v4563_v50 = vmul.f32 %v5967_v25, %v10359_v31  ;;  %v5968_v40 = vld [vmem:[%s11171_s7 + $0x60] sm:$0xff]  ;;  %v11873_v25 = vld [vmem:[#allocation83_spill] sm:$0xff]  ;;  %v5973_v29 = vld [vmem:[%s11171_s7 + $0x88] sm:$0x1f] }
 0x5b4   :  { %vm4547_vm9 = vcmp.ge.f32.partialorder %v4543_v24, 0.0  ;;  %v4560_v23 = vmul.f32 %v5966_v4, %v10363_v56  ;;  %v4608_v19 = vmul.f32 %v5969_v42, %v10350_v0  ;;  %v4610_v62 = vmul.f32 %v5969_v42, %v10359_v31  ;;  %v11875_v42 = vld [vmem:[#allocation60_spill] sm:$0xff] }
 0x5b5   :  { %5433 = vadd.xlane.f32.xlu1 %v5432_v46  ;;  %v10375_v16 = vsel %vm4547_vm9, %v4543_v24, %v4551_v45  ;;  %v4573_v6 = vsel %vm4178_vm0, %v4563_v50, 0.0  ;;  %v4607_v11 = vmul.f32 %v5968_v40, %v10363_v56  ;;  %v4351_v38 = vmul.f32 %v5959_v28, %v10328_v15  ;;  %v11874_v45 = vld [vmem:[#allocation84_spill] sm:$0xff] }
 0x5b6   :  { %v4564_v37 = vsel %vm4176_vm1, %v4560_v23, 0.0  ;;  %v4562_v27 = vmul.f32 %v5966_v4, %v10375_v16  ;;  %v4614_v61 = vsel %vm4178_vm0, %v4608_v19, 0.0  ;;  %v4620_v54 = vsel %vm4178_vm0, %v4610_v62, 0.0 }
 0x5b7   :  { %4257 = vadd.xlane.f32.xlu0 %v4256_v1  ;;  %v4611_v51 = vsel %vm4176_vm1, %v4607_v11, 0.0  ;;  %v4609_v46 = vmul.f32 %v5968_v40, %v10375_v16  ;;  %v4357_v12 = vsel %vm4178_vm0, %v4351_v38, 0.0  ;;  %v4353_v5 = vmul.f32 %v5959_v28, %v10320_v17  ;;  %v5971_v1 = vld [vmem:[%s11171_s7 + $0x78] sm:$0x1f] }
 0x5b8   :  { %v4570_v33 = vsel %vm4176_vm1, %v4562_v27, 0.0  ;;  %v4350_v7 = vmul.f32 %v5958_v48, %v10311_v60  ;;  %v4352_v59 = vmul.f32 %v5958_v48, %v10337_v34  ;;  %v4657_v58 = vmul.f32 %v5971_v1, %v10359_v31 }
 0x5b9   :  { %4266 = vadd.xlane.f32.xlu1 %v4265_v2  ;;  %v4617_v39 = vsel %vm4176_vm1, %v4609_v46, 0.0  ;;  %v4363_v26 = vsel %vm4178_vm0, %v4353_v5, 0.0  ;;  %v4655_v2 = vmul.f32 %v5971_v1, %v10350_v0  ;;  %v4654_v30 = vmul.f32 %v5970_v47, %v10363_v56 }
 0x5ba   :  { %v4354_v63 = vsel %vm4176_vm1, %v4350_v7, 0.0  ;;  %v4360_v52 = vsel %vm4176_vm1, %v4352_v59, 0.0  ;;  %v4656_v20 = vmul.f32 %v5970_v47, %v10375_v16  ;;  %v4396_v21 = vmul.f32 %v5960_v13, %v10311_v60  ;;  %v5978_v47 = vld [vmem:[%s11171_s7 + $0xa0] sm:$0xff] }
 0x5bb   :  { %4260 = vadd.xlane.f32.xlu0 %v4259_v3  ;;  %v4661_v49 = vsel %vm4178_vm0, %v4655_v2, 0.0  ;;  %v5961_v3 = vld [vmem:[%s11171_s7 + $0x38] sm:$0x1f]  ;;  %v4658_v53 = vsel %vm4176_vm1, %v4654_v30, 0.0  ;;  %v4846_v4 = vmul.f32 %v4842_v35, %v11874_v45  ;;  %v4702_v50 = vmul.f32 %v5973_v29, %v10350_v0 }
 0x5bc   :  { %v4397_v57 = vmul.f32 %v5961_v3, %v10328_v15  ;;  %v4399_v8 = vmul.f32 %v5961_v3, %v10320_v17  ;;  %v4400_v19 = vsel %vm4176_vm1, %v4396_v21, 0.0  ;;  %v4704_v28 = vmul.f32 %v5973_v29, %v10359_v31  ;;  %v5981_v3 = vld [vmem:[%s11171_s7 + $0xb8] sm:$0x1f] }
 0x5bd   :  { %4312 = vadd.xlane.f32.xlu1 %v4311_v44  ;;  %v4667_v44 = vsel %vm4178_vm0, %v4657_v58, 0.0  ;;  %v4851_v23 = vadd.f32 %v4847_v32, %v4846_v4  ;;  %v4708_v62 = vsel %vm4178_vm0, %v4702_v50, 0.0  ;;  %v5962_v4 = vld [vmem:[%s11171_s7 + $0x40] sm:$0xff] }
 0x5be   :  { %v4403_v24 = vsel %vm4178_vm0, %v4397_v57, 0.0  ;;  %v4714_v1 = vsel %vm4178_vm0, %v4704_v28, 0.0 }
 0x5bf   :  { %4263 = vadd.xlane.f32.xlu0 %v4262_v9  ;;  %v4844_v9 = vmul.f32 %v4842_v35, %v11873_v25  ;;  %vm4855_vm11 = vcmp.ge.f32.partialorder %v4851_v23, 0.0  ;;  %v5980_v25 = vld [vmem:[%s11171_s7 + $0xb0] sm:$0xff] }
 0x5c1   :  { %4318 = vadd.xlane.f32.xlu1 %v4317_v18  ;;  %v4849_v18 = vadd.f32 %v4847_v32, %v4844_v9 }
 0x5c3   :  { %4309 = vadd.xlane.f32.xlu0 %v4308_v14  ;;  %v4664_v14 = vsel %vm4176_vm1, %v4656_v20, 0.0  ;;  %vm4853_vm10 = vcmp.ge.f32.partialorder %v4849_v18, 0.0 }
 0x5c5   :  { %4568 = vadd.xlane.f32.xlu1 %v4567_v22  ;;  %v4409_v22 = vsel %vm4178_vm0, %v4399_v8, 0.0 }
 0x5c7   :  { %4315 = vadd.xlane.f32.xlu0 %v4314_v10  ;;  %v4843_v10 = vmul.f32 %v4842_v35, %v11875_v42  ;;  %v5975_v42 = vld [vmem:[%s11171_s7 + $0x98] sm:$0x1f] }
 0x5c9   :  { %4574 = vadd.xlane.f32.xlu1 %v4573_v6  ;;  %v4857_v6 = vmul.f32 0.01, %v4849_v18  ;;  %v4848_v27 = vadd.f32 %v4847_v32, %v4843_v10  ;;  %v4442_v10 = vmul.f32 %v5962_v4, %v10311_v60  ;;  %v5983_v60 = vld [vmem:[%s11171_s7 + $0xc8] sm:$0x1f] }
 0x5cb   :  { %4565 = vadd.xlane.f32.xlu0 %v4564_v37  ;;  %v4398_v37 = vmul.f32 %v5960_v13, %v10337_v34  ;;  %v10452_v38 = vsel %vm4853_vm10, %v4849_v18, %v4857_v6  ;;  %v4856_v5 = vmul.f32 0.01, %v4848_v27  ;;  %vm4852_vm12 = vcmp.ge.f32.partialorder %v4848_v27, 0.0 }
 0x5cc   :  { %v4749_v6 = vmul.f32 %v5975_v42, %v10350_v0  ;;  %vm4297_vm10 = vcmask 99328  }
 0x5cd   :  { %4615 = vadd.xlane.f32.xlu1 %v4614_v61  ;;  %v5972_v61 = vld [vmem:[%s11171_s7 + $0x80] sm:$0xff]  ;;  %v4406_v46 = vsel %vm4176_vm1, %v4398_v37, 0.0  ;;  %v10465_v59 = vsel %vm4852_vm12, %v4848_v27, %v4856_v5  ;;  %v4444_v37 = vmul.f32 %v5962_v4, %v10337_v34  ;;  %vm5719_vm12 = vcmask 31744  }
 0x5ce   :  { %v4701_v48 = vmul.f32 %v5972_v61, %v10363_v56  ;;  %v4703_v2 = vmul.f32 %v5972_v61, %v10375_v16  ;;  %v4914_v18 = vmul.f32 %v5980_v25, %v10465_v59  ;;  %v4755_v27 = vsel %vm4178_vm0, %v4749_v6, 0.0 }
 0x5cf   :  { %4571 = vadd.xlane.f32.xlu0 %v4570_v33  ;;  %v11876_v33 = vld [vmem:[#allocation102_spill] sm:$0xff]  ;;  %v4452_v0 = vsel %vm4176_vm1, %v4444_v37, 0.0 }
 0x5d0   :  { %v4845_v11 = vmul.f32 %v4842_v35, %v11876_v33  ;;  %v4711_v30 = vsel %vm4176_vm1, %v4703_v2, 0.0  ;;  %v4867_v35 = vmul.f32 %v5978_v47, %v10465_v59  ;;  %v4918_v21 = vsel %vm4176_vm1, %v4914_v18, 0.0 }
 0x5d1   :  { %4621 = vadd.xlane.f32.xlu1 %v4620_v54  ;;  %v4859_v54 = vmul.f32 0.01, %v4851_v23 }
 0x5d3   :  { %4612 = vadd.xlane.f32.xlu0 %v4611_v51  ;;  %v5979_v51 = vld [vmem:[%s11171_s7 + $0xa8] sm:$0x1f]  ;;  %v10461_v7 = vsel %vm4855_vm11, %v4851_v23, %v4859_v54  ;;  %vm5717_vm11 = vcmask 23552  }
 0x5d4   :  { %v4870_v58 = vmul.f32 %v5979_v51, %v10461_v7  ;;  %v4917_v13 = vmul.f32 %v5981_v3, %v10461_v7  ;;  %v4964_v54 = vmul.f32 %v5983_v60, %v10461_v7 }
 0x5d5   :  { %4358 = vadd.xlane.f32.xlu1 %v4357_v12  ;;  %s6050_s4 = spop %6049  ;;  %v4850_v12 = vadd.f32 %v4847_v32, %v4845_v11  ;;  %v4915_v32 = vmul.f32 %v5981_v3, %v10452_v38 }
 0x5d6   :  { %s10420_s21 = smul.f32 0.00295858, %s6050_s4  ;;  %v4880_v57 = vsel %vm4178_vm0, %v4870_v58, 0.0  ;;  %v4927_v29 = vsel %vm4178_vm0, %v4917_v13, 0.0 }
 0x5d7   :  { %4618 = vadd.xlane.f32.xlu0 %v4617_v39  ;;  %v4868_v39 = vmul.f32 %v5979_v51, %v10452_v38  ;;  %vm4854_vm13 = vcmp.ge.f32.partialorder %v4850_v12, 0.0  ;;  %v4921_v9 = vsel %vm4178_vm0, %v4915_v32, 0.0 }
 0x5d8   :  { %s5137_s6 = smul.f32 %s10420_s21, %s10420_s21 }
 0x5d9   :  { %4364 = vadd.xlane.f32.xlu1 %v4363_v26  ;;  %v4705_v26 = vsel %vm4176_vm1, %v4701_v48, 0.0 }
 0x5db   :  { %4355 = vadd.xlane.f32.xlu0 %v4354_v63  ;;  %v4858_v63 = vmul.f32 0.01, %v4850_v12 }
 0x5dd   :  { %4662 = vadd.xlane.f32.xlu1 %v4661_v49  ;;  %v4874_v49 = vsel %vm4178_vm0, %v4868_v39, 0.0 }
 0x5df   :  { %4361 = vadd.xlane.f32.xlu0 %v4360_v52 }
 0x5e1   :  { %4668 = vadd.xlane.f32.xlu1 %v4667_v44  ;;  %v10477_v44 = vsel %vm4854_vm13, %v4850_v12, %v4858_v63  ;;  %vm5729_vm13 = vcmask 33792  }
 0x5e2   :  { %v4869_v20 = vmul.f32 %v5978_v47, %v10477_v44  ;;  %v4916_v45 = vmul.f32 %v5980_v25, %v10477_v44  ;;  %v11880_v25 = vld [vmem:[#allocation154_spill] sm:$0xff] }
 0x5e3   :  { %s6052_s20 = spop %6051  ;;  %4659 = vadd.xlane.f32.xlu0 %v4658_v53  ;;  %v4871_v53 = vsel %vm4176_vm1, %v4867_v35, 0.0 }
 0x5e4   :  { %s5136_s25 = smul.f32 0.00295858, %s6052_s20  ;;  %v4877_v8 = vsel %vm4176_vm1, %v4869_v20, 0.0 }
 0x5e5   :  { %4404 = vadd.xlane.f32.xlu1 %v4403_v24  ;;  %v5963_v24 = vld [vmem:[%s11171_s7 + $0x48] sm:$0x1f] }
 0x5e6   :  { %s5138_s28 = ssub.f32 %s5136_s25, %s5137_s6  ;;  %v4445_v50 = vmul.f32 %v5963_v24, %v10320_v17  ;;  %v5974_v17 = vld [vmem:[%s11171_s7 + $0x90] sm:$0xff] }
 0x5e7   :  { %4665 = vadd.xlane.f32.xlu0 %v4664_v14  ;;  %v4443_v14 = vmul.f32 %v5963_v24, %v10328_v15  ;;  %v4924_v15 = vsel %vm4176_vm1, %v4916_v45, 0.0  ;;  %v4748_v61 = vmul.f32 %v5974_v17, %v10363_v56  ;;  %v4750_v33 = vmul.f32 %v5974_v17, %v10375_v16  ;;  %v5985_v56 = vld [vmem:[%s11171_s7 + $0xd8] sm:$0x1f] }
 0x5e8   :  { %s5139_s15 = smax.f32 %s6201_s29, %s5138_s28  ;;  %v4455_v23 = vsel %vm4178_vm0, %v4445_v50, 0.0  ;;  %v4974_v16 = vsel %vm4178_vm0, %v4964_v54, 0.0  ;;  %v5009_v48 = vmul.f32 %v5985_v56, %v10452_v38 }
 0x5e9   :  { %s5140_s0 = sadd.f32 1e-05, %s5139_s15  ;;  %4410 = vadd.xlane.f32.xlu1 %v4409_v22  ;;  %v4449_v22 = vsel %vm4178_vm0, %v4443_v14, 0.0  ;;  %v4752_v28 = vsel %vm4176_vm1, %v4748_v61, 0.0  ;;  %v4758_v51 = vsel %vm4176_vm1, %v4750_v33, 0.0 }
 0x5ea   :  { %v5015_v39 = vsel %vm4178_vm0, %v5009_v48, 0.0  ;;  %v5991_v14 = vld [vmem:[%s11171_s7 + $0xf8] sm:$0x1f] }
 0x5eb   :  { %v5141_v40 = vstv %s5140_s0  ;;  %4401 = vadd.xlane.f32.xlu0 %v4400_v19  ;;  %v4446_v19 = vsel %vm4176_vm1, %v4442_v10, 0.0 }
 0x5ec   :  { %6083 = vrsqrt.f32 %v5141_v40  ;;  %v4751_v40 = vmul.f32 %v5975_v42, %v10359_v31  ;;  %v5982_v31 = vld [vmem:[%s11171_s7 + $0xc0] sm:$0xff] }
 0x5ed   :  { %4709 = vadd.xlane.f32.xlu1 %v4708_v62  ;;  %v4962_v62 = vmul.f32 %v5983_v60, %v10452_v38  ;;  %v4963_v5 = vmul.f32 %v5982_v31, %v10477_v44  ;;  %v5993_v60 = vld [vmem:[%s11171_s7 + $0x108] sm:$0x1f] }
 0x5ee   :  { %v4761_v34 = vsel %vm4178_vm0, %v4751_v40, 0.0 }
 0x5ef   :  { %4407 = vadd.xlane.f32.xlu0 %v4406_v46  ;;  %v4968_v11 = vsel %vm4178_vm0, %v4962_v62, 0.0  ;;  %v4961_v46 = vmul.f32 %v5982_v31, %v10465_v59  ;;  %v4971_v2 = vsel %vm4176_vm1, %v4963_v5, 0.0 }
 0x5f1   :  { %4715 = vadd.xlane.f32.xlu1 %v4714_v1  ;;  %v4965_v12 = vsel %vm4176_vm1, %v4961_v46, 0.0  ;;  %v5984_v1 = vld [vmem:[%s11171_s7 + $0xd0] sm:$0xff] }
 0x5f2   :  { %v5008_v63 = vmul.f32 %v5984_v1, %v10465_v59  ;;  %v5010_v58 = vmul.f32 %v5984_v1, %v10477_v44 }
 0x5f3   :  { %4706 = vadd.xlane.f32.xlu0 %v4705_v26  ;;  %v5011_v26 = vmul.f32 %v5985_v56, %v10461_v7  ;;  %v5987_v56 = vld [vmem:[%s11171_s7 + $0xe8] sm:$0x1f] }
 0x5f4   :  { %v5018_v3 = vsel %vm4176_vm1, %v5010_v58, 0.0 }
 0x5f5   :  { %4875 = vadd.xlane.f32.xlu1 %v4874_v49  ;;  %v5021_v47 = vsel %vm4178_vm0, %v5011_v26, 0.0  ;;  %v5012_v49 = vsel %vm4176_vm1, %v5008_v63, 0.0 }
 0x5f6   :  { %v6084_v52 = vpop.eup %6083 }
 0x5f7   :  { %6053 = vpush %v6084_v52  ;;  %4712 = vadd.xlane.f32.xlu0 %v4711_v30  ;;  %v11877_v30 = vld [vmem:[#allocation89_spill] sm:$0xff] }
 0x5f9   :  { %4881 = vadd.xlane.f32.xlu1 %v4880_v57  ;;  %v11878_v57 = vld [vmem:[#allocation86_spill] sm:$0xff] }
 0x5fb   :  { %4872 = vadd.xlane.f32.xlu0 %v4871_v53  ;;  %v11879_v53 = vld [vmem:[#allocation194_spill] sm:$0xff] }
 0x5fd   :  { %4922 = vadd.xlane.f32.xlu1 %v4921_v9 }
 0x5ff   :  { %4878 = vadd.xlane.f32.xlu0 %v4877_v8 }
 0x601   :  { %4928 = vadd.xlane.f32.xlu1 %v4927_v29 }
 0x603   :  { %4919 = vadd.xlane.f32.xlu0 %v4918_v21  ;;  %v5990_v21 = vld [vmem:[%s11171_s7 + $0xf0] sm:$0xff] }
 0x605   :  { %4450 = vadd.xlane.f32.xlu1 %v4449_v22 }
 0x607   :  { %4925 = vadd.xlane.f32.xlu0 %v4924_v15 }
 0x609   :  { %4456 = vadd.xlane.f32.xlu1 %v4455_v23 }
 0x60b   :  { %4447 = vadd.xlane.f32.xlu0 %v4446_v19 }
 0x60d   :  { %4756 = vadd.xlane.f32.xlu1 %v4755_v27 }
 0x60f   :  { %4453 = vadd.xlane.f32.xlu0 %v4452_v0  ;;  %v5992_v0 = vld [vmem:[%s11171_s7 + $0x100] sm:$0xff] }
 0x611   :  { %4762 = vadd.xlane.f32.xlu1 %v4761_v34 }
 0x613   :  { %4753 = vadd.xlane.f32.xlu0 %v4752_v28 }
 0x615   :  { %4969 = vadd.xlane.f32.xlu1 %v4968_v11 }
 0x617   :  { %4759 = vadd.xlane.f32.xlu0 %v4758_v51  ;;  %v5986_v51 = vld [vmem:[%s11171_s7 + $0xe0] sm:$0xff] }
 0x618   :  { %v5055_v5 = vmul.f32 %v5986_v51, %v10465_v59 }
 0x619   :  { %4975 = vadd.xlane.f32.xlu1 %v4974_v16 }
 0x61b   :  { %4966 = vadd.xlane.f32.xlu0 %v4965_v12  ;;  %v5056_v12 = vmul.f32 %v5987_v56, %v10452_v38  ;;  %v5057_v38 = vmul.f32 %v5986_v51, %v10477_v44 }
 0x61d   :  { %5016 = vadd.xlane.f32.xlu1 %v5015_v39  ;;  %v5062_v59 = vsel %vm4178_vm0, %v5056_v12, 0.0 }
 0x61f   :  { %4972 = vadd.xlane.f32.xlu0 %v4971_v2 }
 0x621   :  { %5022 = vadd.xlane.f32.xlu1 %v5021_v47 }
 0x623   :  { %5013 = vadd.xlane.f32.xlu0 %v5012_v49 }
 0x627   :  { %5019 = vadd.xlane.f32.xlu0 %v5018_v3  ;;  %v5058_v3 = vmul.f32 %v5987_v56, %v10461_v7  ;;  %v5994_v7 = vld [vmem:[%s11171_s7 + $0x110] sm:$0xff] }
 0x628   :  { %s6054_s27 = spop %6053  ;;  %v5998_v56 = vld [vmem:[%s11171_s7 + $0x130] sm:$0xff] }
 0x629   :  { %s5145_s11 = smul.f32 %s6054_s27, %s5988_s13 }
 0x62b   :  { %s5147_s1 = smul.f32 %s5145_s11, %s10420_s21  ;;  %v5149_v52 = vstv %s5145_s11 }
 0x62c   :  { %v5150_v35 = vmul.f32 %v5149_v52, %v11877_v30  ;;  %v5151_v32 = vmul.f32 %v5149_v52, %v11878_v57  ;;  %v5152_v20 = vmul.f32 %v5149_v52, %v11879_v53  ;;  %v5153_v9 = vmul.f32 %v5149_v52, %v11880_v25 }
 0x62d   :  { %s5148_s3 = ssub.f32 %s5989_s14, %s5147_s1  ;;  %v5059_v52 = vsel %vm4176_vm1, %v5055_v5, 0.0  ;;  %v5068_v25 = vsel %vm4178_vm0, %v5058_v3, 0.0 }
 0x62f   :  { %v5154_v13 = vstv %s5148_s3 }
 0x630   :  { %v5155_v24 = vadd.f32 %v5154_v13, %v5150_v35  ;;  %v5156_v8 = vadd.f32 %v5154_v13, %v5151_v32  ;;  %v5157_v18 = vadd.f32 %v5154_v13, %v5152_v20  ;;  %v5158_v29 = vadd.f32 %v5154_v13, %v5153_v9  ;;  %v5995_v32 = vld [vmem:[%s11171_s7 + $0x118] sm:$0x1f] }
 0x631   :  { %v5065_v9 = vsel %vm4176_vm1, %v5057_v38, 0.0 }
 0x632   :  { %v5163_v45 = vmul.f32 0.01, %v5155_v24  ;;  %v5164_v4 = vmul.f32 0.01, %v5156_v8  ;;  %v5165_v22 = vmul.f32 0.01, %v5157_v18 }
 0x633   :  { %v5166_v50 = vmul.f32 0.01, %v5158_v29  ;;  %vm5160_vm14 = vcmp.ge.f32.partialorder %v5156_v8, 0.0  ;;  %vm5159_vm15 = vcmp.ge.f32.partialorder %v5155_v24, 0.0  ;;  %vm5162_vm2 = vcmp.ge.f32.partialorder %v5158_v29, 0.0 }
 0x634   :  { %v10561_v42 = vsel %vm5160_vm14, %v5156_v8, %v5164_v4  ;;  %v10563_v15 = vsel %vm5159_vm15, %v5155_v24, %v5163_v45  ;;  %vm5161_vm3 = vcmp.ge.f32.partialorder %v5157_v18, 0.0 }
 0x635   :  { %v5175_v10 = vmul.f32 %v5991_v14, %v10561_v42  ;;  %v5174_v23 = vmul.f32 %v5990_v21, %v10563_v15  ;;  %v10567_v6 = vsel %vm5162_vm2, %v5158_v29, %v5166_v50  ;;  %v10569_v19 = vsel %vm5161_vm3, %v5157_v18, %v5165_v22 }
 0x636   :  { %v5177_v27 = vmul.f32 %v5991_v14, %v10567_v6  ;;  %v5176_v40 = vmul.f32 %v5990_v21, %v10569_v19  ;;  %v5222_v62 = vmul.f32 %v5993_v60, %v10561_v42  ;;  %v5221_v28 = vmul.f32 %v5992_v0, %v10563_v15 }
 0x637   :  { %v5181_v37 = vsel %vm4178_vm0, %v5175_v10, 0.0  ;;  %v5178_v17 = vsel %vm4176_vm1, %v5174_v23, 0.0  ;;  %v5224_v11 = vmul.f32 %v5993_v60, %v10567_v6  ;;  %v5223_v54 = vmul.f32 %v5992_v0, %v10569_v19  ;;  %v5997_v23 = vld [vmem:[%s11171_s7 + $0x128] sm:$0x1f] }
 0x638   :  { %5182 = vadd.xlane.f32.xlu1 %v5181_v37  ;;  %5179 = vadd.xlane.f32.xlu0 %v5178_v17  ;;  %v5187_v61 = vsel %vm4178_vm0, %v5177_v27, 0.0  ;;  %v5184_v34 = vsel %vm4176_vm1, %v5176_v40, 0.0  ;;  %v5228_v33 = vsel %vm4178_vm0, %v5222_v62, 0.0  ;;  %v5225_v31 = vsel %vm4176_vm1, %v5221_v28, 0.0  ;;  %v5996_v37 = vld [vmem:[%s11171_s7 + $0x120] sm:$0xff] }
 0x639   :  { %v5234_v26 = vsel %vm4178_vm0, %v5224_v11, 0.0  ;;  %v5231_v2 = vsel %vm4176_vm1, %v5223_v54, 0.0  ;;  %v5269_v8 = vmul.f32 %v5995_v32, %v10561_v42  ;;  %v5268_v18 = vmul.f32 %v5994_v7, %v10563_v15  ;;  %v5999_v54 = vld [vmem:[%s11171_s7 + $0x138] sm:$0x1f] }
 0x63a   :  { %v5271_v22 = vmul.f32 %v5995_v32, %v10567_v6  ;;  %v5270_v50 = vmul.f32 %v5994_v7, %v10569_v19  ;;  %v5316_v60 = vmul.f32 %v5997_v23, %v10561_v42  ;;  %v5315_v0 = vmul.f32 %v5996_v37, %v10563_v15 }
 0x63b   :  { %v5275_v45 = vsel %vm4178_vm0, %v5269_v8, 0.0  ;;  %v5272_v4 = vsel %vm4176_vm1, %v5268_v18, 0.0  ;;  %v5362_v12 = vmul.f32 %v5998_v56, %v10563_v15 }
 0x63c   :  { %5188 = vadd.xlane.f32.xlu1 %v5187_v61  ;;  %5185 = vadd.xlane.f32.xlu0 %v5184_v34  ;;  %v5281_v27 = vsel %vm4178_vm0, %v5271_v22, 0.0  ;;  %v5278_v40 = vsel %vm4176_vm1, %v5270_v50, 0.0  ;;  %v5322_v62 = vsel %vm4178_vm0, %v5316_v60, 0.0  ;;  %v5319_v28 = vsel %vm4176_vm1, %v5315_v0, 0.0 }
 0x640   :  { %5229 = vadd.xlane.f32.xlu1 %v5228_v33  ;;  %5226 = vadd.xlane.f32.xlu0 %v5225_v31  ;;  %v5414_v46 = vpop.xlane.xlu0 %5413  ;;  %v5318_v33 = vmul.f32 %v5997_v23, %v10567_v6  ;;  %v5317_v31 = vmul.f32 %v5996_v37, %v10569_v19 }
 0x641   :  { %v5415_v16 = vrot.slane %v5414_v46, 4 }
 0x642   :  { %v5434_v48 = vpop.xlane.xlu1 %5433 }
 0x643   :  { %v5416_v1 = vadd.f32 %v5415_v16, %v5414_v46  ;;  %v5435_v39 = vrot.slane %v5434_v48, 4  ;;  %v5328_v46 = vsel %vm4178_vm0, %v5318_v33, 0.0  ;;  %v5325_v16 = vsel %vm4176_vm1, %v5317_v31, 0.0 }
 0x644   :  { %5235 = vadd.xlane.f32.xlu1 %v5234_v26  ;;  %5232 = vadd.xlane.f32.xlu0 %v5231_v2  ;;  %v10599_v63 = vpop.xlane.xlu0 %4257  ;;  %v5366_v26 = vsel %vm4176_vm1, %v5362_v12, 0.0  ;;  %v5365_v2 = vmul.f32 %v5999_v54, %v10567_v6 }
 0x645   :  { %v5436_v47 = vadd.f32 %v5435_v39, %v5434_v48  ;;  %v5417_v49 = vrot.slane %v5416_v1, 2  ;;  %v5363_v48 = vmul.f32 %v5999_v54, %v10561_v42 }
 0x646   :  { %v10601_v58 = vpop.xlane.xlu1 %4266  ;;  %v5375_v15 = vsel %vm4178_vm0, %v5365_v2, 0.0 }
 0x647   :  { %v5418_v30 = vadd.f32 %v5417_v49, %v5416_v1  ;;  %v5437_v35 = vrot.slane %v5436_v47, 2  ;;  %v5369_v39 = vsel %vm4178_vm0, %v5363_v48, 0.0 }
 0x648   :  { %5063 = vadd.xlane.f32.xlu1 %v5062_v59  ;;  %5060 = vadd.xlane.f32.xlu0 %v5059_v52  ;;  %v10607_v57 = vpop.xlane.xlu0 %4260 }
 0x649   :  { %v5419_v53 = vrot.slane %v5418_v30, 1  ;;  %v5438_v44 = vadd.f32 %v5437_v35, %v5436_v47  ;;  %v5364_v47 = vmul.f32 %v5998_v56, %v10569_v19 }
 0x64a   :  { %v10615_v20 = vpop.xlane.xlu1 %4312 }
 0x64b   :  { %v5420_v13 = vadd.f32 %v5419_v53, %v5418_v30  ;;  %v5439_v24 = vrot.slane %v5438_v44, 1  ;;  %v5372_v3 = vsel %vm4176_vm1, %v5364_v47, 0.0 }
 0x64c   :  { %5069 = vadd.xlane.f32.xlu1 %v5068_v25  ;;  %5066 = vadd.xlane.f32.xlu0 %v5065_v9  ;;  %v10621_v29 = vpop.xlane.xlu0 %4263  ;;  %v4272_v25 = vlaneseq }
 0x64d   :  { %6055 = vpush %v5420_v13  ;;  %v5440_v14 = vadd.f32 %v5439_v24, %v5438_v44 }
 0x64e   :  { %v10623_v21 = vpop.xlane.xlu1 %4318  ;;  %v4273_v24 = vand.u32 127, %v4272_v25  ;;  %v4275_v18 = vshrl.u32 %v4272_v25, 7 }
 0x64f   :  { %6057 = vpush %v5440_v14 }
 0x650   :  { %5276 = vadd.xlane.f32.xlu1 %v5275_v45  ;;  %5273 = vadd.xlane.f32.xlu0 %v5272_v4  ;;  %v10629_v10 = vpop.xlane.xlu0 %4309  ;;  %v4278_v45 = vadd.s32 4294967288, %v4273_v24  ;;  %v10707_v22 = vsub.s32 %v4273_v24, %v4275_v18 }
 0x652   :  { %v10637_v17 = vpop.xlane.xlu1 %4568  ;;  %v10709_v23 = vsub.s32 %v4278_v45, %v4275_v18 }
 0x654   :  { %5282 = vadd.xlane.f32.xlu1 %v5281_v27  ;;  %5279 = vadd.xlane.f32.xlu0 %v5278_v40  ;;  %v10643_v61 = vpop.xlane.xlu0 %4315 }
 0x656   :  { %v10645_v34 = vpop.xlane.xlu1 %4574 }
 0x658   :  { %5323 = vadd.xlane.f32.xlu1 %v5322_v62  ;;  %5320 = vadd.xlane.f32.xlu0 %v5319_v28  ;;  %v10651_v11 = vpop.xlane.xlu0 %4565 }
 0x65a   :  { %v10659_v51 = vpop.xlane.xlu1 %4615 }
 0x65c   :  { %5329 = vadd.xlane.f32.xlu1 %v5328_v46  ;;  %5326 = vadd.xlane.f32.xlu0 %v5325_v16  ;;  %v10665_v5 = vpop.xlane.xlu0 %4571 }
 0x65e   :  { %v10667_v1 = vpop.xlane.xlu1 %4621 }
 0x660   :  { %5370 = vadd.xlane.f32.xlu1 %v5369_v39  ;;  %5367 = vadd.xlane.f32.xlu0 %v5366_v26  ;;  %v10673_v49 = vpop.xlane.xlu0 %4612 }
 0x662   :  { %v10675_v42 = vpop.xlane.xlu1 %4358 }
 0x664   :  { %5376 = vadd.xlane.f32.xlu1 %v5375_v15  ;;  %5373 = vadd.xlane.f32.xlu0 %v5372_v3  ;;  %v10679_v38 = vpop.xlane.xlu0 %4618 }
 0x666   :  { %v10681_v59 = vpop.xlane.xlu1 %4364 }
 0x668   :  { %v10683_v52 = vpop.xlane.xlu0 %4355 }
 0x66a   :  { %v10685_v6 = vpop.xlane.xlu1 %4662 }
 0x66c   :  { %v10687_v19 = vpop.xlane.xlu0 %4361 }
 0x66e   :  { %v10689_v30 = vpop.xlane.xlu1 %4668 }
 0x670   :  { %v10691_v35 = vpop.xlane.xlu0 %4659 }
 0x672   :  { %v10693_v32 = vpop.xlane.xlu1 %4404 }
 0x674   :  { %v10695_v7 = vpop.xlane.xlu0 %4665 }
 0x676   :  { %v10697_v53 = vpop.xlane.xlu1 %4410 }
 0x678   :  { %v10699_v44 = vpop.xlane.xlu0 %4401 }
 0x67a   :  { %v4710_v9 = vpop.xlane.xlu1 %4709 }
 0x67b   :  { %v4728_v40 = vrot.slane %v4710_v9, %v10709_v23 }
 0x67c   :  { %v10701_v13 = vpop.xlane.xlu0 %4407 }
 0x67e   :  { %v4716_v8 = vpop.xlane.xlu1 %4715  ;;  %s6056_s11 = spop %6055 }
 0x67f   :  { %s10703_s1 = smul.f32 0.00295858, %s6056_s11  ;;  %v4737_v60 = vrot.slane %v4716_v8, %v10709_v23 }
 0x680   :  { %s6058_s3 = spop %6057  ;;  %v4707_v14 = vpop.xlane.xlu0 %4706 }
 0x681   :  { %s5444_s30 = smul.f32 %s10703_s1, %s10703_s1  ;;  %v4724_v37 = vrot.slane %v4707_v14, %v10707_v22 }
 0x682   :  { %s5443_s10 = smul.f32 0.00295858, %s6058_s3  ;;  %v4876_v4 = vpop.xlane.xlu1 %4875 }
 0x683   :  { %v4894_v33 = vrot.slane %v4876_v4, %v10709_v23  ;;  %v4729_v54 = vsel %vm4283_vm4, %v4728_v40, %v4724_v37 }
 0x684   :  { %s5445_s21 = ssub.f32 %s5443_s10, %s5444_s30  ;;  %v4713_v50 = vpop.xlane.xlu0 %4712 }
 0x685   :  { %v4733_v27 = vrot.slane %v4713_v50, %v10707_v22 }
 0x686   :  { %s5446_s23 = smax.f32 %s6201_s29, %s5445_s21  ;;  %v4882_v0 = vpop.xlane.xlu1 %4881  ;;  %s6000_s29 = sld [smem:[#allocation10 + $0x4]] }
 0x687   :  { %s5447_s16 = sadd.f32 1e-05, %s5446_s23  ;;  %v4738_v56 = vsel %vm4283_vm4, %v4737_v60, %v4733_v27  ;;  %v4903_v12 = vrot.slane %v4882_v0, %v10709_v23 }
 0x688   :  { %v4873_v62 = vpop.xlane.xlu0 %4872  ;;  %v10721_v46 = vsel %vm4294_vm5, %v4738_v56, %v4729_v54 }
 0x689   :  { %v5448_v28 = vstv %s5447_s16  ;;  %v4890_v31 = vrot.slane %v4873_v62, %v10707_v22  ;;  %s6204_s16 = smov [#allocation13]  }
 0x68a   :  { %6085 = vrsqrt.f32 %v5448_v28  ;;  %v4923_v26 = vpop.xlane.xlu1 %4922 }
 0x68b   :  { %v4895_v16 = vsel %vm4283_vm4, %v4894_v33, %v4890_v31  ;;  %v4941_v3 = vrot.slane %v4923_v26, %v10709_v23 }
 0x68c   :  { %v4879_v48 = vpop.xlane.xlu0 %4878 }
 0x68d   :  { %v4899_v39 = vrot.slane %v4879_v48, %v10707_v22 }
 0x68e   :  { %v10735_v8 = vpop.xlane.xlu1 %4928 }
 0x68f   :  { %v4904_v2 = vsel %vm4283_vm4, %v4903_v12, %v4899_v39 }
 0x690   :  { %v4920_v47 = vpop.xlane.xlu0 %4919  ;;  %v10728_v15 = vsel %vm4294_vm5, %v4904_v2, %v4895_v16 }
 0x691   :  { %11881 = vst [vmem:[#allocation130_spill] sm:$0xff] %v10728_v15  ;;  %v4937_v25 = vrot.slane %v4920_v47, %v10707_v22 }
 0x692   :  { %v10739_v14 = vpop.xlane.xlu1 %4450 }
 0x693   :  { %v10733_v9 = vsel %vm4283_vm4, %v4941_v3, %v4937_v25 }
 0x694   :  { %v6086_v24 = vpop.eup %6085  ;;  %v10737_v18 = vpop.xlane.xlu0 %4925 }
 0x695   :  { %6059 = vpush %v6086_v24 }
 0x696   :  { %v10743_v4 = vpop.xlane.xlu1 %4456 }
 0x698   :  { %v10741_v45 = vpop.xlane.xlu0 %4447 }
 0x69a   :  { %v10747_v37 = vpop.xlane.xlu1 %4756 }
 0x69c   :  { %v10745_v50 = vpop.xlane.xlu0 %4453 }
 0x69e   :  { %v10751_v40 = vpop.xlane.xlu1 %4762 }
 0x6a0   :  { %v10749_v27 = vpop.xlane.xlu0 %4753 }
 0x6a2   :  { %v10755_v0 = vpop.xlane.xlu1 %4969 }
 0x6a3   :  { %11882 = vst [vmem:[#allocation131_spill] sm:$0xff] %v10755_v0 }
 0x6a4   :  { %v10753_v60 = vpop.xlane.xlu0 %4759 }
 0x6a6   :  { %v10759_v28 = vpop.xlane.xlu1 %4975 }
 0x6a7   :  { %11883 = vst [vmem:[#allocation153_spill] sm:$0xff] %v10759_v28 }
 0x6a8   :  { %v10757_v62 = vpop.xlane.xlu0 %4966 }
 0x6aa   :  { %v10763_v31 = vpop.xlane.xlu1 %5016 }
 0x6ab   :  { %11884 = vst [vmem:[#allocation74_spill] sm:$0xff] %v10763_v31 }
 0x6ac   :  { %v10761_v33 = vpop.xlane.xlu0 %4972 }
 0x6ae   :  { %v10772_v2 = vpop.xlane.xlu1 %5022 }
 0x6af   :  { %11886 = vst [vmem:[#allocation155_spill] sm:$0xff] %v10772_v2 }
 0x6b0   :  { %v10765_v54 = vpop.xlane.xlu0 %5013 }
 0x6b1   :  { %11885 = vst [vmem:[#allocation95_spill] sm:$0xff] %v10765_v54  ;;  %v6003_v54 = vld [vmem:[%s11171_s7 + $0x148] sm:$0x1f] }
 0x6b4   :  { %v10774_v47 = vpop.xlane.xlu0 %5019 }
 0x6b5   :  { %11887 = vst [vmem:[#allocation97_spill] sm:$0xff] %v10774_v47 }
 0x6c5   :  { %v10782_v2 = vpop.xlane.xlu1 %5182 }
 0x6c6   :  { %s6060_s26 = spop %6059  ;;  %11888 = vst [vmem:[#allocation108_spill] sm:$0xff] %v10782_v2 }
 0x6c7   :  { %s5452_s4 = smul.f32 %s6060_s26, %s6000_s29  ;;  %s5748_s29 = sshll.u32 %s6204_s16, 4  ;;  %s5749_s29 = int_to_ptr.vmem [resolvable:$true] %s5748_s29 }
 0x6c8   :  { %p6168_p3 = scmp.lt.s32.totalorder %s5749_s29, %s5749_s29 }
 0x6c9   :  { %s5454_s18 = smul.f32 %s5452_s4, %s10703_s1  ;;  %v5456_v56 = vstv %s5452_s4 }
 0x6ca   :  { %v5457_v16 = vmul.f32 %v5456_v56, %v10290_v43  ;;  %v5458_v48 = vmul.f32 %v5456_v56, %v10274_v41  ;;  %v5459_v12 = vmul.f32 %v5456_v56, %v10284_v55  ;;  %v5460_v39 = vmul.f32 %v5456_v56, %v10300_v36  ;;  %v6002_v41 = vld [vmem:[%s11171_s7 + $0x140] sm:$0xff] }
 0x6cb   :  { %s5455_s19 = ssub.f32 %s6001_s2, %s5454_s18 }
 0x6cd   :  { %v5461_v26 = vstv %s5455_s19 }
 0x6ce   :  { %v5462_v3 = vadd.f32 %v5461_v26, %v5457_v16  ;;  %v5463_v25 = vadd.f32 %v5461_v26, %v5458_v48  ;;  %v5464_v24 = vadd.f32 %v5461_v26, %v5459_v12  ;;  %v5465_v31 = vadd.f32 %v5461_v26, %v5460_v39  ;;  %v10784_v16 = vpop.xlane.xlu0 %5179 }
 0x6cf   :  { %11889 = vst [vmem:[#allocation138_spill] sm:$0xff] %v10784_v16 }
 0x6d0   :  { %v5470_v55 = vmul.f32 0.01, %v5462_v3  ;;  %v5471_v43 = vmul.f32 0.01, %v5463_v25  ;;  %v5472_v36 = vmul.f32 0.01, %v5464_v24 }
 0x6d1   :  { %v5473_v56 = vmul.f32 0.01, %v5465_v31  ;;  %vm5467_vm6 = vcmp.ge.f32.partialorder %v5463_v25, 0.0  ;;  %vm5466_vm7 = vcmp.ge.f32.partialorder %v5462_v3, 0.0  ;;  %vm5469_vm8 = vcmp.ge.f32.partialorder %v5465_v31, 0.0 }
 0x6d2   :  { %v10786_v48 = vsel %vm5467_vm6, %v5463_v25, %v5471_v43  ;;  %v10788_v12 = vsel %vm5466_vm7, %v5462_v3, %v5470_v55  ;;  %vm5468_vm9 = vcmp.ge.f32.partialorder %v5464_v24, 0.0  ;;  %v6005_v3 = vld [vmem:[%s11171_s7 + $0x158] sm:$0x1f]  ;;  %v10808_v55 = vpop.xlane.xlu0 %5185 }
 0x6d3   :  { %v5482_v39 = vmul.f32 %v6003_v54, %v10786_v48  ;;  %v5481_v26 = vmul.f32 %v6002_v41, %v10788_v12  ;;  %v10792_v0 = vsel %vm5469_vm8, %v5465_v31, %v5473_v56  ;;  %v10794_v15 = vsel %vm5468_vm9, %v5464_v24, %v5472_v36  ;;  %v6004_v31 = vld [vmem:[%s11171_s7 + $0x150] sm:$0xff]  ;;  %v10806_v24 = vpop.xlane.xlu1 %5188  ;;  %11891 = vst [vmem:[#allocation134_spill] sm:$0xff] %v10808_v55 }
 0x6d4   :  { %v5484_v2 = vmul.f32 %v6003_v54, %v10792_v0  ;;  %v5483_v25 = vmul.f32 %v6002_v41, %v10794_v15  ;;  %11890 = vst [vmem:[#allocation195_spill] sm:$0xff] %v10806_v24  ;;  %v5529_v41 = vmul.f32 %v6005_v3, %v10786_v48  ;;  %v5531_v56 = vmul.f32 %v6005_v3, %v10792_v0 }
 0x6d5   :  { %v5488_v47 = vsel %vm4178_vm0, %v5482_v39, 0.0  ;;  %v5485_v28 = vsel %vm4176_vm1, %v5481_v26, 0.0  ;;  %v5530_v39 = vmul.f32 %v6004_v31, %v10794_v15 }
 0x6d6   :  { %5489 = vadd.xlane.f32.xlu1 %v5488_v47  ;;  %5486 = vadd.xlane.f32.xlu0 %v5485_v28  ;;  %v5494_v43 = vsel %vm4178_vm0, %v5484_v2, 0.0  ;;  %v5491_v54 = vsel %vm4176_vm1, %v5483_v25, 0.0  ;;  %v5528_v28 = vmul.f32 %v6004_v31, %v10788_v12  ;;  %v5535_v47 = vsel %vm4178_vm0, %v5529_v41, 0.0  ;;  %v10820_v16 = vpop.xlane.xlu0 %5226  ;;  %v6007_v2 = vld [vmem:[%s11171_s7 + $0x168] sm:$0x1f]  ;;  %v6006_v25 = vld [vmem:[%s11171_s7 + $0x160] sm:$0xff] }
 0x6d7   :  { %v10818_v26 = vpop.xlane.xlu1 %5229  ;;  %11892 = vst [vmem:[#allocation156_spill] sm:$0xff] %v10820_v16  ;;  %v5538_v3 = vsel %vm4176_vm1, %v5530_v39, 0.0  ;;  %v5576_v31 = vmul.f32 %v6007_v2, %v10786_v48  ;;  %v5578_v55 = vmul.f32 %v6007_v2, %v10792_v0  ;;  %v6009_v39 = vld [vmem:[%s11171_s7 + $0x178] sm:$0x1f] }
 0x6d8   :  { %v5532_v36 = vsel %vm4176_vm1, %v5528_v28, 0.0  ;;  %v5625_v16 = vmul.f32 %v6009_v39, %v10792_v0 }
 0x6da   :  { %5495 = vadd.xlane.f32.xlu1 %v5494_v43  ;;  %5492 = vadd.xlane.f32.xlu0 %v5491_v54  ;;  %v5541_v43 = vsel %vm4178_vm0, %v5531_v56, 0.0  ;;  %v5575_v54 = vmul.f32 %v6006_v25, %v10788_v12  ;;  %v10834_v28 = vpop.xlane.xlu0 %5232  ;;  %v5577_v56 = vmul.f32 %v6006_v25, %v10794_v15 }
 0x6db   :  { %v10832_v41 = vpop.xlane.xlu1 %5235 }
 0x6de   :  { %5536 = vadd.xlane.f32.xlu1 %v5535_v47  ;;  %5533 = vadd.xlane.f32.xlu0 %v5532_v36  ;;  %v5582_v47 = vsel %vm4178_vm0, %v5576_v31, 0.0  ;;  %v5579_v36 = vsel %vm4176_vm1, %v5575_v54, 0.0  ;;  %v5585_v31 = vsel %vm4176_vm1, %v5577_v56, 0.0  ;;  %v5623_v54 = vmul.f32 %v6009_v39, %v10786_v48  ;;  %v10852_v25 = vpop.xlane.xlu0 %5060  ;;  %v6011_v56 = vld [vmem:[%s11171_s7 + $0x188] sm:$0x1f] }
 0x6df   :  { %v10850_v24 = vpop.xlane.xlu1 %5063  ;;  %11894 = vst [vmem:[#allocation174_spill] sm:$0xff] %v10852_v25  ;;  %v6010_v25 = vld [vmem:[%s11171_s7 + $0x180] sm:$0xff] }
 0x6e0   :  { %11893 = vst [vmem:[#allocation157_spill] sm:$0xff] %v10850_v24  ;;  %v4288_v24 = vrot.slane %v10621_v29, %v10707_v22  ;;  %v5672_v29 = vmul.f32 %v6011_v56, %v10792_v0  ;;  %v4592_v0 = vrot.slane %v10665_v5, %v10707_v22 }
 0x6e2   :  { %5542 = vadd.xlane.f32.xlu1 %v5541_v43  ;;  %5539 = vadd.xlane.f32.xlu0 %v5538_v3  ;;  %v6008_v43 = vld [vmem:[%s11171_s7 + $0x170] sm:$0xff]  ;;  %v5588_v3 = vsel %vm4178_vm0, %v5578_v55, 0.0  ;;  %v5682_v5 = vsel %vm4178_vm0, %v5672_v29, 0.0  ;;  %v4681_v29 = vrot.slane %v10685_v6, %v10709_v23 }
 0x6e3   :  { %v5622_v2 = vmul.f32 %v6008_v43, %v10788_v12  ;;  %v5624_v55 = vmul.f32 %v6008_v43, %v10794_v15  ;;  %v5670_v43 = vmul.f32 %v6011_v56, %v10786_v48  ;;  %v4331_v48 = vrot.slane %v10615_v20, %v10709_v23 }
 0x6e4   :  { %v4596_v20 = vrot.slane %v10645_v34, %v10709_v23  ;;  %v4634_v34 = vrot.slane %v10659_v51, %v10709_v23  ;;  %v4630_v56 = vrot.slane %v10673_v49, %v10707_v22  ;;  %v4382_v51 = vrot.slane %v10687_v19, %v10707_v22 }
 0x6e5   :  { %v5632_v39 = vsel %vm4176_vm1, %v5624_v55, 0.0  ;;  %v4282_v55 = vrot.slane %v10607_v57, %v10709_v23  ;;  %v4587_v57 = vrot.slane %v10637_v17, %v10709_v23  ;;  %v4373_v19 = vrot.slane %v10683_v52, %v10707_v22 }
 0x6e6   :  { %5583 = vadd.xlane.f32.xlu1 %v5582_v47  ;;  %5580 = vadd.xlane.f32.xlu0 %v5579_v36  ;;  %v5629_v47 = vsel %vm4178_vm0, %v5623_v54, 0.0  ;;  %v5626_v36 = vsel %vm4176_vm1, %v5622_v2, 0.0  ;;  %v5635_v54 = vsel %vm4178_vm0, %v5625_v16, 0.0  ;;  %v5669_v2 = vmul.f32 %v6010_v25, %v10788_v12 }
 0x6e7   :  { %v4336_v16 = vrot.slane %v10643_v61, %v10707_v22  ;;  %v4340_v12 = vrot.slane %v10623_v21, %v10709_v23  ;;  %v5671_v61 = vmul.f32 %v6010_v25, %v10794_v15  ;;  %v4583_v21 = vrot.slane %v10651_v11, %v10707_v22 }
 0x6e8   :  { %v4639_v15 = vrot.slane %v10679_v38, %v10707_v22  ;;  %v4643_v11 = vrot.slane %v10667_v1, %v10709_v23  ;;  %v4635_v52 = vsel %vm4283_vm4, %v4634_v34, %v4630_v56  ;;  %v4950_v34 = vrot.slane %v10735_v8, %v10709_v23 }
 0x6e9   :  { %v4341_v25 = vsel %vm4283_vm4, %v4340_v12, %v4336_v16  ;;  %v5679_v38 = vsel %vm4176_vm1, %v5671_v61, 0.0  ;;  %v4428_v12 = vrot.slane %v10701_v13, %v10707_v22  ;;  %v4423_v61 = vrot.slane %v10693_v32, %v10709_v23 }
 0x6ea   :  { %5589 = vadd.xlane.f32.xlu1 %v5588_v3  ;;  %5586 = vadd.xlane.f32.xlu0 %v5585_v31  ;;  %v10864_v3 = vpop.xlane.xlu1 %5069  ;;  %v10866_v31 = vpop.xlane.xlu0 %5066  ;;  %v4644_v16 = vsel %vm4283_vm4, %v4643_v11, %v4639_v15  ;;  %v4780_v8 = vrot.slane %v10753_v60, %v10707_v22 }
 0x6ee   :  { %5630 = vadd.xlane.f32.xlu1 %v5629_v47  ;;  %5627 = vadd.xlane.f32.xlu0 %v5626_v36  ;;  %v4277_v47 = vrot.slane %v10599_v63, %v10707_v22  ;;  %v4292_v36 = vrot.slane %v10601_v58, %v10709_v23  ;;  %v4327_v63 = vrot.slane %v10629_v10, %v10707_v22  ;;  %v5676_v58 = vsel %vm4178_vm0, %v5670_v43, 0.0  ;;  %v10900_v10 = vpop.xlane.xlu0 %5273 }
 0x6ef   :  { %v4377_v43 = vrot.slane %v10675_v42, %v10709_v23  ;;  %v4386_v42 = vrot.slane %v10681_v59, %v10709_v23  ;;  %vm5713_vm0 = vcmask 7168  }
 0x6f0   :  { %v4293_v17 = vsel %vm4283_vm4, %v4292_v36, %v4288_v24  ;;  %v4284_v24 = vsel %vm4283_vm4, %v4282_v55, %v4277_v47  ;;  %v4686_v36 = vrot.slane %v10695_v7, %v10707_v22  ;;  %v4597_v47 = vsel %vm4283_vm4, %v4596_v20, %v4592_v0 }
 0x6f1   :  { %v4295_v1 = vsel %vm4294_vm5, %v4293_v17, %v4284_v24  ;;  %v4690_v55 = vrot.slane %v10689_v30, %v10709_v23  ;;  %v4387_v13 = vsel %vm4283_vm4, %v4386_v42, %v4382_v51  ;;  %v4946_v0 = vrot.slane %v10737_v18, %v10707_v22 }
 0x6f2   :  { %5636 = vadd.xlane.f32.xlu1 %v5635_v54  ;;  %5633 = vadd.xlane.f32.xlu0 %v5632_v39  ;;  %v5673_v54 = vsel %vm4176_vm1, %v5669_v2, 0.0  ;;  %v10898_v39 = vpop.xlane.xlu1 %5276  ;;  %v4332_v2 = vsel %vm4283_vm4, %v4331_v48, %v4327_v63  ;;  %v4677_v48 = vrot.slane %v10691_v35, %v10707_v22  ;;  %v10940_v63 = vpop.xlane.xlu0 %5279  ;;  %v4298_v7 = vsel %vm4297_vm10, %v4295_v1, 0.0 }
 0x6f3   :  { %v4342_v49 = vsel %vm4294_vm5, %v4341_v25, %v4332_v2  ;;  %v4645_v35 = vsel %vm4294_vm5, %v4644_v16, %v4635_v52  ;;  %v4691_v20 = vsel %vm4283_vm4, %v4690_v55, %v4686_v36  ;;  %v4378_v15 = vsel %vm4283_vm4, %v4377_v43, %v4373_v19  ;;  %v11896_v55 = vld [vmem:[#allocation97_spill] sm:$0xff] }
 0x6f4   :  { %v4647_v6 = vsel %vm4297_vm10, %v4645_v35, 0.0  ;;  %v4388_v25 = vsel %vm4294_vm5, %v4387_v13, %v4378_v15  ;;  %v4682_v32 = vsel %vm4283_vm4, %v4681_v29, %v4677_v48  ;;  %v4478_v51 = vrot.slane %v10743_v4, %v10709_v23  ;;  %v11900_v35 = vld [vmem:[#allocation155_spill] sm:$0xff] }
 0x6f5   :  { %v4390_v56 = vsel %vm4297_vm10, %v4388_v25, 0.0  ;;  %v4465_v1 = vrot.slane %v10741_v45, %v10707_v22  ;;  %v4469_v42 = vrot.slane %v10739_v14, %v10709_v23  ;;  %v4993_v4 = vrot.slane %v10761_v33, %v10707_v22  ;;  %v11895_v33 = vld [vmem:[#allocation153_spill] sm:$0xff] }
 0x6f6   :  { %5677 = vadd.xlane.f32.xlu1 %v5676_v58  ;;  %5674 = vadd.xlane.f32.xlu0 %v5673_v54  ;;  %v10938_v59 = vpop.xlane.xlu1 %5282  ;;  %v4344_v58 = vsel %vm4297_vm10, %v4342_v49, 0.0  ;;  %v4588_v54 = vsel %vm4283_vm4, %v4587_v57, %v4583_v21  ;;  %v4432_v57 = vrot.slane %v10697_v53, %v10709_v23  ;;  %v4419_v21 = vrot.slane %v10699_v44, %v10707_v22  ;;  %v10969_v11 = vpop.xlane.xlu0 %5320 }
 0x6f7   :  { %v4598_v30 = vsel %vm4294_vm5, %v4597_v47, %v4588_v54  ;;  %v4692_v44 = vsel %vm4294_vm5, %v4691_v20, %v4682_v32  ;;  %v4784_v49 = vrot.slane %v10751_v40, %v10709_v23  ;;  %v4741_v40 = vsel %vm4297_vm10, %v10721_v46, 0.0 }
 0x6f8   :  { %v4600_v17 = vsel %vm4297_vm10, %v4598_v30, 0.0  ;;  %v4433_v18 = vsel %vm4283_vm4, %v4432_v57, %v4428_v12  ;;  %v4424_v43 = vsel %vm4283_vm4, %v4423_v61, %v4419_v21  ;;  %v4694_v24 = vsel %vm4297_vm10, %v4692_v44, 0.0  ;;  %v11897_v12 = vld [vmem:[#allocation130_spill] sm:$0xff] }
 0x6f9   :  { %v4434_v2 = vsel %vm4294_vm5, %v4433_v18, %v4424_v43  ;;  %v4785_v16 = vsel %vm4283_vm4, %v4784_v49, %v4780_v8  ;;  %v4997_v19 = vrot.slane %v11895_v33, %v10709_v23  ;;  %v5040_v48 = vrot.slane %v11896_v55, %v10707_v22  ;;  %v11901_v57 = vld [vmem:[#allocation74_spill] sm:$0xff]  ;;  %v11902_v43 = vld [vmem:[#allocation156_spill] sm:$0xff] }
 0x6fa   :  { %5683 = vadd.xlane.f32.xlu1 %v5682_v5  ;;  %5680 = vadd.xlane.f32.xlu0 %v5679_v38  ;;  %v10967_v53 = vpop.xlane.xlu1 %5323  ;;  %v4951_v5 = vsel %vm4283_vm4, %v4950_v34, %v4946_v0  ;;  %v4474_v38 = vrot.slane %v10745_v50, %v10707_v22  ;;  %v4771_v50 = vrot.slane %v10749_v27, %v10707_v22  ;;  %v10998_v47 = vpop.xlane.xlu0 %5326  ;;  %v4436_v45 = vsel %vm4297_vm10, %v4434_v2, 0.0  ;;  %v11904_v8 = vld [vmem:[#allocation174_spill] sm:$0xff]  ;;  %v11905_v2 = vld [vmem:[#allocation195_spill] sm:$0xff] }
 0x6fb   :  { %v4952_v60 = vsel %vm4294_vm5, %v4951_v5, %v10733_v9  ;;  %v4775_v27 = vrot.slane %v10747_v37, %v10709_v23  ;;  %v4984_v9 = vrot.slane %v10757_v62, %v10707_v22  ;;  %v4907_v46 = vsel %vm4297_vm10, %v11897_v12, 0.0  ;;  %v11903_v5 = vld [vmem:[#allocation157_spill] sm:$0xff] }
 0x6fc   :  { %v4479_v14 = vsel %vm4283_vm4, %v4478_v51, %v4474_v38  ;;  %v4954_v37 = vsel %vm4297_vm10, %v4952_v60, 0.0  ;;  %v4470_v52 = vsel %vm4283_vm4, %v4469_v42, %v4465_v1  ;;  %v5044_v13 = vrot.slane %v11900_v35, %v10709_v23  ;;  %v11906_v1 = vld [vmem:[#allocation134_spill] sm:$0xff] }
 0x6fd   :  { %v4776_v30 = vsel %vm4283_vm4, %v4775_v27, %v4771_v50  ;;  %v4480_v29 = vsel %vm4294_vm5, %v4479_v14, %v4470_v52  ;;  %v4998_v20 = vsel %vm4283_vm4, %v4997_v19, %v4993_v4  ;;  %v5035_v21 = vrot.slane %v11901_v57, %v10709_v23  ;;  %v11908_v27 = vld [vmem:[#allocation138_spill] sm:$0xff] }
 0x6fe   :  { %4299 = vadd.xlane.f32.xlu0 %v4298_v7  ;;  %4345 = vadd.xlane.f32.xlu1 %v4344_v58  ;;  %v10996_v36 = vpop.xlane.xlu1 %5329  ;;  %v11898_v7 = vld [vmem:[#allocation131_spill] sm:$0xff]  ;;  %v4786_v61 = vsel %vm4294_vm5, %v4785_v16, %v4776_v30  ;;  %v5257_v0 = vrot.slane %v10832_v41, %v10709_v23  ;;  %v5253_v15 = vrot.slane %v10834_v28, %v10707_v22  ;;  %v5368_v34 = vpop.xlane.xlu0 %5367  ;;  %v4482_v18 = vsel %vm4297_vm10, %v4480_v29, 0.0 }
 0x6ff   :  { %v4988_v62 = vrot.slane %v11898_v7, %v10709_v23  ;;  %v11899_v58 = vld [vmem:[#allocation95_spill] sm:$0xff]  ;;  %v5087_v25 = vrot.slane %v10866_v31, %v10707_v22  ;;  %v5045_v44 = vsel %vm4283_vm4, %v5044_v13, %v5040_v48  ;;  %v4788_v41 = vsel %vm4297_vm10, %v4786_v61, 0.0 }
 0x700   :  { %v5031_v54 = vrot.slane %v11899_v58, %v10707_v22  ;;  %v5244_v31 = vrot.slane %v11902_v43, %v10707_v22  ;;  %v5082_v38 = vrot.slane %v11903_v5, %v10709_v23  ;;  %v5210_v51 = vrot.slane %v11905_v2, %v10709_v23 }
 0x701   :  { %v5206_v49 = vrot.slane %v11906_v1, %v10707_v22  ;;  %v5258_v60 = vsel %vm4283_vm4, %v5257_v0, %v5253_v15  ;;  %v5300_v42 = vrot.slane %v10940_v63, %v10707_v22  ;;  %v5295_v14 = vrot.slane %v10898_v39, %v10709_v23 }
 0x702   :  { %4601 = vadd.xlane.f32.xlu0 %v4600_v17  ;;  %4648 = vadd.xlane.f32.xlu1 %v4647_v6  ;;  %v4989_v17 = vsel %vm4283_vm4, %v4988_v62, %v4984_v9  ;;  %v5091_v6 = vrot.slane %v10864_v3, %v10709_v23  ;;  %v5371_v32 = vpop.xlane.xlu1 %5370  ;;  %v5248_v3 = vrot.slane %v10818_v26, %v10709_v23  ;;  %v5374_v33 = vpop.xlane.xlu0 %5373  ;;  %vm5715_vm1 = vcmask 15360  }
 0x703   :  { %v4999_v28 = vsel %vm4294_vm5, %v4998_v20, %v4989_v17  ;;  %v5304_v26 = vrot.slane %v10938_v59, %v10709_v23  ;;  %v5197_v9 = vrot.slane %v11908_v27, %v10707_v22  ;;  %v5291_v16 = vrot.slane %v10900_v10, %v10707_v22 }
 0x704   :  { %v5092_v4 = vsel %vm4283_vm4, %v5091_v6, %v5087_v25  ;;  %v5249_v63 = vsel %vm4283_vm4, %v5248_v3, %v5244_v31  ;;  %v5001_v55 = vsel %vm4297_vm10, %v4999_v28, 0.0  ;;  %v5211_v39 = vsel %vm4283_vm4, %v5210_v51, %v5206_v49 }
 0x705   :  { %v5259_v12 = vsel %vm4294_vm5, %v5258_v60, %v5249_v63  ;;  %v5305_v10 = vsel %vm4283_vm4, %v5304_v26, %v5300_v42  ;;  %v5347_v7 = vrot.slane %v10998_v47, %v10707_v22  ;;  %v5394_v58 = vrot.slane %v5374_v33, %v10707_v22 }
 0x706   :  { %4391 = vadd.xlane.f32.xlu0 %v4390_v56  ;;  %4695 = vadd.xlane.f32.xlu1 %v4694_v24  ;;  %v5036_v56 = vsel %vm4283_vm4, %v5035_v21, %v5031_v54  ;;  %v5078_v24 = vrot.slane %v11904_v8, %v10707_v22  ;;  %v5377_v59 = vpop.xlane.xlu1 %5376  ;;  %v5261_v54 = vsel %vm4297_vm10, %v5259_v12, 0.0  ;;  %v5296_v35 = vsel %vm4283_vm4, %v5295_v14, %v5291_v16 }
 0x707   :  { %v5046_v50 = vsel %vm4294_vm5, %v5045_v44, %v5036_v56  ;;  %v5398_v62 = vrot.slane %v5377_v59, %v10709_v23  ;;  %v5342_v13 = vrot.slane %v10967_v53, %v10709_v23  ;;  %v5389_v47 = vrot.slane %v5371_v32, %v10709_v23 }
 0x708   :  { %v5083_v19 = vsel %vm4283_vm4, %v5082_v38, %v5078_v24  ;;  %v5048_v48 = vsel %vm4297_vm10, %v5046_v50, 0.0  ;;  %v5385_v29 = vrot.slane %v5368_v34, %v10707_v22  ;;  %v5306_v20 = vsel %vm4294_vm5, %v5305_v10, %v5296_v35 }
 0x709   :  { %v5399_v21 = vsel %vm4283_vm4, %v5398_v62, %v5394_v58  ;;  %v5308_v53 = vsel %vm4297_vm10, %v5306_v20, 0.0 }
 0x70a   :  { %4437 = vadd.xlane.f32.xlu0 %v4436_v45  ;;  %4742 = vadd.xlane.f32.xlu1 %v4741_v40  ;;  %v11907_v45 = vld [vmem:[#allocation108_spill] sm:$0xff]  ;;  %v5390_v15 = vsel %vm4283_vm4, %v5389_v47, %v5385_v29 }
 0x70b   :  { %v5201_v40 = vrot.slane %v11907_v45, %v10709_v23  ;;  %v5400_v6 = vsel %vm4294_vm5, %v5399_v21, %v5390_v15 }
 0x70c   :  { %v5402_v32 = vsel %vm4297_vm10, %v5400_v6, 0.0 }
 0x70d   :  { %v5202_v30 = vsel %vm4283_vm4, %v5201_v40, %v5197_v9 }
 0x70e   :  { %4908 = vadd.xlane.f32.xlu0 %v4907_v46  ;;  %4955 = vadd.xlane.f32.xlu1 %v4954_v37  ;;  %v5093_v46 = vsel %vm4294_vm5, %v5092_v4, %v5083_v19  ;;  %v5351_v37 = vrot.slane %v10996_v36, %v10709_v23  ;;  %v5338_v36 = vrot.slane %v10969_v11, %v10707_v22 }
 0x70f   :  { %v5095_v52 = vsel %vm4297_vm10, %v5093_v46, 0.0  ;;  %v5212_v61 = vsel %vm4294_vm5, %v5211_v39, %v5202_v30 }
 0x710   :  { %v5352_v57 = vsel %vm4283_vm4, %v5351_v37, %v5347_v7  ;;  %v5214_v0 = vsel %vm4297_vm10, %v5212_v61, 0.0  ;;  %v5343_v11 = vsel %vm4283_vm4, %v5342_v13, %v5338_v36 }
 0x711   :  { %v5353_v17 = vsel %vm4294_vm5, %v5352_v57, %v5343_v11 }
 0x712   :  { %4483 = vadd.xlane.f32.xlu0 %v4482_v18  ;;  %4789 = vadd.xlane.f32.xlu1 %v4788_v41  ;;  %v5355_v25 = vsel %vm4297_vm10, %v5353_v17, 0.0 }
 0x716   :  { %5002 = vadd.xlane.f32.xlu0 %v5001_v55  ;;  %5049 = vadd.xlane.f32.xlu1 %v5048_v48 }
 0x71a   :  { %5262 = vadd.xlane.f32.xlu1 %v5261_v54  ;;  %5096 = vadd.xlane.f32.xlu0 %v5095_v52 }
 0x71e   :  { %5215 = vadd.xlane.f32.xlu0 %v5214_v0  ;;  %5309 = vadd.xlane.f32.xlu1 %v5308_v53 }
 0x722   :  { %5356 = vadd.xlane.f32.xlu0 %v5355_v25  ;;  %5403 = vadd.xlane.f32.xlu1 %v5402_v32 }
 0x763   :  { %v5490_v34 = vpop.xlane.xlu1 %5489  ;;  %v5487_v44 = vpop.xlane.xlu0 %5486 }
 0x764   :  { %v5508_v18 = vrot.slane %v5490_v34, %v10709_v23  ;;  %v5504_v41 = vrot.slane %v5487_v44, %v10707_v22 }
 0x766   :  { %v5509_v31 = vsel %vm4283_vm4, %v5508_v18, %v5504_v41 }
 0x767   :  { %v5496_v28 = vpop.xlane.xlu1 %5495  ;;  %v5493_v56 = vpop.xlane.xlu0 %5492 }
 0x768   :  { %v5517_v3 = vrot.slane %v5496_v28, %v10709_v23  ;;  %v5513_v43 = vrot.slane %v5493_v56, %v10707_v22 }
 0x76a   :  { %v5518_v5 = vsel %vm4283_vm4, %v5517_v3, %v5513_v43 }
 0x76b   :  { %v5537_v38 = vpop.xlane.xlu1 %5536  ;;  %v5534_v8 = vpop.xlane.xlu0 %5533  ;;  %v5519_v24 = vsel %vm4294_vm5, %v5518_v5, %v5509_v31 }
 0x76c   :  { %v5521_v2 = vsel %vm4297_vm10, %v5519_v24, 0.0  ;;  %v5555_v51 = vrot.slane %v5537_v38, %v10709_v23  ;;  %v5551_v1 = vrot.slane %v5534_v8, %v10707_v22 }
 0x76d   :  { %5522 = vadd.xlane.f32.xlu1 %v5521_v2 }
 0x76e   :  { %v5556_v42 = vsel %vm4283_vm4, %v5555_v51, %v5551_v1 }
 0x76f   :  { %v5543_v49 = vpop.xlane.xlu1 %5542  ;;  %v5540_v50 = vpop.xlane.xlu0 %5539 }
 0x770   :  { %v5564_v60 = vrot.slane %v5543_v49, %v10709_v23  ;;  %v5560_v26 = vrot.slane %v5540_v50, %v10707_v22 }
 0x772   :  { %v5565_v4 = vsel %vm4283_vm4, %v5564_v60, %v5560_v26 }
 0x773   :  { %v5584_v45 = vpop.xlane.xlu1 %5583  ;;  %v5581_v40 = vpop.xlane.xlu0 %5580  ;;  %v5566_v27 = vsel %vm4294_vm5, %v5565_v4, %v5556_v42 }
 0x774   :  { %v5568_v9 = vsel %vm4297_vm10, %v5566_v27, 0.0  ;;  %v5602_v14 = vrot.slane %v5584_v45, %v10709_v23  ;;  %v5598_v16 = vrot.slane %v5581_v40, %v10707_v22 }
 0x775   :  { %5569 = vadd.xlane.f32.xlu0 %v5568_v9 }
 0x776   :  { %v5603_v55 = vsel %vm4283_vm4, %v5602_v14, %v5598_v16 }
 0x777   :  { %v5590_v59 = vpop.xlane.xlu1 %5589  ;;  %v5587_v33 = vpop.xlane.xlu0 %5586 }
 0x778   :  { %v5611_v63 = vrot.slane %v5590_v59, %v10709_v23  ;;  %v5607_v19 = vrot.slane %v5587_v33, %v10707_v22 }
 0x77a   :  { %v5612_v48 = vsel %vm4283_vm4, %v5611_v63, %v5607_v19 }
 0x77b   :  { %v5631_v12 = vpop.xlane.xlu1 %5630  ;;  %v5628_v46 = vpop.xlane.xlu0 %5627  ;;  %v5613_v39 = vsel %vm4294_vm5, %v5612_v48, %v5603_v55 }
 0x77c   :  { %v5615_v10 = vsel %vm4297_vm10, %v5613_v39, 0.0  ;;  %v5649_v37 = vrot.slane %v5631_v12, %v10709_v23  ;;  %v5645_v7 = vrot.slane %v5628_v46, %v10707_v22 }
 0x77d   :  { %5616 = vadd.xlane.f32.xlu0 %v5615_v10 }
 0x77e   :  { %v5650_v30 = vsel %vm4283_vm4, %v5649_v37, %v5645_v7 }
 0x77f   :  { %v5637_v62 = vpop.xlane.xlu1 %5636  ;;  %v5634_v58 = vpop.xlane.xlu0 %5633 }
 0x780   :  { %v5658_v54 = vrot.slane %v5637_v62, %v10709_v23  ;;  %v5654_v52 = vrot.slane %v5634_v58, %v10707_v22 }
 0x782   :  { %v5659_v35 = vsel %vm4283_vm4, %v5658_v54, %v5654_v52  ;;  %v6012_v52 = vld [vmem:[%s11172_s8] ss:$0 sm:$0xff]  ;;  %s6163_s8 = scalar_lea.vmem %s5749_s29, 32 }
 0x783   :  { %v5678_v13 = vpop.xlane.xlu1 %5677  ;;  %v5675_v36 = vpop.xlane.xlu0 %5674  ;;  %v5660_v47 = vsel %vm4294_vm5, %v5659_v35, %v5650_v30  ;;  %p6164_p2 = scmp.ne.s32.totalorder %s5749_s29, %s6163_s8  ;;  %p6169_p4 = scmp.lt.s32.totalorder %s6163_s8, %s6163_s8 }
 0x784   :  { %v5662_v29 = vsel %vm4297_vm10, %v5660_v47, 0.0  ;;  %v5696_v61 = vrot.slane %v5678_v13, %v10709_v23  ;;  %v5692_v20 = vrot.slane %v5675_v36, %v10707_v22 }
 0x785   :  { %5663 = vadd.xlane.f32.xlu1 %v5662_v29  ;;  %p6170_p5 = por %p6169_p4, %p6168_p3 }
 0x786   :  { %v5697_v11 = vsel %vm4283_vm4, %v5696_v61, %v5692_v20 }
 0x787   :  { %v5684_v57 = vpop.xlane.xlu1 %5683  ;;  %v5681_v21 = vpop.xlane.xlu0 %5680  ;;  %p6171_p6 = pnand %p6170_p5, %p6164_p2 }
 0x788   :  { %v5705_v0 = vrot.slane %v5684_v57, %v10709_v23  ;;  %v5701_v53 = vrot.slane %v5681_v21, %v10707_v22 }
 0x78a   :  { %v5706_v15 = vsel %vm4283_vm4, %v5705_v0, %v5701_v53 }
 0x78b   :  { %v5707_v17 = vsel %vm4294_vm5, %v5706_v15, %v5697_v11  ;;  %v4300_v25 = vpop.xlane.xlu0 %4299  ;;  %v4346_v32 = vpop.xlane.xlu1 %4345 }
 0x78c   :  { %v5709_v6 = vsel %vm4297_vm10, %v5707_v17, 0.0 }
 0x78d   :  { %5710 = vadd.xlane.f32.xlu0 %v5709_v6 }
 0x78f   :  { %v4602_v34 = vpop.xlane.xlu0 %4601  ;;  %v4649_v44 = vpop.xlane.xlu1 %4648 }
 0x790   :  { %v4650_v49 = vadd.f32 %v4649_v44, %v4346_v32  ;;  %v4603_v42 = vadd.f32 %v4602_v34, %v4300_v25 }
 0x793   :  { %v4392_v18 = vpop.xlane.xlu0 %4391  ;;  %v4696_v41 = vpop.xlane.xlu1 %4695 }
 0x794   :  { %v4697_v60 = vadd.f32 %v4696_v41, %v4392_v18 }
 0x797   :  { %v4438_v28 = vpop.xlane.xlu0 %4437  ;;  %v4743_v56 = vpop.xlane.xlu1 %4742 }
 0x798   :  { %v4744_v4 = vadd.f32 %v4743_v56, %v4438_v28 }
 0x79b   :  { %v4909_v23 = vpop.xlane.xlu0 %4908  ;;  %v4956_v3 = vpop.xlane.xlu1 %4955 }
 0x79c   :  { %v4957_v45 = vadd.f32 %v4956_v3, %v4650_v49  ;;  %v4910_v27 = vadd.f32 %v4909_v23, %v4603_v42 }
 0x79f   :  { %v4484_v22 = vpop.xlane.xlu0 %4483  ;;  %v4790_v43 = vpop.xlane.xlu1 %4789 }
 0x7a0   :  { %v4791_v59 = vadd.f32 %v4790_v43, %v4484_v22 }
 0x7a3   :  { %v5003_v31 = vpop.xlane.xlu0 %5002  ;;  %v5050_v5 = vpop.xlane.xlu1 %5049 }
 0x7a4   :  { %v5004_v40 = vadd.f32 %v5003_v31, %v4697_v60  ;;  %v5051_v9 = vadd.f32 %v5050_v5, %v4744_v4 }
 0x7a7   :  { %v5097_v38 = vpop.xlane.xlu0 %5096  ;;  %v5263_v8 = vpop.xlane.xlu1 %5262 }
 0x7a8   :  { %v5264_v14 = vadd.f32 %v5263_v8, %v4957_v45  ;;  %v5098_v12 = vadd.f32 %v5097_v38, %v4791_v59 }
 0x7ab   :  { %v5216_v24 = vpop.xlane.xlu0 %5215  ;;  %v5310_v2 = vpop.xlane.xlu1 %5309 }
 0x7ac   :  { %v5311_v33 = vadd.f32 %v5310_v2, %v5004_v40  ;;  %v5217_v19 = vadd.f32 %v5216_v24, %v4910_v27 }
 0x7af   :  { %v5357_v51 = vpop.xlane.xlu0 %5356  ;;  %v5404_v1 = vpop.xlane.xlu1 %5403 }
 0x7b0   :  { %v5358_v55 = vadd.f32 %v5357_v51, %v5051_v9  ;;  %v5405_v37 = vadd.f32 %v5404_v1, %v5098_v12 }
 0x7fa   :  { %v5523_v26 = vpop.xlane.xlu1 %5522 }
 0x7fb   :  { %v5524_v39 = vadd.f32 %v5523_v26, %v5217_v19 }
 0x802   :  { %v5570_v50 = vpop.xlane.xlu0 %5569 }
 0x803   :  { %v5571_v48 = vadd.f32 %v5570_v50, %v5264_v14 }
 0x805   :  { %v5714_v7 = vsel %vm5713_vm0, %v5524_v39, %v5571_v48 }
 0x80a   :  { %v5617_v16 = vpop.xlane.xlu0 %5616 }
 0x80b   :  { %v5618_v46 = vadd.f32 %v5617_v16, %v5311_v33 }
 0x80d   :  { %v5716_v58 = vsel %vm5715_vm1, %v5714_v7, %v5618_v46 }
 0x812   :  { %v5664_v63 = vpop.xlane.xlu1 %5663 }
 0x813   :  { %v5665_v10 = vadd.f32 %v5664_v63, %v5358_v55 }
 0x815   :  { %v5718_v30 = vsel %vm5717_vm11, %v5716_v58, %v5665_v10 }
 0x81a   :  { %v5711_v62 = vpop.xlane.xlu0 %5710 }
 0x81b   :  { %v5712_v54 = vadd.f32 %v5711_v62, %v5405_v37 }
 0x81d   :  { %v5720_v35 = vsel %vm5719_vm12, %v5718_v30, %v5712_v54 }
 0x81e   :  { %v5728_v13 = vadd.f32 %v6012_v52, %v5720_v35 }
 0x820   :  { %v5730_v36 = vsel %vm5729_vm13, %v5728_v13, -inf }
 0x821   :  { %5731 = vmax.xlane.f32.xlu1 %v5730_v36 }
 0x8ae   :  { %v5732_v47 = vpop.xlane.xlu1 %5731 }
 0x8af   :  { %v5733_v29 = vsub.f32 %v5728_v13, %v5732_v47 }
 0x8b1   :  { %v5734_v61 = vmul.f32 1.442695, %v5733_v29 }
 0x8b3   :  { %6087 = vpow2.f32 %v5734_v61 }
 0x8bd   :  { %v6088_v20 = vpop.eup %6087 }
 0x8be   :  { %v5736_v57 = vsel %vm5729_vm13, %v6088_v20, 0.0 }
 0x8bf   :  { %5737 = vadd.xlane.f32.xlu0 %v5736_v57 }
 0x94c   :  { %v5738_v21 = vpop.xlane.xlu0 %5737 }
 0x94d   :  { %6089 = vrcp.f32 %v5738_v21 }
 0x957   :  { %v6090_v0 = vpop.eup %6089 }
 0x958   :  { %v5740_v53 = vmul.f32 %v6090_v0, %v6088_v20 }
 0x95a   :  { %5741 = vst.msk [vmem:[#allocation13] sm:$0x3] %vm5729_vm13, %v5740_v53 }
 0x95b   :  { %6174 = shalt.err (!%p6171_p6)
}
 0x95c   :  { %s6175_s4 = scalar_lea.hbm %s11173_s9, 32 }
 0x95d   :  { %p6176_p7 = scmp.ne.s32.totalorder %s11173_s9, %s6175_s4  ;;  %p6179_p8 = scmp.lt.u32.totalorder %s6175_s4, %s11173_s9 }
 0x95f   :  { %p6181_p9 = pnand %p6179_p8, %p6176_p7 }
 0x961   :  { %6184 = shalt.err (!%p6181_p9)
}
 0x962   :  { %5751 = dma.vmem_to_hbm [thread:$0]  %s5749_s29, 32, %s11173_s9, [#allocation3]  }
 0x963   :  { %6193 = dma.done.wait [#allocation3], 32  }
 0x964   :  { %6194 = vsyncadd [#allocation3], 4294967264 }
 0x965   :  { %5755 = vsyncpa [#allocation3], 1 }
 0x966   :  { %5756 = vsyncpa [#allocation4], 1 }
 0x967   :  { %5757 = vsyncpa [#allocation6], 1 }
 0x968   :  { %5758 = vsyncpa [#allocation9], 1 }
 0x969   :  { %5759 = vsyncpa [#allocation12], 1 }

</bundles_post_ra>
